<compile_context>
chip_gen: v5e
topology: v5e:2x2
jax: 0.10.0
libtpu: 0.0.40
codegen_flags: <defaults>
</compile_context>

<pallas_src>
import functools

import jax
import jax.numpy as jnp
from jax import lax
from jax.experimental import pallas as pl
from jax.experimental.pallas import tpu as pltpu


def mc_lstm_kernel(pre_ref, xm_ref, c0_ref, wc_ref, s_ref, st_ref, p_ref,
                   hs_ref, cs_ref, c_scr, *, tc, hid, n_rows):
    """One time-chunk of the MC-LSTM recurrence; grid axis 0 = chunk index."""
    chunk = pl.program_id(0)

    @pl.when(chunk == 0)
    def _init():
        c_scr[...] = c0_ref[...].astype(jnp.float32)

    # Loop-invariant loads hoisted above the time loop.
    wc = wc_ref[...]        # (H, G)         recurrent gate weights
    seg_sum = s_ref[...]    # (RIH, n_rows)  0/1 segment-sum matrix
    seg_bcast = st_ref[...] # (n_rows, RIH)  0/1 segment-broadcast matrix
    pos = p_ref[...]        # (RIH, H)       0/1 within-segment position matrix
    rih = n_rows * hid
    tiny = jnp.float32(1e-30)

    def step(s_idx, c):
        pre = pre_ref[s_idx]                       # (B, G)  xa@Wa + b (precomputed)
        xm = xm_ref[s_idx].astype(jnp.float32)     # (B, IN) mass input

        # MCGate state input is c / sum(c)  (sum == 0 -> scale 1).
        c_sum = jnp.sum(c, axis=-1, keepdims=True)
        c_scale = jnp.where(c_sum == 0.0, jnp.ones_like(c_sum), c_sum)
        c_norm = c / c_scale

        # Fused gate pre-activations [redistribution | in_gate | out_gate]: (B, G)
        gates = pre + jnp.dot(c_norm, wc, preferred_element_type=jnp.float32)

        ri_lin = gates[:, :rih]                    # fused redist + in_gate rows
        o_lin = gates[:, rih:rih + hid]            # out gate

        # Fused row-softmax + mass contraction  c@R + xm@I  via 0/1 segment
        # matrices (no in-kernel reshape).  Softmax is shift-invariant per row,
        # so a per-sample shift keeps exp() bounded; rowsum is clamped so a
        # fully-underflowed row contributes 0 instead of NaN.
        mass = jnp.concatenate([c, xm], axis=-1)                    # (B, H+IN)
        e = jnp.exp(ri_lin - jnp.max(ri_lin, axis=-1, keepdims=True))
        rowsum = jnp.dot(e, seg_sum, preferred_element_type=jnp.float32)
        w = mass / jnp.maximum(rowsum, tiny)                        # (B, H+IN)
        w_flat = jnp.dot(w, seg_bcast, preferred_element_type=jnp.float32)
        c_new = jnp.dot(e * w_flat, pos,
                        preferred_element_type=jnp.float32)         # (B, H)

        o = jax.nn.sigmoid(o_lin)
        h = o * c_new
        c_next = c_new - h

        hs_ref[s_idx] = h.astype(hs_ref.dtype)     # stays in VMEM; one DMA/chunk
        cs_ref[s_idx] = c_next.astype(cs_ref.dtype)
        return c_next

    c_final = lax.fori_loop(0, tc, step, c_scr[...], unroll=True)
    c_scr[...] = c_final


def _segment_matrices(n_rows, seg_len, dtype=jnp.float32):
    """0/1 matrices for segment sums / broadcasts over flat (n_rows*seg_len)."""
    j = jnp.arange(n_rows * seg_len)
    s = (j[:, None] // seg_len == jnp.arange(n_rows)[None, :]).astype(dtype)
    p = (j[:, None] % seg_len == jnp.arange(seg_len)[None, :]).astype(dtype)
    return s, s.T, p


def prepare_mc_lstm_params(wr, br, wi, bi, wo, bo, aux_dim):
    """Pack the three MCGate Linear layers (PyTorch (out,in) layout) ONCE.

    Gate column layout: [redistribution (H*H) | in_gate (IN*H) | out_gate (H)].
    For H=32, IN=8 the block boundaries land on lane-aligned columns
    (1024 / 1280) so the in-kernel slices are free views.
    """
    hid = wo.shape[0]
    in_dim = wi.shape[0] // hid
    w_all = jnp.concatenate([wr, wi, wo], axis=0)                  # (G, aux+H)
    b_all = jnp.concatenate([br, bi, bo], axis=0)                  # (G,)
    wa = jnp.asarray(w_all[:, :aux_dim].T, jnp.float32)            # (aux, G)
    wc = jnp.asarray(w_all[:, aux_dim:].T, jnp.float32)            # (H,   G)
    # Fused segment matrices over the (H + IN) softmax rows (segment length H).
    s_f, st_f, p_f = _segment_matrices(hid + in_dim, hid)
    return dict(wa=wa, wc=wc, b=jnp.asarray(b_all, jnp.float32),
                s=s_f, st=st_f, p=p_f, hid=hid, in_dim=in_dim, aux=aux_dim)


def mc_lstm_forward(xm, xa, c0, params, *, chunk=8):
    """xm: (T,B,in_dim), xa: (T,B,aux_dim), c0: (B,out_dim)  (batch_first=False)."""
    T, B, in_dim = xm.shape
    aux = xa.shape[2]
    hid = c0.shape[1]
    wa, wc, b, s_f, st_f, p_f = (params[k] for k in ("wa", "wc", "b", "s", "st", "p"))
    G = wa.shape[1]
    n_rows = hid + in_dim

    # (1) Hoist the non-recurrent projection out of the recurrence: one big
    #     (T*B, aux)@(aux, G) matmul (full MXU rows) + bias, done once by XLA.
    pre = (jnp.dot(xa.reshape(T * B, aux).astype(jnp.float32), wa,
                   precision=jax.lax.Precision.HIGHEST)
           + b[None, :]).reshape(T, B, G)

    # (2) Chunk time; pad T up to a multiple of the chunk (padded steps compute
    #     harmless values that are sliced off below).
    tc = max(1, min(chunk, T))
    n_chunks = pl.cdiv(T, tc)
    t_pad = n_chunks * tc
    xm_f = xm.astype(jnp.float32)
    if t_pad != T:
        pad = ((0, t_pad - T), (0, 0), (0, 0))
        pre = jnp.pad(pre, pad)
        xm_f = jnp.pad(xm_f, pad)

    def resident(a):   # whole array, DMA'd once, VMEM-resident across the grid
        n = a.ndim
        return pl.BlockSpec(a.shape, lambda i, n=n: (0,) * n)

    kernel = functools.partial(mc_lstm_kernel, tc=tc, hid=hid, n_rows=n_rows)

    hs, cs = pl.pallas_call(
        kernel,
        grid=(n_chunks,),
        out_shape=(jax.ShapeDtypeStruct((t_pad, B, hid), jnp.float32),
                   jax.ShapeDtypeStruct((t_pad, B, hid), jnp.float32)),
        in_specs=[pl.BlockSpec((tc, B, G), lambda i: (i, 0, 0)),       # pre-acts
                  pl.BlockSpec((tc, B, in_dim), lambda i: (i, 0, 0)),  # mass in
                  resident(c0), resident(wc),
                  resident(s_f), resident(st_f), resident(p_f)],
        out_specs=(pl.BlockSpec((tc, B, hid), lambda i: (i, 0, 0)),
                   pl.BlockSpec((tc, B, hid), lambda i: (i, 0, 0))),
        scratch_shapes=[pltpu.VMEM((B, hid), jnp.float32)],
        compiler_params=pltpu.CompilerParams(
            dimension_semantics=("arbitrary",)),   # recurrence: stays sequential
    )(pre, xm_f, c0.astype(jnp.float32), wc, s_f, st_f, p_f)

    return hs[:T], cs[:T]


def mc_lstm_reference(xm, xa, c0, wr, br, wi, bi, wo, bo):
    """Pure-JAX mirror of MassConservingLSTM.forward (default MCGates)."""
    hp = jax.lax.Precision.HIGHEST
    T, B, _ = xm.shape
    IN = xm.shape[2]
    H = c0.shape[1]
    c = c0
    hs, cs = [], []
    for t in range(T):
        c_sum = jnp.sum(c, axis=-1, keepdims=True)
        scale = jnp.where(c_sum == 0.0, jnp.ones_like(c_sum), c_sum)
        x_ = jnp.concatenate([xa[t], c / scale], axis=-1)
        r = jax.nn.softmax(
            (jnp.dot(x_, wr.T, precision=hp) + br).reshape(B, H, H), axis=-1)
        i = jax.nn.softmax(
            (jnp.dot(x_, wi.T, precision=hp) + bi).reshape(B, IN, H), axis=-1)
        o = jax.nn.sigmoid(jnp.dot(x_, wo.T, precision=hp) + bo)
        c_new = (jnp.einsum('bo,bop->bp', c, r, precision=hp)
                 + jnp.einsum('bk,bkp->bp', xm[t], i, precision=hp))
        h = o * c_new
        c = c_new - h
        hs.append(h)
        cs.append(c)
    return jnp.stack(hs, axis=0), jnp.stack(cs, axis=0)


if __name__ == "__main__":
    T, B = 8, 8
    in_dim, aux_dim, out_dim = 8, 16, 32
    K = aux_dim + out_dim   # default (time-dependent) gates see [xa, c/sum(c)]

    key = jax.random.PRNGKey(0)
    k_xm, k_xa, k_wr, k_wi, k_wo = jax.random.split(key, 5)

    # Parameters in PyTorch nn.Linear layout (out_features, in_features);
    # biases follow MassConservingLSTM.reset_parameters():
    #   redistribution bias = eye, in_gate bias = 0, out_gate bias = -3.
    wr = 0.1 * jax.random.normal(k_wr, (out_dim * out_dim, K), jnp.float32)
    wi = 0.1 * jax.random.normal(k_wi, (in_dim * out_dim, K), jnp.float32)
    wo = 0.1 * jax.random.normal(k_wo, (out_dim, K), jnp.float32)
    br = jnp.eye(out_dim, dtype=jnp.float32).reshape(-1)
    bi = jnp.zeros((in_dim * out_dim,), jnp.float32)
    bo = jnp.full((out_dim,), -3.0, jnp.float32)

    # Inputs (batch_first=False): mass inputs non-negative, aux arbitrary.
    xm = jax.random.uniform(k_xm, (T, B, in_dim), jnp.float32)
    xa = jax.random.normal(k_xa, (T, B, aux_dim), jnp.float32)
    c0 = jnp.zeros((B, out_dim), jnp.float32)   # default init_state()

    params = prepare_mc_lstm_params(wr, br, wi, bi, wo, bo, aux_dim)
    # chunk=4 exercises the multi-chunk path (cross-chunk state carry in VMEM).
    hs, cs = mc_lstm_forward(xm, xa, c0, params, chunk=4)
    jax.block_until_ready((hs, cs))

    hs_ref, cs_ref = mc_lstm_reference(xm, xa, c0, wr, br, wi, bi, wo, bo)
    assert hs.shape == (T, B, out_dim) and cs.shape == (T, B, out_dim)
    assert bool(jnp.all(jnp.isfinite(hs))) and bool(jnp.all(jnp.isfinite(cs)))
    assert jnp.allclose(hs, hs_ref, atol=1e-4, rtol=1e-4), \
        float(jnp.max(jnp.abs(hs - hs_ref)))
    assert jnp.allclose(cs, cs_ref, atol=1e-4, rtol=1e-4), \
        float(jnp.max(jnp.abs(cs - cs_ref)))

    print("KERNEL_OK")
</pallas_src>

<mosaic_0001>
module attributes {stable_mosaic.version = 11 : i64} {
  func.func @mc_lstm_kernel(%arg0: i32, %arg1: memref<4x8x1312xf32, #tpu.memory_space<vmem>>, %arg2: memref<4x8x8xf32, #tpu.memory_space<vmem>>, %arg3: memref<8x32xf32, #tpu.memory_space<vmem>>, %arg4: memref<32x1312xf32, #tpu.memory_space<vmem>>, %arg5: memref<1280x40xf32, #tpu.memory_space<vmem>>, %arg6: memref<40x1280xf32, #tpu.memory_space<vmem>>, %arg7: memref<1280x32xf32, #tpu.memory_space<vmem>>, %arg8: memref<4x8x32xf32, #tpu.memory_space<vmem>>, %arg9: memref<4x8x32xf32, #tpu.memory_space<vmem>>, %arg10: memref<8x32xf32, #tpu.memory_space<vmem>>) attributes {dimension_semantics = [#tpu.dimension_semantics<arbitrary>], iteration_bounds = array<i64: 2>, scalar_prefetch = 0 : i64, scratch_operands = 1 : i64, tpu.core_type = #tpu.core_type<tc>, window_params = [{transform_indices = @transform_0, window_bounds = array<i64: 4, 8, 1312>}, {transform_indices = @transform_1, window_bounds = array<i64: 4, 8, 8>}, {pipeline_mode = #tpu.pipeline_mode<synchronous>, transform_indices = @transform_2, window_bounds = array<i64: 8, 32>}, {pipeline_mode = #tpu.pipeline_mode<synchronous>, transform_indices = @transform_3, window_bounds = array<i64: 32, 1312>}, {pipeline_mode = #tpu.pipeline_mode<synchronous>, transform_indices = @transform_4, window_bounds = array<i64: 1280, 40>}, {pipeline_mode = #tpu.pipeline_mode<synchronous>, transform_indices = @transform_5, window_bounds = array<i64: 40, 1280>}, {pipeline_mode = #tpu.pipeline_mode<synchronous>, transform_indices = @transform_6, window_bounds = array<i64: 1280, 32>}, {transform_indices = @transform_7, window_bounds = array<i64: 4, 8, 32>}, {transform_indices = @transform_8, window_bounds = array<i64: 4, 8, 32>}]} {
    %c0_i32 = arith.constant 0 : i32
    %0 = arith.cmpi eq, %arg0, %c0_i32 : i32
    %1 = arith.extui %0 : i1 to i32
    %c0_i32_0 = arith.constant 0 : i32
    %2 = arith.cmpi ne, %1, %c0_i32_0 : i32
    scf.if %2 {
      %c0_81 = arith.constant 0 : index
      %c0_82 = arith.constant 0 : index
      %193 = vector.load %arg3[%c0_81, %c0_82] : memref<8x32xf32, #tpu.memory_space<vmem>>, vector<8x32xf32>
      %c0_83 = arith.constant 0 : index
      %c0_84 = arith.constant 0 : index
      %194 = vector.load %arg10[%c0_83, %c0_84] : memref<8x32xf32, #tpu.memory_space<vmem>>, vector<8x32xf32>
      tpu.vector_store %arg10[%c0_83, %c0_84], %193 {strides = array<i32>} : memref<8x32xf32, #tpu.memory_space<vmem>>, vector<8x32xf32>,
    } else {
    }
    %c0 = arith.constant 0 : index
    %c0_1 = arith.constant 0 : index
    %3 = vector.load %arg4[%c0, %c0_1] : memref<32x1312xf32, #tpu.memory_space<vmem>>, vector<32x1312xf32>
    %c0_2 = arith.constant 0 : index
    %c0_3 = arith.constant 0 : index
    %4 = vector.load %arg5[%c0_2, %c0_3] : memref<1280x40xf32, #tpu.memory_space<vmem>>, vector<1280x40xf32>
    %c0_4 = arith.constant 0 : index
    %c0_5 = arith.constant 0 : index
    %5 = vector.load %arg6[%c0_4, %c0_5] : memref<40x1280xf32, #tpu.memory_space<vmem>>, vector<40x1280xf32>
    %c0_6 = arith.constant 0 : index
    %c0_7 = arith.constant 0 : index
    %6 = vector.load %arg7[%c0_6, %c0_7] : memref<1280x32xf32, #tpu.memory_space<vmem>>, vector<1280x32xf32>
    %c0_8 = arith.constant 0 : index
    %c0_9 = arith.constant 0 : index
    %7 = vector.load %arg10[%c0_8, %c0_9] : memref<8x32xf32, #tpu.memory_space<vmem>>, vector<8x32xf32>
    %cst = arith.constant 1.000000e-30 : f32
    %c0_i32_10 = arith.constant 0 : i32
    %8 = arith.index_cast %c0_i32_10 : i32 to index
    %c0_11 = arith.constant 0 : index
    %c0_12 = arith.constant 0 : index
    %9 = vector.load %arg1[%8, %c0_11, %c0_12] : memref<4x8x1312xf32, #tpu.memory_space<vmem>>, vector<1x8x1312xf32>
    %10 = vector.shape_cast %9 : vector<1x8x1312xf32> to vector<8x1312xf32>
    %11 = arith.index_cast %c0_i32_10 : i32 to index
    %c0_13 = arith.constant 0 : index
    %c0_14 = arith.constant 0 : index
    %12 = vector.load %arg2[%11, %c0_13, %c0_14] : memref<4x8x8xf32, #tpu.memory_space<vmem>>, vector<1x8x8xf32>
    %13 = vector.shape_cast %12 : vector<1x8x8xf32> to vector<8x8xf32>
    %cst_15 = arith.constant dense<0.000000e+00> : vector<8xf32>
    %14 = vector.multi_reduction <add>, %7, %cst_15 [1] : vector<8x32xf32> to vector<8xf32>
    %15 = vector.shape_cast %14 : vector<8xf32> to vector<8x1xf32>
    %cst_16 = arith.constant 0.000000e+00 : f32
    %16 = vector.broadcast %cst_16 : f32 to vector<8x1xf32>
    %17 = arith.cmpf oeq, %15, %16 : vector<8x1xf32>
    %cst_17 = arith.constant 1.000000e+00 : f32
    %18 = vector.broadcast %cst_17 : f32 to vector<8x1xf32>
    %19 = arith.select %17, %18, %15 : vector<8x1xi1>, vector<8x1xf32>
    %20 = vector.broadcast %19 : vector<8x1xf32> to vector<8x32xf32>
    %21 = arith.divf %7, %20 : vector<8x32xf32>
    %cst_18 = arith.constant dense<0.000000e+00> : vector<8x1312xf32>
    %22 = tpu.matmul %21, %3, %cst_18 {dimension_numbers = #tpu.dot_dimension_numbers<[1], [0], [0], [1], [0, 0, 1, 1], [], []>} : vector<8x32xf32>, vector<32x1312xf32>, vector<8x1312xf32> -> vector<8x1312xf32>
    %23 = arith.addf %10, %22 : vector<8x1312xf32>
    %24 = vector.extract_strided_slice %23 {offsets = [0, 0], sizes = [8, 1280], strides = [1, 1]} : vector<8x1312xf32> to vector<8x1280xf32>
    %25 = vector.extract_strided_slice %23 {offsets = [0, 1280], sizes = [8, 32], strides = [1, 1]} : vector<8x1312xf32> to vector<8x32xf32>
    %26 = tpu.concatenate %7, %13 in 1 : vector<8x32xf32>, vector<8x8xf32> -> vector<8x40xf32>
    %cst_19 = arith.constant dense<0xFF800000> : vector<8xf32>
    %27 = vector.multi_reduction <maximumf>, %24, %cst_19 [1] : vector<8x1280xf32> to vector<8xf32>
    %28 = vector.shape_cast %27 : vector<8xf32> to vector<8x1xf32>
    %29 = vector.broadcast %28 : vector<8x1xf32> to vector<8x1280xf32>
    %30 = arith.subf %24, %29 : vector<8x1280xf32>
    %31 = math.exp %30 : vector<8x1280xf32>
    %cst_20 = arith.constant dense<0.000000e+00> : vector<8x40xf32>
    %32 = tpu.matmul %31, %4, %cst_20 {dimension_numbers = #tpu.dot_dimension_numbers<[1], [0], [0], [1], [0, 0, 1, 1], [], []>} : vector<8x1280xf32>, vector<1280x40xf32>, vector<8x40xf32> -> vector<8x40xf32>
    %33 = vector.broadcast %cst : f32 to vector<8x40xf32>
    %34 = arith.maximumf %32, %33 : vector<8x40xf32>
    %35 = arith.divf %26, %34 : vector<8x40xf32>
    %cst_21 = arith.constant dense<0.000000e+00> : vector<8x1280xf32>
    %36 = tpu.matmul %35, %5, %cst_21 {dimension_numbers = #tpu.dot_dimension_numbers<[1], [0], [0], [1], [0, 0, 1, 1], [], []>} : vector<8x40xf32>, vector<40x1280xf32>, vector<8x1280xf32> -> vector<8x1280xf32>
    %37 = arith.mulf %31, %36 : vector<8x1280xf32>
    %cst_22 = arith.constant dense<0.000000e+00> : vector<8x32xf32>
    %38 = tpu.matmul %37, %6, %cst_22 {dimension_numbers = #tpu.dot_dimension_numbers<[1], [0], [0], [1], [0, 0, 1, 1], [], []>} : vector<8x1280xf32>, vector<1280x32xf32>, vector<8x32xf32> -> vector<8x32xf32>
    %39 = arith.negf %25 : vector<8x32xf32>
    %40 = math.exp %39 : vector<8x32xf32>
    %cst_23 = arith.constant 1.000000e+00 : f32
    %41 = vector.broadcast %cst_23 : f32 to vector<8x32xf32>
    %42 = arith.addf %41, %40 : vector<8x32xf32>
    %43 = arith.divf %41, %42 : vector<8x32xf32>
    %44 = arith.mulf %43, %38 : vector<8x32xf32>
    %45 = arith.subf %38, %44 : vector<8x32xf32>
    %46 = arith.index_cast %c0_i32_10 : i32 to index
    %c0_24 = arith.constant 0 : index
    %c0_25 = arith.constant 0 : index
    %47 = vector.load %arg8[%46, %c0_24, %c0_25] : memref<4x8x32xf32, #tpu.memory_space<vmem>>, vector<1x8x32xf32>
    %48 = vector.shape_cast %47 : vector<1x8x32xf32> to vector<8x32xf32>
    %49 = vector.shape_cast %44 : vector<8x32xf32> to vector<1x8x32xf32>
    tpu.vector_store %arg8[%46, %c0_24, %c0_25], %49 {strides = array<i32>} : memref<4x8x32xf32, #tpu.memory_space<vmem>>, vector<1x8x32xf32>,
    %50 = arith.index_cast %c0_i32_10 : i32 to index
    %c0_26 = arith.constant 0 : index
    %c0_27 = arith.constant 0 : index
    %51 = vector.load %arg9[%50, %c0_26, %c0_27] : memref<4x8x32xf32, #tpu.memory_space<vmem>>, vector<1x8x32xf32>
    %52 = vector.shape_cast %51 : vector<1x8x32xf32> to vector<8x32xf32>
    %53 = vector.shape_cast %45 : vector<8x32xf32> to vector<1x8x32xf32>
    tpu.vector_store %arg9[%50, %c0_26, %c0_27], %53 {strides = array<i32>} : memref<4x8x32xf32, #tpu.memory_space<vmem>>, vector<1x8x32xf32>,
    %c1_i32 = arith.constant 1 : i32
    %54 = arith.index_cast %c1_i32 : i32 to index
    %c0_28 = arith.constant 0 : index
    %c0_29 = arith.constant 0 : index
    %55 = vector.load %arg1[%54, %c0_28, %c0_29] : memref<4x8x1312xf32, #tpu.memory_space<vmem>>, vector<1x8x1312xf32>
    %56 = vector.shape_cast %55 : vector<1x8x1312xf32> to vector<8x1312xf32>
    %57 = arith.index_cast %c1_i32 : i32 to index
    %c0_30 = arith.constant 0 : index
    %c0_31 = arith.constant 0 : index
    %58 = vector.load %arg2[%57, %c0_30, %c0_31] : memref<4x8x8xf32, #tpu.memory_space<vmem>>, vector<1x8x8xf32>
    %59 = vector.shape_cast %58 : vector<1x8x8xf32> to vector<8x8xf32>
    %cst_32 = arith.constant dense<0.000000e+00> : vector<8xf32>
    %60 = vector.multi_reduction <add>, %45, %cst_32 [1] : vector<8x32xf32> to vector<8xf32>
    %61 = vector.shape_cast %60 : vector<8xf32> to vector<8x1xf32>
    %cst_33 = arith.constant 0.000000e+00 : f32
    %62 = vector.broadcast %cst_33 : f32 to vector<8x1xf32>
    %63 = arith.cmpf oeq, %61, %62 : vector<8x1xf32>
    %cst_34 = arith.constant 1.000000e+00 : f32
    %64 = vector.broadcast %cst_34 : f32 to vector<8x1xf32>
    %65 = arith.select %63, %64, %61 : vector<8x1xi1>, vector<8x1xf32>
    %66 = vector.broadcast %65 : vector<8x1xf32> to vector<8x32xf32>
    %67 = arith.divf %45, %66 : vector<8x32xf32>
    %cst_35 = arith.constant dense<0.000000e+00> : vector<8x1312xf32>
    %68 = tpu.matmul %67, %3, %cst_35 {dimension_numbers = #tpu.dot_dimension_numbers<[1], [0], [0], [1], [0, 0, 1, 1], [], []>} : vector<8x32xf32>, vector<32x1312xf32>, vector<8x1312xf32> -> vector<8x1312xf32>
    %69 = arith.addf %56, %68 : vector<8x1312xf32>
    %70 = vector.extract_strided_slice %69 {offsets = [0, 0], sizes = [8, 1280], strides = [1, 1]} : vector<8x1312xf32> to vector<8x1280xf32>
    %71 = vector.extract_strided_slice %69 {offsets = [0, 1280], sizes = [8, 32], strides = [1, 1]} : vector<8x1312xf32> to vector<8x32xf32>
    %72 = tpu.concatenate %45, %59 in 1 : vector<8x32xf32>, vector<8x8xf32> -> vector<8x40xf32>
    %cst_36 = arith.constant dense<0xFF800000> : vector<8xf32>
    %73 = vector.multi_reduction <maximumf>, %70, %cst_36 [1] : vector<8x1280xf32> to vector<8xf32>
    %74 = vector.shape_cast %73 : vector<8xf32> to vector<8x1xf32>
    %75 = vector.broadcast %74 : vector<8x1xf32> to vector<8x1280xf32>
    %76 = arith.subf %70, %75 : vector<8x1280xf32>
    %77 = math.exp %76 : vector<8x1280xf32>
    %cst_37 = arith.constant dense<0.000000e+00> : vector<8x40xf32>
    %78 = tpu.matmul %77, %4, %cst_37 {dimension_numbers = #tpu.dot_dimension_numbers<[1], [0], [0], [1], [0, 0, 1, 1], [], []>} : vector<8x1280xf32>, vector<1280x40xf32>, vector<8x40xf32> -> vector<8x40xf32>
    %79 = vector.broadcast %cst : f32 to vector<8x40xf32>
    %80 = arith.maximumf %78, %79 : vector<8x40xf32>
    %81 = arith.divf %72, %80 : vector<8x40xf32>
    %cst_38 = arith.constant dense<0.000000e+00> : vector<8x1280xf32>
    %82 = tpu.matmul %81, %5, %cst_38 {dimension_numbers = #tpu.dot_dimension_numbers<[1], [0], [0], [1], [0, 0, 1, 1], [], []>} : vector<8x40xf32>, vector<40x1280xf32>, vector<8x1280xf32> -> vector<8x1280xf32>
    %83 = arith.mulf %77, %82 : vector<8x1280xf32>
    %cst_39 = arith.constant dense<0.000000e+00> : vector<8x32xf32>
    %84 = tpu.matmul %83, %6, %cst_39 {dimension_numbers = #tpu.dot_dimension_numbers<[1], [0], [0], [1], [0, 0, 1, 1], [], []>} : vector<8x1280xf32>, vector<1280x32xf32>, vector<8x32xf32> -> vector<8x32xf32>
    %85 = arith.negf %71 : vector<8x32xf32>
    %86 = math.exp %85 : vector<8x32xf32>
    %cst_40 = arith.constant 1.000000e+00 : f32
    %87 = vector.broadcast %cst_40 : f32 to vector<8x32xf32>
    %88 = arith.addf %87, %86 : vector<8x32xf32>
    %89 = arith.divf %87, %88 : vector<8x32xf32>
    %90 = arith.mulf %89, %84 : vector<8x32xf32>
    %91 = arith.subf %84, %90 : vector<8x32xf32>
    %92 = arith.index_cast %c1_i32 : i32 to index
    %c0_41 = arith.constant 0 : index
    %c0_42 = arith.constant 0 : index
    %93 = vector.load %arg8[%92, %c0_41, %c0_42] : memref<4x8x32xf32, #tpu.memory_space<vmem>>, vector<1x8x32xf32>
    %94 = vector.shape_cast %93 : vector<1x8x32xf32> to vector<8x32xf32>
    %95 = vector.shape_cast %90 : vector<8x32xf32> to vector<1x8x32xf32>
    tpu.vector_store %arg8[%92, %c0_41, %c0_42], %95 {strides = array<i32>} : memref<4x8x32xf32, #tpu.memory_space<vmem>>, vector<1x8x32xf32>,
    %96 = arith.index_cast %c1_i32 : i32 to index
    %c0_43 = arith.constant 0 : index
    %c0_44 = arith.constant 0 : index
    %97 = vector.load %arg9[%96, %c0_43, %c0_44] : memref<4x8x32xf32, #tpu.memory_space<vmem>>, vector<1x8x32xf32>
    %98 = vector.shape_cast %97 : vector<1x8x32xf32> to vector<8x32xf32>
    %99 = vector.shape_cast %91 : vector<8x32xf32> to vector<1x8x32xf32>
    tpu.vector_store %arg9[%96, %c0_43, %c0_44], %99 {strides = array<i32>} : memref<4x8x32xf32, #tpu.memory_space<vmem>>, vector<1x8x32xf32>,
    %c2_i32 = arith.constant 2 : i32
    %100 = arith.index_cast %c2_i32 : i32 to index
    %c0_45 = arith.constant 0 : index
    %c0_46 = arith.constant 0 : index
    %101 = vector.load %arg1[%100, %c0_45, %c0_46] : memref<4x8x1312xf32, #tpu.memory_space<vmem>>, vector<1x8x1312xf32>
    %102 = vector.shape_cast %101 : vector<1x8x1312xf32> to vector<8x1312xf32>
    %103 = arith.index_cast %c2_i32 : i32 to index
    %c0_47 = arith.constant 0 : index
    %c0_48 = arith.constant 0 : index
    %104 = vector.load %arg2[%103, %c0_47, %c0_48] : memref<4x8x8xf32, #tpu.memory_space<vmem>>, vector<1x8x8xf32>
    %105 = vector.shape_cast %104 : vector<1x8x8xf32> to vector<8x8xf32>
    %cst_49 = arith.constant dense<0.000000e+00> : vector<8xf32>
    %106 = vector.multi_reduction <add>, %91, %cst_49 [1] : vector<8x32xf32> to vector<8xf32>
    %107 = vector.shape_cast %106 : vector<8xf32> to vector<8x1xf32>
    %cst_50 = arith.constant 0.000000e+00 : f32
    %108 = vector.broadcast %cst_50 : f32 to vector<8x1xf32>
    %109 = arith.cmpf oeq, %107, %108 : vector<8x1xf32>
    %cst_51 = arith.constant 1.000000e+00 : f32
    %110 = vector.broadcast %cst_51 : f32 to vector<8x1xf32>
    %111 = arith.select %109, %110, %107 : vector<8x1xi1>, vector<8x1xf32>
    %112 = vector.broadcast %111 : vector<8x1xf32> to vector<8x32xf32>
    %113 = arith.divf %91, %112 : vector<8x32xf32>
    %cst_52 = arith.constant dense<0.000000e+00> : vector<8x1312xf32>
    %114 = tpu.matmul %113, %3, %cst_52 {dimension_numbers = #tpu.dot_dimension_numbers<[1], [0], [0], [1], [0, 0, 1, 1], [], []>} : vector<8x32xf32>, vector<32x1312xf32>, vector<8x1312xf32> -> vector<8x1312xf32>
    %115 = arith.addf %102, %114 : vector<8x1312xf32>
    %116 = vector.extract_strided_slice %115 {offsets = [0, 0], sizes = [8, 1280], strides = [1, 1]} : vector<8x1312xf32> to vector<8x1280xf32>
    %117 = vector.extract_strided_slice %115 {offsets = [0, 1280], sizes = [8, 32], strides = [1, 1]} : vector<8x1312xf32> to vector<8x32xf32>
    %118 = tpu.concatenate %91, %105 in 1 : vector<8x32xf32>, vector<8x8xf32> -> vector<8x40xf32>
    %cst_53 = arith.constant dense<0xFF800000> : vector<8xf32>
    %119 = vector.multi_reduction <maximumf>, %116, %cst_53 [1] : vector<8x1280xf32> to vector<8xf32>
    %120 = vector.shape_cast %119 : vector<8xf32> to vector<8x1xf32>
    %121 = vector.broadcast %120 : vector<8x1xf32> to vector<8x1280xf32>
    %122 = arith.subf %116, %121 : vector<8x1280xf32>
    %123 = math.exp %122 : vector<8x1280xf32>
    %cst_54 = arith.constant dense<0.000000e+00> : vector<8x40xf32>
    %124 = tpu.matmul %123, %4, %cst_54 {dimension_numbers = #tpu.dot_dimension_numbers<[1], [0], [0], [1], [0, 0, 1, 1], [], []>} : vector<8x1280xf32>, vector<1280x40xf32>, vector<8x40xf32> -> vector<8x40xf32>
    %125 = vector.broadcast %cst : f32 to vector<8x40xf32>
    %126 = arith.maximumf %124, %125 : vector<8x40xf32>
    %127 = arith.divf %118, %126 : vector<8x40xf32>
    %cst_55 = arith.constant dense<0.000000e+00> : vector<8x1280xf32>
    %128 = tpu.matmul %127, %5, %cst_55 {dimension_numbers = #tpu.dot_dimension_numbers<[1], [0], [0], [1], [0, 0, 1, 1], [], []>} : vector<8x40xf32>, vector<40x1280xf32>, vector<8x1280xf32> -> vector<8x1280xf32>
    %129 = arith.mulf %123, %128 : vector<8x1280xf32>
    %cst_56 = arith.constant dense<0.000000e+00> : vector<8x32xf32>
    %130 = tpu.matmul %129, %6, %cst_56 {dimension_numbers = #tpu.dot_dimension_numbers<[1], [0], [0], [1], [0, 0, 1, 1], [], []>} : vector<8x1280xf32>, vector<1280x32xf32>, vector<8x32xf32> -> vector<8x32xf32>
    %131 = arith.negf %117 : vector<8x32xf32>
    %132 = math.exp %131 : vector<8x32xf32>
    %cst_57 = arith.constant 1.000000e+00 : f32
    %133 = vector.broadcast %cst_57 : f32 to vector<8x32xf32>
    %134 = arith.addf %133, %132 : vector<8x32xf32>
    %135 = arith.divf %133, %134 : vector<8x32xf32>
    %136 = arith.mulf %135, %130 : vector<8x32xf32>
    %137 = arith.subf %130, %136 : vector<8x32xf32>
    %138 = arith.index_cast %c2_i32 : i32 to index
    %c0_58 = arith.constant 0 : index
    %c0_59 = arith.constant 0 : index
    %139 = vector.load %arg8[%138, %c0_58, %c0_59] : memref<4x8x32xf32, #tpu.memory_space<vmem>>, vector<1x8x32xf32>
    %140 = vector.shape_cast %139 : vector<1x8x32xf32> to vector<8x32xf32>
    %141 = vector.shape_cast %136 : vector<8x32xf32> to vector<1x8x32xf32>
    tpu.vector_store %arg8[%138, %c0_58, %c0_59], %141 {strides = array<i32>} : memref<4x8x32xf32, #tpu.memory_space<vmem>>, vector<1x8x32xf32>,
    %142 = arith.index_cast %c2_i32 : i32 to index
    %c0_60 = arith.constant 0 : index
    %c0_61 = arith.constant 0 : index
    %143 = vector.load %arg9[%142, %c0_60, %c0_61] : memref<4x8x32xf32, #tpu.memory_space<vmem>>, vector<1x8x32xf32>
    %144 = vector.shape_cast %143 : vector<1x8x32xf32> to vector<8x32xf32>
    %145 = vector.shape_cast %137 : vector<8x32xf32> to vector<1x8x32xf32>
    tpu.vector_store %arg9[%142, %c0_60, %c0_61], %145 {strides = array<i32>} : memref<4x8x32xf32, #tpu.memory_space<vmem>>, vector<1x8x32xf32>,
    %c3_i32 = arith.constant 3 : i32
    %146 = arith.index_cast %c3_i32 : i32 to index
    %c0_62 = arith.constant 0 : index
    %c0_63 = arith.constant 0 : index
    %147 = vector.load %arg1[%146, %c0_62, %c0_63] : memref<4x8x1312xf32, #tpu.memory_space<vmem>>, vector<1x8x1312xf32>
    %148 = vector.shape_cast %147 : vector<1x8x1312xf32> to vector<8x1312xf32>
    %149 = arith.index_cast %c3_i32 : i32 to index
    %c0_64 = arith.constant 0 : index
    %c0_65 = arith.constant 0 : index
    %150 = vector.load %arg2[%149, %c0_64, %c0_65] : memref<4x8x8xf32, #tpu.memory_space<vmem>>, vector<1x8x8xf32>
    %151 = vector.shape_cast %150 : vector<1x8x8xf32> to vector<8x8xf32>
    %cst_66 = arith.constant dense<0.000000e+00> : vector<8xf32>
    %152 = vector.multi_reduction <add>, %137, %cst_66 [1] : vector<8x32xf32> to vector<8xf32>
    %153 = vector.shape_cast %152 : vector<8xf32> to vector<8x1xf32>
    %cst_67 = arith.constant 0.000000e+00 : f32
    %154 = vector.broadcast %cst_67 : f32 to vector<8x1xf32>
    %155 = arith.cmpf oeq, %153, %154 : vector<8x1xf32>
    %cst_68 = arith.constant 1.000000e+00 : f32
    %156 = vector.broadcast %cst_68 : f32 to vector<8x1xf32>
    %157 = arith.select %155, %156, %153 : vector<8x1xi1>, vector<8x1xf32>
    %158 = vector.broadcast %157 : vector<8x1xf32> to vector<8x32xf32>
    %159 = arith.divf %137, %158 : vector<8x32xf32>
    %cst_69 = arith.constant dense<0.000000e+00> : vector<8x1312xf32>
    %160 = tpu.matmul %159, %3, %cst_69 {dimension_numbers = #tpu.dot_dimension_numbers<[1], [0], [0], [1], [0, 0, 1, 1], [], []>} : vector<8x32xf32>, vector<32x1312xf32>, vector<8x1312xf32> -> vector<8x1312xf32>
    %161 = arith.addf %148, %160 : vector<8x1312xf32>
    %162 = vector.extract_strided_slice %161 {offsets = [0, 0], sizes = [8, 1280], strides = [1, 1]} : vector<8x1312xf32> to vector<8x1280xf32>
    %163 = vector.extract_strided_slice %161 {offsets = [0, 1280], sizes = [8, 32], strides = [1, 1]} : vector<8x1312xf32> to vector<8x32xf32>
    %164 = tpu.concatenate %137, %151 in 1 : vector<8x32xf32>, vector<8x8xf32> -> vector<8x40xf32>
    %cst_70 = arith.constant dense<0xFF800000> : vector<8xf32>
    %165 = vector.multi_reduction <maximumf>, %162, %cst_70 [1] : vector<8x1280xf32> to vector<8xf32>
    %166 = vector.shape_cast %165 : vector<8xf32> to vector<8x1xf32>
    %167 = vector.broadcast %166 : vector<8x1xf32> to vector<8x1280xf32>
    %168 = arith.subf %162, %167 : vector<8x1280xf32>
    %169 = math.exp %168 : vector<8x1280xf32>
    %cst_71 = arith.constant dense<0.000000e+00> : vector<8x40xf32>
    %170 = tpu.matmul %169, %4, %cst_71 {dimension_numbers = #tpu.dot_dimension_numbers<[1], [0], [0], [1], [0, 0, 1, 1], [], []>} : vector<8x1280xf32>, vector<1280x40xf32>, vector<8x40xf32> -> vector<8x40xf32>
    %171 = vector.broadcast %cst : f32 to vector<8x40xf32>
    %172 = arith.maximumf %170, %171 : vector<8x40xf32>
    %173 = arith.divf %164, %172 : vector<8x40xf32>
    %cst_72 = arith.constant dense<0.000000e+00> : vector<8x1280xf32>
    %174 = tpu.matmul %173, %5, %cst_72 {dimension_numbers = #tpu.dot_dimension_numbers<[1], [0], [0], [1], [0, 0, 1, 1], [], []>} : vector<8x40xf32>, vector<40x1280xf32>, vector<8x1280xf32> -> vector<8x1280xf32>
    %175 = arith.mulf %169, %174 : vector<8x1280xf32>
    %cst_73 = arith.constant dense<0.000000e+00> : vector<8x32xf32>
    %176 = tpu.matmul %175, %6, %cst_73 {dimension_numbers = #tpu.dot_dimension_numbers<[1], [0], [0], [1], [0, 0, 1, 1], [], []>} : vector<8x1280xf32>, vector<1280x32xf32>, vector<8x32xf32> -> vector<8x32xf32>
    %177 = arith.negf %163 : vector<8x32xf32>
    %178 = math.exp %177 : vector<8x32xf32>
    %cst_74 = arith.constant 1.000000e+00 : f32
    %179 = vector.broadcast %cst_74 : f32 to vector<8x32xf32>
    %180 = arith.addf %179, %178 : vector<8x32xf32>
    %181 = arith.divf %179, %180 : vector<8x32xf32>
    %182 = arith.mulf %181, %176 : vector<8x32xf32>
    %183 = arith.subf %176, %182 : vector<8x32xf32>
    %184 = arith.index_cast %c3_i32 : i32 to index
    %c0_75 = arith.constant 0 : index
    %c0_76 = arith.constant 0 : index
    %185 = vector.load %arg8[%184, %c0_75, %c0_76] : memref<4x8x32xf32, #tpu.memory_space<vmem>>, vector<1x8x32xf32>
    %186 = vector.shape_cast %185 : vector<1x8x32xf32> to vector<8x32xf32>
    %187 = vector.shape_cast %182 : vector<8x32xf32> to vector<1x8x32xf32>
    tpu.vector_store %arg8[%184, %c0_75, %c0_76], %187 {strides = array<i32>} : memref<4x8x32xf32, #tpu.memory_space<vmem>>, vector<1x8x32xf32>,
    %188 = arith.index_cast %c3_i32 : i32 to index
    %c0_77 = arith.constant 0 : index
    %c0_78 = arith.constant 0 : index
    %189 = vector.load %arg9[%188, %c0_77, %c0_78] : memref<4x8x32xf32, #tpu.memory_space<vmem>>, vector<1x8x32xf32>
    %190 = vector.shape_cast %189 : vector<1x8x32xf32> to vector<8x32xf32>
    %191 = vector.shape_cast %183 : vector<8x32xf32> to vector<1x8x32xf32>
    tpu.vector_store %arg9[%188, %c0_77, %c0_78], %191 {strides = array<i32>} : memref<4x8x32xf32, #tpu.memory_space<vmem>>, vector<1x8x32xf32>,
    %c4_i32 = arith.constant 4 : i32
    %c0_79 = arith.constant 0 : index
    %c0_80 = arith.constant 0 : index
    %192 = vector.load %arg10[%c0_79, %c0_80] : memref<8x32xf32, #tpu.memory_space<vmem>>, vector<8x32xf32>
    tpu.vector_store %arg10[%c0_79, %c0_80], %183 {strides = array<i32>} : memref<8x32xf32, #tpu.memory_space<vmem>>, vector<8x32xf32>,
    return
  }
  func.func @transform_0(%arg0: i32) -> (i32, i32, i32) {
    %c0_i32 = arith.constant 0 : i32
    %c0_i32_0 = arith.constant 0 : i32
    %c0_i32_1 = arith.constant 0 : i32
    return %arg0, %c0_i32, %c0_i32_0 : i32, i32, i32
  }
  func.func @transform_1(%arg0: i32) -> (i32, i32, i32) {
    %c0_i32 = arith.constant 0 : i32
    %c0_i32_0 = arith.constant 0 : i32
    %c0_i32_1 = arith.constant 0 : i32
    return %arg0, %c0_i32, %c0_i32_0 : i32, i32, i32
  }
  func.func @transform_2(%arg0: i32) -> (i32, i32) {
    %c0_i32 = arith.constant 0 : i32
    %c0_i32_0 = arith.constant 0 : i32
    %c0_i32_1 = arith.constant 0 : i32
    return %c0_i32, %c0_i32_0 : i32, i32
  }
  func.func @transform_3(%arg0: i32) -> (i32, i32) {
    %c0_i32 = arith.constant 0 : i32
    %c0_i32_0 = arith.constant 0 : i32
    %c0_i32_1 = arith.constant 0 : i32
    return %c0_i32, %c0_i32_0 : i32, i32
  }
  func.func @transform_4(%arg0: i32) -> (i32, i32) {
    %c0_i32 = arith.constant 0 : i32
    %c0_i32_0 = arith.constant 0 : i32
    %c0_i32_1 = arith.constant 0 : i32
    return %c0_i32, %c0_i32_0 : i32, i32
  }
  func.func @transform_5(%arg0: i32) -> (i32, i32) {
    %c0_i32 = arith.constant 0 : i32
    %c0_i32_0 = arith.constant 0 : i32
    %c0_i32_1 = arith.constant 0 : i32
    return %c0_i32, %c0_i32_0 : i32, i32
  }
  func.func @transform_6(%arg0: i32) -> (i32, i32) {
    %c0_i32 = arith.constant 0 : i32
    %c0_i32_0 = arith.constant 0 : i32
    %c0_i32_1 = arith.constant 0 : i32
    return %c0_i32, %c0_i32_0 : i32, i32
  }
  func.func @transform_7(%arg0: i32) -> (i32, i32, i32) {
    %c0_i32 = arith.constant 0 : i32
    %c0_i32_0 = arith.constant 0 : i32
    %c0_i32_1 = arith.constant 0 : i32
    return %arg0, %c0_i32, %c0_i32_0 : i32, i32, i32
  }
  func.func @transform_8(%arg0: i32) -> (i32, i32, i32) {
    %c0_i32 = arith.constant 0 : i32
    %c0_i32_0 = arith.constant 0 : i32
    %c0_i32_1 = arith.constant 0 : i32
    return %arg0, %c0_i32, %c0_i32_0 : i32, i32, i32
  }
}

</mosaic_0001>

<bundles_post_ra>
// kernel: tpu_custom_call.1
= control target key start
LH: loop header
LB: loop body
LE: loop exit
PB: predicated region body
PF: predicated region fallthrough
CT: control target
= control target key end

     0   :  { %s12144_s0 = inlined_call_operand.vmem [shape: f32[8,8,1312], index: 0, kind: input, shape index: {}]   ;;  %s12145_s1 = inlined_call_operand.vmem [shape: f32[8,8,8], index: 1, kind: input, shape index: {}]   ;;  %s12146_s2 = inlined_call_operand.vmem [shape: f32[8,32], index: 2, kind: input, shape index: {}]   ;;  %s12147_s3 = inlined_call_operand.vmem [shape: f32[32,1312], index: 3, kind: input, shape index: {}]   ;;  %s12148_s4 = inlined_call_operand.vmem [shape: f32[1280,40], index: 4, kind: input, shape index: {}]   ;;  %s12149_s5 = inlined_call_operand.vmem [shape: f32[40,1280], index: 5, kind: input, shape index: {}]   ;;  %s12150_s6 = inlined_call_operand.vmem [shape: f32[1280,32], index: 6, kind: input, shape index: {}]   ;;  %s12151_s7 = inlined_call_operand.hbm [shape: f32[8,8,32], index: 7, kind: output, shape index: {0}]   ;;  %s12152_s8 = inlined_call_operand.hbm [shape: f32[8,8,32], index: 8, kind: output, shape index: {1}]  }
   0x1   :  { %12156 = sst [smem:[#allocation11_spill]] %s12144_s0 }
   0x2   :  { %14 = vsyncpa [#allocation4], 0 }
   0x3   :  { %16 = vsyncpa [#allocation4 + $0x1], 0 }
   0x4   :  { %17 = vsyncpa [#allocation6], 0 }
   0x5   :  { %19 = vsyncpa [#allocation6 + $0x1], 0  ;;  %s6480_s27 = smov 0   ;;  %s6482_s28 = smov 0  }
   0x6   :  { %s6484_s29 = smov 0   ;;  %s6486_s30 = smov 0  }
   0x7 LB: > { %12157 = sst [smem:[#allocation9_spill]] %s6426_s29  ;;  %s6501_s9 = sadd.s32 4294967295, %s6430_s30   ;;  %s6430_s30 = sphi %s6486_s30, %s12167_s30   ;;  %s6426_s29 = sphi %s6484_s29, %s12164_s29   ;;  %s6422_s28 = sphi %s6482_s28, %s12166_s28   ;;  %s6418_s27 = sphi %s6480_s27, %s12165_s27  }
   0x8   : > { %s4782_s10 = sadd.s32 4294967294, %s6430_s30   ;;  %s6505_s11 = sadd.s32 1, %s6430_s30  }
   0x9   : > { %s189_s12 = sadd.s32 1, %s6426_s29  ;;  %s186_s13 = ssub.s32 %s6430_s30, %s6505_s11 }
   0xa   : > { %p199_p0 = scmp.ne.s32.totalorder %s6426_s29, %s6422_s28  ;;  %p187_p1 = scmp.eq.s32.totalorder %s186_s13, 0 }
   0xb   : > { %p200_p2 = scmp.eq.s32.totalorder %s6501_s9, 1  ;;  %p205_p3 = scmp.ne.s32.totalorder %s6422_s28, %s6418_s27 }
   0xc   : > { %p206_p4 = scmp.eq.s32.totalorder %s4782_s10, 1  ;;  %p4785_p7 = scmp.ge.s32.totalorder %s6430_s30, 1 }
   0xd   : > { %s6516_s14 = scalar_select %p187_p1, %s6426_s29, %s189_s12  }
   0xe   : > { %p6518_p5 = por %p200_p2, %p199_p0  ;;  %p6522_p6 = por %p206_p4, %p205_p3 }
   0xf   : > { %12158 = sst [smem:[#allocation10_spill]] %s6516_s14  ;;  %p284_p8 = scmp.lt.s32.totalorder %s6430_s30, 3 }
  0x11   : > { %p285_p9 = pnand %p4785_p7, %p284_p8 }
  0x12   : > { %s6529_s17 = sand.u32 (!%p285_p9), 1, %s6422_s28   ;;  %s4788_s18 = sshll.u32 (!%p285_p9), %s6501_s9, 2 }
  0x13   : > { %288 = sbr.rel (%p285_p9) target bundleno = 3720 (0xe88), region = 48  ;;  %s4786_s19 = sshll.u32 (!%p285_p9), %s6529_s17, 5 }
  0x14   : > { %p330_p10 = scmp.lt.s32.totalorder (!%p285_p9), %s4788_s18, 7  ;;  %s12161_s0 = sld [smem:[#allocation11_spill]] (!%p285_p9) }
  0x15   : > { %s6543_s12 = scalar_lea.vmem (!%p285_p9), [#allocation3], %s4786_s19  ;;  %s6545_s13 = scalar_lea.vmem (!%p285_p9), [#allocation5], %s4786_s19 }
  0x16   : > { %p4792_p11 = scmp.ne.s32.totalorder (!%p285_p9), %s6501_s9, 0 }
  0x18   : > { %s12169_s18 = smov (!%p330_p10, %s4788_s18), 7  ;;  %347 = sbr.rel (%p4792_p11) target bundleno = 31 (0x1f), region = 52 }
  0x19   : > { %s4933_s20 = smul.u32 88, %s12169_s18  ;;  %s4791_s21 = sshll.u32 %s12169_s18, 3 }
  0x1a   : > { %s6536_s24 = scalar_lea.vmem %s12145_s1, %s4791_s21 }
  0x1b   : > { %s6541_s10 = scalar_lea.vmem %s12161_s0, %s4933_s20 }
  0x1d   : > { %v348_v0 = vld [vmem:[%s12146_s2] sm:$0xff]  ;;  %vm349_vm0 = vcmask 261120  }
  0x1e   : > { %350 = vst.msk [vmem:[#allocation2] sm:$0xff] %vm349_vm0, %v348_v0 }
  0x1f PF: > { %vm778_vm1 = vcmask 261120   ;;  %v384_v3 = vld [vmem:[%s12147_s3 + $0x108] sm:$0xff]  ;;  %v385_v4 = vld [vmem:[%s12147_s3 + $0x110] sm:$0xff]  ;;  %v386_v5 = vld [vmem:[%s12147_s3 + $0x118] sm:$0xff]  ;;  %s12154_s25 = smov 32   ;;  %vm1295_vm11 = vcmask 326656  }
  0x20   : > { %814 = vmatpush.msra.mxu0 %v384_v3  ;;  %834 = vmatpush.msra.mxu1 %v385_v4  ;;  %v390_v6 = vld [vmem:[%s12147_s3 + $0x138] sm:$0xff]  ;;  %v373_v7 = vld [vmem:[%s12147_s3 + $0xb0] sm:$0xff]  ;;  %v375_v9 = vld [vmem:[%s12147_s3 + $0xc0] sm:$0xff]  ;;  %s12162_s29 = smov 32   ;;  %s4655_s18 = sshll.u32 %s6543_s12, 4  ;;  %s12089_s18 = int_to_ptr.vmem [resolvable:$true] %s4655_s18 }
  0x21   : > { %854 = vmatpush.msra.mxu3 %v386_v5  ;;  %934 = vmatpush.msra.mxu2 %v390_v6  ;;  %v374_v8 = vld [vmem:[%s12147_s3 + $0xb8] sm:$0xff]  ;;  %v379_v10 = vld [vmem:[%s12147_s3 + $0xe0] sm:$0xff]  ;;  %v364_v13 = vld [vmem:[%s12147_s3 + $0x68] sm:$0xff]  ;;  %s4672_s14 = sshll.u32 %s6545_s13, 4  ;;  %s6356_s0 = scalar_lea.hbm %s12151_s7, 64  ;;  %s12094_s14 = int_to_ptr.vmem [resolvable:$true] %s4672_s14 }
  0x22   : > { %815 = vmatpush.msra.mxu0 %v373_v7  ;;  %835 = vmatpush.msra.mxu1 %v374_v8  ;;  %v362_v11 = vld [vmem:[%s12147_s3 + $0x58] sm:$0xff]  ;;  %v363_v12 = vld [vmem:[%s12147_s3 + $0x60] sm:$0xff]  ;;  %v368_v14 = vld [vmem:[%s12147_s3 + $0x88] sm:$0xff] }
  0x23   : > { %855 = vmatpush.msra.mxu3 %v375_v9  ;;  %935 = vmatpush.msra.mxu2 %v379_v10  ;;  %v351_v15 = vld [vmem:[%s12147_s3] sm:$0xff]  ;;  %v352_v16 = vld [vmem:[%s12147_s3 + $0x8] sm:$0xff]  ;;  %v353_v17 = vld [vmem:[%s12147_s3 + $0x10] sm:$0xff] }
  0x24   : > { %816 = vmatpush.msra.mxu0 %v362_v11  ;;  %836 = vmatpush.msra.mxu1 %v363_v12  ;;  %v357_v18 = vld [vmem:[%s12147_s3 + $0x30] sm:$0xff]  ;;  %v387_v19 = vld [vmem:[%s12147_s3 + $0x120] sm:$0xff]  ;;  %v388_v20 = vld [vmem:[%s12147_s3 + $0x128] sm:$0xff] }
  0x25   : > { %v6551_v1 = vld [vmem:[#allocation2] sm:$0xff]  ;;  %856 = vmatpush.msra.mxu3 %v364_v13  ;;  %936 = vmatpush.msra.mxu2 %v368_v14  ;;  %v389_v21 = vld [vmem:[%s12147_s3 + $0x130] sm:$0xff]  ;;  %v394_v22 = vld [vmem:[%s12147_s3 + $0x158] sm:$0xff] }
  0x26   : > { %v779_v2 = vsel %vm778_vm1, %v6551_v1, 0.0  ;;  %817 = vmatpush.msra.mxu0 %v351_v15  ;;  %837 = vmatpush.msra.mxu1 %v352_v16  ;;  %v376_v23 = vld [vmem:[%s12147_s3 + $0xc8] sm:$0xff]  ;;  %v377_v24 = vld [vmem:[%s12147_s3 + $0xd0] sm:$0xff]  ;;  %v378_v25 = vld [vmem:[%s12147_s3 + $0xd8] sm:$0xff] }
  0x27   : > { %780 = vadd.xlane.f32.xlu0 %v779_v2  ;;  %857 = vmatpush.msra.mxu3 %v353_v17  ;;  %v383_v26 = vld [vmem:[%s12147_s3 + $0x100] sm:$0xff]  ;;  %v365_v27 = vld [vmem:[%s12147_s3 + $0x70] sm:$0xff]  ;;  %v366_v28 = vld [vmem:[%s12147_s3 + $0x78] sm:$0xff] }
  0x28   : > { %937 = vmatpush.msra.mxu2 %v357_v18  ;;  %894 = vmatpush.msrb.mxu0 %v388_v20  ;;  %v367_v29 = vld [vmem:[%s12147_s3 + $0x80] sm:$0xff]  ;;  %v372_v30 = vld [vmem:[%s12147_s3 + $0xa8] sm:$0xff]  ;;  %v354_v31 = vld [vmem:[%s12147_s3 + $0x18] sm:$0xff] }
  0x29   : > { %874 = vmatpush.msrb.mxu3 %v387_v19  ;;  %914 = vmatpush.msrb.mxu1 %v389_v21  ;;  %v355_v32 = vld [vmem:[%s12147_s3 + $0x20] sm:$0xff]  ;;  %v356_v33 = vld [vmem:[%s12147_s3 + $0x28] sm:$0xff]  ;;  %v361_v34 = vld [vmem:[%s12147_s3 + $0x50] sm:$0xff] }
  0x2a   : > { %1014 = vmatpush.msrb.mxu2 %v394_v22  ;;  %895 = vmatpush.msrb.mxu0 %v377_v24  ;;  %v391_v48 = vld [vmem:[%s12147_s3 + $0x140] sm:$0xff]  ;;  %v392_v49 = vld [vmem:[%s12147_s3 + $0x148] sm:$0xff]  ;;  %v393_v50 = vld [vmem:[%s12147_s3 + $0x150] sm:$0xff] }
  0x2b   : > { %875 = vmatpush.msrb.mxu3 %v376_v23  ;;  %915 = vmatpush.msrb.mxu1 %v378_v25  ;;  %v380_v51 = vld [vmem:[%s12147_s3 + $0xe8] sm:$0xff]  ;;  %v381_v52 = vld [vmem:[%s12147_s3 + $0xf0] sm:$0xff]  ;;  %v382_v53 = vld [vmem:[%s12147_s3 + $0xf8] sm:$0xff] }
  0x2c   : > { %1015 = vmatpush.msrb.mxu2 %v383_v26  ;;  %896 = vmatpush.msrb.mxu0 %v366_v28  ;;  %v369_v54 = vld [vmem:[%s12147_s3 + $0x90] sm:$0xff]  ;;  %v370_v55 = vld [vmem:[%s12147_s3 + $0x98] sm:$0xff]  ;;  %v371_v56 = vld [vmem:[%s12147_s3 + $0xa0] sm:$0xff] }
  0x2d   : > { %876 = vmatpush.msrb.mxu3 %v365_v27  ;;  %916 = vmatpush.msrb.mxu1 %v367_v29  ;;  %v358_v57 = vld [vmem:[%s12147_s3 + $0x38] sm:$0xff]  ;;  %v359_v58 = vld [vmem:[%s12147_s3 + $0x40] sm:$0xff]  ;;  %v360_v59 = vld [vmem:[%s12147_s3 + $0x48] sm:$0xff] }
  0x2e   : > { %1016 = vmatpush.msrb.mxu2 %v372_v30  ;;  %897 = vmatpush.msrb.mxu0 %v355_v32  ;;  %v410_v62 = vld [vmem:[%s12148_s4 + $0x78] sm:$0xff]  ;;  %v409_v0 = vld [vmem:[%s12148_s4 + $0x70] sm:$0xff]  ;;  %v408_v2 = vld [vmem:[%s12148_s4 + $0x68] sm:$0xff] }
  0x2f   : > { %877 = vmatpush.msrb.mxu3 %v354_v31  ;;  %917 = vmatpush.msrb.mxu1 %v356_v33  ;;  %v426_v63 = vld [vmem:[%s12148_s4 + $0xf8] sm:$0xff]  ;;  %v424_v3 = vld [vmem:[%s12148_s4 + $0xe8] sm:$0xff]  ;;  %v407_v6 = vld [vmem:[%s12148_s4 + $0x60] sm:$0xff] }
  0x30   : > { %1017 = vmatpush.msrb.mxu2 %v361_v34  ;;  %v442_v4 = vld [vmem:[%s12148_s4 + $0x178] sm:$0xff]  ;;  %v423_v7 = vld [vmem:[%s12148_s4 + $0xe0] sm:$0xff]  ;;  %v441_v8 = vld [vmem:[%s12148_s4 + $0x170] sm:$0xff] }
  0x31   : > { %v458_v5 = vld [vmem:[%s12148_s4 + $0x1f8] sm:$0xff]  ;;  %v457_v10 = vld [vmem:[%s12148_s4 + $0x1f0] sm:$0xff]  ;;  %v440_v12 = vld [vmem:[%s12148_s4 + $0x168] sm:$0xff] }
  0x32   : > { %v406_v9 = vld [vmem:[%s12148_s4 + $0x58] sm:$0xff]  ;;  %v456_v13 = vld [vmem:[%s12148_s4 + $0x1e8] sm:$0xff]  ;;  %v439_v15 = vld [vmem:[%s12148_s4 + $0x160] sm:$0xff] }
  0x33   : > { %v422_v11 = vld [vmem:[%s12148_s4 + $0xd8] sm:$0xff]  ;;  %v455_v16 = vld [vmem:[%s12148_s4 + $0x1e0] sm:$0xff]  ;;  %v405_v19 = vld [vmem:[%s12148_s4 + $0x50] sm:$0xff] }
  0x34   : > { %v421_v20 = vld [vmem:[%s12148_s4 + $0xd0] sm:$0xff]  ;;  %v438_v21 = vld [vmem:[%s12148_s4 + $0x158] sm:$0xff]  ;;  %v404_v23 = vld [vmem:[%s12148_s4 + $0x48] sm:$0xff] }
  0x35   : > { %v454_v22 = vld [vmem:[%s12148_s4 + $0x1d8] sm:$0xff]  ;;  %v420_v24 = vld [vmem:[%s12148_s4 + $0xc8] sm:$0xff]  ;;  %v437_v25 = vld [vmem:[%s12148_s4 + $0x150] sm:$0xff] }
  0x36   : > { %v453_v26 = vld [vmem:[%s12148_s4 + $0x1d0] sm:$0xff]  ;;  %v403_v27 = vld [vmem:[%s12148_s4 + $0x40] sm:$0xff]  ;;  %v436_v29 = vld [vmem:[%s12148_s4 + $0x148] sm:$0xff] }
  0x37   : > { %v419_v28 = vld [vmem:[%s12148_s4 + $0xc0] sm:$0xff]  ;;  %v452_v30 = vld [vmem:[%s12148_s4 + $0x1c8] sm:$0xff]  ;;  %v402_v33 = vld [vmem:[%s12148_s4 + $0x38] sm:$0xff] }
  0x38   : > { %v766_v31 = vld [vmem:[%s6541_s10] sm:$0xff]  ;;  %v418_v34 = vld [vmem:[%s12148_s4 + $0xb8] sm:$0xff] }
  0x39   : > { %v770_v32 = vld [vmem:[%s6541_s10 + $0x20] sm:$0xff] }
  0x9a   : > { %v781_v35 = vpop.xlane.xlu0 %780 }
  0x9b   : > { %vm782_vm2 = vcmp.eq.f32.partialorder %v781_v35, 0.0 }
  0x9c   : > { %v783_v36 = vsel %vm782_vm2, 1.0, %v781_v35  ;;  %v767_v35 = vld [vmem:[%s6541_s10 + $0x8] sm:$0xff] }
  0x9d   : > { %4981 = vrcp.f32 %v783_v36  ;;  %v795_v40 = vand.u32 2147483648, %v783_v36  ;;  %v793_v42 = vand.u32 2147483647, %v783_v36  ;;  %vm789_vm4 = vweird.f32 %v783_v36 }
  0x9f   : > { %v796_v44 = vor.u32 1.1754944e-38, %v795_v40  ;;  %vm794_vm6 = vcmp.eq.f32.partialorder %v793_v42, 8.507059e+37  ;;  %v774_v40 = vld [vmem:[%s6541_s10 + $0x40] sm:$0xff]  ;;  %v417_v42 = vld [vmem:[%s12148_s4 + $0xb0] sm:$0xff] }
  0xa3   : > { %v4982_v37 = vpop.eup %4981 }
  0xa4   : > { %v785_v38 = vmul.f32 %v4982_v37, %v783_v36  ;;  %vm790_vm3 = vweird.f32 %v4982_v37  ;;  %v771_v36 = vld [vmem:[%s6541_s10 + $0x28] sm:$0xff] }
  0xa5   : > { %vm791_vm5 = vmor %vm789_vm4, %vm790_vm3 }
  0xa6   : > { %v786_v39 = vsub.f32 1.0, %v785_v38  ;;  %v435_v38 = vld [vmem:[%s12148_s4 + $0x140] sm:$0xff] }
  0xa8   : > { %v787_v41 = vmul.f32 %v4982_v37, %v786_v39  ;;  %v451_v39 = vld [vmem:[%s12148_s4 + $0x1c0] sm:$0xff] }
  0xaa   : > { %v788_v43 = vadd.f32 %v4982_v37, %v787_v41  ;;  %v401_v41 = vld [vmem:[%s12148_s4 + $0x30] sm:$0xff] }
  0xac   : > { %v792_v45 = vsel %vm791_vm5, %v4982_v37, %v788_v43 }
  0xad   : > { %v797_v46 = vsel %vm794_vm6, %v796_v44, %v792_v45  ;;  %v775_v44 = vld [vmem:[%s6541_s10 + $0x48] sm:$0xff] }
  0xae   : > { %v798_v47 = vmul.f32 %v797_v46, %v6551_v1  ;;  %v425_v1 = vld [vmem:[%s12148_s4 + $0xf0] sm:$0xff]  ;;  %v434_v46 = vld [vmem:[%s12148_s4 + $0x138] sm:$0xff] }
  0xb0   : > { %4793 = vmatmul.msk.f32.vlgmr.msra.gmra.mxu0 %vm778_vm1, %v798_v47  ;;  %4794 = vmatmul.msk.f32.vlgmr.msra.gmra.mxu1 %vm778_vm1, %v798_v47 }
  0xb1   : > { %4795 = vmatmul.msk.f32.vlgmr.msra.gmra.mxu3 %vm778_vm1, %v798_v47  ;;  %4799 = vmatmul.msk.f32.vlgmr.msra.gmra.mxu2 %vm778_vm1, %v798_v47 }
  0xb2   : > { %954 = vmatpush.msra.mxu3 %v391_v48  ;;  %974 = vmatpush.msra.mxu0 %v392_v49  ;;  %v768_v48 = vld [vmem:[%s6541_s10 + $0x10] sm:$0xff] }
  0xb3   : > { %994 = vmatpush.msra.mxu1 %v393_v50  ;;  %1139 = vmatpush.msra.mxu2 %v458_v5 }
  0xb4   : > { %955 = vmatpush.msra.mxu3 %v380_v51  ;;  %975 = vmatpush.msra.mxu0 %v381_v52  ;;  %v400_v51 = vld [vmem:[%s12148_s4 + $0x28] sm:$0xff] }
  0xb5   : > { %995 = vmatpush.msra.mxu1 %v382_v53  ;;  %1140 = vmatpush.msra.mxu2 %v457_v10  ;;  %v416_v52 = vld [vmem:[%s12148_s4 + $0xa8] sm:$0xff] }
  0xb6   : > { %956 = vmatpush.msra.mxu3 %v369_v54  ;;  %976 = vmatpush.msra.mxu0 %v370_v55  ;;  %v772_v54 = vld [vmem:[%s6541_s10 + $0x30] sm:$0xff] }
  0xb7   : > { %996 = vmatpush.msra.mxu1 %v371_v56  ;;  %1141 = vmatpush.msra.mxu2 %v456_v13  ;;  %v433_v56 = vld [vmem:[%s12148_s4 + $0x130] sm:$0xff] }
  0xb8   : > { %4797 = vmatmul.msk.f32.vlgmr.msrb.gmra.mxu0 %vm778_vm1, %v798_v47  ;;  %4798 = vmatmul.msk.f32.vlgmr.msrb.gmra.mxu1 %vm778_vm1, %v798_v47 }
  0xb9   : > { %4796 = vmatmul.msk.f32.vlgmr.msrb.gmra.mxu3 %vm778_vm1, %v798_v47  ;;  %4803 = vmatmul.msk.f32.vlgmr.msrb.gmra.mxu2 %vm778_vm1, %v798_v47 }
  0xba   : > { %957 = vmatpush.msra.mxu3 %v358_v57  ;;  %977 = vmatpush.msra.mxu0 %v359_v58  ;;  %v449_v57 = vld [vmem:[%s12148_s4 + $0x1b0] sm:$0xff] }
  0xbb   : > { %997 = vmatpush.msra.mxu1 %v360_v59  ;;  %1142 = vmatpush.msra.mxu2 %v455_v16  ;;  %v769_v59 = vld [vmem:[%s6541_s10 + $0x18] sm:$0xff]  ;;  %v397_v16 = vld [vmem:[%s12148_s4 + $0x10] sm:$0xff] }
  0xbc   : > { %1079 = vmatpush.msrb.mxu3 %v410_v62  ;;  %1099 = vmatpush.msrb.mxu0 %v426_v63  ;;  %v399_v63 = vld [vmem:[%s12148_s4 + $0x20] sm:$0xff] }
  0xbd   : > { %1119 = vmatpush.msrb.mxu1 %v442_v4  ;;  %1143 = vmatpush.msra.mxu2 %v454_v22  ;;  %v396_v22 = vld [vmem:[%s12148_s4 + $0x8] sm:$0xff] }
  0xbe   : > { %1080 = vmatpush.msrb.mxu3 %v409_v0  ;;  %1100 = vmatpush.msrb.mxu0 %v425_v1  ;;  %v415_v0 = vld [vmem:[%s12148_s4 + $0xa0] sm:$0xff] }
  0xbf   : > { %1120 = vmatpush.msrb.mxu1 %v441_v8  ;;  %1144 = vmatpush.msra.mxu2 %v453_v26  ;;  %v414_v8 = vld [vmem:[%s12148_s4 + $0x98] sm:$0xff] }
  0xc0   : > { %4801 = vmatmul.msk.f32.vlgmr.msra.gmra.mxu0 %vm778_vm1, %v798_v47  ;;  %4802 = vmatmul.msk.f32.vlgmr.msra.gmra.mxu1 %vm778_vm1, %v798_v47 }
  0xc1   : > { %4800 = vmatmul.msk.f32.vlgmr.msra.gmra.mxu3 %vm778_vm1, %v798_v47  ;;  %1101 = vmatpush.msrb.mxu0 %v424_v3  ;;  %v450_v47 = vld [vmem:[%s12148_s4 + $0x1b8] sm:$0xff]  ;;  %v448_v3 = vld [vmem:[%s12148_s4 + $0x1a8] sm:$0xff] }
  0xc2   : > { %1081 = vmatpush.msrb.mxu3 %v408_v2  ;;  %1121 = vmatpush.msrb.mxu1 %v440_v12  ;;  %v432_v2 = vld [vmem:[%s12148_s4 + $0x128] sm:$0xff]  ;;  %v447_v12 = vld [vmem:[%s12148_s4 + $0x1a0] sm:$0xff] }
  0xc3   : > { %1102 = vmatpush.msrb.mxu0 %v423_v7  ;;  %1145 = vmatpush.msra.mxu2 %v452_v30  ;;  %v398_v7 = vld [vmem:[%s12148_s4 + $0x18] sm:$0xff] }
  0xc4   : > { %1082 = vmatpush.msrb.mxu3 %v407_v6  ;;  %1122 = vmatpush.msrb.mxu1 %v439_v15  ;;  %v474_v30 = vld [vmem:[%s12148_s4 + $0x278] sm:$0xff] }
  0xc5   : > { %1103 = vmatpush.msrb.mxu0 %v422_v11  ;;  %1146 = vmatpush.msra.mxu2 %v451_v39  ;;  %v431_v11 = vld [vmem:[%s12148_s4 + $0x120] sm:$0xff] }
  0xc6   : > { %1083 = vmatpush.msrb.mxu3 %v406_v9  ;;  %1123 = vmatpush.msrb.mxu1 %v438_v21  ;;  %v443_v39 = vld [vmem:[%s12148_s4 + $0x180] sm:$0xff] }
  0xc7   : > { %1104 = vmatpush.msrb.mxu0 %v421_v20  ;;  %1147 = vmatpush.msra.mxu2 %v450_v47  ;;  %v521_v47 = vld [vmem:[%s12148_s4 + $0x3f0] sm:$0xff] }
  0xc8   : > { %1084 = vmatpush.msrb.mxu3 %v405_v19  ;;  %1124 = vmatpush.msrb.mxu1 %v437_v25  ;;  %v446_v19 = vld [vmem:[%s12148_s4 + $0x198] sm:$0xff]  ;;  %v445_v25 = vld [vmem:[%s12148_s4 + $0x190] sm:$0xff] }
  0xc9   : > { %1105 = vmatpush.msrb.mxu0 %v420_v24  ;;  %1148 = vmatpush.msra.mxu2 %v449_v57  ;;  %v429_v24 = vld [vmem:[%s12148_s4 + $0x110] sm:$0xff]  ;;  %v468_v57 = vld [vmem:[%s12148_s4 + $0x248] sm:$0xff] }
  0xca   : > { %1085 = vmatpush.msrb.mxu3 %v404_v23  ;;  %1125 = vmatpush.msrb.mxu1 %v436_v29  ;;  %v412_v23 = vld [vmem:[%s12148_s4 + $0x88] sm:$0xff]  ;;  %v411_v29 = vld [vmem:[%s12148_s4 + $0x80] sm:$0xff] }
  0xcb   : > { %1106 = vmatpush.msrb.mxu0 %v419_v28  ;;  %1149 = vmatpush.msra.mxu2 %v448_v3  ;;  %v395_v28 = vld [vmem:[%s12148_s4] sm:$0xff] }
  0xcc   : > { %1086 = vmatpush.msrb.mxu3 %v403_v27  ;;  %1126 = vmatpush.msrb.mxu1 %v435_v38  ;;  %v472_v38 = vld [vmem:[%s12148_s4 + $0x268] sm:$0xff]  ;;  %v483_v3 = vld [vmem:[%s12148_s4 + $0x2c0] sm:$0xff] }
  0xcd   : > { %1107 = vmatpush.msrb.mxu0 %v418_v34  ;;  %1150 = vmatpush.msra.mxu2 %v447_v12  ;;  %v473_v34 = vld [vmem:[%s12148_s4 + $0x270] sm:$0xff]  ;;  %v464_v12 = vld [vmem:[%s12148_s4 + $0x228] sm:$0xff] }
  0xce   : > { %1087 = vmatpush.msrb.mxu3 %v402_v33  ;;  %1127 = vmatpush.msrb.mxu1 %v434_v46  ;;  %v428_v33 = vld [vmem:[%s12148_s4 + $0x108] sm:$0xff]  ;;  %v470_v46 = vld [vmem:[%s12148_s4 + $0x258] sm:$0xff] }
  0xcf   : > { %1108 = vmatpush.msrb.mxu0 %v417_v42  ;;  %1151 = vmatpush.msra.mxu2 %v446_v19  ;;  %v471_v42 = vld [vmem:[%s12148_s4 + $0x260] sm:$0xff] }
  0xd0   : > { %1088 = vmatpush.msrb.mxu3 %v401_v41  ;;  %1128 = vmatpush.msrb.mxu1 %v433_v56  ;;  %v506_v41 = vld [vmem:[%s12148_s4 + $0x378] sm:$0xff]  ;;  %v503_v56 = vld [vmem:[%s12148_s4 + $0x360] sm:$0xff] }
  0xd1   : > { %1109 = vmatpush.msrb.mxu0 %v416_v52  ;;  %1152 = vmatpush.msra.mxu2 %v445_v25  ;;  %v469_v52 = vld [vmem:[%s12148_s4 + $0x250] sm:$0xff]  ;;  %v499_v19 = vld [vmem:[%s12148_s4 + $0x340] sm:$0xff] }
  0xd2   : > { %1089 = vmatpush.msrb.mxu3 %v400_v51  ;;  %1129 = vmatpush.msrb.mxu1 %v432_v2  ;;  %v504_v51 = vld [vmem:[%s12148_s4 + $0x368] sm:$0xff]  ;;  %v518_v2 = vld [vmem:[%s12148_s4 + $0x3d8] sm:$0xff]  ;;  %v461_v25 = vld [vmem:[%s12148_s4 + $0x210] sm:$0xff] }
  0xd3   : > { %1110 = vmatpush.msrb.mxu0 %v415_v0  ;;  %v502_v0 = vld [vmem:[%s12148_s4 + $0x358] sm:$0xff] }
  0xd4   : > { %1090 = vmatpush.msrb.mxu3 %v399_v63  ;;  %1130 = vmatpush.msrb.mxu1 %v431_v11  ;;  %v484_v63 = vld [vmem:[%s12148_s4 + $0x2c8] sm:$0xff]  ;;  %v481_v11 = vld [vmem:[%s12148_s4 + $0x2b0] sm:$0xff] }
  0xd5   : > { %1111 = vmatpush.msrb.mxu0 %v414_v8  ;;  %v482_v8 = vld [vmem:[%s12148_s4 + $0x2b8] sm:$0xff] }
  0xd6   : > { %1091 = vmatpush.msrb.mxu3 %v398_v7  ;;  %v517_v7 = vld [vmem:[%s12148_s4 + $0x3d0] sm:$0xff] }
  0xd8   : > { %1092 = vmatpush.msrb.mxu3 %v397_v16  ;;  %v516_v16 = vld [vmem:[%s12148_s4 + $0x3c8] sm:$0xff] }
  0xda   : > { %1093 = vmatpush.msrb.mxu3 %v396_v22  ;;  %v478_v22 = vld [vmem:[%s12148_s4 + $0x298] sm:$0xff] }
  0xdc   : > { %1094 = vmatpush.msrb.mxu3 %v395_v28  ;;  %v513_v28 = vld [vmem:[%s12148_s4 + $0x3b0] sm:$0xff] }
  0xde   : > { %1159 = vmatpush.msra.mxu3 %v474_v30  ;;  %v476_v30 = vld [vmem:[%s12148_s4 + $0x288] sm:$0xff] }
  0xe0   : > { %1160 = vmatpush.msra.mxu3 %v473_v34  ;;  %v475_v34 = vld [vmem:[%s12148_s4 + $0x280] sm:$0xff] }
  0xe2   : > { %1161 = vmatpush.msra.mxu3 %v472_v38  ;;  %v510_v38 = vld [vmem:[%s12148_s4 + $0x398] sm:$0xff] }
  0xe4   : > { %1162 = vmatpush.msra.mxu3 %v471_v42  ;;  %v508_v42 = vld [vmem:[%s12148_s4 + $0x388] sm:$0xff] }
  0xe6   : > { %1163 = vmatpush.msra.mxu3 %v470_v46 }
  0xe8   : > { %1164 = vmatpush.msra.mxu3 %v469_v52 }
  0xea   : > { %1165 = vmatpush.msra.mxu3 %v468_v57 }
 0x12d   : > { %v6699_v60 = vpop.f32.mrf.mxu0  ;;  %v6701_v61 = vpop.f32.mrf.mxu1 }
 0x12e   : > { %v6837_v53 = vadd.f32 %v6699_v60, %v766_v31  ;;  %v6847_v58 = vadd.f32 %v6701_v61, %v767_v35  ;;  %v773_v61 = vld [vmem:[%s6541_s10 + $0x38] sm:$0xff]  ;;  %v444_v35 = vld [vmem:[%s12148_s4 + $0x188] sm:$0xff] }
 0x12f   : > { %1153 = vmatpush.msra.mxu2 %v444_v35  ;;  %v495_v35 = vld [vmem:[%s12148_s4 + $0x320] sm:$0xff] }
 0x131   : > { %1154 = vmatpush.msra.mxu2 %v443_v39  ;;  %v493_v39 = vld [vmem:[%s12148_s4 + $0x310] sm:$0xff] }
 0x134   : > { %v6751_v14 = vpop.f32.mrf.mxu3  ;;  %v939_v55 = vpop.f32.mrf.mxu2 }
 0x135   : > { %v899_v17 = vpop.f32.mrf.mxu0  ;;  %v919_v18 = vpop.f32.mrf.mxu1  ;;  %v6861_v1 = vadd.f32 %v6751_v14, %v768_v48  ;;  %v6870_v4 = vadd.f32 %v939_v55, %v772_v54  ;;  %v486_v48 = vld [vmem:[%s12148_s4 + $0x2d8] sm:$0xff]  ;;  %v520_v54 = vld [vmem:[%s12148_s4 + $0x3e8] sm:$0xff]  ;;  %v485_v55 = vld [vmem:[%s12148_s4 + $0x2d0] sm:$0xff] }
 0x136   : > { %v6826_v49 = vadd.f32 %v899_v17, %v770_v32  ;;  %v6828_v50 = vadd.f32 %v919_v18, %v771_v36  ;;  %v413_v17 = vld [vmem:[%s12148_s4 + $0x90] sm:$0xff]  ;;  %v430_v18 = vld [vmem:[%s12148_s4 + $0x118] sm:$0xff] }
 0x137   : > { %v1040_v20 = vmax.f32 %v6861_v1, %v6870_v4  ;;  %1112 = vmatpush.msrb.mxu0 %v413_v17  ;;  %1131 = vmatpush.msrb.mxu1 %v430_v18  ;;  %v490_v32 = vld [vmem:[%s12148_s4 + $0x2f8] sm:$0xff]  ;;  %v489_v36 = vld [vmem:[%s12148_s4 + $0x2f0] sm:$0xff]  ;;  %v463_v17 = vld [vmem:[%s12148_s4 + $0x220] sm:$0xff] }
 0x138   : > { %v1038_v5 = vmax.f32 %v6837_v53, %v6826_v49  ;;  %v1039_v6 = vmax.f32 %v6847_v58, %v6828_v50  ;;  %v479_v18 = vld [vmem:[%s12148_s4 + $0x2a0] sm:$0xff] }
 0x139   : > { %1113 = vmatpush.msrb.mxu0 %v412_v23  ;;  %1132 = vmatpush.msrb.mxu1 %v429_v24  ;;  %v498_v23 = vld [vmem:[%s12148_s4 + $0x338] sm:$0xff] }
 0x13a   : > { %v514_v24 = vld [vmem:[%s12148_s4 + $0x3b8] sm:$0xff] }
 0x13b   : > { %1114 = vmatpush.msrb.mxu0 %v411_v29  ;;  %1133 = vmatpush.msrb.mxu1 %v428_v33  ;;  %v460_v29 = vld [vmem:[%s12148_s4 + $0x208] sm:$0xff]  ;;  %v459_v33 = vld [vmem:[%s12148_s4 + $0x200] sm:$0xff] }
 0x13c   : > { %v879_v37 = vpop.f32.mrf.mxu3 }
 0x13d   : > { %v979_v43 = vpop.f32.mrf.mxu0  ;;  %v999_v45 = vpop.f32.mrf.mxu1  ;;  %v6882_v9 = vadd.f32 %v879_v37, %v769_v59  ;;  %v427_v37 = vld [vmem:[%s12148_s4 + $0x100] sm:$0xff]  ;;  %1179 = vmatpush.msra.mxu0 %v490_v32  ;;  %v512_v32 = vld [vmem:[%s12148_s4 + $0x3a8] sm:$0xff] }
 0x13e   : > { %v6850_v62 = vadd.f32 %v979_v43, %v774_v40  ;;  %v6852_v60 = vadd.f32 %v999_v45, %v775_v44  ;;  %v488_v40 = vld [vmem:[%s12148_s4 + $0x2e8] sm:$0xff]  ;;  %1134 = vmatpush.msrb.mxu1 %v427_v37  ;;  %v522_v43 = vld [vmem:[%s12148_s4 + $0x3f8] sm:$0xff]  ;;  %v487_v44 = vld [vmem:[%s12148_s4 + $0x2e0] sm:$0xff] }
 0x13f   : > { %1180 = vmatpush.msra.mxu0 %v489_v36  ;;  %v505_v45 = vld [vmem:[%s12148_s4 + $0x370] sm:$0xff]  ;;  %1219 = vmatpush.msrb.mxu2 %v522_v43  ;;  %v519_v59 = vld [vmem:[%s12148_s4 + $0x3e0] sm:$0xff]  ;;  %v494_v37 = vld [vmem:[%s12148_s4 + $0x318] sm:$0xff] }
 0x140   : > { %v1042_v13 = vmax.f32 %v1038_v5, %v6850_v62  ;;  %v1043_v14 = vmax.f32 %v1039_v6, %v6852_v60  ;;  %1199 = vmatpush.msra.mxu1 %v506_v41  ;;  %v501_v5 = vld [vmem:[%s12148_s4 + $0x350] sm:$0xff]  ;;  %v466_v6 = vld [vmem:[%s12148_s4 + $0x238] sm:$0xff]  ;;  %v511_v36 = vld [vmem:[%s12148_s4 + $0x3a0] sm:$0xff] }
 0x141   : > { %1181 = vmatpush.msra.mxu0 %v488_v40  ;;  %1220 = vmatpush.msrb.mxu2 %v521_v47  ;;  %v509_v40 = vld [vmem:[%s12148_s4 + $0x390] sm:$0xff]  ;;  %v492_v41 = vld [vmem:[%s12148_s4 + $0x308] sm:$0xff]  ;;  %v491_v43 = vld [vmem:[%s12148_s4 + $0x300] sm:$0xff] }
 0x142   : > { %v1044_v26 = vmax.f32 %v1042_v13, %v1043_v14  ;;  %1200 = vmatpush.msra.mxu1 %v505_v45  ;;  %v480_v13 = vld [vmem:[%s12148_s4 + $0x2a8] sm:$0xff] }
 0x143   : > { %1182 = vmatpush.msra.mxu0 %v487_v44  ;;  %1221 = vmatpush.msrb.mxu2 %v520_v54  ;;  %v500_v14 = vld [vmem:[%s12148_s4 + $0x348] sm:$0xff]  ;;  %v507_v44 = vld [vmem:[%s12148_s4 + $0x380] sm:$0xff] }
 0x144   : > { %v959_v10 = vpop.f32.mrf.mxu3  ;;  %1201 = vmatpush.msra.mxu1 %v504_v51 }
 0x145   : > { %v6892_v15 = vadd.f32 %v959_v10, %v773_v61  ;;  %1183 = vmatpush.msra.mxu0 %v486_v48  ;;  %v467_v61 = vld [vmem:[%s12148_s4 + $0x240] sm:$0xff]  ;;  %1222 = vmatpush.msrb.mxu2 %v519_v59  ;;  %v465_v10 = vld [vmem:[%s12148_s4 + $0x230] sm:$0xff]  ;;  %v538_v59 = vld [vmem:[%s12148_s4 + $0x478] sm:$0xff] }
 0x146   : > { %1202 = vmatpush.msra.mxu1 %v503_v56  ;;  %1166 = vmatpush.msra.mxu3 %v467_v61 }
 0x147   : > { %v1041_v21 = vmax.f32 %v6882_v9, %v6892_v15  ;;  %1184 = vmatpush.msra.mxu0 %v485_v55  ;;  %1223 = vmatpush.msrb.mxu2 %v518_v2 }
 0x148   : > { %1203 = vmatpush.msra.mxu1 %v502_v0  ;;  %1167 = vmatpush.msra.mxu3 %v466_v6 }
 0x149   : > { %v1045_v27 = vmax.f32 %v1040_v20, %v1041_v21  ;;  %1185 = vmatpush.msra.mxu0 %v484_v63  ;;  %1224 = vmatpush.msrb.mxu2 %v517_v7  ;;  %v515_v20 = vld [vmem:[%s12148_s4 + $0x3c0] sm:$0xff]  ;;  %v462_v21 = vld [vmem:[%s12148_s4 + $0x218] sm:$0xff]  ;;  %v536_v7 = vld [vmem:[%s12148_s4 + $0x468] sm:$0xff] }
 0x14a   : > { %1204 = vmatpush.msra.mxu1 %v501_v5  ;;  %1168 = vmatpush.msra.mxu3 %v465_v10  ;;  %v777_v5 = vld [vmem:[%s6536_s24] sm:$0xff] }
 0x14b   : > { %v1046_v31 = vmax.f32 %v1044_v26, %v1045_v27  ;;  %1186 = vmatpush.msra.mxu0 %v483_v3  ;;  %1225 = vmatpush.msrb.mxu2 %v516_v16  ;;  %v477_v26 = vld [vmem:[%s12148_s4 + $0x290] sm:$0xff]  ;;  %v535_v10 = vld [vmem:[%s12148_s4 + $0x460] sm:$0xff] }
 0x14c   : > { %1169 = vmatpush.msra.mxu3 %v464_v12  ;;  %1205 = vmatpush.msra.mxu1 %v500_v14  ;;  %v497_v27 = vld [vmem:[%s12148_s4 + $0x330] sm:$0xff]  ;;  %v534_v12 = vld [vmem:[%s12148_s4 + $0x458] sm:$0xff] }
 0x14d   : > { %1047 = vmax.xlane.f32.xlu0 %v1046_v31  ;;  %1187 = vmatpush.msra.mxu0 %v482_v8  ;;  %v496_v31 = vld [vmem:[%s12148_s4 + $0x328] sm:$0xff]  ;;  %v553_v3 = vld [vmem:[%s12148_s4 + $0x4f0] sm:$0xff]  ;;  %v550_v14 = vld [vmem:[%s12148_s4 + $0x4d8] sm:$0xff] }
 0x14e   : > { %1170 = vmatpush.msra.mxu3 %v463_v17  ;;  %1206 = vmatpush.msra.mxu1 %v499_v19  ;;  %v552_v8 = vld [vmem:[%s12148_s4 + $0x4e8] sm:$0xff]  ;;  %v533_v17 = vld [vmem:[%s12148_s4 + $0x450] sm:$0xff] }
 0x14f   : > { %1188 = vmatpush.msra.mxu0 %v481_v11  ;;  %1226 = vmatpush.msrb.mxu2 %v515_v20  ;;  %v551_v11 = vld [vmem:[%s12148_s4 + $0x4e0] sm:$0xff]  ;;  %v549_v19 = vld [vmem:[%s12148_s4 + $0x4d0] sm:$0xff] }
 0x150   : > { %1171 = vmatpush.msra.mxu3 %v462_v21  ;;  %1207 = vmatpush.msra.mxu1 %v498_v23  ;;  %v532_v21 = vld [vmem:[%s12148_s4 + $0x448] sm:$0xff]  ;;  %v531_v23 = vld [vmem:[%s12148_s4 + $0x440] sm:$0xff] }
 0x151   : > { %1189 = vmatpush.msra.mxu0 %v480_v13  ;;  %1227 = vmatpush.msrb.mxu2 %v514_v24  ;;  %v547_v24 = vld [vmem:[%s12148_s4 + $0x4c0] sm:$0xff] }
 0x152   : > { %1172 = vmatpush.msra.mxu3 %v461_v25  ;;  %1208 = vmatpush.msra.mxu1 %v497_v27  ;;  %v530_v25 = vld [vmem:[%s12148_s4 + $0x438] sm:$0xff]  ;;  %v529_v27 = vld [vmem:[%s12148_s4 + $0x430] sm:$0xff] }
 0x153   : > { %1190 = vmatpush.msra.mxu0 %v479_v18  ;;  %1228 = vmatpush.msrb.mxu2 %v513_v28  ;;  %v545_v28 = vld [vmem:[%s12148_s4 + $0x4b0] sm:$0xff] }
 0x154   : > { %1173 = vmatpush.msra.mxu3 %v460_v29  ;;  %1209 = vmatpush.msra.mxu1 %v496_v31 }
 0x155   : > { %1191 = vmatpush.msra.mxu0 %v478_v22  ;;  %1229 = vmatpush.msrb.mxu2 %v512_v32  ;;  %v548_v22 = vld [vmem:[%s12148_s4 + $0x4c8] sm:$0xff] }
 0x156   : > { %1174 = vmatpush.msra.mxu3 %v459_v33  ;;  %1210 = vmatpush.msra.mxu1 %v495_v35  ;;  %v544_v32 = vld [vmem:[%s12148_s4 + $0x4a8] sm:$0xff]  ;;  %v527_v33 = vld [vmem:[%s12148_s4 + $0x420] sm:$0xff] }
 0x157   : > { %1192 = vmatpush.msra.mxu0 %v477_v26  ;;  %1230 = vmatpush.msrb.mxu2 %v511_v36  ;;  %v546_v26 = vld [vmem:[%s12148_s4 + $0x4b8] sm:$0xff] }
 0x158   : > { %1211 = vmatpush.msra.mxu1 %v494_v37  ;;  %1034 = vrot.lane.b32.xlu1 %v777_v5, %s12154_s25  ;;  %v542_v36 = vld [vmem:[%s12148_s4 + $0x498] sm:$0xff]  ;;  %v525_v37 = vld [vmem:[%s12148_s4 + $0x410] sm:$0xff] }
 0x159   : > { %1193 = vmatpush.msra.mxu0 %v476_v30  ;;  %1231 = vmatpush.msrb.mxu2 %v510_v38  ;;  %v528_v30 = vld [vmem:[%s12148_s4 + $0x428] sm:$0xff]  ;;  %v541_v38 = vld [vmem:[%s12148_s4 + $0x490] sm:$0xff] }
 0x15a   : > { %1212 = vmatpush.msra.mxu1 %v493_v39  ;;  %v524_v39 = vld [vmem:[%s12148_s4 + $0x408] sm:$0xff] }
 0x15b   : > { %1194 = vmatpush.msra.mxu0 %v475_v34  ;;  %1232 = vmatpush.msrb.mxu2 %v509_v40  ;;  %v540_v40 = vld [vmem:[%s12148_s4 + $0x488] sm:$0xff] }
 0x15c   : > { %1213 = vmatpush.msra.mxu1 %v492_v41  ;;  %v523_v41 = vld [vmem:[%s12148_s4 + $0x400] sm:$0xff] }
 0x15d   : > { %1233 = vmatpush.msrb.mxu2 %v508_v42  ;;  %v539_v42 = vld [vmem:[%s12148_s4 + $0x480] sm:$0xff] }
 0x15e   : > { %1214 = vmatpush.msra.mxu1 %v491_v43 }
 0x15f   : > { %1234 = vmatpush.msrb.mxu2 %v507_v44 }
 0x1c0   : > { %v7132_v45 = vpop.xlane.xlu0 %1047 }
 0x1c1   : > { %v1049_v46 = vsub.f32 %v6837_v53, %v7132_v45  ;;  %v1050_v47 = vsub.f32 %v6847_v58, %v7132_v45  ;;  %v1051_v48 = vsub.f32 %v6861_v1, %v7132_v45  ;;  %v1052_v51 = vsub.f32 %v6882_v9, %v7132_v45 }
 0x1c2   : > { %v1053_v57 = vsub.f32 %v6826_v49, %v7132_v45  ;;  %v1054_v53 = vsub.f32 %v6828_v50, %v7132_v45  ;;  %v1055_v58 = vsub.f32 %v6870_v4, %v7132_v45  ;;  %v1056_v1 = vsub.f32 %v6892_v15, %v7132_v45  ;;  %v554_v50 = vld [vmem:[%s12148_s4 + $0x4f8] sm:$0xff]  ;;  %v537_v4 = vld [vmem:[%s12148_s4 + $0x470] sm:$0xff] }
 0x1c3   : > { %v1059_v52 = vmul.f32 1.442695, %v1049_v46  ;;  %v1061_v54 = vmul.f32 1.442695, %v1050_v47  ;;  %v1063_v55 = vmul.f32 1.442695, %v1051_v48  ;;  %v1057_v29 = vsub.f32 %v6850_v62, %v7132_v45 }
 0x1c4   : > { %v1065_v56 = vmul.f32 1.442695, %v1052_v51  ;;  %v1067_v9 = vmul.f32 1.442695, %v1053_v57  ;;  %v1069_v63 = vmul.f32 1.442695, %v1054_v53  ;;  %v1058_v31 = vsub.f32 %v6852_v60, %v7132_v45  ;;  %v7291_v51 = vpop.f32.mrf.mxu2 }
 0x1c5   : > { %4983 = vpow2.f32 %v1059_v52  ;;  %v1071_v0 = vmul.f32 1.442695, %v1055_v58  ;;  %v1073_v15 = vmul.f32 1.442695, %v1056_v1  ;;  %v543_v62 = vld [vmem:[%s12148_s4 + $0x4a0] sm:$0xff]  ;;  %v526_v60 = vld [vmem:[%s12148_s4 + $0x418] sm:$0xff] }
 0x1c6   : > { %4985 = vpow2.f32 %v1061_v54  ;;  %v1075_v34 = vmul.f32 1.442695, %v1057_v29  ;;  %v1077_v35 = vmul.f32 1.442695, %v1058_v31  ;;  %v597_v46 = vld [vmem:[%s12149_s5 + $0x150] sm:$0xff]  ;;  %v598_v47 = vld [vmem:[%s12149_s5 + $0x158] sm:$0xff] }
 0x1c7   : > { %4987 = vpow2.f32 %v1063_v55  ;;  %v595_v48 = vld [vmem:[%s12149_s5 + $0x140] sm:$0xff]  ;;  %v596_v54 = vld [vmem:[%s12149_s5 + $0x148] sm:$0xff]  ;;  %v585_v53 = vld [vmem:[%s12149_s5 + $0xf0] sm:$0xff] }
 0x1c8   : > { %4989 = vpow2.f32 %v1065_v56  ;;  %v587_v55 = vld [vmem:[%s12149_s5 + $0x100] sm:$0xff]  ;;  %v588_v56 = vld [vmem:[%s12149_s5 + $0x108] sm:$0xff]  ;;  %v586_v58 = vld [vmem:[%s12149_s5 + $0xf8] sm:$0xff] }
 0x1c9   : > { %4991 = vpow2.f32 %v1067_v9  ;;  %v577_v1 = vld [vmem:[%s12149_s5 + $0xb0] sm:$0xff]  ;;  %v578_v9 = vld [vmem:[%s12149_s5 + $0xb8] sm:$0xff]  ;;  %v591_v31 = vld [vmem:[%s12149_s5 + $0x120] sm:$0xff] }
 0x1ca   : > { %4993 = vpow2.f32 %v1069_v63  ;;  %v576_v63 = vld [vmem:[%s12149_s5 + $0xa8] sm:$0xff]  ;;  %v589_v29 = vld [vmem:[%s12149_s5 + $0x110] sm:$0xff] }
 0x1cb   : > { %v7153_v49 = vpop.eup %4983  ;;  %4995 = vpow2.f32 %v1071_v0  ;;  %v568_v0 = vld [vmem:[%s12149_s5 + $0x68] sm:$0xff] }
 0x1cc   : > { %v7158_v61 = vpop.eup %4985  ;;  %1095 = vmatmul.f32.vlgmr.msrb.gmra.mxu3 %v7153_v49  ;;  %4997 = vpow2.f32 %v1073_v15 }
 0x1cd   : > { %v7164_v2 = vpop.eup %4987  ;;  %1115 = vmatmul.f32.vlgmr.msrb.gmra.mxu0 %v7158_v61  ;;  %1239 = vmatpush.msrb.mxu3 %v538_v59  ;;  %4999 = vpow2.f32 %v1075_v34  ;;  %v575_v59 = vld [vmem:[%s12149_s5 + $0xa0] sm:$0xff] }
 0x1ce   : > { %v7171_v6 = vpop.eup %4989  ;;  %1135 = vmatmul.f32.vlgmr.msrb.gmra.mxu1 %v7164_v2  ;;  %1259 = vmatpush.msrb.mxu0 %v554_v50  ;;  %5001 = vpow2.f32 %v1077_v35  ;;  %v567_v50 = vld [vmem:[%s12149_s5 + $0x60] sm:$0xff]  ;;  %v584_v35 = vld [vmem:[%s12149_s5 + $0xe8] sm:$0xff] }
 0x1cf   : > { %1155 = vmatmul.f32.vlgmr.msra.gmra.mxu2 %v7171_v6  ;;  %1240 = vmatpush.msrb.mxu3 %v537_v4  ;;  %v7191_v13 = vpop.eup %4991 }
 0x1d0   : > { %1260 = vmatpush.msrb.mxu0 %v553_v3  ;;  %v7196_v16 = vpop.eup %4993  ;;  %1350 = vmatpush.msrb.mxu1 %v597_v46  ;;  %v560_v46 = vld [vmem:[%s12149_s5 + $0x28] sm:$0xff] }
 0x1d1   : > { %1241 = vmatpush.msrb.mxu3 %v536_v7  ;;  %v7202_v18 = vpop.eup %4995  ;;  %1370 = vmatpush.msra.mxu2 %v598_v47 }
 0x1d2   : > { %1261 = vmatpush.msrb.mxu0 %v552_v8  ;;  %v7208_v20 = vpop.eup %4997  ;;  %1351 = vmatpush.msrb.mxu1 %v587_v55 }
 0x1d3   : > { %1242 = vmatpush.msrb.mxu3 %v535_v10  ;;  %v7276_v43 = vpop.eup %4999  ;;  %1371 = vmatpush.msra.mxu2 %v588_v56 }
 0x1d4   : > { %1262 = vmatpush.msrb.mxu0 %v551_v11  ;;  %1175 = vmatmul.f32.vlgmr.msra.gmra.mxu3 %v7191_v13  ;;  %v7278_v44 = vpop.eup %5001 }
 0x1d5   : > { %1195 = vmatmul.f32.vlgmr.msra.gmra.mxu0 %v7196_v16  ;;  %1243 = vmatpush.msrb.mxu3 %v534_v12  ;;  %v565_v12 = vld [vmem:[%s12149_s5 + $0x50] sm:$0xff] }
 0x1d6   : > { %1215 = vmatmul.f32.vlgmr.msra.gmra.mxu1 %v7202_v18  ;;  %1263 = vmatpush.msrb.mxu0 %v550_v14  ;;  %v566_v14 = vld [vmem:[%s12149_s5 + $0x58] sm:$0xff] }
 0x1d7   : > { %1235 = vmatmul.f32.vlgmr.msrb.gmra.mxu2 %v7208_v20  ;;  %1244 = vmatpush.msrb.mxu3 %v533_v17  ;;  %v557_v17 = vld [vmem:[%s12149_s5 + $0x10] sm:$0xff] }
 0x1d8   : > { %1264 = vmatpush.msrb.mxu0 %v549_v19  ;;  %1352 = vmatpush.msrb.mxu1 %v577_v1  ;;  %v558_v19 = vld [vmem:[%s12149_s5 + $0x18] sm:$0xff]  ;;  %v1035_v1 = vpop.permute.xlu1 %1034 }
 0x1d9   : > { %1245 = vmatpush.msrb.mxu3 %v532_v21  ;;  %1372 = vmatpush.msra.mxu2 %v578_v9  ;;  %v555_v21 = vld [vmem:[%s12149_s5] sm:$0xff] }
 0x1da   : > { %1265 = vmatpush.msrb.mxu0 %v548_v22  ;;  %1353 = vmatpush.msrb.mxu1 %v567_v50  ;;  %v556_v22 = vld [vmem:[%s12149_s5 + $0x8] sm:$0xff]  ;;  %v5093_v50 = vld [vmem:[#allocation2] sm:$0xff] }
 0x1db   : > { %1246 = vmatpush.msrb.mxu3 %v531_v23  ;;  %1373 = vmatpush.msra.mxu2 %v568_v0  ;;  %v1037_v0 = vsel %vm778_vm1, %v5093_v50, %v1035_v1  ;;  %v610_v1 = vld [vmem:[%s12150_s6 + $0x28] sm:$0xff]  ;;  %v609_v50 = vld [vmem:[%s12150_s6 + $0x20] sm:$0xff] }
 0x1dc   : > { %1266 = vmatpush.msrb.mxu0 %v547_v24  ;;  %1354 = vmatpush.msrb.mxu1 %v557_v17  ;;  %v599_v24 = vld [vmem:[%s12149_s5 + $0x160] sm:$0xff]  ;;  %v619_v17 = vld [vmem:[%s12150_s6 + $0x70] sm:$0xff] }
 0x1dd   : > { %1247 = vmatpush.msrb.mxu3 %v530_v25  ;;  %1374 = vmatpush.msra.mxu2 %v558_v19  ;;  %v600_v25 = vld [vmem:[%s12149_s5 + $0x168] sm:$0xff]  ;;  %v667_v19 = vld [vmem:[%s12150_s6 + $0x1f0] sm:$0xff] }
 0x1de   : > { %1267 = vmatpush.msrb.mxu0 %v546_v26  ;;  %v601_v26 = vld [vmem:[%s12149_s5 + $0x170] sm:$0xff]  ;;  %1390 = vmatpush.msra.mxu1 %v599_v24  ;;  %v666_v24 = vld [vmem:[%s12150_s6 + $0x1e8] sm:$0xff] }
 0x1df   : > { %1248 = vmatpush.msrb.mxu3 %v529_v27  ;;  %1410 = vmatpush.msrb.mxu2 %v600_v25  ;;  %v572_v25 = vld [vmem:[%s12149_s5 + $0x88] sm:$0xff] }
 0x1e0   : > { %1268 = vmatpush.msrb.mxu0 %v545_v28  ;;  %v604_v28 = vld [vmem:[%s12149_s5 + $0x188] sm:$0xff]  ;;  %1391 = vmatpush.msra.mxu1 %v589_v29  ;;  %v562_v29 = vld [vmem:[%s12149_s5 + $0x38] sm:$0xff] }
 0x1e1   : > { %1249 = vmatpush.msrb.mxu3 %v528_v30  ;;  %v590_v30 = vld [vmem:[%s12149_s5 + $0x118] sm:$0xff] }
 0x1e2   : > { %1269 = vmatpush.msrb.mxu0 %v544_v32  ;;  %v594_v32 = vld [vmem:[%s12149_s5 + $0x138] sm:$0xff]  ;;  %1411 = vmatpush.msrb.mxu2 %v590_v30  ;;  %v563_v30 = vld [vmem:[%s12149_s5 + $0x40] sm:$0xff] }
 0x1e3   : > { %1250 = vmatpush.msrb.mxu3 %v527_v33  ;;  %v579_v33 = vld [vmem:[%s12149_s5 + $0xc0] sm:$0xff] }
 0x1e4   : > { %1270 = vmatpush.msrb.mxu0 %v543_v62  ;;  %v580_v62 = vld [vmem:[%s12149_s5 + $0xc8] sm:$0xff]  ;;  %1392 = vmatpush.msra.mxu1 %v579_v33  ;;  %v652_v33 = vld [vmem:[%s12150_s6 + $0x178] sm:$0xff] }
 0x1e5   : > { %1251 = vmatpush.msrb.mxu3 %v526_v60  ;;  %v581_v60 = vld [vmem:[%s12149_s5 + $0xd0] sm:$0xff]  ;;  %1412 = vmatpush.msrb.mxu2 %v580_v62  ;;  %v664_v62 = vld [vmem:[%s12150_s6 + $0x1d8] sm:$0xff] }
 0x1e6   : > { %1271 = vmatpush.msrb.mxu0 %v542_v36 }
 0x1e7   : > { %1252 = vmatpush.msrb.mxu3 %v525_v37  ;;  %v569_v37 = vld [vmem:[%s12149_s5 + $0x70] sm:$0xff] }
 0x1e8   : > { %1272 = vmatpush.msrb.mxu0 %v541_v38  ;;  %v570_v38 = vld [vmem:[%s12149_s5 + $0x78] sm:$0xff]  ;;  %1393 = vmatpush.msra.mxu1 %v569_v37  ;;  %v634_v37 = vld [vmem:[%s12150_s6 + $0xe8] sm:$0xff] }
 0x1e9   : > { %1253 = vmatpush.msrb.mxu3 %v524_v39  ;;  %1413 = vmatpush.msrb.mxu2 %v570_v38  ;;  %v614_v38 = vld [vmem:[%s12150_s6 + $0x48] sm:$0xff] }
 0x1ea   : > { %1273 = vmatpush.msrb.mxu0 %v540_v40  ;;  %v571_v40 = vld [vmem:[%s12149_s5 + $0x80] sm:$0xff] }
 0x1eb   : > { %1254 = vmatpush.msrb.mxu3 %v523_v41  ;;  %v574_v41 = vld [vmem:[%s12149_s5 + $0x98] sm:$0xff]  ;;  %1414 = vmatpush.msrb.mxu2 %v560_v46  ;;  %v661_v46 = vld [vmem:[%s12150_s6 + $0x1c0] sm:$0xff] }
 0x1ec   : > { %1274 = vmatpush.msrb.mxu0 %v539_v42  ;;  %1255 = vmatmul.f32.vlgmr.msrb.gmra.mxu3 %v7276_v43 }
 0x1ed   : > { %1275 = vmatmul.f32.vlgmr.msrb.gmra.mxu0 %v7278_v44  ;;  %1330 = vmatpush.msra.mxu3 %v596_v54 }
 0x1ee   : > { %1310 = vmatpush.msra.mxu0 %v595_v48  ;;  %v561_v48 = vld [vmem:[%s12149_s5 + $0x30] sm:$0xff] }
 0x1ef   : > { %1331 = vmatpush.msra.mxu3 %v586_v58 }
 0x1f0   : > { %1311 = vmatpush.msra.mxu0 %v585_v53 }
 0x1f1   : > { %1332 = vmatpush.msra.mxu3 %v576_v63 }
 0x1f2   : > { %1312 = vmatpush.msra.mxu0 %v575_v59 }
 0x1f3   : > { %1333 = vmatpush.msra.mxu3 %v566_v14  ;;  %v593_v14 = vld [vmem:[%s12149_s5 + $0x130] sm:$0xff] }
 0x1f4   : > { %1313 = vmatpush.msra.mxu0 %v565_v12  ;;  %v592_v12 = vld [vmem:[%s12149_s5 + $0x128] sm:$0xff] }
 0x1f5   : > { %1334 = vmatpush.msra.mxu3 %v556_v22  ;;  %v583_v22 = vld [vmem:[%s12149_s5 + $0xe0] sm:$0xff] }
 0x1f6   : > { %1314 = vmatpush.msra.mxu0 %v555_v21  ;;  %v582_v21 = vld [vmem:[%s12149_s5 + $0xd8] sm:$0xff] }
 0x1f7   : > { %1430 = vmatpush.msrb.mxu3 %v601_v26  ;;  %v573_v26 = vld [vmem:[%s12149_s5 + $0x90] sm:$0xff] }
 0x1f8   : > { %1490 = vmatpush.msrb.mxu0 %v604_v28  ;;  %v665_v28 = vld [vmem:[%s12150_s6 + $0x1e0] sm:$0xff] }
 0x1f9   : > { %1431 = vmatpush.msrb.mxu3 %v591_v31  ;;  %v636_v31 = vld [vmem:[%s12150_s6 + $0xf8] sm:$0xff] }
 0x1fa   : > { %1491 = vmatpush.msrb.mxu0 %v594_v32  ;;  %v616_v32 = vld [vmem:[%s12150_s6 + $0x58] sm:$0xff] }
 0x1fb   : > { %1432 = vmatpush.msrb.mxu3 %v581_v60  ;;  %v615_v60 = vld [vmem:[%s12150_s6 + $0x50] sm:$0xff] }
 0x1fc   : > { %1492 = vmatpush.msrb.mxu0 %v584_v35  ;;  %v651_v35 = vld [vmem:[%s12150_s6 + $0x170] sm:$0xff] }
 0x1fd   : > { %1433 = vmatpush.msrb.mxu3 %v571_v40  ;;  %v662_v40 = vld [vmem:[%s12150_s6 + $0x1c8] sm:$0xff] }
 0x1fe   : > { %1493 = vmatpush.msrb.mxu0 %v574_v41  ;;  %v633_v41 = vld [vmem:[%s12150_s6 + $0xe0] sm:$0xff] }
 0x1ff   : > { %1434 = vmatpush.msrb.mxu3 %v561_v48  ;;  %v612_v48 = vld [vmem:[%s12150_s6 + $0x38] sm:$0xff] }
 0x24a   : > { %v1116_v52 = vpop.f32.mrf.mxu0 }
 0x24b   : > { %v1136_v4 = vpop.f32.mrf.mxu1 }
 0x24f   : > { %v1096_v45 = vpop.f32.mrf.mxu3 }
 0x250   : > { %v1117_v57 = vadd.f32 %v1116_v52, %v1096_v45  ;;  %v559_v45 = vld [vmem:[%s12149_s5 + $0x20] sm:$0xff]  ;;  %v564_v52 = vld [vmem:[%s12149_s5 + $0x48] sm:$0xff] }
 0x251   : > { %1394 = vmatpush.msra.mxu1 %v559_v45  ;;  %1494 = vmatpush.msrb.mxu0 %v564_v52  ;;  %v649_v45 = vld [vmem:[%s12150_s6 + $0x160] sm:$0xff]  ;;  %v648_v52 = vld [vmem:[%s12150_s6 + $0x158] sm:$0xff] }
 0x252   : > { %v1137_v15 = vadd.f32 %v1136_v4, %v1117_v57  ;;  %v1156_v3 = vpop.f32.mrf.mxu2  ;;  %v1196_v10 = vpop.f32.mrf.mxu0 }
 0x253   : > { %v1216_v23 = vpop.f32.mrf.mxu1 }
 0x254   : > { %v1157_v7 = vadd.f32 %v1156_v3, %v1137_v15 }
 0x257   : > { %v1176_v5 = vpop.f32.mrf.mxu3 }
 0x258   : > { %v1177_v8 = vadd.f32 %v1176_v5, %v1157_v7  ;;  %v602_v7 = vld [vmem:[%s12149_s5 + $0x178] sm:$0xff] }
 0x25a   : > { %v1197_v11 = vadd.f32 %v1196_v10, %v1177_v8  ;;  %v1236_v34 = vpop.f32.mrf.mxu2  ;;  %v603_v8 = vld [vmem:[%s12149_s5 + $0x180] sm:$0xff]  ;;  %v620_v10 = vld [vmem:[%s12150_s6 + $0x78] sm:$0xff] }
 0x25c   : > { %v1217_v27 = vadd.f32 %v1216_v23, %v1197_v11  ;;  %v668_v11 = vld [vmem:[%s12150_s6 + $0x1f8] sm:$0xff]  ;;  %v618_v23 = vld [vmem:[%s12150_s6 + $0x68] sm:$0xff] }
 0x25e   : > { %v1237_v36 = vadd.f32 %v1236_v34, %v1217_v27  ;;  %v617_v27 = vld [vmem:[%s12150_s6 + $0x60] sm:$0xff]  ;;  %v635_v34 = vld [vmem:[%s12150_s6 + $0xf0] sm:$0xff] }
 0x26a   : > { %v1276_v47 = vpop.f32.mrf.mxu0 }
 0x26f   : > { %v1256_v39 = vpop.f32.mrf.mxu3 }
 0x270   : > { %v1257_v42 = vadd.f32 %v1256_v39, %v1237_v36  ;;  %v663_v36 = vld [vmem:[%s12150_s6 + $0x1d0] sm:$0xff]  ;;  %v650_v39 = vld [vmem:[%s12150_s6 + $0x168] sm:$0xff] }
 0x272   : > { %v1277_v54 = vadd.f32 %v1276_v47, %v1257_v42  ;;  %v613_v42 = vld [vmem:[%s12150_s6 + $0x40] sm:$0xff]  ;;  %v632_v47 = vld [vmem:[%s12150_s6 + $0xd8] sm:$0xff] }
 0x274   : > { %v1279_v55 = vmax.f32 %v1277_v54, 1e-30  ;;  %v660_v54 = vld [vmem:[%s12150_s6 + $0x1b8] sm:$0xff] }
 0x276   : > { %5003 = vrcp.f32 %v1279_v55  ;;  %v1291_v58 = vand.u32 2147483648, %v1279_v55  ;;  %v1289_v59 = vand.u32 2147483647, %v1279_v55  ;;  %vm1285_vm8 = vweird.f32 %v1279_v55 }
 0x278   : > { %v1292_v4 = vor.u32 1.1754944e-38, %v1291_v58  ;;  %vm1290_vm10 = vcmp.eq.f32.partialorder %v1289_v59, 8.507059e+37  ;;  %v630_v58 = vld [vmem:[%s12150_s6 + $0xc8] sm:$0xff] }
 0x279   : > { %v658_v59 = vld [vmem:[%s12150_s6 + $0x1a8] sm:$0xff] }
 0x27c   : > { %v5004_v56 = vpop.eup %5003 }
 0x27d   : > { %v1281_v57 = vmul.f32 %v5004_v56, %v1279_v55  ;;  %vm1286_vm7 = vweird.f32 %v5004_v56  ;;  %v631_v55 = vld [vmem:[%s12150_s6 + $0xd0] sm:$0xff] }
 0x27e   : > { %vm1287_vm9 = vmor %vm1285_vm8, %vm1286_vm7 }
 0x27f   : > { %v1282_v53 = vsub.f32 1.0, %v1281_v57  ;;  %v647_v57 = vld [vmem:[%s12150_s6 + $0x150] sm:$0xff] }
 0x281   : > { %v1283_v9 = vmul.f32 %v5004_v56, %v1282_v53  ;;  %v659_v53 = vld [vmem:[%s12150_s6 + $0x1b0] sm:$0xff] }
 0x283   : > { %v1284_v63 = vadd.f32 %v5004_v56, %v1283_v9  ;;  %v646_v9 = vld [vmem:[%s12150_s6 + $0x148] sm:$0xff] }
 0x285   : > { %v1288_v15 = vsel %vm1287_vm9, %v5004_v56, %v1284_v63  ;;  %v611_v56 = vld [vmem:[%s12150_s6 + $0x30] sm:$0xff]  ;;  %v629_v63 = vld [vmem:[%s12150_s6 + $0xc0] sm:$0xff] }
 0x286   : > { %v1293_v3 = vsel %vm1290_vm10, %v1292_v4, %v1288_v15  ;;  %v657_v4 = vld [vmem:[%s12150_s6 + $0x1a0] sm:$0xff]  ;;  %v628_v15 = vld [vmem:[%s12150_s6 + $0xb8] sm:$0xff] }
 0x287   : > { %v7405_v5 = vmul.f32 %v1293_v3, %v1037_v0  ;;  %v645_v0 = vld [vmem:[%s12150_s6 + $0x140] sm:$0xff]  ;;  %v608_v3 = vld [vmem:[%s12150_s6 + $0x18] sm:$0xff] }
 0x289   : > { %4804 = vmatmul.msk.f32.vlgmr.msra.gmra.mxu0 %vm1295_vm11, %v7405_v5  ;;  %4805 = vmatmul.msk.f32.vlgmr.msra.gmra.mxu3 %vm1295_vm11, %v7405_v5 }
 0x28a   : > { %4806 = vmatmul.msk.f32.vlgmr.msrb.gmra.mxu1 %vm1295_vm11, %v7405_v5  ;;  %4807 = vmatmul.msk.f32.vlgmr.msra.gmra.mxu2 %vm1295_vm11, %v7405_v5 }
 0x28b   : > { %1450 = vmatpush.msrb.mxu1 %v602_v7  ;;  %1470 = vmatpush.msra.mxu2 %v603_v8  ;;  %v656_v7 = vld [vmem:[%s12150_s6 + $0x198] sm:$0xff]  ;;  %v627_v8 = vld [vmem:[%s12150_s6 + $0xb0] sm:$0xff] }
 0x28c   : > { %1509 = vmatpush.msra.mxu3 %v620_v10  ;;  %1569 = vmatpush.msra.mxu0 %v668_v11  ;;  %v607_v10 = vld [vmem:[%s12150_s6 + $0x10] sm:$0xff] }
 0x28d   : > { %1451 = vmatpush.msrb.mxu1 %v592_v12  ;;  %1471 = vmatpush.msra.mxu2 %v593_v14  ;;  %v643_v11 = vld [vmem:[%s12150_s6 + $0x130] sm:$0xff]  ;;  %v626_v14 = vld [vmem:[%s12150_s6 + $0xa8] sm:$0xff] }
 0x28e   : > { %1510 = vmatpush.msra.mxu3 %v619_v17  ;;  %1570 = vmatpush.msra.mxu0 %v667_v19  ;;  %v655_v12 = vld [vmem:[%s12150_s6 + $0x190] sm:$0xff]  ;;  %v606_v17 = vld [vmem:[%s12150_s6 + $0x8] sm:$0xff] }
 0x28f   : > { %1452 = vmatpush.msrb.mxu1 %v582_v21  ;;  %1472 = vmatpush.msra.mxu2 %v583_v22  ;;  %v642_v19 = vld [vmem:[%s12150_s6 + $0x128] sm:$0xff]  ;;  %v625_v22 = vld [vmem:[%s12150_s6 + $0xa0] sm:$0xff] }
 0x290   : > { %1511 = vmatpush.msra.mxu3 %v618_v23  ;;  %1571 = vmatpush.msra.mxu0 %v666_v24  ;;  %v654_v21 = vld [vmem:[%s12150_s6 + $0x188] sm:$0xff]  ;;  %v605_v23 = vld [vmem:[%s12150_s6] sm:$0xff]  ;;  %v684_v24 = vld [vmem:[%s12150_s6 + $0x278] sm:$0xff] }
 0x291   : > { %4810 = vmatmul.msk.f32.vlgmr.msrb.gmra.mxu3 %vm1295_vm11, %v7405_v5  ;;  %4813 = vmatmul.msk.f32.vlgmr.msrb.gmra.mxu0 %vm1295_vm11, %v7405_v5 }
 0x292   : > { %4808 = vmatmul.msk.f32.vlgmr.msra.gmra.mxu1 %vm1295_vm11, %v7405_v5  ;;  %4809 = vmatmul.msk.f32.vlgmr.msrb.gmra.mxu2 %vm1295_vm11, %v7405_v5 }
 0x293   : > { %1453 = vmatpush.msrb.mxu1 %v572_v25  ;;  %1473 = vmatpush.msra.mxu2 %v573_v26  ;;  %v641_v25 = vld [vmem:[%s12150_s6 + $0x120] sm:$0xff]  ;;  %v624_v26 = vld [vmem:[%s12150_s6 + $0x98] sm:$0xff] }
 0x294   : > { %1512 = vmatpush.msra.mxu3 %v617_v27  ;;  %1572 = vmatpush.msra.mxu0 %v665_v28  ;;  %v653_v27 = vld [vmem:[%s12150_s6 + $0x180] sm:$0xff]  ;;  %v683_v28 = vld [vmem:[%s12150_s6 + $0x270] sm:$0xff] }
 0x295   : > { %1454 = vmatpush.msrb.mxu1 %v562_v29  ;;  %1474 = vmatpush.msra.mxu2 %v563_v30  ;;  %v640_v29 = vld [vmem:[%s12150_s6 + $0x118] sm:$0xff]  ;;  %v623_v30 = vld [vmem:[%s12150_s6 + $0x90] sm:$0xff] }
 0x296   : > { %1513 = vmatpush.msra.mxu3 %v616_v32  ;;  %1573 = vmatpush.msra.mxu0 %v664_v62  ;;  %v682_v32 = vld [vmem:[%s12150_s6 + $0x268] sm:$0xff] }
 0x297   : > { %1529 = vmatpush.msra.mxu1 %v636_v31  ;;  %1549 = vmatpush.msrb.mxu2 %v652_v33  ;;  %v732_v31 = vld [vmem:[%s12150_s6 + $0x3f8] sm:$0xff]  ;;  %v639_v33 = vld [vmem:[%s12150_s6 + $0x110] sm:$0xff]  ;;  %v622_v62 = vld [vmem:[%s12150_s6 + $0x88] sm:$0xff] }
 0x298   : > { %1514 = vmatpush.msra.mxu3 %v615_v60  ;;  %1574 = vmatpush.msra.mxu0 %v663_v36  ;;  %v681_v60 = vld [vmem:[%s12150_s6 + $0x260] sm:$0xff] }
 0x299   : > { %1530 = vmatpush.msra.mxu1 %v635_v34  ;;  %1550 = vmatpush.msrb.mxu2 %v651_v35  ;;  %v731_v34 = vld [vmem:[%s12150_s6 + $0x3f0] sm:$0xff]  ;;  %v638_v35 = vld [vmem:[%s12150_s6 + $0x108] sm:$0xff]  ;;  %v621_v36 = vld [vmem:[%s12150_s6 + $0x80] sm:$0xff] }
 0x29a   : > { %4811 = vmatmul.msk.f32.vlgmr.msrb.gmra.mxu1 %vm1295_vm11, %v7405_v5  ;;  %4812 = vmatmul.msk.f32.vlgmr.msra.gmra.mxu2 %vm1295_vm11, %v7405_v5  ;;  %v644_v5 = vld [vmem:[%s12150_s6 + $0x138] sm:$0xff] }
 0x29b   : > { %1531 = vmatpush.msra.mxu1 %v634_v37  ;;  %1515 = vmatpush.msra.mxu3 %v614_v38  ;;  %v730_v37 = vld [vmem:[%s12150_s6 + $0x3e8] sm:$0xff]  ;;  %v700_v38 = vld [vmem:[%s12150_s6 + $0x2f8] sm:$0xff] }
 0x29c   : > { %1551 = vmatpush.msrb.mxu2 %v650_v39  ;;  %1575 = vmatpush.msra.mxu0 %v662_v40  ;;  %v680_v39 = vld [vmem:[%s12150_s6 + $0x258] sm:$0xff]  ;;  %v637_v40 = vld [vmem:[%s12150_s6 + $0x100] sm:$0xff] }
 0x29d   : > { %1532 = vmatpush.msra.mxu1 %v633_v41  ;;  %1516 = vmatpush.msra.mxu3 %v613_v42  ;;  %v729_v41 = vld [vmem:[%s12150_s6 + $0x3e0] sm:$0xff]  ;;  %v699_v42 = vld [vmem:[%s12150_s6 + $0x2f0] sm:$0xff] }
 0x29e   : > { %1552 = vmatpush.msrb.mxu2 %v649_v45  ;;  %1576 = vmatpush.msra.mxu0 %v661_v46  ;;  %v679_v45 = vld [vmem:[%s12150_s6 + $0x250] sm:$0xff]  ;;  %v716_v46 = vld [vmem:[%s12150_s6 + $0x378] sm:$0xff] }
 0x29f   : > { %1533 = vmatpush.msra.mxu1 %v632_v47  ;;  %1517 = vmatpush.msra.mxu3 %v612_v48  ;;  %v728_v47 = vld [vmem:[%s12150_s6 + $0x3d8] sm:$0xff]  ;;  %v698_v48 = vld [vmem:[%s12150_s6 + $0x2e8] sm:$0xff] }
 0x2a0   : > { %1553 = vmatpush.msrb.mxu2 %v648_v52  ;;  %1577 = vmatpush.msra.mxu0 %v660_v54  ;;  %v678_v52 = vld [vmem:[%s12150_s6 + $0x248] sm:$0xff]  ;;  %v715_v54 = vld [vmem:[%s12150_s6 + $0x370] sm:$0xff] }
 0x2a1   : > { %1534 = vmatpush.msra.mxu1 %v631_v55  ;;  %1518 = vmatpush.msra.mxu3 %v611_v56  ;;  %v727_v55 = vld [vmem:[%s12150_s6 + $0x3d0] sm:$0xff]  ;;  %v697_v56 = vld [vmem:[%s12150_s6 + $0x2e0] sm:$0xff] }
 0x2a2   : > { %1554 = vmatpush.msrb.mxu2 %v647_v57  ;;  %1578 = vmatpush.msra.mxu0 %v659_v53  ;;  %v677_v57 = vld [vmem:[%s12150_s6 + $0x240] sm:$0xff]  ;;  %v714_v53 = vld [vmem:[%s12150_s6 + $0x368] sm:$0xff] }
 0x2a3   : > { %1535 = vmatpush.msra.mxu1 %v630_v58  ;;  %1519 = vmatpush.msra.mxu3 %v610_v1  ;;  %v696_v58 = vld [vmem:[%s12150_s6 + $0x2d8] sm:$0xff] }
 0x2a4   : > { %1555 = vmatpush.msrb.mxu2 %v646_v9  ;;  %1579 = vmatpush.msra.mxu0 %v658_v59  ;;  %v676_v1 = vld [vmem:[%s12150_s6 + $0x238] sm:$0xff]  ;;  %v713_v9 = vld [vmem:[%s12150_s6 + $0x360] sm:$0xff]  ;;  %v695_v59 = vld [vmem:[%s12150_s6 + $0x2d0] sm:$0xff] }
 0x2a5   : > { %1536 = vmatpush.msra.mxu1 %v629_v63  ;;  %1520 = vmatpush.msra.mxu3 %v609_v50  ;;  %v675_v63 = vld [vmem:[%s12150_s6 + $0x230] sm:$0xff]  ;;  %v712_v50 = vld [vmem:[%s12150_s6 + $0x358] sm:$0xff] }
 0x2a6   : > { %1556 = vmatpush.msrb.mxu2 %v645_v0  ;;  %1580 = vmatpush.msra.mxu0 %v657_v4  ;;  %v694_v0 = vld [vmem:[%s12150_s6 + $0x2c8] sm:$0xff] }
 0x2a7   : > { %1537 = vmatpush.msra.mxu1 %v628_v15  ;;  %1521 = vmatpush.msra.mxu3 %v608_v3  ;;  %v674_v4 = vld [vmem:[%s12150_s6 + $0x228] sm:$0xff]  ;;  %v711_v15 = vld [vmem:[%s12150_s6 + $0x350] sm:$0xff]  ;;  %v693_v3 = vld [vmem:[%s12150_s6 + $0x2c0] sm:$0xff] }
 0x2a8   : > { %1557 = vmatpush.msrb.mxu2 %v644_v5  ;;  %1581 = vmatpush.msra.mxu0 %v656_v7  ;;  %v673_v5 = vld [vmem:[%s12150_s6 + $0x220] sm:$0xff]  ;;  %v710_v7 = vld [vmem:[%s12150_s6 + $0x348] sm:$0xff] }
 0x2a9   : > { %1538 = vmatpush.msra.mxu1 %v627_v8  ;;  %1522 = vmatpush.msra.mxu3 %v607_v10  ;;  %v692_v8 = vld [vmem:[%s12150_s6 + $0x2b8] sm:$0xff] }
 0x2aa   : > { %1558 = vmatpush.msrb.mxu2 %v643_v11  ;;  %1582 = vmatpush.msra.mxu0 %v655_v12  ;;  %v672_v10 = vld [vmem:[%s12150_s6 + $0x218] sm:$0xff]  ;;  %v691_v11 = vld [vmem:[%s12150_s6 + $0x2b0] sm:$0xff] }
 0x2ab   : > { %1539 = vmatpush.msra.mxu1 %v626_v14  ;;  %1523 = vmatpush.msra.mxu3 %v606_v17  ;;  %v671_v12 = vld [vmem:[%s12150_s6 + $0x210] sm:$0xff]  ;;  %v690_v14 = vld [vmem:[%s12150_s6 + $0x2a8] sm:$0xff] }
 0x2ac   : > { %1559 = vmatpush.msrb.mxu2 %v642_v19  ;;  %1583 = vmatpush.msra.mxu0 %v654_v21  ;;  %v670_v17 = vld [vmem:[%s12150_s6 + $0x208] sm:$0xff]  ;;  %v689_v19 = vld [vmem:[%s12150_s6 + $0x2a0] sm:$0xff] }
 0x2ad   : > { %1540 = vmatpush.msra.mxu1 %v625_v22  ;;  %1524 = vmatpush.msra.mxu3 %v605_v23  ;;  %v709_v21 = vld [vmem:[%s12150_s6 + $0x340] sm:$0xff]  ;;  %v726_v22 = vld [vmem:[%s12150_s6 + $0x3c8] sm:$0xff] }
 0x2ae   : > { %1560 = vmatpush.msrb.mxu2 %v641_v25  ;;  %1584 = vmatpush.msra.mxu0 %v653_v27  ;;  %v669_v23 = vld [vmem:[%s12150_s6 + $0x200] sm:$0xff]  ;;  %v708_v25 = vld [vmem:[%s12150_s6 + $0x338] sm:$0xff]  ;;  %v687_v27 = vld [vmem:[%s12150_s6 + $0x290] sm:$0xff] }
 0x2af   : > { %1589 = vmatpush.msrb.mxu3 %v684_v24  ;;  %1541 = vmatpush.msra.mxu1 %v624_v26  ;;  %v688_v24 = vld [vmem:[%s12150_s6 + $0x298] sm:$0xff]  ;;  %v725_v26 = vld [vmem:[%s12150_s6 + $0x3c0] sm:$0xff] }
 0x2b0   : > { %1561 = vmatpush.msrb.mxu2 %v640_v29  ;;  %1649 = vmatpush.msrb.mxu0 %v732_v31  ;;  %v724_v29 = vld [vmem:[%s12150_s6 + $0x3b8] sm:$0xff]  ;;  %v706_v31 = vld [vmem:[%s12150_s6 + $0x328] sm:$0xff] }
 0x2b1   : > { %1590 = vmatpush.msrb.mxu3 %v683_v28  ;;  %1542 = vmatpush.msra.mxu1 %v623_v30  ;;  %v707_v28 = vld [vmem:[%s12150_s6 + $0x330] sm:$0xff]  ;;  %v686_v30 = vld [vmem:[%s12150_s6 + $0x288] sm:$0xff] }
 0x2b2   : > { %1562 = vmatpush.msrb.mxu2 %v639_v33  ;;  %1650 = vmatpush.msrb.mxu0 %v731_v34  ;;  %v685_v33 = vld [vmem:[%s12150_s6 + $0x280] sm:$0xff]  ;;  %v722_v34 = vld [vmem:[%s12150_s6 + $0x3a8] sm:$0xff] }
 0x2b3   : > { %1591 = vmatpush.msrb.mxu3 %v682_v32  ;;  %1543 = vmatpush.msra.mxu1 %v622_v62  ;;  %v723_v32 = vld [vmem:[%s12150_s6 + $0x3b0] sm:$0xff]  ;;  %v705_v62 = vld [vmem:[%s12150_s6 + $0x320] sm:$0xff] }
 0x2b4   : > { %1563 = vmatpush.msrb.mxu2 %v638_v35  ;;  %1651 = vmatpush.msrb.mxu0 %v730_v37  ;;  %v721_v35 = vld [vmem:[%s12150_s6 + $0x3a0] sm:$0xff]  ;;  %v720_v37 = vld [vmem:[%s12150_s6 + $0x398] sm:$0xff] }
 0x2b5   : > { %1592 = vmatpush.msrb.mxu3 %v681_v60  ;;  %1544 = vmatpush.msra.mxu1 %v621_v36  ;;  %v704_v60 = vld [vmem:[%s12150_s6 + $0x318] sm:$0xff]  ;;  %v703_v36 = vld [vmem:[%s12150_s6 + $0x310] sm:$0xff] }
 0x2b6   : > { %1564 = vmatpush.msrb.mxu2 %v637_v40  ;;  %1652 = vmatpush.msrb.mxu0 %v729_v41  ;;  %v701_v40 = vld [vmem:[%s12150_s6 + $0x300] sm:$0xff]  ;;  %v718_v41 = vld [vmem:[%s12150_s6 + $0x388] sm:$0xff] }
 0x2b7   : > { %1609 = vmatpush.msrb.mxu1 %v700_v38  ;;  %1593 = vmatpush.msrb.mxu3 %v680_v39  ;;  %v702_v38 = vld [vmem:[%s12150_s6 + $0x308] sm:$0xff]  ;;  %v719_v39 = vld [vmem:[%s12150_s6 + $0x390] sm:$0xff] }
 0x2b8   : > { %1629 = vmatpush.msra.mxu2 %v716_v46  ;;  %1653 = vmatpush.msrb.mxu0 %v728_v47 }
 0x2b9   : > { %1610 = vmatpush.msrb.mxu1 %v699_v42  ;;  %1594 = vmatpush.msrb.mxu3 %v679_v45  ;;  %v717_v42 = vld [vmem:[%s12150_s6 + $0x380] sm:$0xff] }
 0x2ba   : > { %1630 = vmatpush.msra.mxu2 %v715_v54  ;;  %1654 = vmatpush.msrb.mxu0 %v727_v55  ;;  %v747_v54 = vld [vmem:[%s12150_s6 + $0x470] sm:$0xff]  ;;  %v746_v55 = vld [vmem:[%s12150_s6 + $0x468] sm:$0xff] }
 0x2bb   : > { %1611 = vmatpush.msrb.mxu1 %v698_v48  ;;  %1595 = vmatpush.msrb.mxu3 %v678_v52  ;;  %v748_v48 = vld [vmem:[%s12150_s6 + $0x478] sm:$0xff] }
 0x2bc   : > { %1631 = vmatpush.msra.mxu2 %v714_v53  ;;  %1655 = vmatpush.msrb.mxu0 %v726_v22  ;;  %v745_v53 = vld [vmem:[%s12150_s6 + $0x460] sm:$0xff]  ;;  %v759_v22 = vld [vmem:[%s12150_s6 + $0x4d0] sm:$0xff] }
 0x2bd   : > { %1612 = vmatpush.msrb.mxu1 %v697_v56  ;;  %1596 = vmatpush.msrb.mxu3 %v677_v57 }
 0x2be   : > { %1632 = vmatpush.msra.mxu2 %v713_v9  ;;  %1656 = vmatpush.msrb.mxu0 %v725_v26  ;;  %v764_v9 = vld [vmem:[%s12150_s6 + $0x4f8] sm:$0xff]  ;;  %v757_v26 = vld [vmem:[%s12150_s6 + $0x4c0] sm:$0xff] }
 0x2bf   : > { %1613 = vmatpush.msrb.mxu1 %v696_v58  ;;  %1597 = vmatpush.msrb.mxu3 %v676_v1  ;;  %v5095_v58 = vld [vmem:[%s12147_s3 + $0xb0] sm:$0xff] }
 0x2c0   : > { %1633 = vmatpush.msra.mxu2 %v712_v50  ;;  %1657 = vmatpush.msrb.mxu0 %v724_v29  ;;  %v763_v50 = vld [vmem:[%s12150_s6 + $0x4f0] sm:$0xff]  ;;  %v737_v29 = vld [vmem:[%s12150_s6 + $0x420] sm:$0xff] }
 0x2c1   : > { %1614 = vmatpush.msrb.mxu1 %v695_v59  ;;  %1598 = vmatpush.msrb.mxu3 %v675_v63 }
 0x2c2   : > { %1634 = vmatpush.msra.mxu2 %v711_v15  ;;  %1658 = vmatpush.msrb.mxu0 %v723_v32  ;;  %v5098_v15 = vld [vmem:[%s12147_s3] sm:$0xff]  ;;  %v5105_v32 = vld [vmem:[%s12147_s3 + $0x68] sm:$0xff] }
 0x2c3   : > { %1615 = vmatpush.msrb.mxu1 %v694_v0  ;;  %1599 = vmatpush.msrb.mxu3 %v674_v4  ;;  %v5097_v0 = vld [vmem:[%s12147_s3 + $0x110] sm:$0xff]  ;;  %v762_v4 = vld [vmem:[%s12150_s6 + $0x4e8] sm:$0xff] }
 0x2c4   : > { %1635 = vmatpush.msra.mxu2 %v710_v7  ;;  %1659 = vmatpush.msrb.mxu0 %v722_v34  ;;  %v761_v7 = vld [vmem:[%s12150_s6 + $0x4e0] sm:$0xff]  ;;  %v5106_v34 = vld [vmem:[%s12147_s3 + $0xc8] sm:$0xff] }
 0x2c5   : > { %1616 = vmatpush.msrb.mxu1 %v693_v3  ;;  %1600 = vmatpush.msrb.mxu3 %v673_v5  ;;  %v742_v5 = vld [vmem:[%s12150_s6 + $0x448] sm:$0xff] }
 0x2c6   : > { %1636 = vmatpush.msra.mxu2 %v709_v21  ;;  %1660 = vmatpush.msrb.mxu0 %v721_v35  ;;  %v735_v35 = vld [vmem:[%s12150_s6 + $0x410] sm:$0xff] }
 0x2c7   : > { %1617 = vmatpush.msrb.mxu1 %v692_v8  ;;  %1601 = vmatpush.msrb.mxu3 %v672_v10  ;;  %v5099_v8 = vld [vmem:[%s12147_s3 + $0xb8] sm:$0xff] }
 0x2c8   : > { %1637 = vmatpush.msra.mxu2 %v708_v25  ;;  %1661 = vmatpush.msrb.mxu0 %v720_v37  ;;  %v738_v25 = vld [vmem:[%s12150_s6 + $0x428] sm:$0xff]  ;;  %v5108_v37 = vld [vmem:[%s12147_s3 + $0x70] sm:$0xff] }
 0x2c9   : > { %1618 = vmatpush.msrb.mxu1 %v691_v11  ;;  %1602 = vmatpush.msrb.mxu3 %v671_v12 }
 0x2ca   : > { %1638 = vmatpush.msra.mxu2 %v707_v28  ;;  %1662 = vmatpush.msrb.mxu0 %v719_v39  ;;  %v5103_v28 = vld [vmem:[%s12147_s3 + $0xc0] sm:$0xff] }
 0x2cb   : > { %1619 = vmatpush.msrb.mxu1 %v690_v14  ;;  %1603 = vmatpush.msrb.mxu3 %v670_v17  ;;  %v741_v14 = vld [vmem:[%s12150_s6 + $0x440] sm:$0xff]  ;;  %v760_v17 = vld [vmem:[%s12150_s6 + $0x4d8] sm:$0xff] }
 0x2cc   : > { %1639 = vmatpush.msra.mxu2 %v706_v31  ;;  %1663 = vmatpush.msrb.mxu0 %v718_v41  ;;  %v5104_v31 = vld [vmem:[%s12147_s3 + $0x120] sm:$0xff] }
 0x2cd   : > { %1620 = vmatpush.msrb.mxu1 %v689_v19  ;;  %1604 = vmatpush.msrb.mxu3 %v669_v23  ;;  %v5100_v19 = vld [vmem:[%s12147_s3 + $0x60] sm:$0xff]  ;;  %v739_v23 = vld [vmem:[%s12150_s6 + $0x430] sm:$0xff] }
 0x2ce   : > { %1640 = vmatpush.msra.mxu2 %v705_v62  ;;  %1664 = vmatpush.msrb.mxu0 %v717_v42  ;;  %v755_v62 = vld [vmem:[%s12150_s6 + $0x4b0] sm:$0xff]  ;;  %v753_v39 = vld [vmem:[%s12150_s6 + $0x4a0] sm:$0xff] }
 0x2cf   : > { %1621 = vmatpush.msrb.mxu1 %v688_v24  ;;  %v5101_v24 = vld [vmem:[%s12147_s3 + $0x118] sm:$0xff]  ;;  %v733_v42 = vld [vmem:[%s12150_s6 + $0x400] sm:$0xff] }
 0x2d0   : > { %1641 = vmatpush.msra.mxu2 %v704_v60  ;;  %v5107_v60 = vld [vmem:[%s12147_s3 + $0x10] sm:$0xff] }
 0x2d1   : > { %1622 = vmatpush.msrb.mxu1 %v687_v27  ;;  %v5102_v27 = vld [vmem:[%s12147_s3 + $0x8] sm:$0xff] }
 0x2d2   : > { %1642 = vmatpush.msra.mxu2 %v703_v36  ;;  %v754_v36 = vld [vmem:[%s12150_s6 + $0x4a8] sm:$0xff] }
 0x2d3   : > { %1623 = vmatpush.msrb.mxu1 %v686_v30  ;;  %v756_v30 = vld [vmem:[%s12150_s6 + $0x4b8] sm:$0xff] }
 0x2d4   : > { %1643 = vmatpush.msra.mxu2 %v702_v38  ;;  %v734_v38 = vld [vmem:[%s12150_s6 + $0x408] sm:$0xff] }
 0x2d5   : > { %1624 = vmatpush.msrb.mxu1 %v685_v33  ;;  %v736_v33 = vld [vmem:[%s12150_s6 + $0x418] sm:$0xff] }
 0x2d6   : > { %1644 = vmatpush.msra.mxu2 %v701_v40  ;;  %v5109_v40 = vld [vmem:[%s12147_s3 + $0x18] sm:$0xff] }
 0x306   : > { %v1316_v45 = vpop.f32.mrf.mxu0 }
 0x307   : > { %v1499_v46 = vmul.f32 %v7153_v49, %v1316_v45  ;;  %v1356_v47 = vpop.f32.mrf.mxu1  ;;  %v5094_v49 = vld [vmem:[%s12147_s3 + $0x108] sm:$0xff]  ;;  %v752_v45 = vld [vmem:[%s12150_s6 + $0x498] sm:$0xff] }
 0x308   : > { %v1501_v52 = vmul.f32 %v7164_v2, %v1356_v47  ;;  %v751_v47 = vld [vmem:[%s12150_s6 + $0x490] sm:$0xff] }
 0x309   : > { %1525 = vmatmul.f32.vlgmr.msra.gmra.mxu3 %v1499_v46 }
 0x30a   : > { %1565 = vmatmul.f32.vlgmr.msrb.gmra.mxu2 %v1501_v52  ;;  %1669 = vmatpush.msra.mxu3 %v748_v48  ;;  %v750_v48 = vld [vmem:[%s12150_s6 + $0x488] sm:$0xff] }
 0x30b   : > { %1781 = vmatpush.msrb.mxu2 %v5094_v49 }
 0x30c   : > { %1670 = vmatpush.msra.mxu3 %v747_v54  ;;  %v1336_v56 = vpop.f32.mrf.mxu3  ;;  %v5110_v54 = vld [vmem:[%s12147_s3 + $0x148] sm:$0xff] }
 0x30d   : > { %v1500_v2 = vmul.f32 %v7158_v61, %v1336_v56  ;;  %v1376_v57 = vpop.f32.mrf.mxu2  ;;  %1782 = vmatpush.msrb.mxu2 %v5095_v58  ;;  %v5096_v61 = vld [vmem:[%s12147_s3 + $0x58] sm:$0xff]  ;;  %v5117_v58 = vld [vmem:[%s12148_s4 + $0xf0] sm:$0xff] }
 0x30e   : > { %v1502_v1 = vmul.f32 %v7171_v6, %v1376_v57  ;;  %1671 = vmatpush.msra.mxu3 %v746_v55  ;;  %v744_v6 = vld [vmem:[%s12150_s6 + $0x458] sm:$0xff]  ;;  %v1496_v52 = vpop.f32.mrf.mxu0  ;;  %v5111_v55 = vld [vmem:[%s12147_s3 + $0xf0] sm:$0xff]  ;;  %v5114_v57 = vld [vmem:[%s12147_s3 + $0x40] sm:$0xff] }
 0x30f   : > { %v1396_v59 = vpop.f32.mrf.mxu1  ;;  %1545 = vmatmul.f32.vlgmr.msra.gmra.mxu1 %v1500_v2  ;;  %1783 = vmatpush.msrb.mxu2 %v5096_v61  ;;  %v1508_v49 = vmul.f32 %v7278_v44, %v1496_v52  ;;  %v5112_v56 = vld [vmem:[%s12147_s3 + $0x98] sm:$0xff]  ;;  %v5113_v2 = vld [vmem:[%s12147_s3 + $0x150] sm:$0xff]  ;;  %v5121_v61 = vld [vmem:[%s12148_s4 + $0xe0] sm:$0xff] }
 0x310   : > { %v1503_v63 = vmul.f32 %v7191_v13, %v1396_v59  ;;  %1585 = vmatmul.f32.vlgmr.msra.gmra.mxu0 %v1502_v1  ;;  %1672 = vmatpush.msra.mxu3 %v745_v53  ;;  %v743_v13 = vld [vmem:[%s12150_s6 + $0x450] sm:$0xff]  ;;  %v5115_v44 = vld [vmem:[%s12148_s4 + $0xf8] sm:$0xff]  ;;  %v5118_v1 = vld [vmem:[%s12147_s3 + $0xa0] sm:$0xff] }
 0x311   : > { %1689 = vmatpush.msra.mxu1 %v764_v9  ;;  %1801 = vmatpush.msra.mxu0 %v5097_v0  ;;  %v5116_v53 = vld [vmem:[%s12147_s3 + $0xf8] sm:$0xff]  ;;  %v5119_v9 = vld [vmem:[%s12148_s4 + $0xe8] sm:$0xff]  ;;  %v5125_v0 = vld [vmem:[%s12148_s4 + $0xd0] sm:$0xff] }
 0x312   : > { %1605 = vmatmul.f32.vlgmr.msrb.gmra.mxu3 %v1503_v63  ;;  %1784 = vmatpush.msrb.mxu2 %v5098_v15  ;;  %v5120_v59 = vld [vmem:[%s12147_s3 + $0x48] sm:$0xff]  ;;  %v5122_v63 = vld [vmem:[%s12148_s4 + $0x178] sm:$0xff]  ;;  %v5128_v15 = vld [vmem:[%s12148_s4 + $0x160] sm:$0xff] }
 0x313   : > { %1673 = vmatpush.msra.mxu3 %v744_v6  ;;  %1690 = vmatpush.msra.mxu1 %v763_v50  ;;  %v5123_v6 = vld [vmem:[%s12148_s4 + $0xd8] sm:$0xff]  ;;  %v5124_v50 = vld [vmem:[%s12148_s4 + $0x170] sm:$0xff] }
 0x314   : > { %v1436_v3 = vpop.f32.mrf.mxu3  ;;  %1802 = vmatpush.msra.mxu0 %v5099_v8  ;;  %v5132_v8 = vld [vmem:[%s12148_s4 + $0x150] sm:$0xff] }
 0x315   : > { %1674 = vmatpush.msra.mxu3 %v743_v13  ;;  %1691 = vmatpush.msra.mxu1 %v762_v4  ;;  %v1416_v10 = vpop.f32.mrf.mxu2  ;;  %v1505_v11 = vmul.f32 %v7202_v18, %v1436_v3  ;;  %v5126_v13 = vld [vmem:[%s12148_s4 + $0x168] sm:$0xff]  ;;  %v5129_v3 = vld [vmem:[%s12148_s4 + $0xc0] sm:$0xff] }
 0x316   : > { %v1504_v12 = vmul.f32 %v7196_v16, %v1416_v10  ;;  %1803 = vmatpush.msra.mxu0 %v5100_v19  ;;  %v740_v16 = vld [vmem:[%s12150_s6 + $0x438] sm:$0xff]  ;;  %v5127_v4 = vld [vmem:[%s12148_s4 + $0xc8] sm:$0xff]  ;;  %v5133_v10 = vld [vmem:[%s12148_s4 + $0xb0] sm:$0xff] }
 0x317   : > { %1675 = vmatpush.msra.mxu3 %v742_v5  ;;  %1692 = vmatpush.msra.mxu1 %v761_v7  ;;  %v1456_v21 = vpop.f32.mrf.mxu1  ;;  %v5130_v5 = vld [vmem:[%s12148_s4 + $0x158] sm:$0xff] }
 0x318   : > { %v1506_v18 = vmul.f32 %v7208_v20, %v1456_v21  ;;  %1625 = vmatmul.f32.vlgmr.msrb.gmra.mxu1 %v1504_v12  ;;  %1645 = vmatmul.f32.vlgmr.msra.gmra.mxu2 %v1505_v11  ;;  %v758_v20 = vld [vmem:[%s12150_s6 + $0x4c8] sm:$0xff]  ;;  %v5131_v7 = vld [vmem:[%s12148_s4 + $0xb8] sm:$0xff] }
 0x319   : > { %1676 = vmatpush.msra.mxu3 %v741_v14  ;;  %1693 = vmatpush.msra.mxu1 %v760_v17  ;;  %v5134_v11 = vld [vmem:[%s12148_s4 + $0x148] sm:$0xff]  ;;  %v5136_v14 = vld [vmem:[%s12148_s4 + $0x140] sm:$0xff]  ;;  %v5138_v19 = vld [vmem:[%s12148_s4 + $0x138] sm:$0xff] }
 0x31a   : > { %1665 = vmatmul.f32.vlgmr.msrb.gmra.mxu0 %v1506_v18  ;;  %1821 = vmatpush.msra.mxu2 %v5101_v24  ;;  %v5135_v12 = vld [vmem:[%s12148_s4 + $0xa8] sm:$0xff]  ;;  %v5137_v17 = vld [vmem:[%s12148_s4 + $0xa0] sm:$0xff]  ;;  %v5139_v21 = vld [vmem:[%s12148_s4 + $0x98] sm:$0xff] }
 0x31b   : > { %1677 = vmatpush.msra.mxu3 %v740_v16  ;;  %1694 = vmatpush.msra.mxu1 %v759_v22  ;;  %v5140_v18 = vld [vmem:[%s12148_s4 + $0x130] sm:$0xff]  ;;  %v5142_v22 = vld [vmem:[%s12148_s4 + $0x128] sm:$0xff]  ;;  %v5145_v24 = vld [vmem:[%s12148_s4 + $0x80] sm:$0xff] }
 0x31c   : > { %1804 = vmatpush.msra.mxu0 %v5102_v27  ;;  %1822 = vmatpush.msra.mxu2 %v5103_v28  ;;  %v5141_v16 = vld [vmem:[%s12148_s4 + $0x90] sm:$0xff]  ;;  %v5148_v27 = vld [vmem:[%s12148_s4 + $0x108] sm:$0xff]  ;;  %v5149_v28 = vld [vmem:[%s12148_s4 + $0x100] sm:$0xff] }
 0x31d   : > { %1678 = vmatpush.msra.mxu3 %v739_v23  ;;  %1695 = vmatpush.msra.mxu1 %v758_v20  ;;  %v1476_v41 = vpop.f32.mrf.mxu2  ;;  %v5143_v23 = vld [vmem:[%s12148_s4 + $0x88] sm:$0xff]  ;;  %v5144_v20 = vld [vmem:[%s12148_s4 + $0x120] sm:$0xff] }
 0x31e   : > { %1841 = vmatpush.msrb.mxu0 %v5104_v31  ;;  %1823 = vmatpush.msra.mxu2 %v5105_v32  ;;  %v1507_v46 = vmul.f32 %v7276_v43, %v1476_v41  ;;  %v749_v43 = vld [vmem:[%s12150_s6 + $0x480] sm:$0xff] }
 0x31f   : > { %1679 = vmatpush.msra.mxu3 %v738_v25  ;;  %1696 = vmatpush.msra.mxu1 %v757_v26  ;;  %v5146_v25 = vld [vmem:[%s12148_s4 + $0x118] sm:$0xff]  ;;  %v5147_v26 = vld [vmem:[%s12148_s4 + $0x110] sm:$0xff] }
 0x320   : > { %1842 = vmatpush.msrb.mxu0 %v5106_v34  ;;  %1824 = vmatpush.msra.mxu2 %v5107_v60 }
 0x321   : > { %1680 = vmatpush.msra.mxu3 %v737_v29  ;;  %1697 = vmatpush.msra.mxu1 %v756_v30  ;;  %v776_v29 = vld [vmem:[%s6541_s10 + $0x50] sm:$0xff] }
 0x322   : > { %1843 = vmatpush.msrb.mxu0 %v5108_v37  ;;  %v1032_v30 = vadd.f32 %v7291_v51, %v776_v29  ;;  %v5164_v29 = vld [vmem:[%s12147_s3 + $0x138] sm:$0xff] }
 0x323   : > { %1681 = vmatpush.msra.mxu3 %v736_v33  ;;  %1698 = vmatpush.msra.mxu1 %v755_v62 }
 0x324   : > { %1844 = vmatpush.msrb.mxu0 %v5109_v40  ;;  %v4814_v31 = vmul.f32 -1.442695, %v1032_v30  ;;  %v5165_v30 = vld [vmem:[%s12147_s3 + $0x140] sm:$0xff] }
 0x325   : > { %1682 = vmatpush.msra.mxu3 %v735_v35  ;;  %1699 = vmatpush.msra.mxu1 %v754_v36 }
 0x326   : > { %5005 = vpow2.f32 %v4814_v31  ;;  %v5166_v31 = vld [vmem:[%s12148_s4 + $0x2e0] sm:$0xff] }
 0x327   : > { %1683 = vmatpush.msra.mxu3 %v734_v38  ;;  %1700 = vmatpush.msra.mxu1 %v753_v39 }
 0x329   : > { %1684 = vmatpush.msra.mxu3 %v733_v42  ;;  %1701 = vmatpush.msra.mxu1 %v752_v45 }
 0x32a   : > { %1685 = vmatmul.f32.vlgmr.msra.gmra.mxu3 %v1507_v46 }
 0x32b   : > { %1702 = vmatpush.msra.mxu1 %v751_v47  ;;  %1941 = vmatpush.msrb.mxu3 %v5110_v54 }
 0x32c   : > { %v5006_v32 = vpop.eup %5005 }
 0x32d   : > { %1703 = vmatpush.msra.mxu1 %v750_v48  ;;  %1942 = vmatpush.msrb.mxu3 %v5111_v55  ;;  %v1712_v33 = vadd.f32 1.0, %v5006_v32  ;;  %v5167_v32 = vld [vmem:[%s12148_s4 + $0x360] sm:$0xff] }
 0x32f   : > { %1704 = vmatpush.msra.mxu1 %v749_v43  ;;  %1943 = vmatpush.msrb.mxu3 %v5112_v56  ;;  %5007 = vrcp.f32 %v1712_v33  ;;  %v1724_v55 = vand.u32 2147483648, %v1712_v33  ;;  %vm1718_vm13 = vweird.f32 %v1712_v33  ;;  %v1722_v56 = vand.u32 2147483647, %v1712_v33 }
 0x330   : > { %1705 = vmatmul.f32.vlgmr.msra.gmra.mxu1 %v1508_v49 }
 0x331   : > { %1961 = vmatpush.msrb.mxu1 %v5113_v2  ;;  %1944 = vmatpush.msrb.mxu3 %v5114_v57  ;;  %vm1723_vm15 = vcmp.eq.f32.partialorder %v1722_v56, 8.507059e+37  ;;  %v5190_v56 = vld [vmem:[%s12147_s3 + $0x50] sm:$0xff] }
 0x333   : > { %2066 = vmatpush.msra.mxu3 %v5115_v44  ;;  %1962 = vmatpush.msrb.mxu1 %v5116_v53 }
 0x335   : > { %2067 = vmatpush.msra.mxu3 %v5117_v58  ;;  %1963 = vmatpush.msrb.mxu1 %v5118_v1  ;;  %v5008_v35 = vpop.eup %5007  ;;  %v1725_v58 = vor.u32 1.1754944e-38, %v1724_v55  ;;  %v5188_v55 = vld [vmem:[%s12148_s4 + $0x2b8] sm:$0xff] }
 0x336   : > { %v1714_v38 = vmul.f32 %v5008_v35, %v1712_v33  ;;  %vm1719_vm12 = vweird.f32 %v5008_v35  ;;  %v5168_v33 = vld [vmem:[%s12147_s3 + $0xe0] sm:$0xff] }
 0x337   : > { %2068 = vmatpush.msra.mxu3 %v5119_v9  ;;  %1964 = vmatpush.msrb.mxu1 %v5120_v59  ;;  %vm1720_vm14 = vmor %vm1718_vm13, %vm1719_vm12 }
 0x338   : > { %v1715_v45 = vsub.f32 1.0, %v1714_v38  ;;  %v5175_v38 = vld [vmem:[%s12148_s4 + $0x350] sm:$0xff] }
 0x339   : > { %2069 = vmatpush.msra.mxu3 %v5121_v61  ;;  %2086 = vmatpush.msra.mxu1 %v5122_v63 }
 0x33a   : > { %v1716_v48 = vmul.f32 %v5008_v35, %v1715_v45  ;;  %v5180_v45 = vld [vmem:[%s12148_s4 + $0x2c8] sm:$0xff] }
 0x33b   : > { %2070 = vmatpush.msra.mxu3 %v5123_v6  ;;  %2087 = vmatpush.msra.mxu1 %v5124_v50 }
 0x33c   : > { %v1717_v54 = vadd.f32 %v5008_v35, %v1716_v48  ;;  %v5184_v48 = vld [vmem:[%s12148_s4 + $0x2c0] sm:$0xff] }
 0x33d   : > { %2071 = vmatpush.msra.mxu3 %v5125_v0  ;;  %2088 = vmatpush.msra.mxu1 %v5126_v13 }
 0x33e   : > { %v1721_v44 = vsel %vm1720_vm14, %v5008_v35, %v1717_v54  ;;  %v5172_v35 = vld [vmem:[%s12147_s3 + $0x88] sm:$0xff] }
 0x33f   : > { %2072 = vmatpush.msra.mxu3 %v5127_v4  ;;  %2089 = vmatpush.msra.mxu1 %v5128_v15  ;;  %v1726_v9 = vsel %vm1723_vm15, %v1725_v58, %v1721_v44  ;;  %v5186_v54 = vld [vmem:[%s12147_s3 + $0xa8] sm:$0xff]  ;;  %v5193_v44 = vld [vmem:[%s12148_s4 + $0x2b0] sm:$0xff] }
 0x340   : > { %v5195_v58 = vld [vmem:[%s12148_s4 + $0x330] sm:$0xff] }
 0x341   : > { %2073 = vmatpush.msra.mxu3 %v5129_v3  ;;  %2090 = vmatpush.msra.mxu1 %v5130_v5 }
 0x343   : > { %2074 = vmatpush.msra.mxu3 %v5131_v7  ;;  %2091 = vmatpush.msra.mxu1 %v5132_v8 }
 0x345   : > { %2075 = vmatpush.msra.mxu3 %v5133_v10  ;;  %2092 = vmatpush.msra.mxu1 %v5134_v11 }
 0x347   : > { %2076 = vmatpush.msra.mxu3 %v5135_v12  ;;  %2093 = vmatpush.msra.mxu1 %v5136_v14  ;;  %v5150_v14 = vld [vmem:[%s12147_s3 + $0x128] sm:$0xff] }
 0x349   : > { %2077 = vmatpush.msra.mxu3 %v5137_v17  ;;  %2094 = vmatpush.msra.mxu1 %v5138_v19  ;;  %v5151_v17 = vld [vmem:[%s12147_s3 + $0x130] sm:$0xff]  ;;  %v5152_v19 = vld [vmem:[%s12148_s4 + $0x2f8] sm:$0xff] }
 0x34b   : > { %2078 = vmatpush.msra.mxu3 %v5139_v21  ;;  %2095 = vmatpush.msra.mxu1 %v5140_v18  ;;  %v5153_v21 = vld [vmem:[%s12148_s4 + $0x378] sm:$0xff]  ;;  %v5154_v18 = vld [vmem:[%s12147_s3 + $0xd0] sm:$0xff] }
 0x34d   : > { %2079 = vmatpush.msra.mxu3 %v5141_v16  ;;  %2096 = vmatpush.msra.mxu1 %v5142_v22  ;;  %v5155_v16 = vld [vmem:[%s12147_s3 + $0xd8] sm:$0xff]  ;;  %v5156_v22 = vld [vmem:[%s12148_s4 + $0x2f0] sm:$0xff] }
 0x34f   : > { %2080 = vmatpush.msra.mxu3 %v5143_v23  ;;  %2097 = vmatpush.msra.mxu1 %v5144_v20  ;;  %v5157_v23 = vld [vmem:[%s12148_s4 + $0x370] sm:$0xff]  ;;  %v5158_v20 = vld [vmem:[%s12147_s3 + $0x78] sm:$0xff] }
 0x351   : > { %2081 = vmatpush.msra.mxu3 %v5145_v24  ;;  %2098 = vmatpush.msra.mxu1 %v5146_v25  ;;  %v5159_v24 = vld [vmem:[%s12147_s3 + $0x80] sm:$0xff]  ;;  %v5160_v25 = vld [vmem:[%s12148_s4 + $0x2e8] sm:$0xff] }
 0x353   : > { %2099 = vmatpush.msra.mxu1 %v5147_v26  ;;  %v5161_v26 = vld [vmem:[%s12148_s4 + $0x368] sm:$0xff] }
 0x355   : > { %2100 = vmatpush.msra.mxu1 %v5148_v27  ;;  %v5162_v27 = vld [vmem:[%s12147_s3 + $0x20] sm:$0xff] }
 0x357   : > { %2101 = vmatpush.msra.mxu1 %v5149_v28  ;;  %v5163_v28 = vld [vmem:[%s12147_s3 + $0x28] sm:$0xff] }
 0x38c   : > { %v1526_v62 = vpop.f32.mrf.mxu3  ;;  %v1546_v34 = vpop.f32.mrf.mxu1 }
 0x38d   : > { %v1547_v60 = vadd.f32 %v1546_v34, %v1526_v62  ;;  %v1566_v36 = vpop.f32.mrf.mxu2  ;;  %v1586_v39 = vpop.f32.mrf.mxu0  ;;  %v5169_v62 = vld [vmem:[%s12147_s3 + $0xe8] sm:$0xff]  ;;  %v5170_v34 = vld [vmem:[%s12148_s4 + $0x2d8] sm:$0xff] }
 0x38f   : > { %v1567_v37 = vadd.f32 %v1566_v36, %v1547_v60  ;;  %v5171_v60 = vld [vmem:[%s12148_s4 + $0x358] sm:$0xff]  ;;  %v5173_v36 = vld [vmem:[%s12147_s3 + $0x90] sm:$0xff] }
 0x391   : > { %v1587_v41 = vadd.f32 %v1586_v39, %v1567_v37  ;;  %v5174_v37 = vld [vmem:[%s12148_s4 + $0x2d0] sm:$0xff] }
 0x392   : > { %v5176_v39 = vld [vmem:[%s12147_s3 + $0x30] sm:$0xff] }
 0x395   : > { %v1606_v40 = vpop.f32.mrf.mxu3  ;;  %v1626_v46 = vpop.f32.mrf.mxu1 }
 0x396   : > { %v1607_v42 = vadd.f32 %v1606_v40, %v1587_v41  ;;  %v5177_v40 = vld [vmem:[%s12147_s3 + $0x38] sm:$0xff] }
 0x397   : > { %v1666_v43 = vpop.f32.mrf.mxu0  ;;  %v5178_v41 = vld [vmem:[%s12147_s3 + $0x158] sm:$0xff] }
 0x398   : > { %v1627_v51 = vadd.f32 %v1626_v46, %v1607_v42  ;;  %v5179_v42 = vld [vmem:[%s12148_s4 + $0x78] sm:$0xff]  ;;  %v5181_v46 = vld [vmem:[%s12148_s4 + $0x348] sm:$0xff] }
 0x39b   : > { %v1646_v47 = vpop.f32.mrf.mxu2 }
 0x39c   : > { %v1647_v52 = vadd.f32 %v1646_v47, %v1627_v51  ;;  %v5182_v47 = vld [vmem:[%s12147_s3 + $0x100] sm:$0xff]  ;;  %v5183_v51 = vld [vmem:[%s12148_s4 + $0x70] sm:$0xff] }
 0x39e   : > { %v1667_v49 = vadd.f32 %v1666_v43, %v1647_v52  ;;  %v5185_v52 = vld [vmem:[%s12148_s4 + $0x340] sm:$0xff]  ;;  %v5187_v43 = vld [vmem:[%s12148_s4 + $0x68] sm:$0xff] }
 0x3ad   : > { %v1686_v2 = vpop.f32.mrf.mxu3  ;;  %v1706_v53 = vpop.f32.mrf.mxu1 }
 0x3ae   : > { %v1687_v57 = vadd.f32 %v1686_v2, %v1667_v49  ;;  %v5189_v49 = vld [vmem:[%s12148_s4 + $0x338] sm:$0xff]  ;;  %v5191_v2 = vld [vmem:[%s12148_s4 + $0x60] sm:$0xff] }
 0x3b0   : > { %v1707_v1 = vadd.f32 %v1706_v53, %v1687_v57  ;;  %v5192_v57 = vld [vmem:[%s12148_s4 + $0x1f8] sm:$0xff] }
 0x3b1   : > { %v5194_v53 = vld [vmem:[%s12148_s4 + $0x58] sm:$0xff] }
 0x3b2   : > { %v1728_v59 = vmul.f32 %v1726_v9, %v1707_v1  ;;  %v5197_v9 = vld [vmem:[%s12148_s4 + $0x2a8] sm:$0xff] }
 0x3b4   : > { %v8117_v61 = vsub.f32 %v1707_v1, %v1728_v59  ;;  %1730 = vst.msk [vmem:[%s6543_s12] sm:$0xff] %vm778_vm1, %v1728_v59  ;;  %v5196_v1 = vld [vmem:[%s12148_s4 + $0x1f0] sm:$0xff] }
 0x3b5   : > { %v5198_v59 = vld [vmem:[%s12148_s4 + $0x50] sm:$0xff] }
 0x3b6   : > { %1731 = vst.msk [vmem:[%s6545_s13] sm:$0xff] %vm778_vm1, %v8117_v61  ;;  %v1746_v63 = vsel %vm778_vm1, %v8117_v61, 0.0 }
 0x3b7   : > { %1747 = vadd.xlane.f32.xlu1 %v1746_v63  ;;  %v5199_v63 = vld [vmem:[%s12148_s4 + $0x328] sm:$0xff] }
 0x42a   : > { %v1748_v6 = vpop.xlane.xlu1 %1747 }
 0x42b   : > { %vm1749_vm0 = vcmp.eq.f32.partialorder %v1748_v6, 0.0 }
 0x42c   : > { %v1750_v50 = vsel %vm1749_vm0, 1.0, %v1748_v6  ;;  %v5200_v6 = vld [vmem:[%s12148_s4 + $0x1e8] sm:$0xff] }
 0x42d   : > { %5009 = vrcp.f32 %v1750_v50  ;;  %v1762_v15 = vand.u32 2147483648, %v1750_v50  ;;  %v1760_v5 = vand.u32 2147483647, %v1750_v50  ;;  %vm1756_vm3 = vweird.f32 %v1750_v50 }
 0x42f   : > { %v1763_v8 = vor.u32 1.1754944e-38, %v1762_v15  ;;  %vm1761_vm5 = vcmp.eq.f32.partialorder %v1760_v5, 8.507059e+37  ;;  %v5205_v15 = vld [vmem:[%s12148_s4 + $0x40] sm:$0xff]  ;;  %v5207_v5 = vld [vmem:[%s12148_s4 + $0x290] sm:$0xff] }
 0x433   : > { %v5010_v0 = vpop.eup %5009 }
 0x434   : > { %v1752_v13 = vmul.f32 %v5010_v0, %v1750_v50  ;;  %vm1757_vm2 = vweird.f32 %v5010_v0  ;;  %v5201_v50 = vld [vmem:[%s12148_s4 + $0x2a0] sm:$0xff] }
 0x435   : > { %vm1758_vm4 = vmor %vm1756_vm3, %vm1757_vm2 }
 0x436   : > { %v1753_v4 = vsub.f32 1.0, %v1752_v13  ;;  %v5203_v13 = vld [vmem:[%s12148_s4 + $0x320] sm:$0xff] }
 0x438   : > { %v1754_v3 = vmul.f32 %v5010_v0, %v1753_v4  ;;  %v5204_v4 = vld [vmem:[%s12148_s4 + $0x298] sm:$0xff] }
 0x43a   : > { %v1755_v7 = vadd.f32 %v5010_v0, %v1754_v3  ;;  %v5206_v3 = vld [vmem:[%s12148_s4 + $0x1e0] sm:$0xff] }
 0x43c   : > { %v1759_v10 = vsel %vm1758_vm4, %v5010_v0, %v1755_v7  ;;  %v5202_v0 = vld [vmem:[%s12148_s4 + $0x48] sm:$0xff]  ;;  %v5208_v7 = vld [vmem:[%s12148_s4 + $0x318] sm:$0xff] }
 0x43d   : > { %v1764_v11 = vsel %vm1761_vm5, %v1763_v8, %v1759_v10  ;;  %v5209_v8 = vld [vmem:[%s12148_s4 + $0x38] sm:$0xff] }
 0x43e   : > { %v8127_v12 = vmul.f32 %v1764_v11, %v8117_v61  ;;  %v5210_v10 = vld [vmem:[%s12148_s4 + $0x1d8] sm:$0xff]  ;;  %v5211_v11 = vld [vmem:[%s12148_s4 + $0x288] sm:$0xff] }
 0x440   : > { %4827 = vmatmul.msk.f32.vlgmr.msrb.gmra.mxu2 %vm778_vm1, %v8127_v12  ;;  %4828 = vmatmul.msk.f32.vlgmr.msra.gmra.mxu0 %vm778_vm1, %v8127_v12 }
 0x441   : > { %4835 = vmatmul.msk.f32.vlgmr.msrb.gmra.mxu3 %vm778_vm1, %v8127_v12  ;;  %4836 = vmatmul.msk.f32.vlgmr.msrb.gmra.mxu1 %vm778_vm1, %v8127_v12 }
 0x442   : > { %1861 = vmatpush.msrb.mxu2 %v5150_v14  ;;  %1881 = vmatpush.msra.mxu0 %v5151_v17  ;;  %v5213_v14 = vld [vmem:[%s12148_s4 + $0x30] sm:$0xff] }
 0x443   : > { %2146 = vmatpush.msrb.mxu3 %v5152_v19  ;;  %2166 = vmatpush.msrb.mxu1 %v5153_v21  ;;  %v5214_v17 = vld [vmem:[%s12148_s4 + $0x1d0] sm:$0xff]  ;;  %v5215_v19 = vld [vmem:[%s12148_s4 + $0x280] sm:$0xff]  ;;  %v5216_v21 = vld [vmem:[%s12148_s4 + $0x308] sm:$0xff] }
 0x444   : > { %1862 = vmatpush.msrb.mxu2 %v5154_v18  ;;  %1882 = vmatpush.msra.mxu0 %v5155_v16  ;;  %v5217_v18 = vld [vmem:[%s12148_s4 + $0x28] sm:$0xff] }
 0x445   : > { %2147 = vmatpush.msrb.mxu3 %v5156_v22  ;;  %2167 = vmatpush.msrb.mxu1 %v5157_v23  ;;  %v5218_v16 = vld [vmem:[%s12148_s4 + $0x1c8] sm:$0xff]  ;;  %v5219_v22 = vld [vmem:[%s12148_s4 + $0x300] sm:$0xff] }
 0x446   : > { %1863 = vmatpush.msrb.mxu2 %v5158_v20  ;;  %1883 = vmatpush.msra.mxu0 %v5159_v24  ;;  %v5220_v23 = vld [vmem:[%s12148_s4 + $0x20] sm:$0xff]  ;;  %v5222_v24 = vld [vmem:[%s12148_s4 + $0x18] sm:$0xff] }
 0x447   : > { %2148 = vmatpush.msrb.mxu3 %v5160_v25  ;;  %2168 = vmatpush.msrb.mxu1 %v5161_v26  ;;  %v5221_v20 = vld [vmem:[%s12148_s4 + $0x1c0] sm:$0xff]  ;;  %v5223_v25 = vld [vmem:[%s12148_s4 + $0x1b8] sm:$0xff]  ;;  %v5224_v26 = vld [vmem:[%s12148_s4 + $0x10] sm:$0xff] }
 0x448   : > { %4829 = vmatmul.msk.f32.vlgmr.msra.gmra.mxu2 %vm778_vm1, %v8127_v12  ;;  %4830 = vmatmul.msk.f32.vlgmr.msrb.gmra.mxu0 %vm778_vm1, %v8127_v12 }
 0x449   : > { %1864 = vmatpush.msrb.mxu2 %v5162_v27  ;;  %1884 = vmatpush.msra.mxu0 %v5163_v28  ;;  %v5225_v27 = vld [vmem:[%s12148_s4 + $0x1b0] sm:$0xff]  ;;  %v5226_v28 = vld [vmem:[%s12148_s4 + $0x8] sm:$0xff] }
 0x44a   : > { %2149 = vmatpush.msrb.mxu3 %v5166_v31  ;;  %2169 = vmatpush.msrb.mxu1 %v5167_v32  ;;  %v5229_v31 = vld [vmem:[%s12148_s4 + $0x1a0] sm:$0xff]  ;;  %v5230_v32 = vld [vmem:[%s12148_s4 + $0x278] sm:$0xff] }
 0x44b   : > { %1901 = vmatpush.msra.mxu2 %v5164_v29  ;;  %1921 = vmatpush.msrb.mxu0 %v5165_v30  ;;  %v5227_v29 = vld [vmem:[%s12148_s4 + $0x1a8] sm:$0xff]  ;;  %v5228_v30 = vld [vmem:[%s12148_s4] sm:$0xff] }
 0x44c   : > { %2150 = vmatpush.msrb.mxu3 %v5170_v34  ;;  %2170 = vmatpush.msrb.mxu1 %v5171_v60  ;;  %v5233_v34 = vld [vmem:[%s12148_s4 + $0x190] sm:$0xff]  ;;  %v5234_v60 = vld [vmem:[%s12148_s4 + $0x268] sm:$0xff] }
 0x44d   : > { %1902 = vmatpush.msra.mxu2 %v5168_v33  ;;  %1922 = vmatpush.msrb.mxu0 %v5169_v62  ;;  %v5231_v33 = vld [vmem:[%s12148_s4 + $0x198] sm:$0xff]  ;;  %v5232_v62 = vld [vmem:[%s12148_s4 + $0x270] sm:$0xff] }
 0x44e   : > { %2151 = vmatpush.msrb.mxu3 %v5174_v37  ;;  %2171 = vmatpush.msrb.mxu1 %v5175_v38  ;;  %v5237_v37 = vld [vmem:[%s12148_s4 + $0x180] sm:$0xff]  ;;  %v5238_v38 = vld [vmem:[%s12148_s4 + $0x258] sm:$0xff] }
 0x44f   : > { %1903 = vmatpush.msra.mxu2 %v5172_v35  ;;  %1923 = vmatpush.msrb.mxu0 %v5173_v36  ;;  %v5235_v35 = vld [vmem:[%s12148_s4 + $0x188] sm:$0xff]  ;;  %v5236_v36 = vld [vmem:[%s12148_s4 + $0x260] sm:$0xff] }
 0x450   : > { %4831 = vmatmul.msk.f32.vlgmr.msrb.gmra.mxu2 %vm778_vm1, %v8127_v12  ;;  %4832 = vmatmul.msk.f32.vlgmr.msra.gmra.mxu0 %vm778_vm1, %v8127_v12 }
 0x451   : > { %1904 = vmatpush.msra.mxu2 %v5176_v39  ;;  %1924 = vmatpush.msrb.mxu0 %v5177_v40  ;;  %v5239_v39 = vld [vmem:[%s12148_s4 + $0x3f8] sm:$0xff]  ;;  %v5240_v40 = vld [vmem:[%s12148_s4 + $0x250] sm:$0xff] }
 0x452   : > { %2152 = vmatpush.msrb.mxu3 %v5180_v45  ;;  %2172 = vmatpush.msrb.mxu1 %v5181_v46  ;;  %v5243_v45 = vld [vmem:[%s12148_s4 + $0x3e8] sm:$0xff]  ;;  %v5244_v46 = vld [vmem:[%s12148_s4 + $0x240] sm:$0xff] }
 0x453   : > { %1981 = vmatpush.msrb.mxu2 %v5178_v41  ;;  %2046 = vmatpush.msra.mxu0 %v5179_v42  ;;  %v5241_v41 = vld [vmem:[%s12148_s4 + $0x3f0] sm:$0xff]  ;;  %v5242_v42 = vld [vmem:[%s12148_s4 + $0x248] sm:$0xff] }
 0x454   : > { %2153 = vmatpush.msrb.mxu3 %v5184_v48  ;;  %2173 = vmatpush.msrb.mxu1 %v5185_v52  ;;  %v5247_v48 = vld [vmem:[%s12148_s4 + $0x3d8] sm:$0xff]  ;;  %v5248_v52 = vld [vmem:[%s12148_s4 + $0x230] sm:$0xff] }
 0x455   : > { %1982 = vmatpush.msrb.mxu2 %v5182_v47  ;;  %2047 = vmatpush.msra.mxu0 %v5183_v51  ;;  %v5245_v47 = vld [vmem:[%s12148_s4 + $0x3e0] sm:$0xff]  ;;  %v5246_v51 = vld [vmem:[%s12148_s4 + $0x238] sm:$0xff] }
 0x456   : > { %2154 = vmatpush.msrb.mxu3 %v5188_v55  ;;  %2174 = vmatpush.msrb.mxu1 %v5189_v49  ;;  %v5251_v55 = vld [vmem:[%s12148_s4 + $0x3c8] sm:$0xff]  ;;  %v5252_v49 = vld [vmem:[%s12148_s4 + $0x220] sm:$0xff] }
 0x457   : > { %1983 = vmatpush.msrb.mxu2 %v5186_v54  ;;  %2048 = vmatpush.msra.mxu0 %v5187_v43  ;;  %v5249_v54 = vld [vmem:[%s12148_s4 + $0x3d0] sm:$0xff]  ;;  %v5250_v43 = vld [vmem:[%s12148_s4 + $0x228] sm:$0xff] }
 0x458   : > { %4833 = vmatmul.msk.f32.vlgmr.msra.gmra.mxu2 %vm778_vm1, %v8127_v12  ;;  %4834 = vmatmul.msk.f32.vlgmr.msrb.gmra.mxu0 %vm778_vm1, %v8127_v12 }
 0x459   : > { %1984 = vmatpush.msrb.mxu2 %v5190_v56  ;;  %2049 = vmatpush.msra.mxu0 %v5191_v2  ;;  %v5253_v56 = vld [vmem:[%s12148_s4 + $0x3c0] sm:$0xff]  ;;  %v5254_v2 = vld [vmem:[%s12148_s4 + $0x218] sm:$0xff] }
 0x45a   : > { %2155 = vmatpush.msrb.mxu3 %v5193_v44  ;;  %2175 = vmatpush.msrb.mxu1 %v5195_v58  ;;  %v5256_v44 = vld [vmem:[%s12148_s4 + $0x210] sm:$0xff]  ;;  %v5258_v58 = vld [vmem:[%s12148_s4 + $0x208] sm:$0xff] }
 0x45b   : > { %2106 = vmatpush.msra.mxu2 %v5192_v57  ;;  %2050 = vmatpush.msra.mxu0 %v5194_v53  ;;  %v5255_v57 = vld [vmem:[%s12148_s4 + $0x3b8] sm:$0xff]  ;;  %v5257_v53 = vld [vmem:[%s12148_s4 + $0x3b0] sm:$0xff] }
 0x45c   : > { %2156 = vmatpush.msrb.mxu3 %v5197_v9  ;;  %2176 = vmatpush.msrb.mxu1 %v5199_v63  ;;  %v5260_v9 = vld [vmem:[%s12148_s4 + $0x200] sm:$0xff]  ;;  %v5262_v63 = vld [vmem:[%s12148_s4 + $0x398] sm:$0xff] }
 0x45d   : > { %2107 = vmatpush.msra.mxu2 %v5196_v1  ;;  %2051 = vmatpush.msra.mxu0 %v5198_v59  ;;  %v5259_v1 = vld [vmem:[%s12148_s4 + $0x3a8] sm:$0xff]  ;;  %v5261_v59 = vld [vmem:[%s12148_s4 + $0x3a0] sm:$0xff] }
 0x45e   : > { %2157 = vmatpush.msrb.mxu3 %v5201_v50  ;;  %2177 = vmatpush.msrb.mxu1 %v5203_v13  ;;  %v5264_v50 = vld [vmem:[%s12148_s4 + $0x388] sm:$0xff] }
 0x45f   : > { %2108 = vmatpush.msra.mxu2 %v5200_v6  ;;  %2052 = vmatpush.msra.mxu0 %v5202_v0  ;;  %v5263_v6 = vld [vmem:[%s12148_s4 + $0x390] sm:$0xff]  ;;  %v5265_v0 = vld [vmem:[%s12148_s4 + $0x380] sm:$0xff] }
 0x460   : > { %4837 = vmatmul.msk.f32.vlgmr.msrb.gmra.mxu2 %vm778_vm1, %v8127_v12  ;;  %2158 = vmatpush.msrb.mxu3 %v5204_v4  ;;  %v5212_v12 = vld [vmem:[%s12148_s4 + $0x310] sm:$0xff] }
 0x461   : > { %2053 = vmatpush.msra.mxu0 %v5205_v15  ;;  %2109 = vmatpush.msra.mxu2 %v5206_v3 }
 0x462   : > { %2159 = vmatpush.msrb.mxu3 %v5207_v5  ;;  %2178 = vmatpush.msrb.mxu1 %v5208_v7  ;;  %v4819_v7 = vld [vmem:[%s6541_s10 + $0x78] sm:$0xff] }
 0x463   : > { %2054 = vmatpush.msra.mxu0 %v5209_v8  ;;  %2110 = vmatpush.msra.mxu2 %v5210_v10  ;;  %v4815_v8 = vld [vmem:[%s6541_s10 + $0x58] sm:$0xff]  ;;  %v4820_v10 = vld [vmem:[%s6541_s10 + $0x80] sm:$0xff] }
 0x464   : > { %2160 = vmatpush.msrb.mxu3 %v5211_v11  ;;  %2179 = vmatpush.msrb.mxu1 %v5212_v12 }
 0x465   : > { %2055 = vmatpush.msra.mxu0 %v5213_v14  ;;  %2111 = vmatpush.msra.mxu2 %v5214_v17  ;;  %v4816_v14 = vld [vmem:[%s6541_s10 + $0x60] sm:$0xff] }
 0x466   : > { %2161 = vmatpush.msrb.mxu3 %v5215_v19  ;;  %2180 = vmatpush.msrb.mxu1 %v5216_v21  ;;  %v4823_v21 = vld [vmem:[%s6541_s10 + $0x98] sm:$0xff] }
 0x467   : > { %2056 = vmatpush.msra.mxu0 %v5217_v18  ;;  %2112 = vmatpush.msra.mxu2 %v5218_v16  ;;  %v4822_v16 = vld [vmem:[%s6541_s10 + $0x90] sm:$0xff] }
 0x468   : > { %2181 = vmatpush.msrb.mxu1 %v5219_v22 }
 0x469   : > { %2057 = vmatpush.msra.mxu0 %v5220_v23  ;;  %2113 = vmatpush.msra.mxu2 %v5221_v20  ;;  %v4824_v20 = vld [vmem:[%s6541_s10 + $0xa0] sm:$0xff] }
 0x46b   : > { %2058 = vmatpush.msra.mxu0 %v5222_v24  ;;  %2114 = vmatpush.msra.mxu2 %v5223_v25 }
 0x46d   : > { %2059 = vmatpush.msra.mxu0 %v5224_v26  ;;  %2115 = vmatpush.msra.mxu2 %v5225_v27  ;;  %v4818_v26 = vld [vmem:[%s6541_s10 + $0x70] sm:$0xff]  ;;  %v4817_v27 = vld [vmem:[%s6541_s10 + $0x68] sm:$0xff] }
 0x46f   : > { %2060 = vmatpush.msra.mxu0 %v5226_v28  ;;  %2116 = vmatpush.msra.mxu2 %v5227_v29  ;;  %v4821_v28 = vld [vmem:[%s6541_s10 + $0x88] sm:$0xff] }
 0x471   : > { %2061 = vmatpush.msra.mxu0 %v5228_v30  ;;  %2117 = vmatpush.msra.mxu2 %v5229_v31 }
 0x473   : > { %2126 = vmatpush.msrb.mxu0 %v5230_v32  ;;  %2118 = vmatpush.msra.mxu2 %v5231_v33 }
 0x475   : > { %2127 = vmatpush.msrb.mxu0 %v5232_v62  ;;  %2119 = vmatpush.msra.mxu2 %v5233_v34 }
 0x477   : > { %2128 = vmatpush.msrb.mxu0 %v5234_v60  ;;  %2120 = vmatpush.msra.mxu2 %v5235_v35 }
 0x479   : > { %2129 = vmatpush.msrb.mxu0 %v5236_v36  ;;  %2121 = vmatpush.msra.mxu2 %v5237_v37 }
 0x47b   : > { %2130 = vmatpush.msrb.mxu0 %v5238_v38  ;;  %2186 = vmatpush.msrb.mxu2 %v5239_v39 }
 0x47d   : > { %2131 = vmatpush.msrb.mxu0 %v5240_v40  ;;  %2187 = vmatpush.msrb.mxu2 %v5241_v41 }
 0x47f   : > { %2132 = vmatpush.msrb.mxu0 %v5242_v42  ;;  %2188 = vmatpush.msrb.mxu2 %v5243_v45  ;;  %v4826_v42 = vld [vmem:[%s6536_s24 + $0x8] sm:$0xff] }
 0x481   : > { %2133 = vmatpush.msrb.mxu0 %v5244_v46  ;;  %2189 = vmatpush.msrb.mxu2 %v5245_v47 }
 0x483   : > { %2134 = vmatpush.msrb.mxu0 %v5246_v51  ;;  %2190 = vmatpush.msrb.mxu2 %v5247_v48 }
 0x485   : > { %2135 = vmatpush.msrb.mxu0 %v5248_v52  ;;  %2191 = vmatpush.msrb.mxu2 %v5249_v54 }
 0x487   : > { %2136 = vmatpush.msrb.mxu0 %v5250_v43  ;;  %2192 = vmatpush.msrb.mxu2 %v5251_v55 }
 0x489   : > { %2137 = vmatpush.msrb.mxu0 %v5252_v49  ;;  %2193 = vmatpush.msrb.mxu2 %v5253_v56 }
 0x48b   : > { %2138 = vmatpush.msrb.mxu0 %v5254_v2  ;;  %2194 = vmatpush.msrb.mxu2 %v5255_v57 }
 0x48d   : > { %2139 = vmatpush.msrb.mxu0 %v5256_v44  ;;  %2195 = vmatpush.msrb.mxu2 %v5257_v53 }
 0x48f   : > { %2140 = vmatpush.msrb.mxu0 %v5258_v58  ;;  %2196 = vmatpush.msrb.mxu2 %v5259_v1 }
 0x491   : > { %2141 = vmatpush.msrb.mxu0 %v5260_v9  ;;  %2197 = vmatpush.msrb.mxu2 %v5261_v59 }
 0x493   : > { %2198 = vmatpush.msrb.mxu2 %v5262_v63 }
 0x495   : > { %2199 = vmatpush.msrb.mxu2 %v5263_v6  ;;  %v5266_v6 = vld [vmem:[%s12148_s4 + $0x478] sm:$0xff] }
 0x497   : > { %2200 = vmatpush.msrb.mxu2 %v5264_v50 }
 0x499   : > { %2201 = vmatpush.msrb.mxu2 %v5265_v0  ;;  %v5267_v0 = vld [vmem:[%s12148_s4 + $0x4f8] sm:$0xff] }
 0x4bd   : > { %v1806_v13 = vpop.f32.mrf.mxu0 }
 0x4be   : > { %v1990_v23 = vadd.f32 %v4816_v14, %v1806_v13  ;;  %v1966_v24 = vpop.f32.mrf.mxu1  ;;  %v5268_v13 = vld [vmem:[%s12148_s4 + $0x470] sm:$0xff] }
 0x4bf   : > { %v8511_v32 = vadd.f32 %v4824_v20, %v1966_v24  ;;  %v5282_v20 = vld [vmem:[%s12149_s5 + $0xa0] sm:$0xff]  ;;  %v5283_v24 = vld [vmem:[%s12148_s4 + $0x448] sm:$0xff] }
 0x4c3   : > { %v1786_v4 = vpop.f32.mrf.mxu2 }
 0x4c4   : > { %v1989_v17 = vadd.f32 %v4815_v8, %v1786_v4  ;;  %v1946_v18 = vpop.f32.mrf.mxu3  ;;  %v5269_v4 = vld [vmem:[%s12148_s4 + $0x4f0] sm:$0xff] }
 0x4c5   : > { %v1846_v15 = vpop.f32.mrf.mxu0  ;;  %v8509_v29 = vadd.f32 %v4823_v21, %v1946_v18  ;;  %v5274_v8 = vld [vmem:[%s12149_s5 + $0xf0] sm:$0xff]  ;;  %v5278_v21 = vld [vmem:[%s12148_s4 + $0x458] sm:$0xff] }
 0x4c6   : > { %v1992_v62 = vadd.f32 %v4818_v26, %v1846_v15  ;;  %v5270_v15 = vld [vmem:[%s12149_s5 + $0x140] sm:$0xff]  ;;  %v5285_v26 = vld [vmem:[%s12148_s4 + $0x4c8] sm:$0xff] }
 0x4cb   : > { %v1826_v3 = vpop.f32.mrf.mxu2 }
 0x4cc   : > { %v1991_v34 = vadd.f32 %v4817_v27, %v1826_v3  ;;  %v5271_v3 = vld [vmem:[%s12148_s4 + $0x468] sm:$0xff]  ;;  %v5286_v27 = vld [vmem:[%s12149_s5 + $0x50] sm:$0xff] }
 0x4cd   : > { %v1886_v5 = vpop.f32.mrf.mxu0 }
 0x4ce   : > { %v1994_v19 = vadd.f32 %v4820_v10, %v1886_v5  ;;  %v5272_v5 = vld [vmem:[%s12149_s5 + $0x148] sm:$0xff] }
 0x4d0   : > { %v2006_v30 = vmax.f32 %v1990_v23, %v1994_v19 }
 0x4d2   : > { %v2010_v38 = vmax.f32 %v2006_v30, %v8511_v32  ;;  %v5288_v30 = vld [vmem:[%s12149_s5 + $0x58] sm:$0xff] }
 0x4d3   : > { %v1866_v11 = vpop.f32.mrf.mxu2 }
 0x4d4   : > { %v1993_v12 = vadd.f32 %v4819_v7, %v1866_v11  ;;  %v5273_v7 = vld [vmem:[%s12148_s4 + $0x4e8] sm:$0xff]  ;;  %v5275_v11 = vld [vmem:[%s12148_s4 + $0x460] sm:$0xff] }
 0x4d5   : > { %v1926_v22 = vpop.f32.mrf.mxu0 }
 0x4d6   : > { %v2005_v25 = vmax.f32 %v1989_v17, %v1993_v12  ;;  %v1996_v31 = vadd.f32 %v4822_v16, %v1926_v22  ;;  %v5279_v16 = vld [vmem:[%s12148_s4 + $0x4d8] sm:$0xff]  ;;  %v5280_v22 = vld [vmem:[%s12148_s4 + $0x450] sm:$0xff] }
 0x4d8   : > { %v2009_v35 = vmax.f32 %v2005_v25, %v8509_v29  ;;  %v2008_v36 = vmax.f32 %v1992_v62, %v1996_v31  ;;  %v5284_v25 = vld [vmem:[%s12149_s5 + $0xa8] sm:$0xff] }
 0x4da   : > { %v2011_v39 = vmax.f32 %v2009_v35, %v2010_v38  ;;  %v5293_v35 = vld [vmem:[%s12148_s4 + $0x4b8] sm:$0xff] }
 0x4db   : > { %v1906_v33 = vpop.f32.mrf.mxu2  ;;  %v5296_v38 = vld [vmem:[%s12149_s5 + $0x158] sm:$0xff] }
 0x4dc   : > { %v1995_v60 = vadd.f32 %v4821_v28, %v1906_v33  ;;  %v5287_v28 = vld [vmem:[%s12148_s4 + $0x440] sm:$0xff] }
 0x4dd   : > { %v5290_v33 = vld [vmem:[%s12149_s5] sm:$0xff] }
 0x4de   : > { %v2007_v37 = vmax.f32 %v1991_v34, %v1995_v60 }
 0x4e0   : > { %v2012_v40 = vmax.f32 %v2007_v37, %v2008_v36  ;;  %v5294_v37 = vld [vmem:[%s12149_s5 + $0x150] sm:$0xff] }
 0x4e2   : > { %v2013_v41 = vmax.f32 %v2011_v39, %v2012_v40  ;;  %v5297_v39 = vld [vmem:[%s12148_s4 + $0x4b0] sm:$0xff]  ;;  %v5299_v40 = vld [vmem:[%s12148_s4 + $0x428] sm:$0xff] }
 0x4e4   : > { %2014 = vmax.xlane.f32.xlu2 %v2013_v41 }
 0x4fc   : > { %2001 = vrot.lane.b32.xlu2 %v4826_v42, %s12162_s29  ;;  %v5300_v42 = vld [vmem:[%s12149_s5 + $0x108] sm:$0xff] }
 0x557   : > { %v8517_v45 = vpop.xlane.xlu2 %2014 }
 0x558   : > { %v2016_v46 = vsub.f32 %v1989_v17, %v8517_v45  ;;  %v2017_v47 = vsub.f32 %v1990_v23, %v8517_v45  ;;  %v2018_v51 = vsub.f32 %v1991_v34, %v8517_v45  ;;  %v2019_v48 = vsub.f32 %v1992_v62, %v8517_v45  ;;  %v5277_v17 = vld [vmem:[%s12148_s4 + $0x4e0] sm:$0xff]  ;;  %v5281_v23 = vld [vmem:[%s12148_s4 + $0x4d0] sm:$0xff]  ;;  %v5291_v62 = vld [vmem:[%s12148_s4 + $0x438] sm:$0xff] }
 0x559   : > { %v2020_v49 = vsub.f32 %v1993_v12, %v8517_v45  ;;  %v2021_v56 = vsub.f32 %v1994_v19, %v8517_v45  ;;  %v2022_v2 = vsub.f32 %v1995_v60, %v8517_v45  ;;  %v2023_v57 = vsub.f32 %v1996_v31, %v8517_v45  ;;  %v5276_v12 = vld [vmem:[%s12149_s5 + $0xf8] sm:$0xff]  ;;  %v5289_v31 = vld [vmem:[%s12148_s4 + $0x4c0] sm:$0xff]  ;;  %v5292_v60 = vld [vmem:[%s12149_s5 + $0x8] sm:$0xff] }
 0x55a   : > { %v2026_v52 = vmul.f32 1.442695, %v2016_v46  ;;  %v2028_v54 = vmul.f32 1.442695, %v2017_v47  ;;  %v2030_v43 = vmul.f32 1.442695, %v2018_v51  ;;  %v2024_v34 = vsub.f32 %v8509_v29, %v8517_v45 }
 0x55b   : > { %v2032_v55 = vmul.f32 1.442695, %v2019_v48  ;;  %v2034_v44 = vmul.f32 1.442695, %v2020_v49  ;;  %v2036_v53 = vmul.f32 1.442695, %v2021_v56  ;;  %v2025_v36 = vsub.f32 %v8511_v32, %v8517_v45 }
 0x55c   : > { %5011 = vpow2.f32 %v2026_v52  ;;  %v2038_v1 = vmul.f32 1.442695, %v2022_v2  ;;  %v2040_v59 = vmul.f32 1.442695, %v2023_v57  ;;  %v5295_v29 = vld [vmem:[%s12148_s4 + $0x430] sm:$0xff]  ;;  %v5298_v32 = vld [vmem:[%s12149_s5 + $0x100] sm:$0xff] }
 0x55d   : > { %5013 = vpow2.f32 %v2028_v54  ;;  %v2042_v41 = vmul.f32 1.442695, %v2024_v34  ;;  %v5301_v45 = vld [vmem:[%s12148_s4 + $0x4a8] sm:$0xff]  ;;  %v2044_v46 = vmul.f32 1.442695, %v2025_v36  ;;  %v5302_v47 = vld [vmem:[%s12149_s5 + $0xb0] sm:$0xff] }
 0x55e   : > { %5015 = vpow2.f32 %v2030_v43  ;;  %v5303_v51 = vld [vmem:[%s12148_s4 + $0x420] sm:$0xff]  ;;  %v5304_v48 = vld [vmem:[%s12149_s5 + $0xb8] sm:$0xff]  ;;  %v5310_v56 = vld [vmem:[%s12149_s5 + $0x10] sm:$0xff] }
 0x55f   : > { %5017 = vpow2.f32 %v2032_v55  ;;  %v5305_v52 = vld [vmem:[%s12148_s4 + $0x4a0] sm:$0xff]  ;;  %v5307_v43 = vld [vmem:[%s12148_s4 + $0x418] sm:$0xff]  ;;  %v5308_v55 = vld [vmem:[%s12149_s5 + $0x68] sm:$0xff] }
 0x560   : > { %5019 = vpow2.f32 %v2034_v44  ;;  %v5306_v54 = vld [vmem:[%s12149_s5 + $0x60] sm:$0xff]  ;;  %v5309_v49 = vld [vmem:[%s12148_s4 + $0x498] sm:$0xff]  ;;  %v5311_v2 = vld [vmem:[%s12148_s4 + $0x410] sm:$0xff] }
 0x561   : > { %5021 = vpow2.f32 %v2036_v53  ;;  %v5312_v57 = vld [vmem:[%s12149_s5 + $0x18] sm:$0xff]  ;;  %v5313_v44 = vld [vmem:[%s12148_s4 + $0x490] sm:$0xff]  ;;  %v5314_v53 = vld [vmem:[%s12148_s4 + $0x408] sm:$0xff] }
 0x562   : > { %v8527_v58 = vpop.eup %5011  ;;  %5023 = vpow2.f32 %v2038_v1  ;;  %v5315_v1 = vld [vmem:[%s12148_s4 + $0x488] sm:$0xff]  ;;  %v5344_v36 = vld [vmem:[%s12150_s6 + $0x38] sm:$0xff] }
 0x563   : > { %v8529_v9 = vpop.eup %5013  ;;  %2062 = vmatmul.f32.vlgmr.msra.gmra.mxu0 %v8527_v58  ;;  %5025 = vpow2.f32 %v2040_v59  ;;  %v5341_v34 = vld [vmem:[%s12150_s6 + $0xc8] sm:$0xff] }
 0x564   : > { %v8532_v63 = vpop.eup %5015  ;;  %2082 = vmatmul.f32.vlgmr.msra.gmra.mxu3 %v8529_v9  ;;  %2206 = vmatpush.msra.mxu0 %v5266_v6  ;;  %5027 = vpow2.f32 %v2042_v41  ;;  %v5316_v6 = vld [vmem:[%s12148_s4 + $0x400] sm:$0xff] }
 0x565   : > { %v8538_v50 = vpop.eup %5017  ;;  %2102 = vmatmul.f32.vlgmr.msra.gmra.mxu1 %v8532_v63  ;;  %2226 = vmatpush.msra.mxu3 %v5267_v0  ;;  %5029 = vpow2.f32 %v2044_v46  ;;  %v5351_v41 = vld [vmem:[%s12150_s6 + $0xa0] sm:$0xff]  ;;  %v5354_v46 = vld [vmem:[%s12150_s6 + $0x10] sm:$0xff] }
 0x566   : > { %2122 = vmatmul.f32.vlgmr.msra.gmra.mxu2 %v8538_v50  ;;  %2207 = vmatpush.msra.mxu0 %v5268_v13  ;;  %v8566_v10 = vpop.eup %5019  ;;  %v5317_v13 = vld [vmem:[%s12148_s4 + $0x480] sm:$0xff] }
 0x567   : > { %2227 = vmatpush.msra.mxu3 %v5269_v4  ;;  %2276 = vmatpush.msra.mxu1 %v5270_v15  ;;  %v8574_v14 = vpop.eup %5021  ;;  %v5318_v4 = vld [vmem:[%s12149_s5 + $0x170] sm:$0xff]  ;;  %v5319_v15 = vld [vmem:[%s12149_s5 + $0x178] sm:$0xff] }
 0x568   : > { %2208 = vmatpush.msra.mxu0 %v5271_v3  ;;  %2296 = vmatpush.msra.mxu2 %v5272_v5  ;;  %v8580_v19 = vpop.eup %5023  ;;  %v5320_v3 = vld [vmem:[%s12149_s5 + $0x120] sm:$0xff]  ;;  %v5321_v5 = vld [vmem:[%s12149_s5 + $0x128] sm:$0xff] }
 0x569   : > { %2228 = vmatpush.msra.mxu3 %v5273_v7  ;;  %2277 = vmatpush.msra.mxu1 %v5274_v8  ;;  %v8586_v18 = vpop.eup %5025  ;;  %v5322_v7 = vld [vmem:[%s12149_s5 + $0xd0] sm:$0xff]  ;;  %v5323_v8 = vld [vmem:[%s12149_s5 + $0xd8] sm:$0xff] }
 0x56a   : > { %2209 = vmatpush.msra.mxu0 %v5275_v11  ;;  %2297 = vmatpush.msra.mxu2 %v5276_v12  ;;  %v8705_v59 = vpop.eup %5027  ;;  %v5324_v11 = vld [vmem:[%s12149_s5 + $0x80] sm:$0xff]  ;;  %v5325_v12 = vld [vmem:[%s12149_s5 + $0x88] sm:$0xff] }
 0x56b   : > { %2229 = vmatpush.msra.mxu3 %v5277_v17  ;;  %2142 = vmatmul.f32.vlgmr.msrb.gmra.mxu0 %v8566_v10  ;;  %v8710_v0 = vpop.eup %5029  ;;  %v5326_v17 = vld [vmem:[%s12149_s5 + $0x30] sm:$0xff] }
 0x56c   : > { %2162 = vmatmul.f32.vlgmr.msrb.gmra.mxu3 %v8574_v14  ;;  %2210 = vmatpush.msra.mxu0 %v5278_v21  ;;  %v5327_v21 = vld [vmem:[%s12149_s5 + $0x38] sm:$0xff] }
 0x56d   : > { %2182 = vmatmul.f32.vlgmr.msrb.gmra.mxu1 %v8580_v19  ;;  %2230 = vmatpush.msra.mxu3 %v5279_v16  ;;  %v5328_v16 = vld [vmem:[%s12150_s6 + $0x78] sm:$0xff] }
 0x56e   : > { %2202 = vmatmul.f32.vlgmr.msrb.gmra.mxu2 %v8586_v18  ;;  %2211 = vmatpush.msra.mxu0 %v5280_v22  ;;  %v5329_v22 = vld [vmem:[%s12150_s6 + $0xf8] sm:$0xff] }
 0x56f   : > { %2231 = vmatpush.msra.mxu3 %v5281_v23  ;;  %2278 = vmatpush.msra.mxu1 %v5282_v20  ;;  %v5330_v23 = vld [vmem:[%s12150_s6 + $0x70] sm:$0xff] }
 0x570   : > { %2212 = vmatpush.msra.mxu0 %v5283_v24  ;;  %2298 = vmatpush.msra.mxu2 %v5284_v25  ;;  %v5331_v20 = vld [vmem:[%s12150_s6 + $0xf0] sm:$0xff]  ;;  %v5332_v24 = vld [vmem:[%s12150_s6 + $0x68] sm:$0xff] }
 0x571   : > { %2232 = vmatpush.msra.mxu3 %v5285_v26  ;;  %2279 = vmatpush.msra.mxu1 %v5286_v27  ;;  %v5333_v25 = vld [vmem:[%s12150_s6 + $0xe8] sm:$0xff]  ;;  %v5334_v26 = vld [vmem:[%s12150_s6 + $0x60] sm:$0xff] }
 0x572   : > { %2213 = vmatpush.msra.mxu0 %v5287_v28  ;;  %2299 = vmatpush.msra.mxu2 %v5288_v30  ;;  %v5335_v27 = vld [vmem:[%s12150_s6 + $0xe0] sm:$0xff]  ;;  %v5336_v28 = vld [vmem:[%s12150_s6 + $0x58] sm:$0xff] }
 0x573   : > { %2233 = vmatpush.msra.mxu3 %v5289_v31  ;;  %2280 = vmatpush.msra.mxu1 %v5290_v33  ;;  %v5337_v30 = vld [vmem:[%s12150_s6 + $0xd8] sm:$0xff]  ;;  %v5338_v31 = vld [vmem:[%s12150_s6 + $0x50] sm:$0xff] }
 0x574   : > { %2214 = vmatpush.msra.mxu0 %v5291_v62  ;;  %2300 = vmatpush.msra.mxu2 %v5292_v60  ;;  %v5339_v33 = vld [vmem:[%s12150_s6 + $0xd0] sm:$0xff]  ;;  %v5340_v62 = vld [vmem:[%s12150_s6 + $0x48] sm:$0xff]  ;;  %v5342_v60 = vld [vmem:[%s12150_s6 + $0x40] sm:$0xff] }
 0x575   : > { %2234 = vmatpush.msra.mxu3 %v5293_v35  ;;  %2316 = vmatpush.msrb.mxu1 %v5294_v37  ;;  %v5343_v35 = vld [vmem:[%s12150_s6 + $0xc0] sm:$0xff]  ;;  %v5345_v37 = vld [vmem:[%s12150_s6 + $0xb8] sm:$0xff] }
 0x576   : > { %2215 = vmatpush.msra.mxu0 %v5295_v29  ;;  %2336 = vmatpush.msrb.mxu2 %v5296_v38  ;;  %v5346_v29 = vld [vmem:[%s12150_s6 + $0x30] sm:$0xff] }
 0x577   : > { %2235 = vmatpush.msra.mxu3 %v5297_v39  ;;  %2317 = vmatpush.msrb.mxu1 %v5298_v32  ;;  %v5347_v38 = vld [vmem:[%s12150_s6 + $0xb0] sm:$0xff]  ;;  %v5348_v39 = vld [vmem:[%s12150_s6 + $0x28] sm:$0xff] }
 0x578   : > { %2216 = vmatpush.msra.mxu0 %v5299_v40  ;;  %2337 = vmatpush.msrb.mxu2 %v5300_v42  ;;  %v5349_v32 = vld [vmem:[%s12150_s6 + $0xa8] sm:$0xff]  ;;  %v5350_v40 = vld [vmem:[%s12150_s6 + $0x20] sm:$0xff]  ;;  %v5352_v42 = vld [vmem:[%s12150_s6 + $0x18] sm:$0xff] }
 0x579   : > { %2236 = vmatpush.msra.mxu3 %v5301_v45  ;;  %2318 = vmatpush.msrb.mxu1 %v5302_v47  ;;  %v5353_v45 = vld [vmem:[%s12150_s6 + $0x98] sm:$0xff]  ;;  %v5355_v47 = vld [vmem:[%s12150_s6 + $0x90] sm:$0xff] }
 0x57a   : > { %2217 = vmatpush.msra.mxu0 %v5303_v51  ;;  %2338 = vmatpush.msrb.mxu2 %v5304_v48  ;;  %v5356_v51 = vld [vmem:[%s12150_s6 + $0x8] sm:$0xff] }
 0x57b   : > { %2237 = vmatpush.msra.mxu3 %v5305_v52  ;;  %2319 = vmatpush.msrb.mxu1 %v5306_v54  ;;  %v5357_v48 = vld [vmem:[%s12150_s6 + $0x88] sm:$0xff]  ;;  %v5358_v52 = vld [vmem:[%s12150_s6] sm:$0xff] }
 0x57c   : > { %2218 = vmatpush.msra.mxu0 %v5307_v43  ;;  %2339 = vmatpush.msrb.mxu2 %v5308_v55  ;;  %v5359_v54 = vld [vmem:[%s12150_s6 + $0x80] sm:$0xff]  ;;  %v8843_v55 = vpop.f32.mrf.mxu2 }
 0x57d   : > { %2238 = vmatpush.msra.mxu3 %v5309_v49  ;;  %2320 = vmatpush.msrb.mxu1 %v5310_v56 }
 0x57e   : > { %2219 = vmatpush.msra.mxu0 %v5311_v2  ;;  %2340 = vmatpush.msrb.mxu2 %v5312_v57 }
 0x57f   : > { %2239 = vmatpush.msra.mxu3 %v5313_v44 }
 0x580   : > { %2220 = vmatpush.msra.mxu0 %v5314_v53 }
 0x581   : > { %2240 = vmatpush.msra.mxu3 %v5315_v1 }
 0x582   : > { %2221 = vmatpush.msra.mxu0 %v5316_v6 }
 0x583   : > { %2241 = vmatpush.msra.mxu3 %v5317_v13  ;;  %2222 = vmatmul.f32.vlgmr.msra.gmra.mxu0 %v8705_v59 }
 0x584   : > { %2242 = vmatmul.f32.vlgmr.msra.gmra.mxu3 %v8710_v0  ;;  %2396 = vmatpush.msrb.mxu0 %v5318_v4 }
 0x585   : > { %2416 = vmatpush.msrb.mxu3 %v5319_v15 }
 0x586   : > { %2397 = vmatpush.msrb.mxu0 %v5320_v3 }
 0x587   : > { %2417 = vmatpush.msrb.mxu3 %v5321_v5 }
 0x588   : > { %2398 = vmatpush.msrb.mxu0 %v5322_v7 }
 0x589   : > { %2418 = vmatpush.msrb.mxu3 %v5323_v8 }
 0x58a   : > { %2399 = vmatpush.msrb.mxu0 %v5324_v11 }
 0x58b   : > { %2419 = vmatpush.msrb.mxu3 %v5325_v12 }
 0x58c   : > { %2400 = vmatpush.msrb.mxu0 %v5326_v17 }
 0x58d   : > { %2420 = vmatpush.msrb.mxu3 %v5327_v21 }
 0x58e   : > { %2475 = vmatpush.msra.mxu0 %v5328_v16 }
 0x58f   : > { %2495 = vmatpush.msra.mxu3 %v5329_v22 }
 0x590   : > { %2476 = vmatpush.msra.mxu0 %v5330_v23 }
 0x591   : > { %2496 = vmatpush.msra.mxu3 %v5331_v20 }
 0x592   : > { %2477 = vmatpush.msra.mxu0 %v5332_v24 }
 0x593   : > { %2497 = vmatpush.msra.mxu3 %v5333_v25 }
 0x594   : > { %2478 = vmatpush.msra.mxu0 %v5334_v26  ;;  %v2002_v26 = vpop.permute.xlu2 %2001 }
 0x595   : > { %2498 = vmatpush.msra.mxu3 %v5335_v27 }
 0x596   : > { %2479 = vmatpush.msra.mxu0 %v5336_v28 }
 0x597   : > { %2499 = vmatpush.msra.mxu3 %v5337_v30 }
 0x598   : > { %2480 = vmatpush.msra.mxu0 %v5338_v31  ;;  %v2004_v31 = vsel %vm778_vm1, %v8117_v61, %v2002_v26  ;;  %v5361_v61 = vld [vmem:[%s12149_s5 + $0x168] sm:$0xff] }
 0x599   : > { %2500 = vmatpush.msra.mxu3 %v5339_v33  ;;  %v5406_v26 = vld [vmem:[%s12150_s6 + $0x228] sm:$0xff] }
 0x59a   : > { %2481 = vmatpush.msra.mxu0 %v5340_v62 }
 0x59b   : > { %2501 = vmatpush.msra.mxu3 %v5341_v34  ;;  %v5360_v34 = vld [vmem:[%s12149_s5 + $0x160] sm:$0xff] }
 0x59c   : > { %2482 = vmatpush.msra.mxu0 %v5342_v60  ;;  %v5362_v60 = vld [vmem:[%s12150_s6 + $0x278] sm:$0xff] }
 0x59d   : > { %2502 = vmatpush.msra.mxu3 %v5343_v35  ;;  %v5363_v35 = vld [vmem:[%s12150_s6 + $0x2f8] sm:$0xff] }
 0x59e   : > { %2483 = vmatpush.msra.mxu0 %v5344_v36  ;;  %v5364_v36 = vld [vmem:[%s12149_s5 + $0x110] sm:$0xff] }
 0x59f   : > { %2503 = vmatpush.msra.mxu3 %v5345_v37  ;;  %v5365_v37 = vld [vmem:[%s12149_s5 + $0x118] sm:$0xff] }
 0x5a0   : > { %2484 = vmatpush.msra.mxu0 %v5346_v29  ;;  %v5366_v29 = vld [vmem:[%s12150_s6 + $0x270] sm:$0xff] }
 0x5a1   : > { %2504 = vmatpush.msra.mxu3 %v5347_v38  ;;  %v5367_v38 = vld [vmem:[%s12150_s6 + $0x2f0] sm:$0xff] }
 0x5a2   : > { %2485 = vmatpush.msra.mxu0 %v5348_v39  ;;  %v5368_v39 = vld [vmem:[%s12149_s5 + $0xc0] sm:$0xff] }
 0x5a3   : > { %2505 = vmatpush.msra.mxu3 %v5349_v32  ;;  %v5369_v32 = vld [vmem:[%s12149_s5 + $0xc8] sm:$0xff] }
 0x5a4   : > { %2486 = vmatpush.msra.mxu0 %v5350_v40  ;;  %v5370_v40 = vld [vmem:[%s12150_s6 + $0x268] sm:$0xff] }
 0x5a5   : > { %2506 = vmatpush.msra.mxu3 %v5351_v41  ;;  %v5371_v41 = vld [vmem:[%s12150_s6 + $0x2e8] sm:$0xff] }
 0x5a6   : > { %2487 = vmatpush.msra.mxu0 %v5352_v42  ;;  %v5372_v42 = vld [vmem:[%s12149_s5 + $0x70] sm:$0xff] }
 0x5a7   : > { %2507 = vmatpush.msra.mxu3 %v5353_v45  ;;  %v5373_v45 = vld [vmem:[%s12149_s5 + $0x78] sm:$0xff] }
 0x5a8   : > { %2488 = vmatpush.msra.mxu0 %v5354_v46  ;;  %v5374_v46 = vld [vmem:[%s12150_s6 + $0x260] sm:$0xff] }
 0x5a9   : > { %2508 = vmatpush.msra.mxu3 %v5355_v47  ;;  %v5375_v47 = vld [vmem:[%s12150_s6 + $0x2e0] sm:$0xff] }
 0x5aa   : > { %2489 = vmatpush.msra.mxu0 %v5356_v51  ;;  %v5376_v51 = vld [vmem:[%s12149_s5 + $0x20] sm:$0xff] }
 0x5ab   : > { %2509 = vmatpush.msra.mxu3 %v5357_v48  ;;  %v5377_v48 = vld [vmem:[%s12149_s5 + $0x28] sm:$0xff] }
 0x5ac   : > { %2490 = vmatpush.msra.mxu0 %v5358_v52  ;;  %v5378_v52 = vld [vmem:[%s12149_s5 + $0x180] sm:$0xff] }
 0x5ad   : > { %2510 = vmatpush.msra.mxu3 %v5359_v54  ;;  %v5379_v54 = vld [vmem:[%s12149_s5 + $0x188] sm:$0xff] }
 0x5e0   : > { %v2063_v49 = vpop.f32.mrf.mxu0 }
 0x5e2   : > { %v2103_v2 = vpop.f32.mrf.mxu1 }
 0x5e7   : > { %v2083_v43 = vpop.f32.mrf.mxu3 }
 0x5e8   : > { %v2084_v56 = vadd.f32 %v2083_v43, %v2063_v49  ;;  %v2143_v1 = vpop.f32.mrf.mxu0  ;;  %v5380_v43 = vld [vmem:[%s12150_s6 + $0x258] sm:$0xff] }
 0x5e9   : > { %v2123_v44 = vpop.f32.mrf.mxu2  ;;  %v5381_v49 = vld [vmem:[%s12150_s6 + $0x2d8] sm:$0xff] }
 0x5ea   : > { %v2104_v57 = vadd.f32 %v2103_v2, %v2084_v56  ;;  %v2183_v15 = vpop.f32.mrf.mxu1  ;;  %v5382_v56 = vld [vmem:[%s12149_s5 + $0x130] sm:$0xff]  ;;  %v5383_v2 = vld [vmem:[%s12149_s5 + $0x138] sm:$0xff] }
 0x5ec   : > { %v2124_v53 = vadd.f32 %v2123_v44, %v2104_v57  ;;  %v5384_v57 = vld [vmem:[%s12150_s6 + $0x250] sm:$0xff] }
 0x5ed   : > { %v5385_v44 = vld [vmem:[%s12150_s6 + $0x2d0] sm:$0xff] }
 0x5ee   : > { %v2144_v6 = vadd.f32 %v2143_v1, %v2124_v53  ;;  %v5386_v53 = vld [vmem:[%s12149_s5 + $0xe0] sm:$0xff]  ;;  %v5387_v1 = vld [vmem:[%s12149_s5 + $0xe8] sm:$0xff] }
 0x5ef   : > { %v2163_v13 = vpop.f32.mrf.mxu3 }
 0x5f0   : > { %v2164_v4 = vadd.f32 %v2163_v13, %v2144_v6  ;;  %v5388_v6 = vld [vmem:[%s12150_s6 + $0x248] sm:$0xff] }
 0x5f1   : > { %v2203_v5 = vpop.f32.mrf.mxu2  ;;  %v5389_v13 = vld [vmem:[%s12150_s6 + $0x2c8] sm:$0xff] }
 0x5f2   : > { %v2184_v3 = vadd.f32 %v2183_v15, %v2164_v4  ;;  %v5390_v4 = vld [vmem:[%s12149_s5 + $0x90] sm:$0xff]  ;;  %v5391_v15 = vld [vmem:[%s12149_s5 + $0x98] sm:$0xff] }
 0x5f4   : > { %v2204_v8 = vadd.f32 %v2203_v5, %v2184_v3  ;;  %v5392_v3 = vld [vmem:[%s12150_s6 + $0x240] sm:$0xff] }
 0x5f5   : > { %v5393_v5 = vld [vmem:[%s12150_s6 + $0x2c0] sm:$0xff] }
 0x600   : > { %v2223_v7 = vpop.f32.mrf.mxu0 }
 0x601   : > { %v2224_v11 = vadd.f32 %v2223_v7, %v2204_v8  ;;  %v5394_v7 = vld [vmem:[%s12149_s5 + $0x40] sm:$0xff]  ;;  %v5395_v8 = vld [vmem:[%s12149_s5 + $0x48] sm:$0xff] }
 0x607   : > { %v2243_v12 = vpop.f32.mrf.mxu3 }
 0x608   : > { %v2244_v17 = vadd.f32 %v2243_v12, %v2224_v11  ;;  %v5396_v11 = vld [vmem:[%s12150_s6 + $0x178] sm:$0xff] }
 0x609   : > { %v5397_v12 = vld [vmem:[%s12150_s6 + $0x1f8] sm:$0xff] }
 0x60a   : > { %v2246_v21 = vmax.f32 %v2244_v17, 1e-30  ;;  %v5398_v17 = vld [vmem:[%s12150_s6 + $0x238] sm:$0xff] }
 0x60c   : > { %5031 = vrcp.f32 %v2246_v21  ;;  %v2258_v20 = vand.u32 2147483648, %v2246_v21  ;;  %v2256_v25 = vand.u32 2147483647, %v2246_v21  ;;  %vm2252_vm7 = vweird.f32 %v2246_v21 }
 0x60e   : > { %v2259_v28 = vor.u32 1.1754944e-38, %v2258_v20  ;;  %vm2257_vm9 = vcmp.eq.f32.partialorder %v2256_v25, 8.507059e+37  ;;  %v5403_v20 = vld [vmem:[%s12150_s6 + $0x2b0] sm:$0xff]  ;;  %v5405_v25 = vld [vmem:[%s12150_s6 + $0x1e8] sm:$0xff] }
 0x612   : > { %v5032_v16 = vpop.eup %5031 }
 0x613   : > { %v2248_v22 = vmul.f32 %v5032_v16, %v2246_v21  ;;  %vm2253_vm6 = vweird.f32 %v5032_v16  ;;  %v5399_v21 = vld [vmem:[%s12150_s6 + $0x2b8] sm:$0xff] }
 0x614   : > { %vm2254_vm8 = vmor %vm2252_vm7, %vm2253_vm6 }
 0x615   : > { %v2249_v23 = vsub.f32 1.0, %v2248_v22  ;;  %v5401_v22 = vld [vmem:[%s12150_s6 + $0x1f0] sm:$0xff] }
 0x617   : > { %v2250_v24 = vmul.f32 %v5032_v16, %v2249_v23  ;;  %v5402_v23 = vld [vmem:[%s12150_s6 + $0x230] sm:$0xff] }
 0x619   : > { %v2251_v27 = vadd.f32 %v5032_v16, %v2250_v24  ;;  %v5404_v24 = vld [vmem:[%s12150_s6 + $0x168] sm:$0xff] }
 0x61b   : > { %v2255_v30 = vsel %vm2254_vm8, %v5032_v16, %v2251_v27  ;;  %v5400_v16 = vld [vmem:[%s12150_s6 + $0x170] sm:$0xff]  ;;  %v5407_v27 = vld [vmem:[%s12150_s6 + $0x2a8] sm:$0xff] }
 0x61c   : > { %v2260_v33 = vsel %vm2257_vm9, %v2259_v28, %v2255_v30  ;;  %v5408_v28 = vld [vmem:[%s12150_s6 + $0x160] sm:$0xff] }
 0x61d   : > { %v8847_v62 = vmul.f32 %v2260_v33, %v2004_v31  ;;  %v5409_v30 = vld [vmem:[%s12150_s6 + $0x1e0] sm:$0xff] }
 0x61e   : > { %v5410_v31 = vld [vmem:[%s12150_s6 + $0x220] sm:$0xff] }
 0x61f   : > { %4838 = vmatmul.msk.f32.vlgmr.msra.gmra.mxu1 %vm1295_vm11, %v8847_v62  ;;  %4839 = vmatmul.msk.f32.vlgmr.msra.gmra.mxu2 %vm1295_vm11, %v8847_v62  ;;  %v5411_v33 = vld [vmem:[%s12150_s6 + $0x2a0] sm:$0xff] }
 0x620   : > { %4844 = vmatmul.msk.f32.vlgmr.msrb.gmra.mxu0 %vm1295_vm11, %v8847_v62  ;;  %4845 = vmatmul.msk.f32.vlgmr.msrb.gmra.mxu3 %vm1295_vm11, %v8847_v62 }
 0x621   : > { %2356 = vmatpush.msra.mxu1 %v5360_v34  ;;  %2376 = vmatpush.msra.mxu2 %v5361_v61  ;;  %v5413_v34 = vld [vmem:[%s12150_s6 + $0x1d8] sm:$0xff] }
 0x622   : > { %2555 = vmatpush.msrb.mxu0 %v5362_v60  ;;  %2575 = vmatpush.msrb.mxu3 %v5363_v35  ;;  %v5414_v61 = vld [vmem:[%s12150_s6 + $0x218] sm:$0xff]  ;;  %v5416_v35 = vld [vmem:[%s12150_s6 + $0x150] sm:$0xff] }
 0x623   : > { %2357 = vmatpush.msra.mxu1 %v5364_v36  ;;  %2377 = vmatpush.msra.mxu2 %v5365_v37  ;;  %v5415_v60 = vld [vmem:[%s12150_s6 + $0x298] sm:$0xff]  ;;  %v5417_v36 = vld [vmem:[%s12150_s6 + $0x1d0] sm:$0xff] }
 0x624   : > { %2556 = vmatpush.msrb.mxu0 %v5366_v29  ;;  %2576 = vmatpush.msrb.mxu3 %v5367_v38  ;;  %v5418_v37 = vld [vmem:[%s12150_s6 + $0x210] sm:$0xff]  ;;  %v5420_v38 = vld [vmem:[%s12150_s6 + $0x148] sm:$0xff] }
 0x625   : > { %2358 = vmatpush.msra.mxu1 %v5368_v39  ;;  %2378 = vmatpush.msra.mxu2 %v5369_v32  ;;  %v5419_v29 = vld [vmem:[%s12150_s6 + $0x290] sm:$0xff]  ;;  %v5421_v39 = vld [vmem:[%s12150_s6 + $0x1c8] sm:$0xff] }
 0x626   : > { %2557 = vmatpush.msrb.mxu0 %v5370_v40  ;;  %2577 = vmatpush.msrb.mxu3 %v5371_v41  ;;  %v5422_v32 = vld [vmem:[%s12150_s6 + $0x208] sm:$0xff]  ;;  %v5424_v41 = vld [vmem:[%s12150_s6 + $0x140] sm:$0xff] }
 0x627   : > { %4840 = vmatmul.msk.f32.vlgmr.msrb.gmra.mxu1 %vm1295_vm11, %v8847_v62  ;;  %4841 = vmatmul.msk.f32.vlgmr.msrb.gmra.mxu2 %vm1295_vm11, %v8847_v62  ;;  %v5423_v40 = vld [vmem:[%s12150_s6 + $0x288] sm:$0xff] }
 0x628   : > { %2359 = vmatpush.msra.mxu1 %v5372_v42  ;;  %2379 = vmatpush.msra.mxu2 %v5373_v45  ;;  %v5425_v42 = vld [vmem:[%s12150_s6 + $0x1c0] sm:$0xff] }
 0x629   : > { %2558 = vmatpush.msrb.mxu0 %v5374_v46  ;;  %2578 = vmatpush.msrb.mxu3 %v5375_v47  ;;  %v5426_v45 = vld [vmem:[%s12150_s6 + $0x200] sm:$0xff]  ;;  %v5428_v47 = vld [vmem:[%s12150_s6 + $0x138] sm:$0xff] }
 0x62a   : > { %2360 = vmatpush.msra.mxu1 %v5376_v51  ;;  %2380 = vmatpush.msra.mxu2 %v5377_v48  ;;  %v5427_v46 = vld [vmem:[%s12150_s6 + $0x280] sm:$0xff]  ;;  %v5429_v51 = vld [vmem:[%s12150_s6 + $0x1b8] sm:$0xff]  ;;  %v5430_v48 = vld [vmem:[%s12150_s6 + $0x130] sm:$0xff] }
 0x62b   : > { %2559 = vmatpush.msrb.mxu0 %v5380_v43  ;;  %2579 = vmatpush.msrb.mxu3 %v5381_v49  ;;  %v5433_v43 = vld [vmem:[%s12150_s6 + $0x1a8] sm:$0xff]  ;;  %v5434_v49 = vld [vmem:[%s12150_s6 + $0x120] sm:$0xff] }
 0x62c   : > { %2436 = vmatpush.msrb.mxu1 %v5378_v52  ;;  %2456 = vmatpush.msrb.mxu2 %v5379_v54  ;;  %v5431_v52 = vld [vmem:[%s12150_s6 + $0x1b0] sm:$0xff]  ;;  %v5432_v54 = vld [vmem:[%s12150_s6 + $0x128] sm:$0xff] }
 0x62d   : > { %2560 = vmatpush.msrb.mxu0 %v5384_v57  ;;  %2580 = vmatpush.msrb.mxu3 %v5385_v44  ;;  %v5437_v57 = vld [vmem:[%s12150_s6 + $0x198] sm:$0xff]  ;;  %v5438_v44 = vld [vmem:[%s12150_s6 + $0x110] sm:$0xff] }
 0x62e   : > { %2437 = vmatpush.msrb.mxu1 %v5382_v56  ;;  %2457 = vmatpush.msrb.mxu2 %v5383_v2  ;;  %v5435_v56 = vld [vmem:[%s12150_s6 + $0x1a0] sm:$0xff]  ;;  %v5436_v2 = vld [vmem:[%s12150_s6 + $0x118] sm:$0xff] }
 0x62f   : > { %4842 = vmatmul.msk.f32.vlgmr.msra.gmra.mxu1 %vm1295_vm11, %v8847_v62  ;;  %4843 = vmatmul.msk.f32.vlgmr.msra.gmra.mxu2 %vm1295_vm11, %v8847_v62 }
 0x630   : > { %2438 = vmatpush.msrb.mxu1 %v5386_v53  ;;  %2458 = vmatpush.msrb.mxu2 %v5387_v1  ;;  %v5439_v53 = vld [vmem:[%s12150_s6 + $0x190] sm:$0xff]  ;;  %v5440_v1 = vld [vmem:[%s12150_s6 + $0x108] sm:$0xff] }
 0x631   : > { %2561 = vmatpush.msrb.mxu0 %v5388_v6  ;;  %2581 = vmatpush.msrb.mxu3 %v5389_v13  ;;  %v5441_v6 = vld [vmem:[%s12150_s6 + $0x188] sm:$0xff]  ;;  %v5442_v13 = vld [vmem:[%s12150_s6 + $0x100] sm:$0xff] }
 0x632   : > { %2439 = vmatpush.msrb.mxu1 %v5390_v4  ;;  %2459 = vmatpush.msrb.mxu2 %v5391_v15  ;;  %v5443_v4 = vld [vmem:[%s12150_s6 + $0x180] sm:$0xff]  ;;  %v5444_v15 = vld [vmem:[%s12150_s6 + $0x378] sm:$0xff] }
 0x633   : > { %2562 = vmatpush.msrb.mxu0 %v5392_v3  ;;  %2582 = vmatpush.msrb.mxu3 %v5393_v5  ;;  %v5445_v3 = vld [vmem:[%s12150_s6 + $0x3f8] sm:$0xff]  ;;  %v5446_v5 = vld [vmem:[%s12150_s6 + $0x370] sm:$0xff] }
 0x634   : > { %2440 = vmatpush.msrb.mxu1 %v5394_v7  ;;  %2460 = vmatpush.msrb.mxu2 %v5395_v8  ;;  %v5447_v7 = vld [vmem:[%s12150_s6 + $0x3f0] sm:$0xff]  ;;  %v5448_v8 = vld [vmem:[%s12150_s6 + $0x368] sm:$0xff] }
 0x635   : > { %2563 = vmatpush.msrb.mxu0 %v5398_v17  ;;  %2583 = vmatpush.msrb.mxu3 %v5399_v21  ;;  %v5451_v17 = vld [vmem:[%s12150_s6 + $0x3e0] sm:$0xff]  ;;  %v5452_v21 = vld [vmem:[%s12150_s6 + $0x358] sm:$0xff] }
 0x636   : > { %2515 = vmatpush.msra.mxu1 %v5396_v11  ;;  %2535 = vmatpush.msra.mxu2 %v5397_v12  ;;  %v5449_v11 = vld [vmem:[%s12150_s6 + $0x3e8] sm:$0xff]  ;;  %v5450_v12 = vld [vmem:[%s12150_s6 + $0x360] sm:$0xff] }
 0x637   : > { %4846 = vmatmul.msk.f32.vlgmr.msrb.gmra.mxu1 %vm1295_vm11, %v8847_v62  ;;  %4847 = vmatmul.msk.f32.vlgmr.msrb.gmra.mxu2 %vm1295_vm11, %v8847_v62  ;;  %v5412_v62 = vld [vmem:[%s12150_s6 + $0x158] sm:$0xff] }
 0x638   : > { %2516 = vmatpush.msra.mxu1 %v5400_v16  ;;  %2536 = vmatpush.msra.mxu2 %v5401_v22  ;;  %v5453_v16 = vld [vmem:[%s12150_s6 + $0x3d8] sm:$0xff]  ;;  %v5454_v22 = vld [vmem:[%s12150_s6 + $0x350] sm:$0xff] }
 0x639   : > { %2564 = vmatpush.msrb.mxu0 %v5402_v23  ;;  %2584 = vmatpush.msrb.mxu3 %v5403_v20  ;;  %v5455_v23 = vld [vmem:[%s12150_s6 + $0x3d0] sm:$0xff]  ;;  %v5456_v20 = vld [vmem:[%s12150_s6 + $0x348] sm:$0xff] }
 0x63a   : > { %2517 = vmatpush.msra.mxu1 %v5404_v24  ;;  %2537 = vmatpush.msra.mxu2 %v5405_v25  ;;  %v5457_v24 = vld [vmem:[%s12150_s6 + $0x3c8] sm:$0xff]  ;;  %v5458_v25 = vld [vmem:[%s12150_s6 + $0x340] sm:$0xff] }
 0x63b   : > { %2565 = vmatpush.msrb.mxu0 %v5406_v26  ;;  %2585 = vmatpush.msrb.mxu3 %v5407_v27  ;;  %v5459_v26 = vld [vmem:[%s12150_s6 + $0x3c0] sm:$0xff]  ;;  %v5460_v27 = vld [vmem:[%s12150_s6 + $0x338] sm:$0xff] }
 0x63c   : > { %2518 = vmatpush.msra.mxu1 %v5408_v28  ;;  %2538 = vmatpush.msra.mxu2 %v5409_v30  ;;  %v5461_v28 = vld [vmem:[%s12150_s6 + $0x3b8] sm:$0xff]  ;;  %v5462_v30 = vld [vmem:[%s12150_s6 + $0x330] sm:$0xff] }
 0x63d   : > { %2566 = vmatpush.msrb.mxu0 %v5410_v31  ;;  %2586 = vmatpush.msrb.mxu3 %v5411_v33  ;;  %v5463_v31 = vld [vmem:[%s12150_s6 + $0x3b0] sm:$0xff]  ;;  %v5464_v33 = vld [vmem:[%s12150_s6 + $0x328] sm:$0xff] }
 0x63e   : > { %2519 = vmatpush.msra.mxu1 %v5412_v62  ;;  %2539 = vmatpush.msra.mxu2 %v5413_v34  ;;  %v5465_v62 = vld [vmem:[%s12150_s6 + $0x3a8] sm:$0xff]  ;;  %v5466_v34 = vld [vmem:[%s12150_s6 + $0x320] sm:$0xff] }
 0x63f   : > { %2567 = vmatpush.msrb.mxu0 %v5414_v61  ;;  %2587 = vmatpush.msrb.mxu3 %v5415_v60  ;;  %v5467_v61 = vld [vmem:[%s12150_s6 + $0x3a0] sm:$0xff]  ;;  %v5468_v60 = vld [vmem:[%s12150_s6 + $0x318] sm:$0xff] }
 0x640   : > { %2520 = vmatpush.msra.mxu1 %v5416_v35  ;;  %2540 = vmatpush.msra.mxu2 %v5417_v36  ;;  %v5469_v35 = vld [vmem:[%s12150_s6 + $0x398] sm:$0xff]  ;;  %v5470_v36 = vld [vmem:[%s12150_s6 + $0x310] sm:$0xff] }
 0x641   : > { %2568 = vmatpush.msrb.mxu0 %v5418_v37  ;;  %2588 = vmatpush.msrb.mxu3 %v5419_v29  ;;  %v5471_v37 = vld [vmem:[%s12150_s6 + $0x390] sm:$0xff]  ;;  %v5472_v29 = vld [vmem:[%s12150_s6 + $0x308] sm:$0xff] }
 0x642   : > { %2521 = vmatpush.msra.mxu1 %v5420_v38  ;;  %2541 = vmatpush.msra.mxu2 %v5421_v39  ;;  %v5473_v38 = vld [vmem:[%s12150_s6 + $0x388] sm:$0xff]  ;;  %v5474_v39 = vld [vmem:[%s12150_s6 + $0x300] sm:$0xff] }
 0x643   : > { %2569 = vmatpush.msrb.mxu0 %v5422_v32  ;;  %2589 = vmatpush.msrb.mxu3 %v5423_v40  ;;  %v5475_v32 = vld [vmem:[%s12150_s6 + $0x380] sm:$0xff] }
 0x644   : > { %2522 = vmatpush.msra.mxu1 %v5424_v41  ;;  %2542 = vmatpush.msra.mxu2 %v5425_v42  ;;  %v5476_v42 = vld [vmem:[%s12150_s6 + $0x478] sm:$0xff] }
 0x645   : > { %2570 = vmatpush.msrb.mxu0 %v5426_v45  ;;  %2590 = vmatpush.msrb.mxu3 %v5427_v46  ;;  %v5477_v45 = vld [vmem:[%s12150_s6 + $0x470] sm:$0xff] }
 0x646   : > { %2523 = vmatpush.msra.mxu1 %v5428_v47  ;;  %2543 = vmatpush.msra.mxu2 %v5429_v51  ;;  %v5478_v51 = vld [vmem:[%s12150_s6 + $0x468] sm:$0xff] }
 0x648   : > { %2524 = vmatpush.msra.mxu1 %v5430_v48  ;;  %2544 = vmatpush.msra.mxu2 %v5431_v52  ;;  %v5479_v52 = vld [vmem:[%s12150_s6 + $0x460] sm:$0xff] }
 0x64a   : > { %2525 = vmatpush.msra.mxu1 %v5432_v54  ;;  %2545 = vmatpush.msra.mxu2 %v5433_v43  ;;  %v5480_v54 = vld [vmem:[%s12150_s6 + $0x4f8] sm:$0xff]  ;;  %v5483_v43 = vld [vmem:[%s12147_s3 + $0x108] sm:$0xff] }
 0x64c   : > { %2526 = vmatpush.msra.mxu1 %v5434_v49  ;;  %2546 = vmatpush.msra.mxu2 %v5435_v56  ;;  %v5484_v56 = vld [vmem:[%s12150_s6 + $0x450] sm:$0xff] }
 0x64e   : > { %2527 = vmatpush.msra.mxu1 %v5436_v2  ;;  %2547 = vmatpush.msra.mxu2 %v5437_v57  ;;  %v5485_v2 = vld [vmem:[%s12150_s6 + $0x4e8] sm:$0xff] }
 0x650   : > { %2528 = vmatpush.msra.mxu1 %v5438_v44  ;;  %2548 = vmatpush.msra.mxu2 %v5439_v53  ;;  %v5486_v53 = vld [vmem:[%s12147_s3 + $0xb0] sm:$0xff] }
 0x652   : > { %2529 = vmatpush.msra.mxu1 %v5440_v1  ;;  %2549 = vmatpush.msra.mxu2 %v5441_v6  ;;  %v5487_v1 = vld [vmem:[%s12150_s6 + $0x448] sm:$0xff]  ;;  %v5488_v6 = vld [vmem:[%s12150_s6 + $0x4e0] sm:$0xff] }
 0x654   : > { %2530 = vmatpush.msra.mxu1 %v5442_v13  ;;  %2550 = vmatpush.msra.mxu2 %v5443_v4 }
 0x656   : > { %2595 = vmatpush.msrb.mxu1 %v5444_v15  ;;  %2615 = vmatpush.msrb.mxu2 %v5445_v3  ;;  %v5489_v15 = vld [vmem:[%s12147_s3 + $0x58] sm:$0xff]  ;;  %v5490_v3 = vld [vmem:[%s12150_s6 + $0x440] sm:$0xff] }
 0x658   : > { %2596 = vmatpush.msrb.mxu1 %v5446_v5  ;;  %2616 = vmatpush.msrb.mxu2 %v5447_v7  ;;  %v5491_v5 = vld [vmem:[%s12150_s6 + $0x4d8] sm:$0xff]  ;;  %v5493_v7 = vld [vmem:[%s12150_s6 + $0x4d0] sm:$0xff] }
 0x65a   : > { %2597 = vmatpush.msrb.mxu1 %v5448_v8  ;;  %2617 = vmatpush.msrb.mxu2 %v5449_v11  ;;  %v5494_v8 = vld [vmem:[%s12147_s3 + $0x110] sm:$0xff]  ;;  %v5495_v11 = vld [vmem:[%s12147_s3] sm:$0xff] }
 0x65c   : > { %2598 = vmatpush.msrb.mxu1 %v5450_v12  ;;  %2618 = vmatpush.msrb.mxu2 %v5451_v17  ;;  %v5496_v12 = vld [vmem:[%s12150_s6 + $0x430] sm:$0xff]  ;;  %v5497_v17 = vld [vmem:[%s12150_s6 + $0x4c8] sm:$0xff] }
 0x65e   : > { %2599 = vmatpush.msrb.mxu1 %v5452_v21  ;;  %2619 = vmatpush.msrb.mxu2 %v5453_v16 }
 0x660   : > { %2600 = vmatpush.msrb.mxu1 %v5454_v22  ;;  %2620 = vmatpush.msrb.mxu2 %v5455_v23  ;;  %v5498_v23 = vld [vmem:[%s12147_s3 + $0xb8] sm:$0xff] }
 0x662   : > { %2601 = vmatpush.msrb.mxu1 %v5456_v20  ;;  %2621 = vmatpush.msrb.mxu2 %v5457_v24  ;;  %v5499_v20 = vld [vmem:[%s12147_s3 + $0x118] sm:$0xff]  ;;  %v5500_v24 = vld [vmem:[%s12150_s6 + $0x428] sm:$0xff] }
 0x664   : > { %2602 = vmatpush.msrb.mxu1 %v5458_v25  ;;  %2622 = vmatpush.msrb.mxu2 %v5459_v26  ;;  %v5503_v25 = vld [vmem:[%s12150_s6 + $0x4b8] sm:$0xff]  ;;  %v5504_v26 = vld [vmem:[%s12147_s3 + $0x60] sm:$0xff] }
 0x666   : > { %2603 = vmatpush.msrb.mxu1 %v5460_v27  ;;  %2623 = vmatpush.msrb.mxu2 %v5461_v28  ;;  %v5505_v27 = vld [vmem:[%s12147_s3 + $0xc0] sm:$0xff]  ;;  %v5506_v28 = vld [vmem:[%s12150_s6 + $0x418] sm:$0xff] }
 0x668   : > { %2604 = vmatpush.msrb.mxu1 %v5462_v30  ;;  %2624 = vmatpush.msrb.mxu2 %v5463_v31  ;;  %v5507_v30 = vld [vmem:[%s12150_s6 + $0x4b0] sm:$0xff]  ;;  %v5508_v31 = vld [vmem:[%s12147_s3 + $0x8] sm:$0xff] }
 0x66a   : > { %2605 = vmatpush.msrb.mxu1 %v5464_v33  ;;  %2625 = vmatpush.msrb.mxu2 %v5465_v62  ;;  %v5509_v33 = vld [vmem:[%s12147_s3 + $0x68] sm:$0xff] }
 0x66c   : > { %2606 = vmatpush.msrb.mxu1 %v5466_v34  ;;  %2626 = vmatpush.msrb.mxu2 %v5467_v61  ;;  %v5510_v34 = vld [vmem:[%s12150_s6 + $0x410] sm:$0xff]  ;;  %v5511_v61 = vld [vmem:[%s12150_s6 + $0x4a8] sm:$0xff] }
 0x66e   : > { %2607 = vmatpush.msrb.mxu1 %v5468_v60  ;;  %2627 = vmatpush.msrb.mxu2 %v5469_v35  ;;  %v5512_v60 = vld [vmem:[%s12147_s3 + $0x120] sm:$0xff]  ;;  %v5513_v35 = vld [vmem:[%s12147_s3 + $0x10] sm:$0xff] }
 0x670   : > { %2608 = vmatpush.msrb.mxu1 %v5470_v36  ;;  %2628 = vmatpush.msrb.mxu2 %v5471_v37  ;;  %v5514_v36 = vld [vmem:[%s12150_s6 + $0x408] sm:$0xff]  ;;  %v5515_v37 = vld [vmem:[%s12150_s6 + $0x4a0] sm:$0xff] }
 0x672   : > { %2609 = vmatpush.msrb.mxu1 %v5472_v29  ;;  %2629 = vmatpush.msrb.mxu2 %v5473_v38  ;;  %v5516_v38 = vld [vmem:[%s12147_s3 + $0xc8] sm:$0xff] }
 0x674   : > { %2610 = vmatpush.msrb.mxu1 %v5474_v39  ;;  %2630 = vmatpush.msrb.mxu2 %v5475_v32  ;;  %v5517_v39 = vld [vmem:[%s12150_s6 + $0x400] sm:$0xff]  ;;  %v5518_v32 = vld [vmem:[%s12150_s6 + $0x498] sm:$0xff] }
 0x69c   : > { %v2282_v40 = vpop.f32.mrf.mxu1 }
 0x69d   : > { %v2465_v41 = vmul.f32 %v8527_v58, %v2282_v40  ;;  %v2402_v49 = vpop.f32.mrf.mxu0 }
 0x69e   : > { %v2471_v4 = vmul.f32 %v8580_v19, %v2402_v49  ;;  %v5533_v49 = vld [vmem:[%s12148_s4 + $0xe8] sm:$0xff] }
 0x69f   : > { %2491 = vmatmul.f32.vlgmr.msra.gmra.mxu0 %v2465_v41  ;;  %v5520_v41 = vld [vmem:[%s12150_s6 + $0x490] sm:$0xff] }
 0x6a0   : > { %2635 = vmatpush.msra.mxu0 %v5476_v42  ;;  %v5521_v42 = vld [vmem:[%s12147_s3 + $0x148] sm:$0xff] }
 0x6a2   : > { %2636 = vmatpush.msra.mxu0 %v5477_v45  ;;  %v2302_v46 = vpop.f32.mrf.mxu2  ;;  %v5522_v45 = vld [vmem:[%s12147_s3 + $0x18] sm:$0xff] }
 0x6a3   : > { %v2466_v47 = vmul.f32 %v8529_v9, %v2302_v46  ;;  %v5481_v9 = vld [vmem:[%s12150_s6 + $0x458] sm:$0xff]  ;;  %v2422_v19 = vpop.f32.mrf.mxu3  ;;  %v5523_v46 = vld [vmem:[%s12150_s6 + $0x488] sm:$0xff] }
 0x6a4   : > { %2637 = vmatpush.msra.mxu0 %v5478_v51  ;;  %v2322_v58 = vpop.f32.mrf.mxu1  ;;  %v2472_v16 = vmul.f32 %v8586_v18, %v2422_v19  ;;  %v5501_v18 = vld [vmem:[%s12150_s6 + $0x4c0] sm:$0xff]  ;;  %v5547_v19 = vld [vmem:[%s12148_s4 + $0xb0] sm:$0xff] }
 0x6a5   : > { %v2467_v48 = vmul.f32 %v8532_v63, %v2322_v58  ;;  %2511 = vmatmul.f32.vlgmr.msra.gmra.mxu3 %v2466_v47  ;;  %v5482_v63 = vld [vmem:[%s12150_s6 + $0x4f0] sm:$0xff]  ;;  %v5525_v58 = vld [vmem:[%s12150_s6 + $0x480] sm:$0xff] }
 0x6a6   : > { %2638 = vmatpush.msra.mxu0 %v5479_v52  ;;  %2655 = vmatpush.msra.mxu3 %v5480_v54  ;;  %v5524_v47 = vld [vmem:[%s12147_s3 + $0xf0] sm:$0xff]  ;;  %v5529_v54 = vld [vmem:[%s12148_s4 + $0xf8] sm:$0xff] }
 0x6a7   : > { %2531 = vmatmul.f32.vlgmr.msra.gmra.mxu1 %v2467_v48  ;;  %v5526_v48 = vld [vmem:[%s12147_s3 + $0x98] sm:$0xff]  ;;  %v5527_v52 = vld [vmem:[%s12147_s3 + $0x150] sm:$0xff] }
 0x6a8   : > { %2639 = vmatpush.msra.mxu0 %v5481_v9  ;;  %2656 = vmatpush.msra.mxu3 %v5482_v63  ;;  %v5530_v9 = vld [vmem:[%s12147_s3 + $0xf8] sm:$0xff]  ;;  %v5531_v63 = vld [vmem:[%s12148_s4 + $0xf0] sm:$0xff] }
 0x6a9   : > { %2749 = vmatpush.msra.mxu1 %v5483_v43  ;;  %v5532_v43 = vld [vmem:[%s12147_s3 + $0xa0] sm:$0xff] }
 0x6aa   : > { %2640 = vmatpush.msra.mxu0 %v5484_v56  ;;  %2657 = vmatpush.msra.mxu3 %v5485_v2  ;;  %v2342_v57 = vpop.f32.mrf.mxu2  ;;  %v5534_v56 = vld [vmem:[%s12147_s3 + $0x48] sm:$0xff]  ;;  %v5535_v2 = vld [vmem:[%s12148_s4 + $0xe0] sm:$0xff] }
 0x6ab   : > { %v2468_v44 = vmul.f32 %v8538_v50, %v2342_v57  ;;  %2750 = vmatpush.msra.mxu1 %v5486_v53  ;;  %v5536_v57 = vld [vmem:[%s12148_s4 + $0x178] sm:$0xff]  ;;  %v5538_v53 = vld [vmem:[%s12148_s4 + $0x170] sm:$0xff] }
 0x6ac   : > { %2641 = vmatpush.msra.mxu0 %v5487_v1  ;;  %2658 = vmatpush.msra.mxu3 %v5488_v6  ;;  %v2362_v13 = vpop.f32.mrf.mxu1  ;;  %v5539_v1 = vld [vmem:[%s12148_s4 + $0xd0] sm:$0xff]  ;;  %v5540_v6 = vld [vmem:[%s12148_s4 + $0x168] sm:$0xff] }
 0x6ad   : > { %v2469_v50 = vmul.f32 %v8566_v10, %v2362_v13  ;;  %2551 = vmatmul.f32.vlgmr.msra.gmra.mxu2 %v2468_v44  ;;  %2751 = vmatpush.msra.mxu1 %v5489_v15  ;;  %v5492_v10 = vld [vmem:[%s12150_s6 + $0x438] sm:$0xff]  ;;  %v5541_v13 = vld [vmem:[%s12148_s4 + $0xc8] sm:$0xff] }
 0x6ae   : > { %2642 = vmatpush.msra.mxu0 %v5490_v3  ;;  %2659 = vmatpush.msra.mxu3 %v5491_v5  ;;  %v5537_v44 = vld [vmem:[%s12148_s4 + $0xd8] sm:$0xff]  ;;  %v5546_v5 = vld [vmem:[%s12148_s4 + $0x150] sm:$0xff] }
 0x6af   : > { %2571 = vmatmul.f32.vlgmr.msrb.gmra.mxu0 %v2469_v50  ;;  %2611 = vmatmul.f32.vlgmr.msrb.gmra.mxu1 %v2471_v4  ;;  %v5542_v4 = vld [vmem:[%s12148_s4 + $0x160] sm:$0xff]  ;;  %v5544_v15 = vld [vmem:[%s12148_s4 + $0x158] sm:$0xff] }
 0x6b0   : > { %2643 = vmatpush.msra.mxu0 %v5492_v10  ;;  %2660 = vmatpush.msra.mxu3 %v5493_v7  ;;  %v5543_v50 = vld [vmem:[%s12148_s4 + $0xc0] sm:$0xff]  ;;  %v5545_v3 = vld [vmem:[%s12148_s4 + $0xb8] sm:$0xff]  ;;  %v5548_v10 = vld [vmem:[%s12148_s4 + $0x148] sm:$0xff] }
 0x6b1   : > { %2769 = vmatpush.msra.mxu2 %v5494_v8  ;;  %2752 = vmatpush.msra.mxu1 %v5495_v11  ;;  %v5549_v7 = vld [vmem:[%s12148_s4 + $0xa8] sm:$0xff]  ;;  %v5550_v8 = vld [vmem:[%s12148_s4 + $0x140] sm:$0xff] }
 0x6b2   : > { %2644 = vmatpush.msra.mxu0 %v5496_v12  ;;  %2661 = vmatpush.msra.mxu3 %v5497_v17  ;;  %v2382_v21 = vpop.f32.mrf.mxu2  ;;  %v5551_v11 = vld [vmem:[%s12148_s4 + $0xa0] sm:$0xff]  ;;  %v5552_v12 = vld [vmem:[%s12148_s4 + $0x138] sm:$0xff] }
 0x6b3   : > { %v2470_v22 = vmul.f32 %v8574_v14, %v2382_v21  ;;  %2770 = vmatpush.msra.mxu2 %v5498_v23  ;;  %2789 = vmatpush.msrb.mxu1 %v5499_v20  ;;  %v5502_v14 = vld [vmem:[%s12150_s6 + $0x420] sm:$0xff]  ;;  %v5553_v17 = vld [vmem:[%s12148_s4 + $0x98] sm:$0xff]  ;;  %v5554_v21 = vld [vmem:[%s12148_s4 + $0x130] sm:$0xff] }
 0x6b4   : > { %2645 = vmatpush.msra.mxu0 %v5500_v24  ;;  %2662 = vmatpush.msra.mxu3 %v5501_v18  ;;  %v2442_v62 = vpop.f32.mrf.mxu1  ;;  %v5557_v23 = vld [vmem:[%s12148_s4 + $0x88] sm:$0xff]  ;;  %v5558_v20 = vld [vmem:[%s12148_s4 + $0x120] sm:$0xff]  ;;  %v5560_v18 = vld [vmem:[%s12148_s4 + $0x118] sm:$0xff] }
 0x6b5   : > { %2591 = vmatmul.f32.vlgmr.msrb.gmra.mxu3 %v2470_v22  ;;  %2631 = vmatmul.f32.vlgmr.msrb.gmra.mxu2 %v2472_v16  ;;  %v2473_v29 = vmul.f32 %v8705_v59, %v2442_v62  ;;  %v5519_v59 = vld [vmem:[%s12147_s3 + $0x70] sm:$0xff]  ;;  %v5556_v22 = vld [vmem:[%s12148_s4 + $0x128] sm:$0xff]  ;;  %v5559_v24 = vld [vmem:[%s12148_s4 + $0x80] sm:$0xff] }
 0x6b6   : > { %2646 = vmatpush.msra.mxu0 %v5502_v14  ;;  %2663 = vmatpush.msra.mxu3 %v5503_v25  ;;  %v5555_v16 = vld [vmem:[%s12148_s4 + $0x90] sm:$0xff]  ;;  %v5562_v25 = vld [vmem:[%s12148_s4 + $0x108] sm:$0xff] }
 0x6b7   : > { %2771 = vmatpush.msra.mxu2 %v5504_v26  ;;  %2790 = vmatpush.msrb.mxu1 %v5505_v27  ;;  %v5561_v14 = vld [vmem:[%s12148_s4 + $0x110] sm:$0xff]  ;;  %v5563_v26 = vld [vmem:[%s12148_s4 + $0x100] sm:$0xff]  ;;  %v4825_v27 = vld [vmem:[%s6541_s10 + $0xa8] sm:$0xff] }
 0x6b8   : > { %2647 = vmatpush.msra.mxu0 %v5506_v28  ;;  %2664 = vmatpush.msra.mxu3 %v5507_v30  ;;  %v1999_v28 = vadd.f32 %v4825_v27, %v8843_v55  ;;  %v5578_v27 = vld [vmem:[%s12147_s3 + $0x140] sm:$0xff] }
 0x6b9   : > { %2772 = vmatpush.msra.mxu2 %v5508_v31  ;;  %2791 = vmatpush.msrb.mxu1 %v5509_v33 }
 0x6ba   : > { %2648 = vmatpush.msra.mxu0 %v5510_v34  ;;  %2665 = vmatpush.msra.mxu3 %v5511_v61  ;;  %v2462_v40 = vpop.f32.mrf.mxu2  ;;  %v4848_v30 = vmul.f32 -1.442695, %v1999_v28  ;;  %v5579_v28 = vld [vmem:[%s12147_s3 + $0x138] sm:$0xff] }
 0x6bb   : > { %2809 = vmatpush.msrb.mxu2 %v5512_v60  ;;  %2792 = vmatpush.msrb.mxu1 %v5513_v35  ;;  %v2474_v51 = vmul.f32 %v8710_v0, %v2462_v40  ;;  %v5528_v0 = vld [vmem:[%s12147_s3 + $0x40] sm:$0xff] }
 0x6bc   : > { %2649 = vmatpush.msra.mxu0 %v5514_v36  ;;  %2666 = vmatpush.msra.mxu3 %v5515_v37  ;;  %5033 = vpow2.f32 %v4848_v30  ;;  %v5580_v30 = vld [vmem:[%s12148_s4 + $0x2e0] sm:$0xff] }
 0x6bd   : > { %2810 = vmatpush.msrb.mxu2 %v5516_v38 }
 0x6be   : > { %2650 = vmatpush.msra.mxu0 %v5517_v39  ;;  %2667 = vmatpush.msra.mxu3 %v5518_v32 }
 0x6bf   : > { %2651 = vmatmul.f32.vlgmr.msra.gmra.mxu0 %v2473_v29  ;;  %2811 = vmatpush.msrb.mxu2 %v5519_v59 }
 0x6c0   : > { %2668 = vmatpush.msra.mxu3 %v5520_v41  ;;  %2909 = vmatpush.msrb.mxu0 %v5521_v42 }
 0x6c1   : > { %2812 = vmatpush.msrb.mxu2 %v5522_v45 }
 0x6c2   : > { %2669 = vmatpush.msra.mxu3 %v5523_v46  ;;  %2910 = vmatpush.msrb.mxu0 %v5524_v47  ;;  %v5034_v31 = vpop.eup %5033 }
 0x6c3   : > { %v2678_v33 = vadd.f32 1.0, %v5034_v31  ;;  %v5581_v31 = vld [vmem:[%s12148_s4 + $0x360] sm:$0xff] }
 0x6c4   : > { %2670 = vmatpush.msra.mxu3 %v5525_v58  ;;  %2911 = vmatpush.msrb.mxu0 %v5526_v48 }
 0x6c5   : > { %2671 = vmatmul.f32.vlgmr.msra.gmra.mxu3 %v2474_v51  ;;  %5035 = vrcp.f32 %v2678_v33  ;;  %v2690_v58 = vand.u32 2147483648, %v2678_v33  ;;  %vm2684_vm12 = vweird.f32 %v2678_v33  ;;  %v2688_v48 = vand.u32 2147483647, %v2678_v33 }
 0x6c6   : > { %2929 = vmatpush.msrb.mxu3 %v5527_v52  ;;  %2912 = vmatpush.msrb.mxu0 %v5528_v0 }
 0x6c7   : > { %vm2689_vm14 = vcmp.eq.f32.partialorder %v2688_v48, 8.507059e+37  ;;  %v5604_v48 = vld [vmem:[%s12147_s3 + $0x50] sm:$0xff] }
 0x6c8   : > { %3034 = vmatpush.msra.mxu0 %v5529_v54  ;;  %2930 = vmatpush.msrb.mxu3 %v5530_v9 }
 0x6ca   : > { %3035 = vmatpush.msra.mxu0 %v5531_v63  ;;  %2931 = vmatpush.msrb.mxu3 %v5532_v43  ;;  %v2691_v63 = vor.u32 1.1754944e-38, %v2690_v58  ;;  %v5603_v58 = vld [vmem:[%s12148_s4 + $0x338] sm:$0xff] }
 0x6cb   : > { %v5036_v37 = vpop.eup %5035 }
 0x6cc   : > { %3036 = vmatpush.msra.mxu0 %v5533_v49  ;;  %2932 = vmatpush.msrb.mxu3 %v5534_v56  ;;  %v2680_v38 = vmul.f32 %v5036_v37, %v2678_v33  ;;  %vm2685_vm10 = vweird.f32 %v5036_v37  ;;  %v5582_v33 = vld [vmem:[%s12147_s3 + $0xe8] sm:$0xff] }
 0x6cd   : > { %vm2686_vm13 = vmor %vm2684_vm12, %vm2685_vm10 }
 0x6ce   : > { %3037 = vmatpush.msra.mxu0 %v5535_v2  ;;  %3054 = vmatpush.msra.mxu3 %v5536_v57  ;;  %v2681_v41 = vsub.f32 1.0, %v2680_v38  ;;  %v5591_v38 = vld [vmem:[%s12147_s3 + $0x30] sm:$0xff] }
 0x6d0   : > { %3038 = vmatpush.msra.mxu0 %v5537_v44  ;;  %3055 = vmatpush.msra.mxu3 %v5538_v53  ;;  %v2682_v45 = vmul.f32 %v5036_v37, %v2681_v41  ;;  %v5596_v41 = vld [vmem:[%s12147_s3 + $0x100] sm:$0xff] }
 0x6d2   : > { %3039 = vmatpush.msra.mxu0 %v5539_v1  ;;  %3056 = vmatpush.msra.mxu3 %v5540_v6  ;;  %v2683_v51 = vadd.f32 %v5036_v37, %v2682_v45  ;;  %v5599_v45 = vld [vmem:[%s12148_s4 + $0x340] sm:$0xff] }
 0x6d4   : > { %3040 = vmatpush.msra.mxu0 %v5541_v13  ;;  %3057 = vmatpush.msra.mxu3 %v5542_v4  ;;  %v2687_v54 = vsel %vm2686_vm13, %v5036_v37, %v2683_v51  ;;  %v5589_v37 = vld [vmem:[%s12148_s4 + $0x350] sm:$0xff]  ;;  %v5602_v51 = vld [vmem:[%s12148_s4 + $0x2b8] sm:$0xff] }
 0x6d5   : > { %v2692_v49 = vsel %vm2689_vm14, %v2691_v63, %v2687_v54  ;;  %v5607_v54 = vld [vmem:[%s12148_s4 + $0x2b0] sm:$0xff] }
 0x6d6   : > { %3041 = vmatpush.msra.mxu0 %v5543_v50  ;;  %3058 = vmatpush.msra.mxu3 %v5544_v15  ;;  %v5609_v63 = vld [vmem:[%s12148_s4 + $0x330] sm:$0xff] }
 0x6d8   : > { %3042 = vmatpush.msra.mxu0 %v5545_v3  ;;  %3059 = vmatpush.msra.mxu3 %v5546_v5 }
 0x6da   : > { %3043 = vmatpush.msra.mxu0 %v5547_v19  ;;  %3060 = vmatpush.msra.mxu3 %v5548_v10 }
 0x6dc   : > { %3044 = vmatpush.msra.mxu0 %v5549_v7  ;;  %3061 = vmatpush.msra.mxu3 %v5550_v8  ;;  %v5564_v8 = vld [vmem:[%s12147_s3 + $0x130] sm:$0xff] }
 0x6de   : > { %3045 = vmatpush.msra.mxu0 %v5551_v11  ;;  %3062 = vmatpush.msra.mxu3 %v5552_v12  ;;  %v5565_v11 = vld [vmem:[%s12147_s3 + $0x128] sm:$0xff]  ;;  %v5566_v12 = vld [vmem:[%s12148_s4 + $0x2f8] sm:$0xff] }
 0x6e0   : > { %3046 = vmatpush.msra.mxu0 %v5553_v17  ;;  %3063 = vmatpush.msra.mxu3 %v5554_v21  ;;  %v5567_v17 = vld [vmem:[%s12148_s4 + $0x378] sm:$0xff] }
 0x6e1   : > { %v5568_v21 = vld [vmem:[%s12147_s3 + $0xd8] sm:$0xff] }
 0x6e2   : > { %3047 = vmatpush.msra.mxu0 %v5555_v16  ;;  %3064 = vmatpush.msra.mxu3 %v5556_v22  ;;  %v5569_v16 = vld [vmem:[%s12147_s3 + $0xd0] sm:$0xff] }
 0x6e3   : > { %v5570_v22 = vld [vmem:[%s12148_s4 + $0x2f0] sm:$0xff] }
 0x6e4   : > { %3048 = vmatpush.msra.mxu0 %v5557_v23  ;;  %3065 = vmatpush.msra.mxu3 %v5558_v20  ;;  %v5571_v23 = vld [vmem:[%s12148_s4 + $0x370] sm:$0xff]  ;;  %v5572_v20 = vld [vmem:[%s12147_s3 + $0x80] sm:$0xff] }
 0x6e6   : > { %3049 = vmatpush.msra.mxu0 %v5559_v24  ;;  %3066 = vmatpush.msra.mxu3 %v5560_v18  ;;  %v5573_v24 = vld [vmem:[%s12147_s3 + $0x78] sm:$0xff]  ;;  %v5574_v18 = vld [vmem:[%s12148_s4 + $0x2e8] sm:$0xff] }
 0x6e8   : > { %3067 = vmatpush.msra.mxu3 %v5561_v14  ;;  %v5575_v14 = vld [vmem:[%s12148_s4 + $0x368] sm:$0xff] }
 0x6ea   : > { %3068 = vmatpush.msra.mxu3 %v5562_v25  ;;  %v5576_v25 = vld [vmem:[%s12147_s3 + $0x28] sm:$0xff] }
 0x6ec   : > { %3069 = vmatpush.msra.mxu3 %v5563_v26  ;;  %v5577_v26 = vld [vmem:[%s12147_s3 + $0x20] sm:$0xff] }
 0x71c   : > { %v2492_v34 = vpop.f32.mrf.mxu0 }
 0x724   : > { %v2532_v60 = vpop.f32.mrf.mxu1 }
 0x728   : > { %v2512_v62 = vpop.f32.mrf.mxu3 }
 0x729   : > { %v2513_v61 = vadd.f32 %v2512_v62, %v2492_v34  ;;  %v5583_v62 = vld [vmem:[%s12147_s3 + $0xe0] sm:$0xff]  ;;  %v5584_v34 = vld [vmem:[%s12148_s4 + $0x2d8] sm:$0xff] }
 0x72b   : > { %v2533_v36 = vadd.f32 %v2532_v60, %v2513_v61  ;;  %v5585_v61 = vld [vmem:[%s12148_s4 + $0x358] sm:$0xff]  ;;  %v5586_v60 = vld [vmem:[%s12147_s3 + $0x90] sm:$0xff] }
 0x72c   : > { %v2572_v39 = vpop.f32.mrf.mxu0  ;;  %v2612_v55 = vpop.f32.mrf.mxu1 }
 0x730   : > { %v2552_v35 = vpop.f32.mrf.mxu2 }
 0x731   : > { %v2553_v29 = vadd.f32 %v2552_v35, %v2533_v36  ;;  %v5587_v35 = vld [vmem:[%s12147_s3 + $0x88] sm:$0xff]  ;;  %v5588_v36 = vld [vmem:[%s12148_s4 + $0x2d0] sm:$0xff] }
 0x733   : > { %v2573_v59 = vadd.f32 %v2572_v39, %v2553_v29  ;;  %v5590_v29 = vld [vmem:[%s12147_s3 + $0x38] sm:$0xff] }
 0x734   : > { %v5592_v39 = vld [vmem:[%s12147_s3 + $0x158] sm:$0xff] }
 0x738   : > { %v2592_v32 = vpop.f32.mrf.mxu3  ;;  %v2632_v46 = vpop.f32.mrf.mxu2 }
 0x739   : > { %v2593_v40 = vadd.f32 %v2592_v32, %v2573_v59  ;;  %v5593_v32 = vld [vmem:[%s12148_s4 + $0x78] sm:$0xff]  ;;  %v5594_v59 = vld [vmem:[%s12148_s4 + $0x2c8] sm:$0xff] }
 0x73b   : > { %v2613_v42 = vadd.f32 %v2612_v55, %v2593_v40  ;;  %v5595_v40 = vld [vmem:[%s12148_s4 + $0x348] sm:$0xff]  ;;  %v5597_v55 = vld [vmem:[%s12148_s4 + $0x70] sm:$0xff] }
 0x73c   : > { %v2652_v52 = vpop.f32.mrf.mxu0 }
 0x73d   : > { %v2633_v47 = vadd.f32 %v2632_v46, %v2613_v42  ;;  %v5598_v42 = vld [vmem:[%s12148_s4 + $0x2c0] sm:$0xff]  ;;  %v5600_v46 = vld [vmem:[%s12147_s3 + $0xa8] sm:$0xff] }
 0x73f   : > { %v2653_v0 = vadd.f32 %v2652_v52, %v2633_v47  ;;  %v5601_v47 = vld [vmem:[%s12148_s4 + $0x68] sm:$0xff]  ;;  %v5605_v52 = vld [vmem:[%s12148_s4 + $0x60] sm:$0xff] }
 0x748   : > { %v2672_v9 = vpop.f32.mrf.mxu3 }
 0x749   : > { %v2673_v43 = vadd.f32 %v2672_v9, %v2653_v0  ;;  %v5606_v0 = vld [vmem:[%s12148_s4 + $0x1f8] sm:$0xff] }
 0x74a   : > { %v5608_v9 = vld [vmem:[%s12148_s4 + $0x58] sm:$0xff] }
 0x74b   : > { %v2694_v56 = vmul.f32 %v2692_v49, %v2673_v43  ;;  %v5611_v49 = vld [vmem:[%s12148_s4 + $0x2a8] sm:$0xff] }
 0x74d   : > { %v9493_v2 = vsub.f32 %v2673_v43, %v2694_v56  ;;  %4849 = vst.msk [vmem:[%s6543_s12 + $0x8] sm:$0xff] %vm778_vm1, %v2694_v56  ;;  %v5610_v43 = vld [vmem:[%s12148_s4 + $0x1f0] sm:$0xff] }
 0x74e   : > { %v5612_v56 = vld [vmem:[%s12148_s4 + $0x50] sm:$0xff] }
 0x74f   : > { %4850 = vst.msk [vmem:[%s6545_s13 + $0x8] sm:$0xff] %vm778_vm1, %v9493_v2  ;;  %v2714_v57 = vsel %vm778_vm1, %v9493_v2, 0.0 }
 0x750   : > { %2715 = vadd.xlane.f32.xlu0 %v2714_v57  ;;  %v5613_v57 = vld [vmem:[%s12148_s4 + $0x328] sm:$0xff] }
 0x7c3   : > { %v2716_v44 = vpop.xlane.xlu0 %2715 }
 0x7c4   : > { %vm2717_vm15 = vcmp.eq.f32.partialorder %v2716_v44, 0.0 }
 0x7c5   : > { %v2718_v53 = vsel %vm2717_vm15, 1.0, %v2716_v44  ;;  %v5614_v44 = vld [vmem:[%s12148_s4 + $0x1e8] sm:$0xff] }
 0x7c6   : > { %5037 = vrcp.f32 %v2718_v53  ;;  %v2730_v4 = vand.u32 2147483648, %v2718_v53  ;;  %v2728_v15 = vand.u32 2147483647, %v2718_v53  ;;  %vm2724_vm2 = vweird.f32 %v2718_v53 }
 0x7c8   : > { %v2731_v5 = vor.u32 1.1754944e-38, %v2730_v4  ;;  %vm2729_vm4 = vcmp.eq.f32.partialorder %v2728_v15, 8.507059e+37  ;;  %v5619_v4 = vld [vmem:[%s12148_s4 + $0x40] sm:$0xff]  ;;  %v5621_v15 = vld [vmem:[%s12148_s4 + $0x290] sm:$0xff] }
 0x7cc   : > { %v5038_v1 = vpop.eup %5037 }
 0x7cd   : > { %v2720_v6 = vmul.f32 %v5038_v1, %v2718_v53  ;;  %vm2725_vm0 = vweird.f32 %v5038_v1  ;;  %v5615_v53 = vld [vmem:[%s12148_s4 + $0x2a0] sm:$0xff] }
 0x7ce   : > { %vm2726_vm3 = vmor %vm2724_vm2, %vm2725_vm0 }
 0x7cf   : > { %v2721_v13 = vsub.f32 1.0, %v2720_v6  ;;  %v5617_v6 = vld [vmem:[%s12148_s4 + $0x320] sm:$0xff] }
 0x7d1   : > { %v2722_v50 = vmul.f32 %v5038_v1, %v2721_v13  ;;  %v5618_v13 = vld [vmem:[%s12148_s4 + $0x298] sm:$0xff] }
 0x7d3   : > { %v2723_v3 = vadd.f32 %v5038_v1, %v2722_v50  ;;  %v5620_v50 = vld [vmem:[%s12148_s4 + $0x1e0] sm:$0xff] }
 0x7d5   : > { %v2727_v19 = vsel %vm2726_vm3, %v5038_v1, %v2723_v3  ;;  %v5616_v1 = vld [vmem:[%s12148_s4 + $0x48] sm:$0xff]  ;;  %v5622_v3 = vld [vmem:[%s12148_s4 + $0x318] sm:$0xff] }
 0x7d6   : > { %v2732_v10 = vsel %vm2729_vm4, %v2731_v5, %v2727_v19  ;;  %v5623_v5 = vld [vmem:[%s12148_s4 + $0x38] sm:$0xff] }
 0x7d7   : > { %v9503_v7 = vmul.f32 %v2732_v10, %v9493_v2  ;;  %v5624_v19 = vld [vmem:[%s12148_s4 + $0x1d8] sm:$0xff]  ;;  %v5625_v10 = vld [vmem:[%s12148_s4 + $0x288] sm:$0xff] }
 0x7d9   : > { %4863 = vmatmul.msk.f32.vlgmr.msra.gmra.mxu1 %vm778_vm1, %v9503_v7  ;;  %4864 = vmatmul.msk.f32.vlgmr.msra.gmra.mxu2 %vm778_vm1, %v9503_v7 }
 0x7da   : > { %4871 = vmatmul.msk.f32.vlgmr.msrb.gmra.mxu0 %vm778_vm1, %v9503_v7  ;;  %4872 = vmatmul.msk.f32.vlgmr.msrb.gmra.mxu3 %vm778_vm1, %v9503_v7 }
 0x7db   : > { %2849 = vmatpush.msra.mxu2 %v5564_v8  ;;  %2829 = vmatpush.msra.mxu1 %v5565_v11  ;;  %v5627_v8 = vld [vmem:[%s12148_s4 + $0x30] sm:$0xff] }
 0x7dc   : > { %3114 = vmatpush.msrb.mxu0 %v5566_v12  ;;  %3134 = vmatpush.msrb.mxu3 %v5567_v17  ;;  %v5628_v11 = vld [vmem:[%s12148_s4 + $0x1d0] sm:$0xff]  ;;  %v5629_v12 = vld [vmem:[%s12148_s4 + $0x280] sm:$0xff]  ;;  %v5630_v17 = vld [vmem:[%s12148_s4 + $0x308] sm:$0xff] }
 0x7dd   : > { %2850 = vmatpush.msra.mxu2 %v5568_v21  ;;  %2830 = vmatpush.msra.mxu1 %v5569_v16  ;;  %v5631_v21 = vld [vmem:[%s12148_s4 + $0x28] sm:$0xff] }
 0x7de   : > { %3115 = vmatpush.msrb.mxu0 %v5570_v22  ;;  %3135 = vmatpush.msrb.mxu3 %v5571_v23  ;;  %v5632_v16 = vld [vmem:[%s12148_s4 + $0x1c8] sm:$0xff]  ;;  %v5633_v22 = vld [vmem:[%s12148_s4 + $0x300] sm:$0xff] }
 0x7df   : > { %2851 = vmatpush.msra.mxu2 %v5572_v20  ;;  %2831 = vmatpush.msra.mxu1 %v5573_v24  ;;  %v5634_v23 = vld [vmem:[%s12148_s4 + $0x20] sm:$0xff]  ;;  %v5636_v24 = vld [vmem:[%s12148_s4 + $0x18] sm:$0xff] }
 0x7e0   : > { %3116 = vmatpush.msrb.mxu0 %v5574_v18  ;;  %3136 = vmatpush.msrb.mxu3 %v5575_v14  ;;  %v5635_v20 = vld [vmem:[%s12148_s4 + $0x1c0] sm:$0xff]  ;;  %v5637_v18 = vld [vmem:[%s12148_s4 + $0x1b8] sm:$0xff]  ;;  %v5638_v14 = vld [vmem:[%s12148_s4 + $0x10] sm:$0xff] }
 0x7e1   : > { %4865 = vmatmul.msk.f32.vlgmr.msrb.gmra.mxu1 %vm778_vm1, %v9503_v7  ;;  %4866 = vmatmul.msk.f32.vlgmr.msrb.gmra.mxu2 %vm778_vm1, %v9503_v7 }
 0x7e2   : > { %2852 = vmatpush.msra.mxu2 %v5576_v25  ;;  %2832 = vmatpush.msra.mxu1 %v5577_v26  ;;  %v5639_v25 = vld [vmem:[%s12148_s4 + $0x1b0] sm:$0xff]  ;;  %v5640_v26 = vld [vmem:[%s12148_s4 + $0x8] sm:$0xff] }
 0x7e3   : > { %3117 = vmatpush.msrb.mxu0 %v5580_v30  ;;  %3137 = vmatpush.msrb.mxu3 %v5581_v31  ;;  %v5643_v30 = vld [vmem:[%s12148_s4 + $0x1a0] sm:$0xff]  ;;  %v5644_v31 = vld [vmem:[%s12148_s4 + $0x278] sm:$0xff] }
 0x7e4   : > { %2889 = vmatpush.msrb.mxu2 %v5578_v27  ;;  %2869 = vmatpush.msrb.mxu1 %v5579_v28  ;;  %v5641_v27 = vld [vmem:[%s12148_s4 + $0x1a8] sm:$0xff]  ;;  %v5642_v28 = vld [vmem:[%s12148_s4] sm:$0xff] }
 0x7e5   : > { %3118 = vmatpush.msrb.mxu0 %v5584_v34  ;;  %3138 = vmatpush.msrb.mxu3 %v5585_v61  ;;  %v5647_v34 = vld [vmem:[%s12148_s4 + $0x190] sm:$0xff]  ;;  %v5648_v61 = vld [vmem:[%s12148_s4 + $0x268] sm:$0xff] }
 0x7e6   : > { %2890 = vmatpush.msrb.mxu2 %v5582_v33  ;;  %2870 = vmatpush.msrb.mxu1 %v5583_v62  ;;  %v5645_v33 = vld [vmem:[%s12148_s4 + $0x198] sm:$0xff]  ;;  %v5646_v62 = vld [vmem:[%s12148_s4 + $0x270] sm:$0xff] }
 0x7e7   : > { %3119 = vmatpush.msrb.mxu0 %v5588_v36  ;;  %3139 = vmatpush.msrb.mxu3 %v5589_v37  ;;  %v5651_v36 = vld [vmem:[%s12148_s4 + $0x180] sm:$0xff]  ;;  %v5652_v37 = vld [vmem:[%s12148_s4 + $0x258] sm:$0xff] }
 0x7e8   : > { %2891 = vmatpush.msrb.mxu2 %v5586_v60  ;;  %2871 = vmatpush.msrb.mxu1 %v5587_v35  ;;  %v5649_v60 = vld [vmem:[%s12148_s4 + $0x188] sm:$0xff]  ;;  %v5650_v35 = vld [vmem:[%s12148_s4 + $0x260] sm:$0xff] }
 0x7e9   : > { %4867 = vmatmul.msk.f32.vlgmr.msra.gmra.mxu1 %vm778_vm1, %v9503_v7  ;;  %4868 = vmatmul.msk.f32.vlgmr.msra.gmra.mxu2 %vm778_vm1, %v9503_v7 }
 0x7ea   : > { %2892 = vmatpush.msrb.mxu2 %v5590_v29  ;;  %2872 = vmatpush.msrb.mxu1 %v5591_v38  ;;  %v5653_v29 = vld [vmem:[%s12148_s4 + $0x3f8] sm:$0xff]  ;;  %v5654_v38 = vld [vmem:[%s12148_s4 + $0x250] sm:$0xff] }
 0x7eb   : > { %3120 = vmatpush.msrb.mxu0 %v5594_v59  ;;  %3140 = vmatpush.msrb.mxu3 %v5595_v40  ;;  %v5657_v59 = vld [vmem:[%s12148_s4 + $0x3e8] sm:$0xff]  ;;  %v5658_v40 = vld [vmem:[%s12148_s4 + $0x240] sm:$0xff] }
 0x7ec   : > { %2949 = vmatpush.msra.mxu1 %v5592_v39  ;;  %3014 = vmatpush.msra.mxu2 %v5593_v32  ;;  %v5655_v39 = vld [vmem:[%s12148_s4 + $0x3f0] sm:$0xff]  ;;  %v5656_v32 = vld [vmem:[%s12148_s4 + $0x248] sm:$0xff] }
 0x7ed   : > { %3121 = vmatpush.msrb.mxu0 %v5598_v42  ;;  %3141 = vmatpush.msrb.mxu3 %v5599_v45  ;;  %v5661_v42 = vld [vmem:[%s12148_s4 + $0x3d8] sm:$0xff]  ;;  %v5662_v45 = vld [vmem:[%s12148_s4 + $0x230] sm:$0xff] }
 0x7ee   : > { %2950 = vmatpush.msra.mxu1 %v5596_v41  ;;  %3015 = vmatpush.msra.mxu2 %v5597_v55  ;;  %v5659_v41 = vld [vmem:[%s12148_s4 + $0x3e0] sm:$0xff]  ;;  %v5660_v55 = vld [vmem:[%s12148_s4 + $0x238] sm:$0xff] }
 0x7ef   : > { %3122 = vmatpush.msrb.mxu0 %v5602_v51  ;;  %3142 = vmatpush.msrb.mxu3 %v5603_v58  ;;  %v5665_v51 = vld [vmem:[%s12148_s4 + $0x3c8] sm:$0xff]  ;;  %v5666_v58 = vld [vmem:[%s12148_s4 + $0x220] sm:$0xff] }
 0x7f0   : > { %2951 = vmatpush.msra.mxu1 %v5600_v46  ;;  %3016 = vmatpush.msra.mxu2 %v5601_v47  ;;  %v5663_v46 = vld [vmem:[%s12148_s4 + $0x3d0] sm:$0xff]  ;;  %v5664_v47 = vld [vmem:[%s12148_s4 + $0x228] sm:$0xff] }
 0x7f1   : > { %4869 = vmatmul.msk.f32.vlgmr.msrb.gmra.mxu1 %vm778_vm1, %v9503_v7  ;;  %4870 = vmatmul.msk.f32.vlgmr.msrb.gmra.mxu2 %vm778_vm1, %v9503_v7 }
 0x7f2   : > { %2952 = vmatpush.msra.mxu1 %v5604_v48  ;;  %3017 = vmatpush.msra.mxu2 %v5605_v52  ;;  %v5667_v48 = vld [vmem:[%s12148_s4 + $0x3c0] sm:$0xff]  ;;  %v5668_v52 = vld [vmem:[%s12148_s4 + $0x218] sm:$0xff] }
 0x7f3   : > { %3123 = vmatpush.msrb.mxu0 %v5607_v54  ;;  %3143 = vmatpush.msrb.mxu3 %v5609_v63  ;;  %v5670_v54 = vld [vmem:[%s12148_s4 + $0x210] sm:$0xff]  ;;  %v5672_v63 = vld [vmem:[%s12148_s4 + $0x208] sm:$0xff] }
 0x7f4   : > { %3074 = vmatpush.msrb.mxu1 %v5606_v0  ;;  %3018 = vmatpush.msra.mxu2 %v5608_v9  ;;  %v5669_v0 = vld [vmem:[%s12148_s4 + $0x3b8] sm:$0xff]  ;;  %v5671_v9 = vld [vmem:[%s12148_s4 + $0x3b0] sm:$0xff] }
 0x7f5   : > { %3124 = vmatpush.msrb.mxu0 %v5611_v49  ;;  %3144 = vmatpush.msrb.mxu3 %v5613_v57  ;;  %v5674_v49 = vld [vmem:[%s12148_s4 + $0x200] sm:$0xff]  ;;  %v5676_v57 = vld [vmem:[%s12148_s4 + $0x398] sm:$0xff] }
 0x7f6   : > { %3075 = vmatpush.msrb.mxu1 %v5610_v43  ;;  %3019 = vmatpush.msra.mxu2 %v5612_v56  ;;  %v5673_v43 = vld [vmem:[%s12148_s4 + $0x3a8] sm:$0xff]  ;;  %v5675_v56 = vld [vmem:[%s12148_s4 + $0x3a0] sm:$0xff] }
 0x7f7   : > { %3125 = vmatpush.msrb.mxu0 %v5615_v53  ;;  %3145 = vmatpush.msrb.mxu3 %v5617_v6  ;;  %v5678_v53 = vld [vmem:[%s12148_s4 + $0x388] sm:$0xff] }
 0x7f8   : > { %3076 = vmatpush.msrb.mxu1 %v5614_v44  ;;  %3020 = vmatpush.msra.mxu2 %v5616_v1  ;;  %v5677_v44 = vld [vmem:[%s12148_s4 + $0x390] sm:$0xff]  ;;  %v5679_v1 = vld [vmem:[%s12148_s4 + $0x380] sm:$0xff] }
 0x7f9   : > { %4873 = vmatmul.msk.f32.vlgmr.msra.gmra.mxu1 %vm778_vm1, %v9503_v7  ;;  %3126 = vmatpush.msrb.mxu0 %v5618_v13  ;;  %v5626_v7 = vld [vmem:[%s12148_s4 + $0x310] sm:$0xff] }
 0x7fa   : > { %3021 = vmatpush.msra.mxu2 %v5619_v4  ;;  %3077 = vmatpush.msrb.mxu1 %v5620_v50 }
 0x7fb   : > { %3127 = vmatpush.msrb.mxu0 %v5621_v15  ;;  %3146 = vmatpush.msrb.mxu3 %v5622_v3  ;;  %v4856_v3 = vld [vmem:[%s6541_s10 + $0xd8] sm:$0xff] }
 0x7fc   : > { %3022 = vmatpush.msra.mxu2 %v5623_v5  ;;  %3078 = vmatpush.msrb.mxu1 %v5624_v19  ;;  %v4852_v5 = vld [vmem:[%s6541_s10 + $0xb8] sm:$0xff]  ;;  %v4855_v19 = vld [vmem:[%s6541_s10 + $0xd0] sm:$0xff] }
 0x7fd   : > { %3128 = vmatpush.msrb.mxu0 %v5625_v10  ;;  %3147 = vmatpush.msrb.mxu3 %v5626_v7 }
 0x7fe   : > { %3023 = vmatpush.msra.mxu2 %v5627_v8  ;;  %3079 = vmatpush.msrb.mxu1 %v5628_v11  ;;  %v4851_v8 = vld [vmem:[%s6541_s10 + $0xb0] sm:$0xff] }
 0x7ff   : > { %3129 = vmatpush.msrb.mxu0 %v5629_v12  ;;  %3148 = vmatpush.msrb.mxu3 %v5630_v17  ;;  %v4860_v17 = vld [vmem:[%s6541_s10 + $0xf8] sm:$0xff] }
 0x800   : > { %3024 = vmatpush.msra.mxu2 %v5631_v21  ;;  %3080 = vmatpush.msrb.mxu1 %v5632_v16  ;;  %v4857_v16 = vld [vmem:[%s6541_s10 + $0xe0] sm:$0xff] }
 0x801   : > { %3149 = vmatpush.msrb.mxu3 %v5633_v22 }
 0x802   : > { %3025 = vmatpush.msra.mxu2 %v5634_v23  ;;  %3081 = vmatpush.msrb.mxu1 %v5635_v20  ;;  %v4859_v20 = vld [vmem:[%s6541_s10 + $0xf0] sm:$0xff] }
 0x804   : > { %3026 = vmatpush.msra.mxu2 %v5636_v24  ;;  %3082 = vmatpush.msrb.mxu1 %v5637_v18 }
 0x806   : > { %3027 = vmatpush.msra.mxu2 %v5638_v14  ;;  %3083 = vmatpush.msrb.mxu1 %v5639_v25  ;;  %v4853_v14 = vld [vmem:[%s6541_s10 + $0xc0] sm:$0xff]  ;;  %v4854_v25 = vld [vmem:[%s6541_s10 + $0xc8] sm:$0xff] }
 0x808   : > { %3028 = vmatpush.msra.mxu2 %v5640_v26  ;;  %3084 = vmatpush.msrb.mxu1 %v5641_v27  ;;  %v4858_v26 = vld [vmem:[%s6541_s10 + $0xe8] sm:$0xff] }
 0x80a   : > { %3029 = vmatpush.msra.mxu2 %v5642_v28  ;;  %3085 = vmatpush.msrb.mxu1 %v5643_v30 }
 0x80c   : > { %3094 = vmatpush.msrb.mxu2 %v5644_v31  ;;  %3086 = vmatpush.msrb.mxu1 %v5645_v33 }
 0x80e   : > { %3095 = vmatpush.msrb.mxu2 %v5646_v62  ;;  %3087 = vmatpush.msrb.mxu1 %v5647_v34 }
 0x810   : > { %3096 = vmatpush.msrb.mxu2 %v5648_v61  ;;  %3088 = vmatpush.msrb.mxu1 %v5649_v60 }
 0x812   : > { %3097 = vmatpush.msrb.mxu2 %v5650_v35  ;;  %3089 = vmatpush.msrb.mxu1 %v5651_v36 }
 0x814   : > { %3098 = vmatpush.msrb.mxu2 %v5652_v37  ;;  %3154 = vmatpush.msra.mxu1 %v5653_v29 }
 0x816   : > { %3099 = vmatpush.msrb.mxu2 %v5654_v38  ;;  %3155 = vmatpush.msra.mxu1 %v5655_v39 }
 0x818   : > { %3100 = vmatpush.msrb.mxu2 %v5656_v32  ;;  %3156 = vmatpush.msra.mxu1 %v5657_v59  ;;  %v4862_v32 = vld [vmem:[%s6536_s24 + $0x10] sm:$0xff] }
 0x81a   : > { %3101 = vmatpush.msrb.mxu2 %v5658_v40  ;;  %3157 = vmatpush.msra.mxu1 %v5659_v41 }
 0x81c   : > { %3102 = vmatpush.msrb.mxu2 %v5660_v55  ;;  %3158 = vmatpush.msra.mxu1 %v5661_v42 }
 0x81e   : > { %3103 = vmatpush.msrb.mxu2 %v5662_v45  ;;  %3159 = vmatpush.msra.mxu1 %v5663_v46 }
 0x820   : > { %3104 = vmatpush.msrb.mxu2 %v5664_v47  ;;  %3160 = vmatpush.msra.mxu1 %v5665_v51 }
 0x822   : > { %3105 = vmatpush.msrb.mxu2 %v5666_v58  ;;  %3161 = vmatpush.msra.mxu1 %v5667_v48 }
 0x824   : > { %3106 = vmatpush.msrb.mxu2 %v5668_v52  ;;  %3162 = vmatpush.msra.mxu1 %v5669_v0 }
 0x826   : > { %3107 = vmatpush.msrb.mxu2 %v5670_v54  ;;  %3163 = vmatpush.msra.mxu1 %v5671_v9 }
 0x828   : > { %3108 = vmatpush.msrb.mxu2 %v5672_v63  ;;  %3164 = vmatpush.msra.mxu1 %v5673_v43 }
 0x82a   : > { %3109 = vmatpush.msrb.mxu2 %v5674_v49  ;;  %3165 = vmatpush.msra.mxu1 %v5675_v56  ;;  %v5680_v49 = vld [vmem:[%s12148_s4 + $0x478] sm:$0xff]  ;;  %v5681_v56 = vld [vmem:[%s12149_s5 + $0x148] sm:$0xff] }
 0x82c   : > { %3166 = vmatpush.msra.mxu1 %v5676_v57  ;;  %v5682_v57 = vld [vmem:[%s12148_s4 + $0x470] sm:$0xff] }
 0x82e   : > { %3167 = vmatpush.msra.mxu1 %v5677_v44 }
 0x830   : > { %3168 = vmatpush.msra.mxu1 %v5678_v53 }
 0x832   : > { %3169 = vmatpush.msra.mxu1 %v5679_v1  ;;  %v5683_v1 = vld [vmem:[%s12149_s5 + $0xf8] sm:$0xff] }
 0x856   : > { %v2754_v6 = vpop.f32.mrf.mxu1 }
 0x857   : > { %v2957_v23 = vadd.f32 %v4851_v8, %v2754_v6  ;;  %v2914_v24 = vpop.f32.mrf.mxu0  ;;  %v5690_v8 = vld [vmem:[%s12148_s4 + $0x458] sm:$0xff] }
 0x858   : > { %v9890_v31 = vadd.f32 %v4859_v20, %v2914_v24  ;;  %v5697_v24 = vld [vmem:[%s12148_s4 + $0x448] sm:$0xff] }
 0x85c   : > { %v2774_v13 = vpop.f32.mrf.mxu2 }
 0x85d   : > { %v2958_v11 = vadd.f32 %v4852_v5, %v2774_v13  ;;  %v2934_v21 = vpop.f32.mrf.mxu3  ;;  %v5684_v13 = vld [vmem:[%s12148_s4 + $0x468] sm:$0xff]  ;;  %v5687_v5 = vld [vmem:[%s12148_s4 + $0x460] sm:$0xff] }
 0x85e   : > { %v2794_v4 = vpop.f32.mrf.mxu1  ;;  %v9888_v27 = vadd.f32 %v4860_v17, %v2934_v21  ;;  %v5693_v17 = vld [vmem:[%s12148_s4 + $0x450] sm:$0xff]  ;;  %v5694_v21 = vld [vmem:[%s12149_s5 + $0x58] sm:$0xff] }
 0x85f   : > { %v2959_v62 = vadd.f32 %v4853_v14, %v2794_v4  ;;  %v5699_v14 = vld [vmem:[%s12148_s4 + $0x440] sm:$0xff] }
 0x864   : > { %v2814_v50 = vpop.f32.mrf.mxu2 }
 0x865   : > { %v2960_v34 = vadd.f32 %v4854_v25, %v2814_v50  ;;  %v5685_v50 = vld [vmem:[%s12149_s5 + $0xa8] sm:$0xff]  ;;  %v5700_v25 = vld [vmem:[%s12149_s5 + $0x50] sm:$0xff] }
 0x866   : > { %v2834_v15 = vpop.f32.mrf.mxu1 }
 0x867   : > { %v2961_v12 = vadd.f32 %v4855_v19, %v2834_v15  ;;  %v5686_v15 = vld [vmem:[%s12148_s4 + $0x4f8] sm:$0xff]  ;;  %v5688_v19 = vld [vmem:[%s12149_s5 + $0x140] sm:$0xff] }
 0x869   : > { %v2973_v28 = vmax.f32 %v2957_v23, %v2961_v12 }
 0x86b   : > { %v2977_v35 = vmax.f32 %v2973_v28, %v9890_v31  ;;  %v5702_v28 = vld [vmem:[%s12149_s5 + $0x8] sm:$0xff] }
 0x86c   : > { %v2854_v10 = vpop.f32.mrf.mxu2 }
 0x86d   : > { %v9878_v7 = vadd.f32 %v4856_v3, %v2854_v10 }
 0x86e   : > { %v2874_v22 = vpop.f32.mrf.mxu1 }
 0x86f   : > { %v2974_v18 = vmax.f32 %v2958_v11, %v9878_v7  ;;  %v2963_v30 = vadd.f32 %v4857_v16, %v2874_v22  ;;  %v5695_v22 = vld [vmem:[%s12148_s4 + $0x4e0] sm:$0xff] }
 0x871   : > { %v2978_v61 = vmax.f32 %v2974_v18, %v9888_v27  ;;  %v2975_v36 = vmax.f32 %v2959_v62, %v2963_v30  ;;  %v5698_v18 = vld [vmem:[%s12148_s4 + $0x4d8] sm:$0xff] }
 0x873   : > { %v2979_v29 = vmax.f32 %v2977_v35, %v2978_v61  ;;  %v5706_v61 = vld [vmem:[%s12149_s5 + $0x150] sm:$0xff]  ;;  %v5709_v35 = vld [vmem:[%s12148_s4 + $0x4c0] sm:$0xff] }
 0x874   : > { %v2894_v33 = vpop.f32.mrf.mxu2 }
 0x875   : > { %v2964_v60 = vadd.f32 %v4858_v26, %v2894_v33  ;;  %v5701_v26 = vld [vmem:[%s12148_s4 + $0x4d0] sm:$0xff]  ;;  %v5703_v33 = vld [vmem:[%s12148_s4 + $0x438] sm:$0xff] }
 0x877   : > { %v2976_v37 = vmax.f32 %v2960_v34, %v2964_v60 }
 0x879   : > { %v2980_v38 = vmax.f32 %v2975_v36, %v2976_v37  ;;  %v5710_v36 = vld [vmem:[%s12149_s5 + $0x100] sm:$0xff] }
 0x87b   : > { %v2981_v39 = vmax.f32 %v2979_v29, %v2980_v38  ;;  %v5711_v29 = vld [vmem:[%s12148_s4 + $0x428] sm:$0xff] }
 0x87c   : > { %v5712_v38 = vld [vmem:[%s12149_s5 + $0x108] sm:$0xff] }
 0x87d   : > { %2982 = vmax.xlane.f32.xlu0 %v2981_v39 }
 0x891   : > { %2969 = vrot.lane.b32.xlu0 %v4862_v32, %s12162_s29  ;;  %v5713_v32 = vld [vmem:[%s12148_s4 + $0x4b8] sm:$0xff] }
 0x8f0   : > { %v9896_v59 = vpop.xlane.xlu0 %2982 }
 0x8f1   : > { %v2984_v40 = vsub.f32 %v2957_v23, %v9896_v59  ;;  %v2987_v41 = vsub.f32 %v2960_v34, %v9896_v59  ;;  %v2985_v45 = vsub.f32 %v2958_v11, %v9896_v59  ;;  %v2986_v46 = vsub.f32 %v2959_v62, %v9896_v59  ;;  %v5691_v11 = vld [vmem:[%s12148_s4 + $0x4e8] sm:$0xff]  ;;  %v5696_v23 = vld [vmem:[%s12149_s5 + $0xa0] sm:$0xff] }
 0x8f2   : > { %v2988_v47 = vsub.f32 %v2961_v12, %v9896_v59  ;;  %v2991_v51 = vsub.f32 %v2964_v60, %v9896_v59  ;;  %v2989_v9 = vsub.f32 %v9878_v7, %v9896_v59  ;;  %v2990_v43 = vsub.f32 %v2963_v30, %v9896_v59  ;;  %v5689_v7 = vld [vmem:[%s12148_s4 + $0x4f0] sm:$0xff]  ;;  %v5704_v62 = vld [vmem:[%s12149_s5] sm:$0xff]  ;;  %v5705_v34 = vld [vmem:[%s12148_s4 + $0x4c8] sm:$0xff] }
 0x8f3   : > { %v2994_v55 = vmul.f32 1.442695, %v2984_v40  ;;  %v3000_v42 = vmul.f32 1.442695, %v2987_v41  ;;  %v2996_v58 = vmul.f32 1.442695, %v2985_v45  ;;  %v2992_v30 = vsub.f32 %v9890_v31, %v9896_v59 }
 0x8f4   : > { %v2998_v48 = vmul.f32 1.442695, %v2986_v46  ;;  %v3002_v52 = vmul.f32 1.442695, %v2988_v47  ;;  %v3008_v54 = vmul.f32 1.442695, %v2991_v51  ;;  %v2993_v39 = vsub.f32 %v9888_v27, %v9896_v59 }
 0x8f5   : > { %5039 = vpow2.f32 %v2994_v55  ;;  %v3004_v44 = vmul.f32 1.442695, %v2989_v9  ;;  %v3006_v53 = vmul.f32 1.442695, %v2990_v43  ;;  %v5692_v12 = vld [vmem:[%s12149_s5 + $0xf0] sm:$0xff]  ;;  %v5708_v60 = vld [vmem:[%s12149_s5 + $0x158] sm:$0xff] }
 0x8f6   : > { %5041 = vpow2.f32 %v3000_v42  ;;  %v5707_v31 = vld [vmem:[%s12148_s4 + $0x430] sm:$0xff]  ;;  %v3010_v37 = vmul.f32 1.442695, %v2992_v30  ;;  %v5715_v41 = vld [vmem:[%s12148_s4 + $0x420] sm:$0xff]  ;;  %v5716_v55 = vld [vmem:[%s12149_s5 + $0xb8] sm:$0xff] }
 0x8f7   : > { %5043 = vpow2.f32 %v2996_v58  ;;  %v5714_v40 = vld [vmem:[%s12149_s5 + $0xb0] sm:$0xff]  ;;  %v5718_v59 = vld [vmem:[%s12149_s5 + $0x60] sm:$0xff]  ;;  %v5719_v42 = vld [vmem:[%s12148_s4 + $0x418] sm:$0xff]  ;;  %v3012_v46 = vmul.f32 1.442695, %v2993_v39 }
 0x8f8   : > { %5045 = vpow2.f32 %v2998_v48  ;;  %v5717_v27 = vld [vmem:[%s12148_s4 + $0x4b0] sm:$0xff]  ;;  %v5720_v45 = vld [vmem:[%s12149_s5 + $0x68] sm:$0xff]  ;;  %v5724_v48 = vld [vmem:[%s12149_s5 + $0x18] sm:$0xff] }
 0x8f9   : > { %5047 = vpow2.f32 %v3002_v52  ;;  %v5721_v47 = vld [vmem:[%s12148_s4 + $0x4a8] sm:$0xff]  ;;  %v5722_v51 = vld [vmem:[%s12149_s5 + $0x10] sm:$0xff]  ;;  %v5725_v52 = vld [vmem:[%s12148_s4 + $0x4a0] sm:$0xff] }
 0x8fa   : > { %5049 = vpow2.f32 %v3008_v54  ;;  %v5723_v58 = vld [vmem:[%s12148_s4 + $0x410] sm:$0xff]  ;;  %v5726_v54 = vld [vmem:[%s12148_s4 + $0x408] sm:$0xff]  ;;  %v5727_v9 = vld [vmem:[%s12148_s4 + $0x498] sm:$0xff] }
 0x8fb   : > { %v9904_v0 = vpop.eup %5039  ;;  %5051 = vpow2.f32 %v3004_v44  ;;  %v5731_v44 = vld [vmem:[%s12148_s4 + $0x488] sm:$0xff]  ;;  %v5764_v39 = vld [vmem:[%s12150_s6 + $0x18] sm:$0xff] }
 0x8fc   : > { %v9908_v63 = vpop.eup %5041  ;;  %3030 = vmatmul.f32.vlgmr.msra.gmra.mxu2 %v9904_v0  ;;  %5053 = vpow2.f32 %v3006_v53  ;;  %v5732_v53 = vld [vmem:[%s12149_s5 + $0x120] sm:$0xff]  ;;  %v5752_v30 = vld [vmem:[%s12150_s6 + $0x48] sm:$0xff] }
 0x8fd   : > { %3090 = vmatmul.f32.vlgmr.msrb.gmra.mxu1 %v9908_v63  ;;  %3174 = vmatpush.msra.mxu2 %v5680_v49  ;;  %v9925_v6 = vpop.eup %5043  ;;  %5055 = vpow2.f32 %v3010_v37  ;;  %v5728_v49 = vld [vmem:[%s12148_s4 + $0x400] sm:$0xff]  ;;  %v5761_v37 = vld [vmem:[%s12150_s6 + $0x138] sm:$0xff] }
 0x8fe   : > { %3264 = vmatpush.msrb.mxu1 %v5681_v56  ;;  %v9930_v4 = vpop.eup %5045  ;;  %3050 = vmatmul.f32.vlgmr.msra.gmra.mxu0 %v9925_v6  ;;  %5057 = vpow2.f32 %v3012_v46  ;;  %v5729_v56 = vld [vmem:[%s12148_s4 + $0x490] sm:$0xff]  ;;  %v5773_v46 = vld [vmem:[%s12150_s6 + $0x100] sm:$0xff] }
 0x8ff   : > { %3175 = vmatpush.msra.mxu2 %v5682_v57  ;;  %3070 = vmatmul.f32.vlgmr.msra.gmra.mxu3 %v9930_v4  ;;  %v9940_v3 = vpop.eup %5047  ;;  %v5730_v57 = vld [vmem:[%s12149_s5 + $0x170] sm:$0xff] }
 0x900   : > { %3265 = vmatpush.msrb.mxu1 %v5683_v1  ;;  %3194 = vmatpush.msra.mxu0 %v5686_v15  ;;  %v9948_v10 = vpop.eup %5049  ;;  %v5735_v15 = vld [vmem:[%s12149_s5 + $0x180] sm:$0xff] }
 0x901   : > { %3176 = vmatpush.msra.mxu2 %v5684_v13  ;;  %3244 = vmatpush.msra.mxu3 %v5688_v19  ;;  %v9970_v16 = vpop.eup %5051  ;;  %v5733_v13 = vld [vmem:[%s12148_s4 + $0x480] sm:$0xff]  ;;  %v5737_v19 = vld [vmem:[%s12149_s5 + $0x130] sm:$0xff] }
 0x902   : > { %3266 = vmatpush.msrb.mxu1 %v5685_v50  ;;  %3195 = vmatpush.msra.mxu0 %v5689_v7  ;;  %v9978_v20 = vpop.eup %5053  ;;  %v5734_v50 = vld [vmem:[%s12149_s5 + $0xd0] sm:$0xff] }
 0x903   : > { %3177 = vmatpush.msra.mxu2 %v5687_v5  ;;  %3245 = vmatpush.msra.mxu3 %v5692_v12  ;;  %v10079_v43 = vpop.eup %5055  ;;  %v5736_v5 = vld [vmem:[%s12149_s5 + $0x80] sm:$0xff]  ;;  %v5738_v7 = vld [vmem:[%s12149_s5 + $0x30] sm:$0xff] }
 0x904   : > { %3110 = vmatmul.f32.vlgmr.msrb.gmra.mxu2 %v9940_v3  ;;  %3196 = vmatpush.msra.mxu0 %v5691_v11  ;;  %v10097_v1 = vpop.eup %5057  ;;  %v5740_v11 = vld [vmem:[%s12150_s6 + $0x78] sm:$0xff]  ;;  %v5741_v12 = vld [vmem:[%s12149_s5 + $0x90] sm:$0xff] }
 0x905   : > { %3170 = vmatmul.f32.vlgmr.msra.gmra.mxu1 %v9948_v10  ;;  %3178 = vmatpush.msra.mxu2 %v5690_v8  ;;  %v5739_v8 = vld [vmem:[%s12149_s5 + $0xe0] sm:$0xff] }
 0x906   : > { %3267 = vmatpush.msrb.mxu1 %v5694_v21  ;;  %3197 = vmatpush.msra.mxu0 %v5695_v22  ;;  %v5743_v21 = vld [vmem:[%s12149_s5 + $0x40] sm:$0xff]  ;;  %v5744_v22 = vld [vmem:[%s12150_s6 + $0x68] sm:$0xff] }
 0x907   : > { %3179 = vmatpush.msra.mxu2 %v5693_v17  ;;  %3246 = vmatpush.msra.mxu3 %v5696_v23  ;;  %v5742_v17 = vld [vmem:[%s12150_s6 + $0x70] sm:$0xff]  ;;  %v5745_v23 = vld [vmem:[%s12150_s6 + $0x178] sm:$0xff] }
 0x908   : > { %3130 = vmatmul.f32.vlgmr.msrb.gmra.mxu0 %v9970_v16  ;;  %3150 = vmatmul.f32.vlgmr.msrb.gmra.mxu3 %v9978_v20 }
 0x909   : > { %3180 = vmatpush.msra.mxu2 %v5697_v24  ;;  %3198 = vmatpush.msra.mxu0 %v5698_v18  ;;  %v5746_v24 = vld [vmem:[%s12150_s6 + $0x60] sm:$0xff]  ;;  %v5747_v18 = vld [vmem:[%s12150_s6 + $0x170] sm:$0xff] }
 0x90a   : > { %3247 = vmatpush.msra.mxu3 %v5700_v25  ;;  %3268 = vmatpush.msrb.mxu1 %v5702_v28  ;;  %v5749_v25 = vld [vmem:[%s12150_s6 + $0x168] sm:$0xff]  ;;  %v5751_v28 = vld [vmem:[%s12150_s6 + $0x160] sm:$0xff] }
 0x90b   : > { %3181 = vmatpush.msra.mxu2 %v5699_v14  ;;  %3199 = vmatpush.msra.mxu0 %v5701_v26  ;;  %v5748_v14 = vld [vmem:[%s12150_s6 + $0x58] sm:$0xff]  ;;  %v5750_v26 = vld [vmem:[%s12150_s6 + $0x50] sm:$0xff] }
 0x90c   : > { %3248 = vmatpush.msra.mxu3 %v5704_v62  ;;  %3304 = vmatpush.msra.mxu1 %v5708_v60  ;;  %v5754_v62 = vld [vmem:[%s12150_s6 + $0x40] sm:$0xff]  ;;  %v5758_v60 = vld [vmem:[%s12150_s6 + $0x30] sm:$0xff] }
 0x90d   : > { %3182 = vmatpush.msra.mxu2 %v5703_v33  ;;  %3200 = vmatpush.msra.mxu0 %v5705_v34  ;;  %v5753_v33 = vld [vmem:[%s12150_s6 + $0x158] sm:$0xff]  ;;  %v5755_v34 = vld [vmem:[%s12150_s6 + $0x150] sm:$0xff] }
 0x90e   : > { %3284 = vmatpush.msrb.mxu3 %v5706_v61  ;;  %3305 = vmatpush.msra.mxu1 %v5712_v38  ;;  %v5756_v61 = vld [vmem:[%s12150_s6 + $0x38] sm:$0xff]  ;;  %v5763_v38 = vld [vmem:[%s12150_s6 + $0x130] sm:$0xff] }
 0x90f   : > { %3183 = vmatpush.msra.mxu2 %v5707_v31  ;;  %3201 = vmatpush.msra.mxu0 %v5709_v35  ;;  %v5757_v31 = vld [vmem:[%s12150_s6 + $0x148] sm:$0xff]  ;;  %v5759_v35 = vld [vmem:[%s12150_s6 + $0x140] sm:$0xff] }
 0x910   : > { %3285 = vmatpush.msrb.mxu3 %v5710_v36  ;;  %3306 = vmatpush.msra.mxu1 %v5716_v55  ;;  %v5760_v36 = vld [vmem:[%s12150_s6 + $0x28] sm:$0xff] }
 0x911   : > { %3184 = vmatpush.msra.mxu2 %v5711_v29  ;;  %3202 = vmatpush.msra.mxu0 %v5713_v32  ;;  %v5762_v29 = vld [vmem:[%s12150_s6 + $0x20] sm:$0xff]  ;;  %v5765_v32 = vld [vmem:[%s12150_s6 + $0x128] sm:$0xff] }
 0x912   : > { %3286 = vmatpush.msrb.mxu3 %v5714_v40  ;;  %3307 = vmatpush.msra.mxu1 %v5720_v45  ;;  %v5766_v40 = vld [vmem:[%s12150_s6 + $0x10] sm:$0xff]  ;;  %v5768_v55 = vld [vmem:[%s12150_s6 + $0x8] sm:$0xff] }
 0x913   : > { %3185 = vmatpush.msra.mxu2 %v5715_v41  ;;  %3203 = vmatpush.msra.mxu0 %v5717_v27  ;;  %v5767_v41 = vld [vmem:[%s12150_s6 + $0x120] sm:$0xff]  ;;  %v5769_v27 = vld [vmem:[%s12150_s6 + $0x118] sm:$0xff]  ;;  %v5772_v45 = vld [vmem:[%s12150_s6 + $0x108] sm:$0xff] }
 0x914   : > { %3287 = vmatpush.msrb.mxu3 %v5718_v59  ;;  %3308 = vmatpush.msra.mxu1 %v5724_v48  ;;  %v5770_v59 = vld [vmem:[%s12150_s6] sm:$0xff] }
 0x915   : > { %3186 = vmatpush.msra.mxu2 %v5719_v42  ;;  %3204 = vmatpush.msra.mxu0 %v5721_v47  ;;  %v5771_v42 = vld [vmem:[%s12150_s6 + $0x110] sm:$0xff] }
 0x916   : > { %3288 = vmatpush.msrb.mxu3 %v5722_v51  ;;  %v10223_v51 = vpop.f32.mrf.mxu1 }
 0x917   : > { %3187 = vmatpush.msra.mxu2 %v5723_v58  ;;  %3205 = vmatpush.msra.mxu0 %v5725_v52 }
 0x919   : > { %3188 = vmatpush.msra.mxu2 %v5726_v54  ;;  %3206 = vmatpush.msra.mxu0 %v5727_v9 }
 0x91b   : > { %3189 = vmatpush.msra.mxu2 %v5728_v49  ;;  %3207 = vmatpush.msra.mxu0 %v5729_v56 }
 0x91c   : > { %3190 = vmatmul.f32.vlgmr.msra.gmra.mxu2 %v10079_v43 }
 0x91d   : > { %3364 = vmatpush.msrb.mxu2 %v5730_v57  ;;  %3208 = vmatpush.msra.mxu0 %v5731_v44 }
 0x91f   : > { %3365 = vmatpush.msrb.mxu2 %v5732_v53  ;;  %3209 = vmatpush.msra.mxu0 %v5733_v13 }
 0x920   : > { %3210 = vmatmul.f32.vlgmr.msra.gmra.mxu0 %v10097_v1 }
 0x921   : > { %3366 = vmatpush.msrb.mxu2 %v5734_v50  ;;  %3404 = vmatpush.msrb.mxu0 %v5735_v15 }
 0x923   : > { %3367 = vmatpush.msrb.mxu2 %v5736_v5  ;;  %3405 = vmatpush.msrb.mxu0 %v5737_v19 }
 0x925   : > { %3368 = vmatpush.msrb.mxu2 %v5738_v7  ;;  %3406 = vmatpush.msrb.mxu0 %v5739_v8 }
 0x927   : > { %3443 = vmatpush.msra.mxu2 %v5740_v11  ;;  %3407 = vmatpush.msrb.mxu0 %v5741_v12 }
 0x929   : > { %3444 = vmatpush.msra.mxu2 %v5742_v17  ;;  %3408 = vmatpush.msrb.mxu0 %v5743_v21 }
 0x92b   : > { %3445 = vmatpush.msra.mxu2 %v5744_v22  ;;  %3483 = vmatpush.msra.mxu0 %v5745_v23 }
 0x92d   : > { %3446 = vmatpush.msra.mxu2 %v5746_v24  ;;  %3484 = vmatpush.msra.mxu0 %v5747_v18 }
 0x92f   : > { %3447 = vmatpush.msra.mxu2 %v5748_v14  ;;  %3485 = vmatpush.msra.mxu0 %v5749_v25  ;;  %v2970_v14 = vpop.permute.xlu0 %2969 }
 0x931   : > { %3448 = vmatpush.msra.mxu2 %v5750_v26  ;;  %3486 = vmatpush.msra.mxu0 %v5751_v28 }
 0x933   : > { %3449 = vmatpush.msra.mxu2 %v5752_v30  ;;  %3487 = vmatpush.msra.mxu0 %v5753_v33  ;;  %v2972_v30 = vsel %vm778_vm1, %v9493_v2, %v2970_v14  ;;  %v5775_v2 = vld [vmem:[%s12149_s5 + $0x168] sm:$0xff] }
 0x934   : > { %v5820_v14 = vld [vmem:[%s12150_s6 + $0x228] sm:$0xff] }
 0x935   : > { %3450 = vmatpush.msra.mxu2 %v5754_v62  ;;  %3488 = vmatpush.msra.mxu0 %v5755_v34  ;;  %v5774_v34 = vld [vmem:[%s12149_s5 + $0x160] sm:$0xff] }
 0x937   : > { %3451 = vmatpush.msra.mxu2 %v5756_v61  ;;  %3489 = vmatpush.msra.mxu0 %v5757_v31  ;;  %v5776_v61 = vld [vmem:[%s12150_s6 + $0x278] sm:$0xff] }
 0x938   : > { %v5777_v31 = vld [vmem:[%s12150_s6 + $0x378] sm:$0xff] }
 0x939   : > { %3452 = vmatpush.msra.mxu2 %v5758_v60  ;;  %3490 = vmatpush.msra.mxu0 %v5759_v35  ;;  %v5778_v60 = vld [vmem:[%s12149_s5 + $0x110] sm:$0xff]  ;;  %v5779_v35 = vld [vmem:[%s12149_s5 + $0x118] sm:$0xff] }
 0x93b   : > { %3453 = vmatpush.msra.mxu2 %v5760_v36  ;;  %3491 = vmatpush.msra.mxu0 %v5761_v37  ;;  %v5780_v36 = vld [vmem:[%s12150_s6 + $0x270] sm:$0xff] }
 0x93c   : > { %v5781_v37 = vld [vmem:[%s12150_s6 + $0x370] sm:$0xff] }
 0x93d   : > { %3454 = vmatpush.msra.mxu2 %v5762_v29  ;;  %3492 = vmatpush.msra.mxu0 %v5763_v38  ;;  %v5782_v29 = vld [vmem:[%s12149_s5 + $0xc0] sm:$0xff]  ;;  %v5783_v38 = vld [vmem:[%s12149_s5 + $0xc8] sm:$0xff] }
 0x93f   : > { %3455 = vmatpush.msra.mxu2 %v5764_v39  ;;  %3493 = vmatpush.msra.mxu0 %v5765_v32  ;;  %v5784_v39 = vld [vmem:[%s12150_s6 + $0x268] sm:$0xff] }
 0x940   : > { %v5785_v32 = vld [vmem:[%s12150_s6 + $0x368] sm:$0xff] }
 0x941   : > { %3456 = vmatpush.msra.mxu2 %v5766_v40  ;;  %3494 = vmatpush.msra.mxu0 %v5767_v41  ;;  %v5786_v40 = vld [vmem:[%s12149_s5 + $0x70] sm:$0xff]  ;;  %v5787_v41 = vld [vmem:[%s12149_s5 + $0x78] sm:$0xff] }
 0x943   : > { %3457 = vmatpush.msra.mxu2 %v5768_v55  ;;  %3495 = vmatpush.msra.mxu0 %v5769_v27  ;;  %v5788_v55 = vld [vmem:[%s12150_s6 + $0x260] sm:$0xff] }
 0x944   : > { %v5789_v27 = vld [vmem:[%s12150_s6 + $0x360] sm:$0xff] }
 0x945   : > { %3458 = vmatpush.msra.mxu2 %v5770_v59  ;;  %3496 = vmatpush.msra.mxu0 %v5771_v42  ;;  %v5790_v59 = vld [vmem:[%s12149_s5 + $0x20] sm:$0xff]  ;;  %v5791_v42 = vld [vmem:[%s12149_s5 + $0x28] sm:$0xff] }
 0x947   : > { %3497 = vmatpush.msra.mxu0 %v5772_v45  ;;  %v5792_v45 = vld [vmem:[%s12149_s5 + $0x178] sm:$0xff] }
 0x949   : > { %3498 = vmatpush.msra.mxu0 %v5773_v46  ;;  %v5793_v46 = vld [vmem:[%s12149_s5 + $0x188] sm:$0xff] }
 0x97a   : > { %v3091_v9 = vpop.f32.mrf.mxu1 }
 0x97b   : > { %v3051_v58 = vpop.f32.mrf.mxu0 }
 0x97f   : > { %v3031_v47 = vpop.f32.mrf.mxu2 }
 0x980   : > { %v3052_v48 = vadd.f32 %v3051_v58, %v3031_v47  ;;  %v5794_v47 = vld [vmem:[%s12150_s6 + $0x258] sm:$0xff] }
 0x981   : > { %v5795_v58 = vld [vmem:[%s12150_s6 + $0x358] sm:$0xff] }
 0x982   : > { %v3071_v52 = vpop.f32.mrf.mxu3  ;;  %v3171_v15 = vpop.f32.mrf.mxu1 }
 0x983   : > { %v3072_v54 = vadd.f32 %v3071_v52, %v3052_v48  ;;  %v5796_v48 = vld [vmem:[%s12149_s5 + $0x128] sm:$0xff]  ;;  %v5797_v52 = vld [vmem:[%s12149_s5 + $0x138] sm:$0xff] }
 0x985   : > { %v3092_v56 = vadd.f32 %v3091_v9, %v3072_v54  ;;  %v3131_v44 = vpop.f32.mrf.mxu0  ;;  %v5798_v54 = vld [vmem:[%s12150_s6 + $0x250] sm:$0xff] }
 0x986   : > { %v5799_v9 = vld [vmem:[%s12150_s6 + $0x350] sm:$0xff] }
 0x987   : > { %v3111_v49 = vpop.f32.mrf.mxu2 }
 0x988   : > { %v3112_v57 = vadd.f32 %v3111_v49, %v3092_v56  ;;  %v5800_v49 = vld [vmem:[%s12149_s5 + $0xd8] sm:$0xff]  ;;  %v5801_v56 = vld [vmem:[%s12149_s5 + $0xe8] sm:$0xff] }
 0x98a   : > { %v3132_v53 = vadd.f32 %v3131_v44, %v3112_v57  ;;  %v5802_v57 = vld [vmem:[%s12150_s6 + $0x248] sm:$0xff] }
 0x98b   : > { %v3151_v13 = vpop.f32.mrf.mxu3  ;;  %v5803_v44 = vld [vmem:[%s12150_s6 + $0x348] sm:$0xff] }
 0x98c   : > { %v3152_v50 = vadd.f32 %v3151_v13, %v3132_v53  ;;  %v5804_v53 = vld [vmem:[%s12149_s5 + $0x88] sm:$0xff]  ;;  %v5805_v13 = vld [vmem:[%s12149_s5 + $0x98] sm:$0xff] }
 0x98e   : > { %v3172_v5 = vadd.f32 %v3171_v15, %v3152_v50  ;;  %v5806_v50 = vld [vmem:[%s12150_s6 + $0x240] sm:$0xff] }
 0x98f   : > { %v5807_v15 = vld [vmem:[%s12150_s6 + $0x340] sm:$0xff] }
 0x99d   : > { %v3211_v8 = vpop.f32.mrf.mxu0 }
 0x99f   : > { %v3191_v19 = vpop.f32.mrf.mxu2 }
 0x9a0   : > { %v3192_v7 = vadd.f32 %v3191_v19, %v3172_v5  ;;  %v5808_v5 = vld [vmem:[%s12149_s5 + $0x38] sm:$0xff]  ;;  %v5809_v19 = vld [vmem:[%s12149_s5 + $0x48] sm:$0xff] }
 0x9a2   : > { %v3212_v11 = vadd.f32 %v3211_v8, %v3192_v7  ;;  %v5810_v7 = vld [vmem:[%s12150_s6 + $0xf8] sm:$0xff] }
 0x9a3   : > { %v5811_v8 = vld [vmem:[%s12150_s6 + $0x1f8] sm:$0xff] }
 0x9a4   : > { %v3214_v12 = vmax.f32 %v3212_v11, 1e-30  ;;  %v5812_v11 = vld [vmem:[%s12150_s6 + $0x238] sm:$0xff] }
 0x9a6   : > { %5059 = vrcp.f32 %v3214_v12  ;;  %v3226_v23 = vand.u32 2147483648, %v3214_v12  ;;  %v3224_v18 = vand.u32 2147483647, %v3214_v12  ;;  %vm3220_vm6 = vweird.f32 %v3214_v12 }
 0x9a8   : > { %v3227_v26 = vor.u32 1.1754944e-38, %v3226_v23  ;;  %vm3225_vm8 = vcmp.eq.f32.partialorder %v3224_v18, 8.507059e+37  ;;  %v5817_v23 = vld [vmem:[%s12150_s6 + $0x330] sm:$0xff]  ;;  %v5819_v18 = vld [vmem:[%s12150_s6 + $0x1e8] sm:$0xff] }
 0x9ac   : > { %v5060_v17 = vpop.eup %5059 }
 0x9ad   : > { %v3216_v21 = vmul.f32 %v5060_v17, %v3214_v12  ;;  %vm3221_vm5 = vweird.f32 %v5060_v17  ;;  %v5813_v12 = vld [vmem:[%s12150_s6 + $0x338] sm:$0xff] }
 0x9ae   : > { %vm3222_vm7 = vmor %vm3220_vm6, %vm3221_vm5 }
 0x9af   : > { %v3217_v22 = vsub.f32 1.0, %v3216_v21  ;;  %v5815_v21 = vld [vmem:[%s12150_s6 + $0x1f0] sm:$0xff] }
 0x9b1   : > { %v3218_v24 = vmul.f32 %v5060_v17, %v3217_v22  ;;  %v5816_v22 = vld [vmem:[%s12150_s6 + $0x230] sm:$0xff] }
 0x9b3   : > { %v3219_v25 = vadd.f32 %v5060_v17, %v3218_v24  ;;  %v5818_v24 = vld [vmem:[%s12150_s6 + $0xe8] sm:$0xff] }
 0x9b5   : > { %v3223_v28 = vsel %vm3222_vm7, %v5060_v17, %v3219_v25  ;;  %v5814_v17 = vld [vmem:[%s12150_s6 + $0xf0] sm:$0xff]  ;;  %v5821_v25 = vld [vmem:[%s12150_s6 + $0x328] sm:$0xff] }
 0x9b6   : > { %v3228_v33 = vsel %vm3225_vm8, %v3227_v26, %v3223_v28  ;;  %v5822_v26 = vld [vmem:[%s12150_s6 + $0xe0] sm:$0xff] }
 0x9b7   : > { %v10227_v62 = vmul.f32 %v3228_v33, %v2972_v30  ;;  %v5823_v28 = vld [vmem:[%s12150_s6 + $0x1e0] sm:$0xff] }
 0x9b8   : > { %v5824_v30 = vld [vmem:[%s12150_s6 + $0x220] sm:$0xff] }
 0x9b9   : > { %4874 = vmatmul.msk.f32.vlgmr.msra.gmra.mxu3 %vm1295_vm11, %v10227_v62  ;;  %4875 = vmatmul.msk.f32.vlgmr.msrb.gmra.mxu1 %vm1295_vm11, %v10227_v62  ;;  %v5825_v33 = vld [vmem:[%s12150_s6 + $0x320] sm:$0xff] }
 0x9ba   : > { %4880 = vmatmul.msk.f32.vlgmr.msrb.gmra.mxu2 %vm1295_vm11, %v10227_v62  ;;  %4882 = vmatmul.msk.f32.vlgmr.msrb.gmra.mxu0 %vm1295_vm11, %v10227_v62 }
 0x9bb   : > { %3324 = vmatpush.msra.mxu3 %v5774_v34  ;;  %3344 = vmatpush.msrb.mxu1 %v5775_v2  ;;  %v5827_v34 = vld [vmem:[%s12150_s6 + $0x1d8] sm:$0xff] }
 0x9bc   : > { %3523 = vmatpush.msrb.mxu2 %v5776_v61  ;;  %3563 = vmatpush.msrb.mxu0 %v5777_v31  ;;  %v5828_v2 = vld [vmem:[%s12150_s6 + $0x218] sm:$0xff]  ;;  %v5830_v31 = vld [vmem:[%s12150_s6 + $0xd0] sm:$0xff] }
 0x9bd   : > { %3325 = vmatpush.msra.mxu3 %v5778_v60  ;;  %3345 = vmatpush.msrb.mxu1 %v5779_v35  ;;  %v5829_v61 = vld [vmem:[%s12150_s6 + $0x318] sm:$0xff]  ;;  %v5831_v60 = vld [vmem:[%s12150_s6 + $0x1d0] sm:$0xff] }
 0x9be   : > { %3524 = vmatpush.msrb.mxu2 %v5780_v36  ;;  %3564 = vmatpush.msrb.mxu0 %v5781_v37  ;;  %v5832_v35 = vld [vmem:[%s12150_s6 + $0x210] sm:$0xff]  ;;  %v5834_v37 = vld [vmem:[%s12150_s6 + $0xc8] sm:$0xff] }
 0x9bf   : > { %3326 = vmatpush.msra.mxu3 %v5782_v29  ;;  %3346 = vmatpush.msrb.mxu1 %v5783_v38  ;;  %v5833_v36 = vld [vmem:[%s12150_s6 + $0x310] sm:$0xff]  ;;  %v5835_v29 = vld [vmem:[%s12150_s6 + $0x1c8] sm:$0xff] }
 0x9c0   : > { %3525 = vmatpush.msrb.mxu2 %v5784_v39  ;;  %3565 = vmatpush.msrb.mxu0 %v5785_v32  ;;  %v5836_v38 = vld [vmem:[%s12150_s6 + $0x208] sm:$0xff]  ;;  %v5838_v32 = vld [vmem:[%s12150_s6 + $0xc0] sm:$0xff] }
 0x9c1   : > { %4876 = vmatmul.msk.f32.vlgmr.msrb.gmra.mxu3 %vm1295_vm11, %v10227_v62  ;;  %4877 = vmatmul.msk.f32.vlgmr.msra.gmra.mxu1 %vm1295_vm11, %v10227_v62  ;;  %v5837_v39 = vld [vmem:[%s12150_s6 + $0x308] sm:$0xff] }
 0x9c2   : > { %3327 = vmatpush.msra.mxu3 %v5786_v40  ;;  %3347 = vmatpush.msrb.mxu1 %v5787_v41  ;;  %v5839_v40 = vld [vmem:[%s12150_s6 + $0x1c0] sm:$0xff] }
 0x9c3   : > { %3526 = vmatpush.msrb.mxu2 %v5788_v55  ;;  %3566 = vmatpush.msrb.mxu0 %v5789_v27  ;;  %v5840_v41 = vld [vmem:[%s12150_s6 + $0x200] sm:$0xff]  ;;  %v5842_v27 = vld [vmem:[%s12150_s6 + $0xb8] sm:$0xff] }
 0x9c4   : > { %3328 = vmatpush.msra.mxu3 %v5790_v59  ;;  %3348 = vmatpush.msrb.mxu1 %v5791_v42  ;;  %v5841_v55 = vld [vmem:[%s12150_s6 + $0x300] sm:$0xff]  ;;  %v5843_v59 = vld [vmem:[%s12150_s6 + $0x1b8] sm:$0xff]  ;;  %v5844_v42 = vld [vmem:[%s12150_s6 + $0xb0] sm:$0xff] }
 0x9c5   : > { %3527 = vmatpush.msrb.mxu2 %v5794_v47  ;;  %3567 = vmatpush.msrb.mxu0 %v5795_v58  ;;  %v5847_v47 = vld [vmem:[%s12150_s6 + $0x1a8] sm:$0xff]  ;;  %v5848_v58 = vld [vmem:[%s12150_s6 + $0xa0] sm:$0xff] }
 0x9c6   : > { %3384 = vmatpush.msrb.mxu3 %v5792_v45  ;;  %3424 = vmatpush.msra.mxu1 %v5793_v46  ;;  %v5845_v45 = vld [vmem:[%s12150_s6 + $0x1b0] sm:$0xff]  ;;  %v5846_v46 = vld [vmem:[%s12150_s6 + $0xa8] sm:$0xff] }
 0x9c7   : > { %3528 = vmatpush.msrb.mxu2 %v5798_v54  ;;  %3568 = vmatpush.msrb.mxu0 %v5799_v9  ;;  %v5851_v54 = vld [vmem:[%s12150_s6 + $0x198] sm:$0xff]  ;;  %v5852_v9 = vld [vmem:[%s12150_s6 + $0x90] sm:$0xff] }
 0x9c8   : > { %3385 = vmatpush.msrb.mxu3 %v5796_v48  ;;  %3425 = vmatpush.msra.mxu1 %v5797_v52  ;;  %v5849_v48 = vld [vmem:[%s12150_s6 + $0x1a0] sm:$0xff]  ;;  %v5850_v52 = vld [vmem:[%s12150_s6 + $0x98] sm:$0xff] }
 0x9c9   : > { %4878 = vmatmul.msk.f32.vlgmr.msra.gmra.mxu3 %vm1295_vm11, %v10227_v62  ;;  %4879 = vmatmul.msk.f32.vlgmr.msrb.gmra.mxu1 %vm1295_vm11, %v10227_v62 }
 0x9ca   : > { %3386 = vmatpush.msrb.mxu3 %v5800_v49  ;;  %3426 = vmatpush.msra.mxu1 %v5801_v56  ;;  %v5853_v49 = vld [vmem:[%s12150_s6 + $0x190] sm:$0xff]  ;;  %v5854_v56 = vld [vmem:[%s12150_s6 + $0x88] sm:$0xff] }
 0x9cb   : > { %3529 = vmatpush.msrb.mxu2 %v5802_v57  ;;  %3569 = vmatpush.msrb.mxu0 %v5803_v44  ;;  %v5855_v57 = vld [vmem:[%s12150_s6 + $0x188] sm:$0xff]  ;;  %v5856_v44 = vld [vmem:[%s12150_s6 + $0x80] sm:$0xff] }
 0x9cc   : > { %3387 = vmatpush.msrb.mxu3 %v5804_v53  ;;  %3427 = vmatpush.msra.mxu1 %v5805_v13  ;;  %v5857_v53 = vld [vmem:[%s12150_s6 + $0x180] sm:$0xff]  ;;  %v5858_v13 = vld [vmem:[%s12150_s6 + $0x2f8] sm:$0xff] }
 0x9cd   : > { %3530 = vmatpush.msrb.mxu2 %v5806_v50  ;;  %3570 = vmatpush.msrb.mxu0 %v5807_v15  ;;  %v5859_v50 = vld [vmem:[%s12150_s6 + $0x3f8] sm:$0xff]  ;;  %v5860_v15 = vld [vmem:[%s12150_s6 + $0x2f0] sm:$0xff] }
 0x9ce   : > { %3388 = vmatpush.msrb.mxu3 %v5808_v5  ;;  %3428 = vmatpush.msra.mxu1 %v5809_v19  ;;  %v5861_v5 = vld [vmem:[%s12150_s6 + $0x3f0] sm:$0xff]  ;;  %v5862_v19 = vld [vmem:[%s12150_s6 + $0x2e8] sm:$0xff] }
 0x9cf   : > { %3531 = vmatpush.msrb.mxu2 %v5812_v11  ;;  %3571 = vmatpush.msrb.mxu0 %v5813_v12  ;;  %v5865_v11 = vld [vmem:[%s12150_s6 + $0x3e0] sm:$0xff]  ;;  %v5866_v12 = vld [vmem:[%s12150_s6 + $0x2d8] sm:$0xff] }
 0x9d0   : > { %3463 = vmatpush.msra.mxu3 %v5810_v7  ;;  %3503 = vmatpush.msrb.mxu1 %v5811_v8  ;;  %v5863_v7 = vld [vmem:[%s12150_s6 + $0x3e8] sm:$0xff]  ;;  %v5864_v8 = vld [vmem:[%s12150_s6 + $0x2e0] sm:$0xff] }
 0x9d1   : > { %4881 = vmatmul.msk.f32.vlgmr.msrb.gmra.mxu3 %vm1295_vm11, %v10227_v62  ;;  %4883 = vmatmul.msk.f32.vlgmr.msra.gmra.mxu1 %vm1295_vm11, %v10227_v62  ;;  %v5826_v62 = vld [vmem:[%s12150_s6 + $0xd8] sm:$0xff] }
 0x9d2   : > { %3464 = vmatpush.msra.mxu3 %v5814_v17  ;;  %3504 = vmatpush.msrb.mxu1 %v5815_v21  ;;  %v5867_v17 = vld [vmem:[%s12150_s6 + $0x3d8] sm:$0xff]  ;;  %v5868_v21 = vld [vmem:[%s12150_s6 + $0x2d0] sm:$0xff] }
 0x9d3   : > { %3532 = vmatpush.msrb.mxu2 %v5816_v22  ;;  %3572 = vmatpush.msrb.mxu0 %v5817_v23  ;;  %v5869_v22 = vld [vmem:[%s12150_s6 + $0x3d0] sm:$0xff]  ;;  %v5870_v23 = vld [vmem:[%s12150_s6 + $0x2c8] sm:$0xff] }
 0x9d4   : > { %3465 = vmatpush.msra.mxu3 %v5818_v24  ;;  %3505 = vmatpush.msrb.mxu1 %v5819_v18  ;;  %v5871_v24 = vld [vmem:[%s12150_s6 + $0x3c8] sm:$0xff]  ;;  %v5872_v18 = vld [vmem:[%s12150_s6 + $0x2c0] sm:$0xff] }
 0x9d5   : > { %3533 = vmatpush.msrb.mxu2 %v5820_v14  ;;  %3573 = vmatpush.msrb.mxu0 %v5821_v25  ;;  %v5873_v14 = vld [vmem:[%s12150_s6 + $0x3c0] sm:$0xff]  ;;  %v5874_v25 = vld [vmem:[%s12150_s6 + $0x2b8] sm:$0xff] }
 0x9d6   : > { %3466 = vmatpush.msra.mxu3 %v5822_v26  ;;  %3506 = vmatpush.msrb.mxu1 %v5823_v28  ;;  %v5875_v26 = vld [vmem:[%s12150_s6 + $0x3b8] sm:$0xff]  ;;  %v5876_v28 = vld [vmem:[%s12150_s6 + $0x2b0] sm:$0xff] }
 0x9d7   : > { %3534 = vmatpush.msrb.mxu2 %v5824_v30  ;;  %3574 = vmatpush.msrb.mxu0 %v5825_v33  ;;  %v5877_v30 = vld [vmem:[%s12150_s6 + $0x3b0] sm:$0xff]  ;;  %v5878_v33 = vld [vmem:[%s12150_s6 + $0x2a8] sm:$0xff] }
 0x9d8   : > { %3467 = vmatpush.msra.mxu3 %v5826_v62  ;;  %3507 = vmatpush.msrb.mxu1 %v5827_v34  ;;  %v5879_v62 = vld [vmem:[%s12150_s6 + $0x3a8] sm:$0xff]  ;;  %v5880_v34 = vld [vmem:[%s12150_s6 + $0x2a0] sm:$0xff] }
 0x9d9   : > { %3535 = vmatpush.msrb.mxu2 %v5828_v2  ;;  %3575 = vmatpush.msrb.mxu0 %v5829_v61  ;;  %v5881_v2 = vld [vmem:[%s12150_s6 + $0x3a0] sm:$0xff]  ;;  %v5882_v61 = vld [vmem:[%s12150_s6 + $0x298] sm:$0xff] }
 0x9da   : > { %3468 = vmatpush.msra.mxu3 %v5830_v31  ;;  %3508 = vmatpush.msrb.mxu1 %v5831_v60  ;;  %v5883_v31 = vld [vmem:[%s12150_s6 + $0x398] sm:$0xff]  ;;  %v5884_v60 = vld [vmem:[%s12150_s6 + $0x290] sm:$0xff] }
 0x9db   : > { %3536 = vmatpush.msrb.mxu2 %v5832_v35  ;;  %3576 = vmatpush.msrb.mxu0 %v5833_v36  ;;  %v5885_v35 = vld [vmem:[%s12150_s6 + $0x390] sm:$0xff]  ;;  %v5886_v36 = vld [vmem:[%s12150_s6 + $0x288] sm:$0xff] }
 0x9dc   : > { %3469 = vmatpush.msra.mxu3 %v5834_v37  ;;  %3509 = vmatpush.msrb.mxu1 %v5835_v29  ;;  %v5887_v37 = vld [vmem:[%s12150_s6 + $0x388] sm:$0xff]  ;;  %v5888_v29 = vld [vmem:[%s12150_s6 + $0x280] sm:$0xff] }
 0x9dd   : > { %3537 = vmatpush.msrb.mxu2 %v5836_v38  ;;  %3577 = vmatpush.msrb.mxu0 %v5837_v39  ;;  %v5889_v38 = vld [vmem:[%s12150_s6 + $0x380] sm:$0xff] }
 0x9de   : > { %3470 = vmatpush.msra.mxu3 %v5838_v32  ;;  %3510 = vmatpush.msrb.mxu1 %v5839_v40  ;;  %v5890_v40 = vld [vmem:[%s12150_s6 + $0x4f8] sm:$0xff] }
 0x9df   : > { %3538 = vmatpush.msrb.mxu2 %v5840_v41  ;;  %3578 = vmatpush.msrb.mxu0 %v5841_v55  ;;  %v5891_v41 = vld [vmem:[%s12150_s6 + $0x4f0] sm:$0xff] }
 0x9e0   : > { %3471 = vmatpush.msra.mxu3 %v5842_v27  ;;  %3511 = vmatpush.msrb.mxu1 %v5843_v59  ;;  %v5892_v59 = vld [vmem:[%s12150_s6 + $0x4e8] sm:$0xff] }
 0x9e2   : > { %3472 = vmatpush.msra.mxu3 %v5844_v42  ;;  %3512 = vmatpush.msrb.mxu1 %v5845_v45  ;;  %v4898_v45 = vld [vmem:[%s6536_s24 + $0x18] sm:$0xff]  ;;  %s4638_s24 = scalar_lea.sflag [#allocation4], %s6529_s17 }
 0x9e3   : > { %3937 = vrot.lane.b32.xlu0 %v4898_v45, %s12162_s29  ;;  %v5941_v45 = vld [vmem:[%s12147_s3 + $0x148] sm:$0xff] }
 0x9e4   : > { %3473 = vmatpush.msra.mxu3 %v5846_v46  ;;  %3513 = vmatpush.msrb.mxu1 %v5847_v47  ;;  %v5893_v46 = vld [vmem:[%s12150_s6 + $0x478] sm:$0xff]  ;;  %v5894_v47 = vld [vmem:[%s12150_s6 + $0x4e0] sm:$0xff] }
 0x9e6   : > { %3474 = vmatpush.msra.mxu3 %v5848_v58  ;;  %3514 = vmatpush.msrb.mxu1 %v5849_v48  ;;  %v5897_v58 = vld [vmem:[%s12147_s3 + $0x110] sm:$0xff]  ;;  %v5898_v48 = vld [vmem:[%s12150_s6 + $0x468] sm:$0xff] }
 0x9e8   : > { %3475 = vmatpush.msra.mxu3 %v5850_v52  ;;  %3515 = vmatpush.msrb.mxu1 %v5851_v54  ;;  %v5899_v52 = vld [vmem:[%s12150_s6 + $0x4d0] sm:$0xff] }
 0x9ea   : > { %3476 = vmatpush.msra.mxu3 %v5852_v9  ;;  %3516 = vmatpush.msrb.mxu1 %v5853_v49  ;;  %v5900_v49 = vld [vmem:[%s12147_s3 + $0xb8] sm:$0xff] }
 0x9ec   : > { %3477 = vmatpush.msra.mxu3 %v5854_v56  ;;  %3517 = vmatpush.msrb.mxu1 %v5855_v57  ;;  %v5901_v56 = vld [vmem:[%s12150_s6 + $0x460] sm:$0xff]  ;;  %v5902_v57 = vld [vmem:[%s12150_s6 + $0x4c8] sm:$0xff] }
 0x9ee   : > { %3478 = vmatpush.msra.mxu3 %v5856_v44  ;;  %3518 = vmatpush.msrb.mxu1 %v5857_v53 }
 0x9f0   : > { %3543 = vmatpush.msrb.mxu3 %v5858_v13  ;;  %3583 = vmatpush.msra.mxu1 %v5859_v50  ;;  %v5904_v13 = vld [vmem:[%s12150_s6 + $0x458] sm:$0xff]  ;;  %v5905_v50 = vld [vmem:[%s12150_s6 + $0x4c0] sm:$0xff] }
 0x9f2   : > { %3544 = vmatpush.msrb.mxu3 %v5860_v15  ;;  %3584 = vmatpush.msra.mxu1 %v5861_v5  ;;  %v5907_v5 = vld [vmem:[%s12150_s6 + $0x450] sm:$0xff] }
 0x9f4   : > { %3545 = vmatpush.msrb.mxu3 %v5862_v19  ;;  %3585 = vmatpush.msra.mxu1 %v5863_v7  ;;  %v5908_v19 = vld [vmem:[%s12150_s6 + $0x4b8] sm:$0xff]  ;;  %v5909_v7 = vld [vmem:[%s12147_s3 + $0xb0] sm:$0xff] }
 0x9f6   : > { %3546 = vmatpush.msrb.mxu3 %v5864_v8  ;;  %3586 = vmatpush.msra.mxu1 %v5865_v11  ;;  %v5910_v8 = vld [vmem:[%s12147_s3 + $0x8] sm:$0xff] }
 0x9f7   : > { %v5911_v11 = vld [vmem:[%s12150_s6 + $0x448] sm:$0xff] }
 0x9f8   : > { %3547 = vmatpush.msrb.mxu3 %v5866_v12  ;;  %3587 = vmatpush.msra.mxu1 %v5867_v17  ;;  %v5912_v12 = vld [vmem:[%s12150_s6 + $0x4b0] sm:$0xff] }
 0x9fa   : > { %3548 = vmatpush.msrb.mxu3 %v5868_v21  ;;  %3588 = vmatpush.msra.mxu1 %v5869_v22 }
 0x9fc   : > { %3549 = vmatpush.msrb.mxu3 %v5870_v23  ;;  %3589 = vmatpush.msra.mxu1 %v5871_v24  ;;  %v5913_v23 = vld [vmem:[%s12147_s3 + $0x58] sm:$0xff]  ;;  %v5914_v24 = vld [vmem:[%s12150_s6 + $0x440] sm:$0xff] }
 0x9fe   : > { %3550 = vmatpush.msrb.mxu3 %v5872_v18  ;;  %3590 = vmatpush.msra.mxu1 %v5873_v14  ;;  %v5915_v18 = vld [vmem:[%s12150_s6 + $0x4a8] sm:$0xff]  ;;  %v5918_v14 = vld [vmem:[%s12147_s3] sm:$0xff] }
 0xa00   : > { %3551 = vmatpush.msrb.mxu3 %v5874_v25  ;;  %3591 = vmatpush.msra.mxu1 %v5875_v26  ;;  %v5919_v25 = vld [vmem:[%s12150_s6 + $0x430] sm:$0xff]  ;;  %v5920_v26 = vld [vmem:[%s12150_s6 + $0x498] sm:$0xff] }
 0xa02   : > { %3552 = vmatpush.msrb.mxu3 %v5876_v28  ;;  %3592 = vmatpush.msra.mxu1 %v5877_v30  ;;  %v5921_v28 = vld [vmem:[%s12147_s3 + $0x118] sm:$0xff] }
 0xa04   : > { %3553 = vmatpush.msrb.mxu3 %v5878_v33  ;;  %3593 = vmatpush.msra.mxu1 %v5879_v62  ;;  %v5922_v33 = vld [vmem:[%s12150_s6 + $0x428] sm:$0xff]  ;;  %v5923_v62 = vld [vmem:[%s12150_s6 + $0x490] sm:$0xff] }
 0xa06   : > { %3554 = vmatpush.msrb.mxu3 %v5880_v34  ;;  %3594 = vmatpush.msra.mxu1 %v5881_v2 }
 0xa08   : > { %3555 = vmatpush.msrb.mxu3 %v5882_v61  ;;  %3595 = vmatpush.msra.mxu1 %v5883_v31  ;;  %v5924_v61 = vld [vmem:[%s12147_s3 + $0xc0] sm:$0xff] }
 0xa09   : > { %v5925_v31 = vld [vmem:[%s12150_s6 + $0x420] sm:$0xff] }
 0xa0a   : > { %3556 = vmatpush.msrb.mxu3 %v5884_v60  ;;  %3596 = vmatpush.msra.mxu1 %v5885_v35  ;;  %v5926_v60 = vld [vmem:[%s12150_s6 + $0x488] sm:$0xff] }
 0xa0c   : > { %3557 = vmatpush.msrb.mxu3 %v5886_v36  ;;  %3597 = vmatpush.msra.mxu1 %v5887_v37  ;;  %v5928_v36 = vld [vmem:[%s12150_s6 + $0x418] sm:$0xff]  ;;  %v5929_v37 = vld [vmem:[%s12150_s6 + $0x480] sm:$0xff] }
 0xa0e   : > { %3558 = vmatpush.msrb.mxu3 %v5888_v29  ;;  %3598 = vmatpush.msra.mxu1 %v5889_v38  ;;  %v5931_v38 = vld [vmem:[%s12150_s6 + $0x410] sm:$0xff] }
 0xa36   : > { %v3270_v39 = vpop.f32.mrf.mxu1 }
 0xa37   : > { %v3434_v32 = vmul.f32 %v9925_v6, %v3270_v39  ;;  %v3410_v29 = vpop.f32.mrf.mxu0  ;;  %v5932_v39 = vld [vmem:[%s12147_s3 + $0x150] sm:$0xff] }
 0xa39   : > { %3479 = vmatmul.f32.vlgmr.msra.gmra.mxu3 %v3434_v32  ;;  %v5933_v32 = vld [vmem:[%s12147_s3 + $0xc8] sm:$0xff] }
 0xa3a   : > { %3623 = vmatpush.msra.mxu3 %v5890_v40  ;;  %v5934_v40 = vld [vmem:[%s12147_s3 + $0x10] sm:$0xff] }
 0xa3c   : > { %3624 = vmatpush.msra.mxu3 %v5891_v41  ;;  %v3250_v55 = vpop.f32.mrf.mxu3  ;;  %v5935_v41 = vld [vmem:[%s12150_s6 + $0x408] sm:$0xff] }
 0xa3d   : > { %v3433_v27 = vmul.f32 %v9904_v0, %v3250_v55  ;;  %v5895_v0 = vld [vmem:[%s12150_s6 + $0x470] sm:$0xff]  ;;  %v3370_v15 = vpop.f32.mrf.mxu2  ;;  %v5936_v55 = vld [vmem:[%s12147_s3 + $0xf8] sm:$0xff] }
 0xa3e   : > { %3625 = vmatpush.msra.mxu3 %v5892_v59  ;;  %v3310_v6 = vpop.f32.mrf.mxu1  ;;  %v3439_v21 = vmul.f32 %v9978_v20, %v3370_v15  ;;  %v5917_v20 = vld [vmem:[%s12150_s6 + $0x4a0] sm:$0xff]  ;;  %v5937_v59 = vld [vmem:[%s12147_s3 + $0x70] sm:$0xff]  ;;  %v5960_v15 = vld [vmem:[%s12148_s4 + $0x138] sm:$0xff] }
 0xa3f   : > { %v3436_v42 = vmul.f32 %v9908_v63, %v3310_v6  ;;  %3459 = vmatmul.f32.vlgmr.msra.gmra.mxu2 %v3433_v27  ;;  %v5896_v63 = vld [vmem:[%s12150_s6 + $0x4d8] sm:$0xff]  ;;  %v3441_v27 = vmul.f32 %v10079_v43, %v3410_v29  ;;  %v5938_v6 = vld [vmem:[%s12150_s6 + $0x400] sm:$0xff] }
 0xa40   : > { %3603 = vmatpush.msra.mxu2 %v5893_v46  ;;  %3626 = vmatpush.msra.mxu3 %v5894_v47  ;;  %v5940_v43 = vld [vmem:[%s12147_s3 + $0x18] sm:$0xff]  ;;  %v5942_v46 = vld [vmem:[%s12147_s3 + $0x48] sm:$0xff] }
 0xa41   : > { %3519 = vmatmul.f32.vlgmr.msrb.gmra.mxu1 %v3436_v42  ;;  %v5939_v42 = vld [vmem:[%s12147_s3 + $0xa0] sm:$0xff]  ;;  %v5943_v47 = vld [vmem:[%s12148_s4 + $0x178] sm:$0xff] }
 0xa42   : > { %3604 = vmatpush.msra.mxu2 %v5895_v0  ;;  %3627 = vmatpush.msra.mxu3 %v5896_v63  ;;  %v5944_v0 = vld [vmem:[%s12147_s3 + $0xf0] sm:$0xff] }
 0xa43   : > { %3737 = vmatpush.msrb.mxu1 %v5897_v58  ;;  %v5945_v63 = vld [vmem:[%s12148_s4 + $0x170] sm:$0xff]  ;;  %v5946_v58 = vld [vmem:[%s12147_s3 + $0x98] sm:$0xff] }
 0xa44   : > { %3605 = vmatpush.msra.mxu2 %v5898_v48  ;;  %3628 = vmatpush.msra.mxu3 %v5899_v52  ;;  %v3290_v54 = vpop.f32.mrf.mxu3  ;;  %v5947_v48 = vld [vmem:[%s12148_s4 + $0x168] sm:$0xff]  ;;  %v5948_v52 = vld [vmem:[%s12147_s3 + $0x40] sm:$0xff] }
 0xa45   : > { %v3435_v9 = vmul.f32 %v9930_v4, %v3290_v54  ;;  %3738 = vmatpush.msrb.mxu1 %v5900_v49  ;;  %v5903_v4 = vld [vmem:[%s12147_s3 + $0x60] sm:$0xff]  ;;  %v5949_v54 = vld [vmem:[%s12148_s4 + $0xf8] sm:$0xff]  ;;  %v5951_v49 = vld [vmem:[%s12148_s4 + $0xf0] sm:$0xff] }
 0xa46   : > { %3606 = vmatpush.msra.mxu2 %v5901_v56  ;;  %3629 = vmatpush.msra.mxu3 %v5902_v57  ;;  %v3350_v44 = vpop.f32.mrf.mxu1  ;;  %v5952_v56 = vld [vmem:[%s12148_s4 + $0x158] sm:$0xff]  ;;  %v5953_v57 = vld [vmem:[%s12148_s4 + $0xe8] sm:$0xff] }
 0xa47   : > { %v3438_v53 = vmul.f32 %v9970_v16, %v3350_v44  ;;  %3499 = vmatmul.f32.vlgmr.msra.gmra.mxu0 %v3435_v9  ;;  %3739 = vmatpush.msrb.mxu1 %v5903_v4  ;;  %v5906_v16 = vld [vmem:[%s12147_s3 + $0x108] sm:$0xff]  ;;  %v5950_v9 = vld [vmem:[%s12148_s4 + $0x160] sm:$0xff]  ;;  %v5954_v44 = vld [vmem:[%s12148_s4 + $0x150] sm:$0xff] }
 0xa48   : > { %3607 = vmatpush.msra.mxu2 %v5904_v13  ;;  %3630 = vmatpush.msra.mxu3 %v5905_v50  ;;  %v5956_v4 = vld [vmem:[%s12148_s4 + $0x148] sm:$0xff]  ;;  %v5957_v13 = vld [vmem:[%s12148_s4 + $0xd8] sm:$0xff]  ;;  %v5958_v50 = vld [vmem:[%s12148_s4 + $0x140] sm:$0xff] }
 0xa49   : > { %3559 = vmatmul.f32.vlgmr.msrb.gmra.mxu3 %v3438_v53  ;;  %3717 = vmatpush.msra.mxu0 %v5906_v16  ;;  %v5955_v53 = vld [vmem:[%s12148_s4 + $0xe0] sm:$0xff]  ;;  %v5959_v16 = vld [vmem:[%s12148_s4 + $0xd0] sm:$0xff] }
 0xa4a   : > { %3608 = vmatpush.msra.mxu2 %v5907_v5  ;;  %3631 = vmatpush.msra.mxu3 %v5908_v19  ;;  %v5961_v5 = vld [vmem:[%s12148_s4 + $0xc8] sm:$0xff]  ;;  %v5962_v19 = vld [vmem:[%s12148_s4 + $0x130] sm:$0xff] }
 0xa4b   : > { %3718 = vmatpush.msra.mxu0 %v5909_v7  ;;  %3740 = vmatpush.msrb.mxu1 %v5910_v8  ;;  %v5963_v7 = vld [vmem:[%s12148_s4 + $0xc0] sm:$0xff]  ;;  %v5964_v8 = vld [vmem:[%s12148_s4 + $0x128] sm:$0xff] }
 0xa4c   : > { %3609 = vmatpush.msra.mxu2 %v5911_v11  ;;  %3632 = vmatpush.msra.mxu3 %v5912_v12  ;;  %v3330_v17 = vpop.f32.mrf.mxu3  ;;  %v5965_v11 = vld [vmem:[%s12148_s4 + $0xb8] sm:$0xff]  ;;  %v5966_v12 = vld [vmem:[%s12148_s4 + $0x120] sm:$0xff] }
 0xa4d   : > { %v3437_v22 = vmul.f32 %v9940_v3, %v3330_v17  ;;  %3719 = vmatpush.msra.mxu0 %v5913_v23  ;;  %v5916_v3 = vld [vmem:[%s12150_s6 + $0x438] sm:$0xff]  ;;  %v5967_v17 = vld [vmem:[%s12148_s4 + $0xb0] sm:$0xff] }
 0xa4e   : > { %3610 = vmatpush.msra.mxu2 %v5914_v24  ;;  %3633 = vmatpush.msra.mxu3 %v5915_v18  ;;  %v3430_v30 = vpop.f32.mrf.mxu1  ;;  %v5970_v23 = vld [vmem:[%s12148_s4 + $0x110] sm:$0xff]  ;;  %v5971_v24 = vld [vmem:[%s12148_s4 + $0xa0] sm:$0xff]  ;;  %v5972_v18 = vld [vmem:[%s12148_s4 + $0x108] sm:$0xff] }
 0xa4f   : > { %3539 = vmatmul.f32.vlgmr.msrb.gmra.mxu2 %v3437_v22  ;;  %3579 = vmatmul.f32.vlgmr.msrb.gmra.mxu0 %v3439_v21  ;;  %v3442_v35 = vmul.f32 %v10097_v1, %v3430_v30  ;;  %v5930_v1 = vld [vmem:[%s12147_s3 + $0x120] sm:$0xff]  ;;  %v5968_v21 = vld [vmem:[%s12148_s4 + $0x118] sm:$0xff]  ;;  %v5969_v22 = vld [vmem:[%s12148_s4 + $0xa8] sm:$0xff] }
 0xa50   : > { %3611 = vmatpush.msra.mxu2 %v5916_v3  ;;  %3634 = vmatpush.msra.mxu3 %v5917_v20  ;;  %v5973_v3 = vld [vmem:[%s12148_s4 + $0x98] sm:$0xff]  ;;  %v5974_v20 = vld [vmem:[%s12148_s4 + $0x100] sm:$0xff] }
 0xa51   : > { %3720 = vmatpush.msra.mxu0 %v5918_v14  ;;  %v5975_v14 = vld [vmem:[%s12148_s4 + $0x90] sm:$0xff] }
 0xa52   : > { %3612 = vmatpush.msra.mxu2 %v5919_v25  ;;  %3635 = vmatpush.msra.mxu3 %v5920_v26  ;;  %v5976_v25 = vld [vmem:[%s12148_s4 + $0x88] sm:$0xff]  ;;  %v5977_v26 = vld [vmem:[%s12148_s4 + $0x80] sm:$0xff] }
 0xa53   : > { %3757 = vmatpush.msrb.mxu0 %v5921_v28  ;;  %v4861_v28 = vld [vmem:[%s6541_s10 + $0x100] sm:$0xff] }
 0xa54   : > { %3613 = vmatpush.msra.mxu2 %v5922_v33  ;;  %3636 = vmatpush.msra.mxu3 %v5923_v62  ;;  %v3390_v34 = vpop.f32.mrf.mxu3  ;;  %v2967_v30 = vadd.f32 %v4861_v28, %v10223_v51  ;;  %v5992_v28 = vld [vmem:[%s12147_s3 + $0x138] sm:$0xff] }
 0xa55   : > { %v3440_v2 = vmul.f32 %v9948_v10, %v3390_v34  ;;  %3758 = vmatpush.msrb.mxu0 %v5924_v61  ;;  %v5927_v10 = vld [vmem:[%s12147_s3 + $0x68] sm:$0xff] }
 0xa56   : > { %3614 = vmatpush.msra.mxu2 %v5925_v31  ;;  %3637 = vmatpush.msra.mxu3 %v5926_v60  ;;  %v4884_v33 = vmul.f32 -1.442695, %v2967_v30  ;;  %v5993_v30 = vld [vmem:[%s12147_s3 + $0x140] sm:$0xff] }
 0xa57   : > { %3599 = vmatmul.f32.vlgmr.msra.gmra.mxu1 %v3440_v2  ;;  %3759 = vmatpush.msrb.mxu0 %v5927_v10 }
 0xa58   : > { %3615 = vmatpush.msra.mxu2 %v5928_v36  ;;  %3638 = vmatpush.msra.mxu3 %v5929_v37  ;;  %5061 = vpow2.f32 %v4884_v33  ;;  %v5994_v33 = vld [vmem:[%s12148_s4 + $0x2e0] sm:$0xff] }
 0xa59   : > { %3639 = vmatmul.f32.vlgmr.msra.gmra.mxu3 %v3442_v35  ;;  %3777 = vmatpush.msra.mxu1 %v5930_v1 }
 0xa5a   : > { %3616 = vmatpush.msra.mxu2 %v5931_v38  ;;  %3897 = vmatpush.msrb.mxu3 %v5932_v39 }
 0xa5b   : > { %3778 = vmatpush.msra.mxu1 %v5933_v32  ;;  %3760 = vmatpush.msrb.mxu0 %v5934_v40 }
 0xa5c   : > { %3617 = vmatpush.msra.mxu2 %v5935_v41  ;;  %3898 = vmatpush.msrb.mxu3 %v5936_v55 }
 0xa5d   : > { %3779 = vmatpush.msra.mxu1 %v5937_v59 }
 0xa5e   : > { %3618 = vmatpush.msra.mxu2 %v5938_v6  ;;  %3899 = vmatpush.msrb.mxu3 %v5939_v42  ;;  %v5062_v62 = vpop.eup %5061 }
 0xa5f   : > { %3619 = vmatmul.f32.vlgmr.msra.gmra.mxu2 %v3441_v27  ;;  %3780 = vmatpush.msra.mxu1 %v5940_v43  ;;  %v3646_v34 = vadd.f32 1.0, %v5062_v62  ;;  %v5995_v62 = vld [vmem:[%s12148_s4 + $0x360] sm:$0xff] }
 0xa60   : > { %3877 = vmatpush.msrb.mxu2 %v5941_v45  ;;  %3900 = vmatpush.msrb.mxu3 %v5942_v46 }
 0xa61   : > { %5063 = vrcp.f32 %v3646_v34  ;;  %v3658_v6 = vand.u32 2147483648, %v3646_v34  ;;  %vm3652_vm10 = vweird.f32 %v3646_v34  ;;  %v3656_v43 = vand.u32 2147483647, %v3646_v34 }
 0xa62   : > { %4022 = vmatpush.msra.mxu3 %v5943_v47  ;;  %3878 = vmatpush.msrb.mxu2 %v5944_v0 }
 0xa63   : > { %vm3657_vm13 = vcmp.eq.f32.partialorder %v3656_v43, 8.507059e+37  ;;  %v6018_v43 = vld [vmem:[%s12147_s3 + $0x50] sm:$0xff] }
 0xa64   : > { %4023 = vmatpush.msra.mxu3 %v5945_v63  ;;  %3879 = vmatpush.msrb.mxu2 %v5946_v58  ;;  %v3659_v63 = vor.u32 1.1754944e-38, %v3658_v6  ;;  %v6016_v6 = vld [vmem:[%s12148_s4 + $0x2b8] sm:$0xff] }
 0xa66   : > { %4024 = vmatpush.msra.mxu3 %v5947_v48  ;;  %3880 = vmatpush.msrb.mxu2 %v5948_v52 }
 0xa67   : > { %v5064_v10 = vpop.eup %5063 }
 0xa68   : > { %4002 = vmatpush.msra.mxu2 %v5949_v54  ;;  %4025 = vmatpush.msra.mxu3 %v5950_v9  ;;  %v3648_v1 = vmul.f32 %v5064_v10, %v3646_v34  ;;  %vm3653_vm9 = vweird.f32 %v5064_v10  ;;  %v5996_v34 = vld [vmem:[%s12147_s3 + $0xe0] sm:$0xff] }
 0xa69   : > { %vm3654_vm12 = vmor %vm3652_vm10, %vm3653_vm9 }
 0xa6a   : > { %4003 = vmatpush.msra.mxu2 %v5951_v49  ;;  %4026 = vmatpush.msra.mxu3 %v5952_v56  ;;  %v3649_v39 = vsub.f32 1.0, %v3648_v1  ;;  %v6005_v1 = vld [vmem:[%s12147_s3 + $0x38] sm:$0xff] }
 0xa6c   : > { %4004 = vmatpush.msra.mxu2 %v5953_v57  ;;  %4027 = vmatpush.msra.mxu3 %v5954_v44  ;;  %v3650_v51 = vmul.f32 %v5064_v10, %v3649_v39  ;;  %v6008_v39 = vld [vmem:[%s12148_s4 + $0x2c8] sm:$0xff] }
 0xa6e   : > { %4005 = vmatpush.msra.mxu2 %v5955_v53  ;;  %4028 = vmatpush.msra.mxu3 %v5956_v4  ;;  %v3651_v27 = vadd.f32 %v5064_v10, %v3650_v51  ;;  %v6011_v51 = vld [vmem:[%s12148_s4 + $0x70] sm:$0xff] }
 0xa70   : > { %4006 = vmatpush.msra.mxu2 %v5957_v13  ;;  %4029 = vmatpush.msra.mxu3 %v5958_v50  ;;  %v3655_v47 = vsel %vm3654_vm12, %v5064_v10, %v3651_v27  ;;  %v6002_v10 = vld [vmem:[%s12148_s4 + $0x2d0] sm:$0xff]  ;;  %v6014_v27 = vld [vmem:[%s12147_s3 + $0xa8] sm:$0xff] }
 0xa71   : > { %v3660_v48 = vsel %vm3657_vm13, %v3659_v63, %v3655_v47  ;;  %v6021_v47 = vld [vmem:[%s12148_s4 + $0x2b0] sm:$0xff] }
 0xa72   : > { %4007 = vmatpush.msra.mxu2 %v5959_v16  ;;  %4030 = vmatpush.msra.mxu3 %v5960_v15  ;;  %v6023_v63 = vld [vmem:[%s12148_s4 + $0x330] sm:$0xff] }
 0xa74   : > { %4008 = vmatpush.msra.mxu2 %v5961_v5  ;;  %4031 = vmatpush.msra.mxu3 %v5962_v19 }
 0xa76   : > { %4009 = vmatpush.msra.mxu2 %v5963_v7  ;;  %4032 = vmatpush.msra.mxu3 %v5964_v8  ;;  %v5978_v8 = vld [vmem:[%s12147_s3 + $0x128] sm:$0xff] }
 0xa78   : > { %4010 = vmatpush.msra.mxu2 %v5965_v11  ;;  %4033 = vmatpush.msra.mxu3 %v5966_v12  ;;  %v5979_v11 = vld [vmem:[%s12147_s3 + $0x130] sm:$0xff]  ;;  %v5980_v12 = vld [vmem:[%s12148_s4 + $0x2f8] sm:$0xff] }
 0xa7a   : > { %4011 = vmatpush.msra.mxu2 %v5967_v17  ;;  %4034 = vmatpush.msra.mxu3 %v5968_v21  ;;  %v5981_v17 = vld [vmem:[%s12148_s4 + $0x378] sm:$0xff]  ;;  %v5982_v21 = vld [vmem:[%s12147_s3 + $0xd0] sm:$0xff] }
 0xa7c   : > { %4012 = vmatpush.msra.mxu2 %v5969_v22  ;;  %4035 = vmatpush.msra.mxu3 %v5970_v23  ;;  %v5983_v22 = vld [vmem:[%s12147_s3 + $0xd8] sm:$0xff]  ;;  %v5984_v23 = vld [vmem:[%s12148_s4 + $0x2f0] sm:$0xff] }
 0xa7e   : > { %4013 = vmatpush.msra.mxu2 %v5971_v24  ;;  %4036 = vmatpush.msra.mxu3 %v5972_v18  ;;  %v5985_v24 = vld [vmem:[%s12148_s4 + $0x370] sm:$0xff]  ;;  %v5986_v18 = vld [vmem:[%s12147_s3 + $0x78] sm:$0xff] }
 0xa80   : > { %4014 = vmatpush.msra.mxu2 %v5973_v3  ;;  %4037 = vmatpush.msra.mxu3 %v5974_v20  ;;  %v5987_v3 = vld [vmem:[%s12147_s3 + $0x80] sm:$0xff]  ;;  %v5988_v20 = vld [vmem:[%s12148_s4 + $0x2e8] sm:$0xff] }
 0xa82   : > { %4015 = vmatpush.msra.mxu2 %v5975_v14  ;;  %v5989_v14 = vld [vmem:[%s12148_s4 + $0x368] sm:$0xff] }
 0xa84   : > { %4016 = vmatpush.msra.mxu2 %v5976_v25  ;;  %v5990_v25 = vld [vmem:[%s12147_s3 + $0x20] sm:$0xff] }
 0xa86   : > { %4017 = vmatpush.msra.mxu2 %v5977_v26  ;;  %v5991_v26 = vld [vmem:[%s12147_s3 + $0x28] sm:$0xff] }
 0xabc   : > { %v3480_v61 = vpop.f32.mrf.mxu3 }
 0xabe   : > { %v3520_v36 = vpop.f32.mrf.mxu1 }
 0xac2   : > { %v3460_v2 = vpop.f32.mrf.mxu2 }
 0xac3   : > { %v3481_v31 = vadd.f32 %v3480_v61, %v3460_v2  ;;  %v5997_v2 = vld [vmem:[%s12147_s3 + $0xe8] sm:$0xff]  ;;  %v5998_v61 = vld [vmem:[%s12148_s4 + $0x2d8] sm:$0xff] }
 0xac4   : > { %v3500_v60 = vpop.f32.mrf.mxu0 }
 0xac5   : > { %v3501_v35 = vadd.f32 %v3500_v60, %v3481_v31  ;;  %v5999_v31 = vld [vmem:[%s12148_s4 + $0x358] sm:$0xff]  ;;  %v6000_v60 = vld [vmem:[%s12147_s3 + $0x88] sm:$0xff] }
 0xac7   : > { %v3521_v29 = vadd.f32 %v3520_v36, %v3501_v35  ;;  %v6001_v35 = vld [vmem:[%s12147_s3 + $0x90] sm:$0xff] }
 0xac8   : > { %v6003_v36 = vld [vmem:[%s12148_s4 + $0x350] sm:$0xff] }
 0xacc   : > { %v3560_v32 = vpop.f32.mrf.mxu3  ;;  %v3580_v41 = vpop.f32.mrf.mxu0 }
 0xad2   : > { %v3540_v37 = vpop.f32.mrf.mxu2 }
 0xad3   : > { %v3541_v38 = vadd.f32 %v3540_v37, %v3521_v29  ;;  %v6004_v37 = vld [vmem:[%s12147_s3 + $0x30] sm:$0xff]  ;;  %v6006_v29 = vld [vmem:[%s12147_s3 + $0x158] sm:$0xff] }
 0xad4   : > { %v3600_v59 = vpop.f32.mrf.mxu1 }
 0xad5   : > { %v3561_v40 = vadd.f32 %v3560_v32, %v3541_v38  ;;  %v6007_v38 = vld [vmem:[%s12148_s4 + $0x78] sm:$0xff]  ;;  %v6009_v32 = vld [vmem:[%s12148_s4 + $0x348] sm:$0xff] }
 0xad7   : > { %v3581_v55 = vadd.f32 %v3580_v41, %v3561_v40  ;;  %v6010_v40 = vld [vmem:[%s12147_s3 + $0x100] sm:$0xff] }
 0xad8   : > { %v6012_v41 = vld [vmem:[%s12148_s4 + $0x2c0] sm:$0xff] }
 0xad9   : > { %v3601_v42 = vadd.f32 %v3600_v59, %v3581_v55  ;;  %v6013_v55 = vld [vmem:[%s12148_s4 + $0x340] sm:$0xff]  ;;  %v6015_v59 = vld [vmem:[%s12148_s4 + $0x68] sm:$0xff] }
 0xadc   : > { %v3640_v0 = vpop.f32.mrf.mxu3 }
 0xae2   : > { %v3620_v45 = vpop.f32.mrf.mxu2 }
 0xae3   : > { %v3621_v46 = vadd.f32 %v3620_v45, %v3601_v42  ;;  %v6017_v42 = vld [vmem:[%s12148_s4 + $0x338] sm:$0xff]  ;;  %v6019_v45 = vld [vmem:[%s12148_s4 + $0x60] sm:$0xff] }
 0xae5   : > { %v3641_v58 = vadd.f32 %v3640_v0, %v3621_v46  ;;  %v6020_v46 = vld [vmem:[%s12148_s4 + $0x1f8] sm:$0xff] }
 0xae6   : > { %v6022_v0 = vld [vmem:[%s12148_s4 + $0x58] sm:$0xff] }
 0xae7   : > { %v3662_v52 = vmul.f32 %v3660_v48, %v3641_v58  ;;  %v6025_v48 = vld [vmem:[%s12148_s4 + $0x2a8] sm:$0xff] }
 0xae9   : > { %v10875_v54 = vsub.f32 %v3641_v58, %v3662_v52  ;;  %4885 = vst.msk [vmem:[%s6543_s12 + $0x10] sm:$0xff] %vm778_vm1, %v3662_v52  ;;  %v6024_v58 = vld [vmem:[%s12148_s4 + $0x1f0] sm:$0xff] }
 0xaea   : > { %v6026_v52 = vld [vmem:[%s12148_s4 + $0x50] sm:$0xff] }
 0xaeb   : > { %4886 = vst.msk [vmem:[%s6545_s13 + $0x10] sm:$0xff] %vm778_vm1, %v10875_v54  ;;  %v3682_v9 = vsel %vm778_vm1, %v10875_v54, 0.0 }
 0xaec   : > { %3683 = vadd.xlane.f32.xlu2 %v3682_v9  ;;  %v6027_v9 = vld [vmem:[%s12148_s4 + $0x328] sm:$0xff] }
 0xb5f   : > { %v3684_v49 = vpop.xlane.xlu2 %3683 }
 0xb60   : > { %vm3685_vm14 = vcmp.eq.f32.partialorder %v3684_v49, 0.0 }
 0xb61   : > { %v3686_v56 = vsel %vm3685_vm14, 1.0, %v3684_v49  ;;  %v6028_v49 = vld [vmem:[%s12148_s4 + $0x1e8] sm:$0xff] }
 0xb62   : > { %5065 = vrcp.f32 %v3686_v56  ;;  %v3698_v4 = vand.u32 2147483648, %v3686_v56  ;;  %v3696_v50 = vand.u32 2147483647, %v3686_v56  ;;  %vm3692_vm0 = vweird.f32 %v3686_v56 }
 0xb64   : > { %v3699_v15 = vor.u32 1.1754944e-38, %v3698_v4  ;;  %vm3697_vm3 = vcmp.eq.f32.partialorder %v3696_v50, 8.507059e+37  ;;  %v6033_v4 = vld [vmem:[%s12148_s4 + $0x40] sm:$0xff]  ;;  %v6035_v50 = vld [vmem:[%s12148_s4 + $0x290] sm:$0xff] }
 0xb68   : > { %v5066_v57 = vpop.eup %5065 }
 0xb69   : > { %v3688_v44 = vmul.f32 %v5066_v57, %v3686_v56  ;;  %vm3693_vm15 = vweird.f32 %v5066_v57  ;;  %v6029_v56 = vld [vmem:[%s12148_s4 + $0x2a0] sm:$0xff] }
 0xb6a   : > { %vm3694_vm2 = vmor %vm3692_vm0, %vm3693_vm15 }
 0xb6b   : > { %v3689_v53 = vsub.f32 1.0, %v3688_v44  ;;  %v6031_v44 = vld [vmem:[%s12148_s4 + $0x320] sm:$0xff] }
 0xb6d   : > { %v3690_v13 = vmul.f32 %v5066_v57, %v3689_v53  ;;  %v6032_v53 = vld [vmem:[%s12148_s4 + $0x298] sm:$0xff] }
 0xb6f   : > { %v3691_v16 = vadd.f32 %v5066_v57, %v3690_v13  ;;  %v6034_v13 = vld [vmem:[%s12148_s4 + $0x1e0] sm:$0xff] }
 0xb71   : > { %v3695_v5 = vsel %vm3694_vm2, %v5066_v57, %v3691_v16  ;;  %v6030_v57 = vld [vmem:[%s12148_s4 + $0x48] sm:$0xff]  ;;  %v6036_v16 = vld [vmem:[%s12148_s4 + $0x318] sm:$0xff] }
 0xb72   : > { %v3700_v19 = vsel %vm3697_vm3, %v3699_v15, %v3695_v5  ;;  %v6037_v15 = vld [vmem:[%s12148_s4 + $0x38] sm:$0xff] }
 0xb73   : > { %v10885_v7 = vmul.f32 %v3700_v19, %v10875_v54  ;;  %v6038_v5 = vld [vmem:[%s12148_s4 + $0x1d8] sm:$0xff]  ;;  %v6039_v19 = vld [vmem:[%s12148_s4 + $0x288] sm:$0xff] }
 0xb75   : > { %4899 = vmatmul.msk.f32.vlgmr.msra.gmra.mxu0 %vm778_vm1, %v10885_v7  ;;  %4900 = vmatmul.msk.f32.vlgmr.msrb.gmra.mxu1 %vm778_vm1, %v10885_v7 }
 0xb76   : > { %4907 = vmatmul.msk.f32.vlgmr.msrb.gmra.mxu2 %vm778_vm1, %v10885_v7  ;;  %4908 = vmatmul.msk.f32.vlgmr.msrb.gmra.mxu3 %vm778_vm1, %v10885_v7 }
 0xb77   : > { %3797 = vmatpush.msra.mxu0 %v5978_v8  ;;  %3817 = vmatpush.msrb.mxu1 %v5979_v11  ;;  %v6041_v8 = vld [vmem:[%s12148_s4 + $0x30] sm:$0xff] }
 0xb78   : > { %4082 = vmatpush.msrb.mxu2 %v5980_v12  ;;  %4102 = vmatpush.msrb.mxu3 %v5981_v17  ;;  %v6042_v11 = vld [vmem:[%s12148_s4 + $0x1d0] sm:$0xff]  ;;  %v6043_v12 = vld [vmem:[%s12148_s4 + $0x280] sm:$0xff]  ;;  %v6044_v17 = vld [vmem:[%s12148_s4 + $0x308] sm:$0xff] }
 0xb79   : > { %3798 = vmatpush.msra.mxu0 %v5982_v21  ;;  %3818 = vmatpush.msrb.mxu1 %v5983_v22  ;;  %v6045_v21 = vld [vmem:[%s12148_s4 + $0x28] sm:$0xff] }
 0xb7a   : > { %4083 = vmatpush.msrb.mxu2 %v5984_v23  ;;  %4103 = vmatpush.msrb.mxu3 %v5985_v24  ;;  %v6046_v22 = vld [vmem:[%s12148_s4 + $0x1c8] sm:$0xff]  ;;  %v6047_v23 = vld [vmem:[%s12148_s4 + $0x300] sm:$0xff] }
 0xb7b   : > { %3799 = vmatpush.msra.mxu0 %v5986_v18  ;;  %3819 = vmatpush.msrb.mxu1 %v5987_v3  ;;  %v6048_v24 = vld [vmem:[%s12148_s4 + $0x20] sm:$0xff]  ;;  %v6050_v3 = vld [vmem:[%s12148_s4 + $0x18] sm:$0xff] }
 0xb7c   : > { %4084 = vmatpush.msrb.mxu2 %v5988_v20  ;;  %4104 = vmatpush.msrb.mxu3 %v5989_v14  ;;  %v6049_v18 = vld [vmem:[%s12148_s4 + $0x1c0] sm:$0xff]  ;;  %v6051_v20 = vld [vmem:[%s12148_s4 + $0x1b8] sm:$0xff]  ;;  %v6052_v14 = vld [vmem:[%s12148_s4 + $0x10] sm:$0xff] }
 0xb7d   : > { %4901 = vmatmul.msk.f32.vlgmr.msrb.gmra.mxu0 %vm778_vm1, %v10885_v7  ;;  %4902 = vmatmul.msk.f32.vlgmr.msra.gmra.mxu1 %vm778_vm1, %v10885_v7 }
 0xb7e   : > { %3800 = vmatpush.msra.mxu0 %v5990_v25  ;;  %3820 = vmatpush.msrb.mxu1 %v5991_v26  ;;  %v6053_v25 = vld [vmem:[%s12148_s4 + $0x1b0] sm:$0xff]  ;;  %v6054_v26 = vld [vmem:[%s12148_s4 + $0x8] sm:$0xff] }
 0xb7f   : > { %4085 = vmatpush.msrb.mxu2 %v5994_v33  ;;  %4105 = vmatpush.msrb.mxu3 %v5995_v62  ;;  %v6057_v33 = vld [vmem:[%s12148_s4 + $0x1a0] sm:$0xff]  ;;  %v6058_v62 = vld [vmem:[%s12148_s4 + $0x278] sm:$0xff] }
 0xb80   : > { %3837 = vmatpush.msrb.mxu0 %v5992_v28  ;;  %3857 = vmatpush.msra.mxu1 %v5993_v30  ;;  %v6055_v28 = vld [vmem:[%s12148_s4 + $0x1a8] sm:$0xff]  ;;  %v6056_v30 = vld [vmem:[%s12148_s4] sm:$0xff] }
 0xb81   : > { %4086 = vmatpush.msrb.mxu2 %v5998_v61  ;;  %4106 = vmatpush.msrb.mxu3 %v5999_v31  ;;  %v6061_v61 = vld [vmem:[%s12148_s4 + $0x190] sm:$0xff]  ;;  %v6062_v31 = vld [vmem:[%s12148_s4 + $0x268] sm:$0xff] }
 0xb82   : > { %3838 = vmatpush.msrb.mxu0 %v5996_v34  ;;  %3858 = vmatpush.msra.mxu1 %v5997_v2  ;;  %v6059_v34 = vld [vmem:[%s12148_s4 + $0x198] sm:$0xff]  ;;  %v6060_v2 = vld [vmem:[%s12148_s4 + $0x270] sm:$0xff] }
 0xb83   : > { %4087 = vmatpush.msrb.mxu2 %v6002_v10  ;;  %4107 = vmatpush.msrb.mxu3 %v6003_v36  ;;  %v6065_v10 = vld [vmem:[%s12148_s4 + $0x180] sm:$0xff]  ;;  %v6066_v36 = vld [vmem:[%s12148_s4 + $0x258] sm:$0xff] }
 0xb84   : > { %3839 = vmatpush.msrb.mxu0 %v6000_v60  ;;  %3859 = vmatpush.msra.mxu1 %v6001_v35  ;;  %v6063_v60 = vld [vmem:[%s12148_s4 + $0x188] sm:$0xff]  ;;  %v6064_v35 = vld [vmem:[%s12148_s4 + $0x260] sm:$0xff] }
 0xb85   : > { %4903 = vmatmul.msk.f32.vlgmr.msra.gmra.mxu0 %vm778_vm1, %v10885_v7  ;;  %4904 = vmatmul.msk.f32.vlgmr.msrb.gmra.mxu1 %vm778_vm1, %v10885_v7 }
 0xb86   : > { %3840 = vmatpush.msrb.mxu0 %v6004_v37  ;;  %3860 = vmatpush.msra.mxu1 %v6005_v1  ;;  %v6067_v37 = vld [vmem:[%s12148_s4 + $0x3f8] sm:$0xff]  ;;  %v6068_v1 = vld [vmem:[%s12148_s4 + $0x250] sm:$0xff] }
 0xb87   : > { %4088 = vmatpush.msrb.mxu2 %v6008_v39  ;;  %4108 = vmatpush.msrb.mxu3 %v6009_v32  ;;  %v6071_v39 = vld [vmem:[%s12148_s4 + $0x3e8] sm:$0xff]  ;;  %v6072_v32 = vld [vmem:[%s12148_s4 + $0x240] sm:$0xff] }
 0xb88   : > { %3917 = vmatpush.msra.mxu0 %v6006_v29  ;;  %3982 = vmatpush.msrb.mxu1 %v6007_v38  ;;  %v6069_v29 = vld [vmem:[%s12148_s4 + $0x3f0] sm:$0xff]  ;;  %v6070_v38 = vld [vmem:[%s12148_s4 + $0x248] sm:$0xff] }
 0xb89   : > { %4089 = vmatpush.msrb.mxu2 %v6012_v41  ;;  %4109 = vmatpush.msrb.mxu3 %v6013_v55  ;;  %v6075_v41 = vld [vmem:[%s12148_s4 + $0x3d8] sm:$0xff]  ;;  %v6076_v55 = vld [vmem:[%s12148_s4 + $0x230] sm:$0xff] }
 0xb8a   : > { %3918 = vmatpush.msra.mxu0 %v6010_v40  ;;  %3983 = vmatpush.msrb.mxu1 %v6011_v51  ;;  %v6073_v40 = vld [vmem:[%s12148_s4 + $0x3e0] sm:$0xff]  ;;  %v6074_v51 = vld [vmem:[%s12148_s4 + $0x238] sm:$0xff] }
 0xb8b   : > { %4090 = vmatpush.msrb.mxu2 %v6016_v6  ;;  %4110 = vmatpush.msrb.mxu3 %v6017_v42  ;;  %v6079_v6 = vld [vmem:[%s12148_s4 + $0x3c8] sm:$0xff]  ;;  %v6080_v42 = vld [vmem:[%s12148_s4 + $0x220] sm:$0xff] }
 0xb8c   : > { %3919 = vmatpush.msra.mxu0 %v6014_v27  ;;  %3984 = vmatpush.msrb.mxu1 %v6015_v59  ;;  %v6077_v27 = vld [vmem:[%s12148_s4 + $0x3d0] sm:$0xff]  ;;  %v6078_v59 = vld [vmem:[%s12148_s4 + $0x228] sm:$0xff] }
 0xb8d   : > { %4905 = vmatmul.msk.f32.vlgmr.msrb.gmra.mxu0 %vm778_vm1, %v10885_v7  ;;  %4906 = vmatmul.msk.f32.vlgmr.msra.gmra.mxu1 %vm778_vm1, %v10885_v7 }
 0xb8e   : > { %3920 = vmatpush.msra.mxu0 %v6018_v43  ;;  %3985 = vmatpush.msrb.mxu1 %v6019_v45  ;;  %v6081_v43 = vld [vmem:[%s12148_s4 + $0x3c0] sm:$0xff]  ;;  %v6082_v45 = vld [vmem:[%s12148_s4 + $0x218] sm:$0xff] }
 0xb8f   : > { %4091 = vmatpush.msrb.mxu2 %v6021_v47  ;;  %4111 = vmatpush.msrb.mxu3 %v6023_v63  ;;  %v6084_v47 = vld [vmem:[%s12148_s4 + $0x210] sm:$0xff]  ;;  %v6086_v63 = vld [vmem:[%s12148_s4 + $0x208] sm:$0xff] }
 0xb90   : > { %4042 = vmatpush.msrb.mxu0 %v6020_v46  ;;  %3986 = vmatpush.msrb.mxu1 %v6022_v0  ;;  %v6083_v46 = vld [vmem:[%s12148_s4 + $0x3b8] sm:$0xff]  ;;  %v6085_v0 = vld [vmem:[%s12148_s4 + $0x3b0] sm:$0xff] }
 0xb91   : > { %4092 = vmatpush.msrb.mxu2 %v6025_v48  ;;  %4112 = vmatpush.msrb.mxu3 %v6027_v9  ;;  %v6088_v48 = vld [vmem:[%s12148_s4 + $0x200] sm:$0xff]  ;;  %v6090_v9 = vld [vmem:[%s12148_s4 + $0x398] sm:$0xff] }
 0xb92   : > { %4043 = vmatpush.msrb.mxu0 %v6024_v58  ;;  %3987 = vmatpush.msrb.mxu1 %v6026_v52  ;;  %v6087_v58 = vld [vmem:[%s12148_s4 + $0x3a8] sm:$0xff]  ;;  %v6089_v52 = vld [vmem:[%s12148_s4 + $0x3a0] sm:$0xff] }
 0xb93   : > { %4093 = vmatpush.msrb.mxu2 %v6029_v56  ;;  %4113 = vmatpush.msrb.mxu3 %v6031_v44  ;;  %v6092_v56 = vld [vmem:[%s12148_s4 + $0x388] sm:$0xff] }
 0xb94   : > { %4044 = vmatpush.msrb.mxu0 %v6028_v49  ;;  %3988 = vmatpush.msrb.mxu1 %v6030_v57  ;;  %v6091_v49 = vld [vmem:[%s12148_s4 + $0x390] sm:$0xff]  ;;  %v6093_v57 = vld [vmem:[%s12148_s4 + $0x380] sm:$0xff] }
 0xb95   : > { %4909 = vmatmul.msk.f32.vlgmr.msra.gmra.mxu0 %vm778_vm1, %v10885_v7  ;;  %4094 = vmatpush.msrb.mxu2 %v6032_v53  ;;  %v6040_v7 = vld [vmem:[%s12148_s4 + $0x310] sm:$0xff] }
 0xb96   : > { %3989 = vmatpush.msrb.mxu1 %v6033_v4  ;;  %4045 = vmatpush.msrb.mxu0 %v6034_v13 }
 0xb97   : > { %4095 = vmatpush.msrb.mxu2 %v6035_v50  ;;  %4114 = vmatpush.msrb.mxu3 %v6036_v16  ;;  %v4891_v50 = vld [vmem:[%s6541_s10 + $0x128] sm:$0xff]  ;;  %v4892_v16 = vld [vmem:[%s6541_s10 + $0x130] sm:$0xff] }
 0xb98   : > { %3990 = vmatpush.msrb.mxu1 %v6037_v15  ;;  %4046 = vmatpush.msrb.mxu0 %v6038_v5  ;;  %v4887_v15 = vld [vmem:[%s6541_s10 + $0x108] sm:$0xff]  ;;  %v4888_v5 = vld [vmem:[%s6541_s10 + $0x110] sm:$0xff] }
 0xb99   : > { %4096 = vmatpush.msrb.mxu2 %v6039_v19  ;;  %4115 = vmatpush.msrb.mxu3 %v6040_v7 }
 0xb9a   : > { %3991 = vmatpush.msrb.mxu1 %v6041_v8  ;;  %4047 = vmatpush.msrb.mxu0 %v6042_v11 }
 0xb9b   : > { %4097 = vmatpush.msrb.mxu2 %v6043_v12  ;;  %4116 = vmatpush.msrb.mxu3 %v6044_v17 }
 0xb9c   : > { %3992 = vmatpush.msrb.mxu1 %v6045_v21  ;;  %4048 = vmatpush.msrb.mxu0 %v6046_v22  ;;  %v4895_v21 = vld [vmem:[%s6541_s10 + $0x148] sm:$0xff] }
 0xb9d   : > { %4117 = vmatpush.msrb.mxu3 %v6047_v23  ;;  %v4896_v23 = vld [vmem:[%s6541_s10 + $0x150] sm:$0xff] }
 0xb9e   : > { %3993 = vmatpush.msrb.mxu1 %v6048_v24  ;;  %4049 = vmatpush.msrb.mxu0 %v6049_v18  ;;  %v4889_v18 = vld [vmem:[%s6541_s10 + $0x118] sm:$0xff] }
 0xba0   : > { %3994 = vmatpush.msrb.mxu1 %v6050_v3  ;;  %4050 = vmatpush.msrb.mxu0 %v6051_v20  ;;  %v4890_v3 = vld [vmem:[%s6541_s10 + $0x120] sm:$0xff] }
 0xba2   : > { %3995 = vmatpush.msrb.mxu1 %v6052_v14  ;;  %4051 = vmatpush.msrb.mxu0 %v6053_v25  ;;  %v4893_v25 = vld [vmem:[%s6541_s10 + $0x138] sm:$0xff] }
 0xba4   : > { %3996 = vmatpush.msrb.mxu1 %v6054_v26  ;;  %4052 = vmatpush.msrb.mxu0 %v6055_v28  ;;  %v4894_v26 = vld [vmem:[%s6541_s10 + $0x140] sm:$0xff] }
 0xba6   : > { %3997 = vmatpush.msrb.mxu1 %v6056_v30  ;;  %4053 = vmatpush.msrb.mxu0 %v6057_v33 }
 0xba8   : > { %4062 = vmatpush.msra.mxu1 %v6058_v62  ;;  %4054 = vmatpush.msrb.mxu0 %v6059_v34 }
 0xbaa   : > { %4063 = vmatpush.msra.mxu1 %v6060_v2  ;;  %4055 = vmatpush.msrb.mxu0 %v6061_v61 }
 0xbac   : > { %4064 = vmatpush.msra.mxu1 %v6062_v31  ;;  %4056 = vmatpush.msrb.mxu0 %v6063_v60 }
 0xbae   : > { %4065 = vmatpush.msra.mxu1 %v6064_v35  ;;  %4057 = vmatpush.msrb.mxu0 %v6065_v10 }
 0xbb0   : > { %4066 = vmatpush.msra.mxu1 %v6066_v36  ;;  %4122 = vmatpush.msra.mxu0 %v6067_v37 }
 0xbb2   : > { %4067 = vmatpush.msra.mxu1 %v6068_v1  ;;  %4123 = vmatpush.msra.mxu0 %v6069_v29 }
 0xbb4   : > { %4068 = vmatpush.msra.mxu1 %v6070_v38  ;;  %4124 = vmatpush.msra.mxu0 %v6071_v39 }
 0xbb6   : > { %4069 = vmatpush.msra.mxu1 %v6072_v32  ;;  %4125 = vmatpush.msra.mxu0 %v6073_v40 }
 0xbb8   : > { %4070 = vmatpush.msra.mxu1 %v6074_v51  ;;  %4126 = vmatpush.msra.mxu0 %v6075_v41 }
 0xbba   : > { %4071 = vmatpush.msra.mxu1 %v6076_v55  ;;  %4127 = vmatpush.msra.mxu0 %v6077_v27 }
 0xbbc   : > { %4072 = vmatpush.msra.mxu1 %v6078_v59  ;;  %4128 = vmatpush.msra.mxu0 %v6079_v6 }
 0xbbe   : > { %4073 = vmatpush.msra.mxu1 %v6080_v42  ;;  %4129 = vmatpush.msra.mxu0 %v6081_v43 }
 0xbc0   : > { %4074 = vmatpush.msra.mxu1 %v6082_v45  ;;  %4130 = vmatpush.msra.mxu0 %v6083_v46 }
 0xbc2   : > { %4075 = vmatpush.msra.mxu1 %v6084_v47  ;;  %4131 = vmatpush.msra.mxu0 %v6085_v0 }
 0xbc4   : > { %4076 = vmatpush.msra.mxu1 %v6086_v63  ;;  %4132 = vmatpush.msra.mxu0 %v6087_v58 }
 0xbc6   : > { %4077 = vmatpush.msra.mxu1 %v6088_v48  ;;  %4133 = vmatpush.msra.mxu0 %v6089_v52 }
 0xbc8   : > { %4134 = vmatpush.msra.mxu0 %v6090_v9  ;;  %v6094_v9 = vld [vmem:[%s12148_s4 + $0x478] sm:$0xff] }
 0xbca   : > { %4135 = vmatpush.msra.mxu0 %v6091_v49 }
 0xbcc   : > { %4136 = vmatpush.msra.mxu0 %v6092_v56  ;;  %v6095_v56 = vld [vmem:[%s12148_s4 + $0x4f8] sm:$0xff] }
 0xbce   : > { %4137 = vmatpush.msra.mxu0 %v6093_v57  ;;  %v6096_v57 = vld [vmem:[%s12148_s4 + $0x470] sm:$0xff] }
 0xbf2   : > { %v3722_v44 = vpop.f32.mrf.mxu0  ;;  %v3742_v53 = vpop.f32.mrf.mxu1 }
 0xbf3   : > { %v3925_v12 = vadd.f32 %v4887_v15, %v3722_v44  ;;  %v3926_v17 = vadd.f32 %v4888_v5, %v3742_v53  ;;  %v6097_v44 = vld [vmem:[%s12148_s4 + $0x4f0] sm:$0xff]  ;;  %v6098_v53 = vld [vmem:[%s12149_s5 + $0x140] sm:$0xff] }
 0xbf4   : > { %v6103_v5 = vld [vmem:[%s12148_s4 + $0x460] sm:$0xff] }
 0xbf9   : > { %v3882_v22 = vpop.f32.mrf.mxu2  ;;  %v3902_v24 = vpop.f32.mrf.mxu3 }
 0xbfa   : > { %v3762_v4 = vpop.f32.mrf.mxu0  ;;  %v3782_v13 = vpop.f32.mrf.mxu1  ;;  %v11267_v28 = vadd.f32 %v4895_v21, %v3882_v22  ;;  %v11269_v30 = vadd.f32 %v4896_v23, %v3902_v24  ;;  %v6107_v21 = vld [vmem:[%s12148_s4 + $0x4d8] sm:$0xff]  ;;  %v6108_v22 = vld [vmem:[%s12148_s4 + $0x450] sm:$0xff]  ;;  %v6110_v24 = vld [vmem:[%s12149_s5 + $0xa0] sm:$0xff] }
 0xbfb   : > { %v3927_v33 = vadd.f32 %v4889_v18, %v3762_v4  ;;  %v3928_v62 = vadd.f32 %v4890_v3, %v3782_v13  ;;  %v6099_v4 = vld [vmem:[%s12148_s4 + $0x468] sm:$0xff]  ;;  %v6109_v23 = vld [vmem:[%s12148_s4 + $0x4d0] sm:$0xff] }
 0xbfc   : > { %v6100_v13 = vld [vmem:[%s12149_s5 + $0x148] sm:$0xff] }
 0xbfd   : > { %v6111_v18 = vld [vmem:[%s12148_s4 + $0x448] sm:$0xff] }
 0xbfe   : > { %v6112_v3 = vld [vmem:[%s12149_s5 + $0xa8] sm:$0xff] }
 0xc02   : > { %v3802_v19 = vpop.f32.mrf.mxu0  ;;  %v3822_v7 = vpop.f32.mrf.mxu1 }
 0xc03   : > { %v3929_v8 = vadd.f32 %v4891_v50, %v3802_v19  ;;  %v3930_v11 = vadd.f32 %v4892_v16, %v3822_v7  ;;  %v6101_v50 = vld [vmem:[%s12148_s4 + $0x4e8] sm:$0xff]  ;;  %v6102_v16 = vld [vmem:[%s12149_s5 + $0xf0] sm:$0xff]  ;;  %v6104_v19 = vld [vmem:[%s12149_s5 + $0xf8] sm:$0xff] }
 0xc05   : > { %v3941_v20 = vmax.f32 %v3925_v12, %v3929_v8  ;;  %v3942_v14 = vmax.f32 %v3926_v17, %v3930_v11 }
 0xc07   : > { %v3945_v61 = vmax.f32 %v3941_v20, %v11267_v28  ;;  %v3946_v31 = vmax.f32 %v3942_v14, %v11269_v30  ;;  %v6113_v20 = vld [vmem:[%s12148_s4 + $0x4c8] sm:$0xff]  ;;  %v6114_v14 = vld [vmem:[%s12149_s5 + $0x50] sm:$0xff] }
 0xc09   : > { %v3947_v37 = vmax.f32 %v3945_v61, %v3946_v31  ;;  %v6120_v61 = vld [vmem:[%s12149_s5 + $0x8] sm:$0xff] }
 0xc0a   : > { %v3842_v34 = vpop.f32.mrf.mxu0  ;;  %v3862_v2 = vpop.f32.mrf.mxu1 }
 0xc0b   : > { %v3931_v60 = vadd.f32 %v4893_v25, %v3842_v34  ;;  %v3932_v35 = vadd.f32 %v4894_v26, %v3862_v2  ;;  %v6115_v25 = vld [vmem:[%s12148_s4 + $0x440] sm:$0xff]  ;;  %v6116_v26 = vld [vmem:[%s12149_s5 + $0x58] sm:$0xff] }
 0xc0c   : > { %v6119_v2 = vld [vmem:[%s12148_s4 + $0x438] sm:$0xff] }
 0xc0d   : > { %v3943_v10 = vmax.f32 %v3927_v33, %v3931_v60  ;;  %v3944_v36 = vmax.f32 %v3928_v62, %v3932_v35 }
 0xc0f   : > { %v3948_v1 = vmax.f32 %v3943_v10, %v3944_v36  ;;  %v6124_v10 = vld [vmem:[%s12149_s5 + $0x158] sm:$0xff]  ;;  %v6126_v36 = vld [vmem:[%s12149_s5 + $0x100] sm:$0xff] }
 0xc11   : > { %v3949_v29 = vmax.f32 %v3947_v37, %v3948_v1  ;;  %v6127_v1 = vld [vmem:[%s12148_s4 + $0x428] sm:$0xff] }
 0xc13   : > { %3950 = vmax.xlane.f32.xlu1 %v3949_v29  ;;  %v6128_v29 = vld [vmem:[%s12149_s5 + $0x108] sm:$0xff] }
 0xc86   : > { %v11273_v38 = vpop.xlane.xlu1 %3950 }
 0xc87   : > { %v3952_v39 = vsub.f32 %v3925_v12, %v11273_v38  ;;  %v3953_v32 = vsub.f32 %v3926_v17, %v11273_v38  ;;  %v3954_v40 = vsub.f32 %v3927_v33, %v11273_v38  ;;  %v3955_v51 = vsub.f32 %v3928_v62, %v11273_v38  ;;  %v6106_v12 = vld [vmem:[%s12148_s4 + $0x458] sm:$0xff]  ;;  %v6117_v33 = vld [vmem:[%s12148_s4 + $0x4c0] sm:$0xff] }
 0xc88   : > { %v3956_v6 = vsub.f32 %v3929_v8, %v11273_v38  ;;  %v3957_v42 = vsub.f32 %v3930_v11, %v11273_v38  ;;  %v3958_v43 = vsub.f32 %v3931_v60, %v11273_v38  ;;  %v3959_v45 = vsub.f32 %v3932_v35, %v11273_v38  ;;  %v6105_v8 = vld [vmem:[%s12148_s4 + $0x4e0] sm:$0xff]  ;;  %v6121_v60 = vld [vmem:[%s12148_s4 + $0x4b8] sm:$0xff]  ;;  %v6123_v35 = vld [vmem:[%s12148_s4 + $0x430] sm:$0xff] }
 0xc89   : > { %v3962_v41 = vmul.f32 1.442695, %v3952_v39  ;;  %v3964_v55 = vmul.f32 1.442695, %v3953_v32  ;;  %v3966_v27 = vmul.f32 1.442695, %v3954_v40  ;;  %v3960_v34 = vsub.f32 %v11267_v28, %v11273_v38 }
 0xc8a   : > { %v3968_v59 = vmul.f32 1.442695, %v3955_v51  ;;  %v3970_v46 = vmul.f32 1.442695, %v3956_v6  ;;  %v3972_v47 = vmul.f32 1.442695, %v3957_v42  ;;  %v3961_v31 = vsub.f32 %v11269_v30, %v11273_v38 }
 0xc8b   : > { %5067 = vpow2.f32 %v3962_v41  ;;  %v3974_v63 = vmul.f32 1.442695, %v3958_v43  ;;  %v3976_v48 = vmul.f32 1.442695, %v3959_v45  ;;  %v6118_v62 = vld [vmem:[%s12149_s5] sm:$0xff]  ;;  %v6122_v28 = vld [vmem:[%s12149_s5 + $0x150] sm:$0xff] }
 0xc8c   : > { %5069 = vpow2.f32 %v3964_v55  ;;  %v6125_v30 = vld [vmem:[%s12148_s4 + $0x4b0] sm:$0xff]  ;;  %v3978_v37 = vmul.f32 1.442695, %v3960_v34  ;;  %v3980_v38 = vmul.f32 1.442695, %v3961_v31  ;;  %v6129_v39 = vld [vmem:[%s12148_s4 + $0x4a8] sm:$0xff] }
 0xc8d   : > { %5071 = vpow2.f32 %v3966_v27  ;;  %v6130_v32 = vld [vmem:[%s12149_s5 + $0xb0] sm:$0xff]  ;;  %v6131_v40 = vld [vmem:[%s12148_s4 + $0x420] sm:$0xff]  ;;  %v6132_v51 = vld [vmem:[%s12149_s5 + $0xb8] sm:$0xff] }
 0xc8e   : > { %5073 = vpow2.f32 %v3968_v59  ;;  %v6133_v41 = vld [vmem:[%s12148_s4 + $0x4a0] sm:$0xff]  ;;  %v6135_v27 = vld [vmem:[%s12148_s4 + $0x418] sm:$0xff]  ;;  %v6136_v59 = vld [vmem:[%s12149_s5 + $0x68] sm:$0xff] }
 0xc8f   : > { %5075 = vpow2.f32 %v3970_v46  ;;  %v6134_v55 = vld [vmem:[%s12149_s5 + $0x60] sm:$0xff]  ;;  %v6137_v6 = vld [vmem:[%s12148_s4 + $0x498] sm:$0xff]  ;;  %v6138_v42 = vld [vmem:[%s12149_s5 + $0x10] sm:$0xff] }
 0xc90   : > { %5077 = vpow2.f32 %v3972_v47  ;;  %v6139_v43 = vld [vmem:[%s12148_s4 + $0x410] sm:$0xff]  ;;  %v6140_v45 = vld [vmem:[%s12149_s5 + $0x18] sm:$0xff]  ;;  %v6142_v47 = vld [vmem:[%s12148_s4 + $0x408] sm:$0xff] }
 0xc91   : > { %v11283_v0 = vpop.eup %5067  ;;  %5079 = vpow2.f32 %v3974_v63  ;;  %v6141_v46 = vld [vmem:[%s12148_s4 + $0x490] sm:$0xff]  ;;  %v6143_v63 = vld [vmem:[%s12148_s4 + $0x488] sm:$0xff]  ;;  %v6171_v31 = vld [vmem:[%s12150_s6 + $0xc0] sm:$0xff] }
 0xc92   : > { %v11285_v58 = vpop.eup %5069  ;;  %3998 = vmatmul.f32.vlgmr.msrb.gmra.mxu1 %v11283_v0  ;;  %5081 = vpow2.f32 %v3976_v48  ;;  %v6168_v34 = vld [vmem:[%s12150_s6 + $0x48] sm:$0xff] }
 0xc93   : > { %v11288_v52 = vpop.eup %5071  ;;  %4018 = vmatmul.f32.vlgmr.msra.gmra.mxu2 %v11285_v58  ;;  %4142 = vmatpush.msrb.mxu1 %v6094_v9  ;;  %5083 = vpow2.f32 %v3978_v37  ;;  %v6144_v9 = vld [vmem:[%s12148_s4 + $0x400] sm:$0xff] }
 0xc94   : > { %v11294_v49 = vpop.eup %5073  ;;  %4038 = vmatmul.f32.vlgmr.msra.gmra.mxu3 %v11288_v52  ;;  %4162 = vmatpush.msra.mxu2 %v6095_v56  ;;  %5085 = vpow2.f32 %v3980_v38  ;;  %v6178_v37 = vld [vmem:[%s12150_s6 + $0x20] sm:$0xff]  ;;  %v6181_v38 = vld [vmem:[%s12150_s6 + $0x98] sm:$0xff] }
 0xc95   : > { %4058 = vmatmul.f32.vlgmr.msrb.gmra.mxu0 %v11294_v49  ;;  %4143 = vmatpush.msrb.mxu1 %v6096_v57  ;;  %v11322_v15 = vpop.eup %5075  ;;  %v6145_v57 = vld [vmem:[%s12148_s4 + $0x480] sm:$0xff] }
 0xc96   : > { %4163 = vmatpush.msra.mxu2 %v6097_v44  ;;  %4212 = vmatpush.msra.mxu3 %v6098_v53  ;;  %v11330_v7 = vpop.eup %5077  ;;  %v6146_v44 = vld [vmem:[%s12149_s5 + $0x170] sm:$0xff]  ;;  %v6147_v53 = vld [vmem:[%s12149_s5 + $0x178] sm:$0xff] }
 0xc97   : > { %4144 = vmatpush.msrb.mxu1 %v6099_v4  ;;  %4232 = vmatpush.msrb.mxu0 %v6100_v13  ;;  %v11336_v11 = vpop.eup %5079  ;;  %v6148_v4 = vld [vmem:[%s12149_s5 + $0x120] sm:$0xff]  ;;  %v6149_v13 = vld [vmem:[%s12149_s5 + $0x128] sm:$0xff] }
 0xc98   : > { %4164 = vmatpush.msra.mxu2 %v6101_v50  ;;  %4213 = vmatpush.msra.mxu3 %v6102_v16  ;;  %v11342_v17 = vpop.eup %5081  ;;  %v6150_v50 = vld [vmem:[%s12149_s5 + $0xd0] sm:$0xff]  ;;  %v6151_v16 = vld [vmem:[%s12149_s5 + $0xd8] sm:$0xff] }
 0xc99   : > { %4145 = vmatpush.msrb.mxu1 %v6103_v5  ;;  %4233 = vmatpush.msrb.mxu0 %v6104_v19  ;;  %v11461_v48 = vpop.eup %5083  ;;  %v6152_v5 = vld [vmem:[%s12149_s5 + $0x80] sm:$0xff]  ;;  %v6153_v19 = vld [vmem:[%s12149_s5 + $0x88] sm:$0xff] }
 0xc9a   : > { %4165 = vmatpush.msra.mxu2 %v6105_v8  ;;  %4078 = vmatmul.f32.vlgmr.msra.gmra.mxu1 %v11322_v15  ;;  %v11466_v56 = vpop.eup %5085  ;;  %v6154_v8 = vld [vmem:[%s12149_s5 + $0x30] sm:$0xff] }
 0xc9b   : > { %4098 = vmatmul.f32.vlgmr.msrb.gmra.mxu2 %v11330_v7  ;;  %4146 = vmatpush.msrb.mxu1 %v6106_v12  ;;  %v6155_v12 = vld [vmem:[%s12149_s5 + $0x38] sm:$0xff] }
 0xc9c   : > { %4118 = vmatmul.f32.vlgmr.msrb.gmra.mxu3 %v11336_v11  ;;  %4166 = vmatpush.msra.mxu2 %v6107_v21  ;;  %v6156_v21 = vld [vmem:[%s12150_s6 + $0x78] sm:$0xff] }
 0xc9d   : > { %4138 = vmatmul.f32.vlgmr.msra.gmra.mxu0 %v11342_v17  ;;  %4147 = vmatpush.msrb.mxu1 %v6108_v22  ;;  %v6157_v22 = vld [vmem:[%s12150_s6 + $0xf8] sm:$0xff] }
 0xc9e   : > { %4167 = vmatpush.msra.mxu2 %v6109_v23  ;;  %4214 = vmatpush.msra.mxu3 %v6110_v24  ;;  %v6158_v23 = vld [vmem:[%s12150_s6 + $0x70] sm:$0xff] }
 0xc9f   : > { %4148 = vmatpush.msrb.mxu1 %v6111_v18  ;;  %4234 = vmatpush.msrb.mxu0 %v6112_v3  ;;  %v6159_v24 = vld [vmem:[%s12150_s6 + $0xf0] sm:$0xff]  ;;  %v6160_v18 = vld [vmem:[%s12150_s6 + $0x68] sm:$0xff] }
 0xca0   : > { %4168 = vmatpush.msra.mxu2 %v6113_v20  ;;  %4215 = vmatpush.msra.mxu3 %v6114_v14  ;;  %v6161_v3 = vld [vmem:[%s12150_s6 + $0xe8] sm:$0xff]  ;;  %v6162_v20 = vld [vmem:[%s12150_s6 + $0x60] sm:$0xff] }
 0xca1   : > { %4149 = vmatpush.msrb.mxu1 %v6115_v25  ;;  %4235 = vmatpush.msrb.mxu0 %v6116_v26  ;;  %v6163_v14 = vld [vmem:[%s12150_s6 + $0xe0] sm:$0xff]  ;;  %v6164_v25 = vld [vmem:[%s12150_s6 + $0x58] sm:$0xff] }
 0xca2   : > { %4169 = vmatpush.msra.mxu2 %v6117_v33  ;;  %4216 = vmatpush.msra.mxu3 %v6118_v62  ;;  %v6165_v26 = vld [vmem:[%s12150_s6 + $0xd8] sm:$0xff]  ;;  %v6166_v33 = vld [vmem:[%s12150_s6 + $0x50] sm:$0xff] }
 0xca3   : > { %4150 = vmatpush.msrb.mxu1 %v6119_v2  ;;  %4236 = vmatpush.msrb.mxu0 %v6120_v61  ;;  %v6167_v62 = vld [vmem:[%s12150_s6 + $0xd0] sm:$0xff]  ;;  %v6169_v2 = vld [vmem:[%s12150_s6 + $0xc8] sm:$0xff]  ;;  %v6170_v61 = vld [vmem:[%s12150_s6 + $0x40] sm:$0xff] }
 0xca4   : > { %4170 = vmatpush.msra.mxu2 %v6121_v60  ;;  %4252 = vmatpush.msrb.mxu3 %v6122_v28  ;;  %v6172_v60 = vld [vmem:[%s12150_s6 + $0x38] sm:$0xff] }
 0xca5   : > { %4151 = vmatpush.msrb.mxu1 %v6123_v35  ;;  %4272 = vmatpush.msra.mxu0 %v6124_v10  ;;  %v6173_v28 = vld [vmem:[%s12150_s6 + $0xb8] sm:$0xff]  ;;  %v6174_v35 = vld [vmem:[%s12150_s6 + $0x30] sm:$0xff] }
 0xca6   : > { %4171 = vmatpush.msra.mxu2 %v6125_v30  ;;  %4253 = vmatpush.msrb.mxu3 %v6126_v36  ;;  %v6175_v10 = vld [vmem:[%s12150_s6 + $0xb0] sm:$0xff]  ;;  %v6176_v30 = vld [vmem:[%s12150_s6 + $0x28] sm:$0xff] }
 0xca7   : > { %4152 = vmatpush.msrb.mxu1 %v6127_v1  ;;  %4273 = vmatpush.msra.mxu0 %v6128_v29  ;;  %v6177_v36 = vld [vmem:[%s12150_s6 + $0xa8] sm:$0xff]  ;;  %v6179_v1 = vld [vmem:[%s12150_s6 + $0xa0] sm:$0xff]  ;;  %v6180_v29 = vld [vmem:[%s12150_s6 + $0x18] sm:$0xff] }
 0xca8   : > { %4172 = vmatpush.msra.mxu2 %v6129_v39  ;;  %4254 = vmatpush.msrb.mxu3 %v6130_v32  ;;  %v6182_v39 = vld [vmem:[%s12150_s6 + $0x10] sm:$0xff] }
 0xca9   : > { %4153 = vmatpush.msrb.mxu1 %v6131_v40  ;;  %4274 = vmatpush.msra.mxu0 %v6132_v51  ;;  %v6183_v32 = vld [vmem:[%s12150_s6 + $0x90] sm:$0xff]  ;;  %v6184_v40 = vld [vmem:[%s12150_s6 + $0x8] sm:$0xff] }
 0xcaa   : > { %4173 = vmatpush.msra.mxu2 %v6133_v41  ;;  %4255 = vmatpush.msrb.mxu3 %v6134_v55  ;;  %v6185_v51 = vld [vmem:[%s12150_s6 + $0x88] sm:$0xff]  ;;  %v6186_v41 = vld [vmem:[%s12150_s6] sm:$0xff] }
 0xcab   : > { %4154 = vmatpush.msrb.mxu1 %v6135_v27  ;;  %4275 = vmatpush.msra.mxu0 %v6136_v59  ;;  %v6187_v55 = vld [vmem:[%s12150_s6 + $0x80] sm:$0xff]  ;;  %v11599_v59 = vpop.f32.mrf.mxu0 }
 0xcac   : > { %4174 = vmatpush.msra.mxu2 %v6137_v6  ;;  %4256 = vmatpush.msrb.mxu3 %v6138_v42 }
 0xcad   : > { %4155 = vmatpush.msrb.mxu1 %v6139_v43  ;;  %4276 = vmatpush.msra.mxu0 %v6140_v45 }
 0xcae   : > { %4175 = vmatpush.msra.mxu2 %v6141_v46 }
 0xcaf   : > { %4156 = vmatpush.msrb.mxu1 %v6142_v47 }
 0xcb0   : > { %4176 = vmatpush.msra.mxu2 %v6143_v63 }
 0xcb1   : > { %4157 = vmatpush.msrb.mxu1 %v6144_v9 }
 0xcb2   : > { %4177 = vmatpush.msra.mxu2 %v6145_v57  ;;  %4158 = vmatmul.f32.vlgmr.msrb.gmra.mxu1 %v11461_v48 }
 0xcb3   : > { %4178 = vmatmul.f32.vlgmr.msra.gmra.mxu2 %v11466_v56  ;;  %4332 = vmatpush.msra.mxu1 %v6146_v44 }
 0xcb4   : > { %4352 = vmatpush.msrb.mxu2 %v6147_v53 }
 0xcb5   : > { %4333 = vmatpush.msra.mxu1 %v6148_v4 }
 0xcb6   : > { %4353 = vmatpush.msrb.mxu2 %v6149_v13 }
 0xcb7   : > { %4334 = vmatpush.msra.mxu1 %v6150_v50 }
 0xcb8   : > { %4354 = vmatpush.msrb.mxu2 %v6151_v16 }
 0xcb9   : > { %4335 = vmatpush.msra.mxu1 %v6152_v5 }
 0xcba   : > { %4355 = vmatpush.msrb.mxu2 %v6153_v19 }
 0xcbb   : > { %4336 = vmatpush.msra.mxu1 %v6154_v8 }
 0xcbc   : > { %4356 = vmatpush.msrb.mxu2 %v6155_v12 }
 0xcbd   : > { %4411 = vmatpush.msrb.mxu1 %v6156_v21 }
 0xcbe   : > { %4431 = vmatpush.msra.mxu2 %v6157_v22 }
 0xcbf   : > { %4412 = vmatpush.msrb.mxu1 %v6158_v23 }
 0xcc0   : > { %4432 = vmatpush.msra.mxu2 %v6159_v24 }
 0xcc1   : > { %4413 = vmatpush.msrb.mxu1 %v6160_v18 }
 0xcc2   : > { %4433 = vmatpush.msra.mxu2 %v6161_v3 }
 0xcc3   : > { %4414 = vmatpush.msrb.mxu1 %v6162_v20  ;;  %v3938_v20 = vpop.permute.xlu0 %3937 }
 0xcc4   : > { %4434 = vmatpush.msra.mxu2 %v6163_v14 }
 0xcc5   : > { %4415 = vmatpush.msrb.mxu1 %v6164_v25 }
 0xcc6   : > { %4435 = vmatpush.msra.mxu2 %v6165_v26 }
 0xcc7   : > { %4416 = vmatpush.msrb.mxu1 %v6166_v33  ;;  %v3940_v33 = vsel %vm778_vm1, %v10875_v54, %v3938_v20  ;;  %v6189_v54 = vld [vmem:[%s12149_s5 + $0x168] sm:$0xff] }
 0xcc8   : > { %4436 = vmatpush.msra.mxu2 %v6167_v62  ;;  %v6234_v20 = vld [vmem:[%s12150_s6 + $0x2a8] sm:$0xff] }
 0xcc9   : > { %4417 = vmatpush.msrb.mxu1 %v6168_v34 }
 0xcca   : > { %4437 = vmatpush.msra.mxu2 %v6169_v2  ;;  %v6188_v2 = vld [vmem:[%s12149_s5 + $0x160] sm:$0xff] }
 0xccb   : > { %4418 = vmatpush.msrb.mxu1 %v6170_v61  ;;  %v6190_v61 = vld [vmem:[%s12150_s6 + $0x2f8] sm:$0xff] }
 0xccc   : > { %4438 = vmatpush.msra.mxu2 %v6171_v31  ;;  %v6191_v31 = vld [vmem:[%s12150_s6 + $0x278] sm:$0xff] }
 0xccd   : > { %4419 = vmatpush.msrb.mxu1 %v6172_v60  ;;  %v6192_v60 = vld [vmem:[%s12149_s5 + $0x110] sm:$0xff] }
 0xcce   : > { %4439 = vmatpush.msra.mxu2 %v6173_v28  ;;  %v6193_v28 = vld [vmem:[%s12149_s5 + $0x118] sm:$0xff] }
 0xccf   : > { %4420 = vmatpush.msrb.mxu1 %v6174_v35  ;;  %v6194_v35 = vld [vmem:[%s12150_s6 + $0x2f0] sm:$0xff] }
 0xcd0   : > { %4440 = vmatpush.msra.mxu2 %v6175_v10  ;;  %v6195_v10 = vld [vmem:[%s12150_s6 + $0x270] sm:$0xff] }
 0xcd1   : > { %4421 = vmatpush.msrb.mxu1 %v6176_v30  ;;  %v6196_v30 = vld [vmem:[%s12149_s5 + $0xc0] sm:$0xff] }
 0xcd2   : > { %4441 = vmatpush.msra.mxu2 %v6177_v36  ;;  %v6197_v36 = vld [vmem:[%s12149_s5 + $0xc8] sm:$0xff] }
 0xcd3   : > { %4422 = vmatpush.msrb.mxu1 %v6178_v37  ;;  %v6198_v37 = vld [vmem:[%s12150_s6 + $0x2e8] sm:$0xff] }
 0xcd4   : > { %4442 = vmatpush.msra.mxu2 %v6179_v1  ;;  %v6199_v1 = vld [vmem:[%s12150_s6 + $0x268] sm:$0xff] }
 0xcd5   : > { %4423 = vmatpush.msrb.mxu1 %v6180_v29  ;;  %v6200_v29 = vld [vmem:[%s12149_s5 + $0x70] sm:$0xff] }
 0xcd6   : > { %4443 = vmatpush.msra.mxu2 %v6181_v38  ;;  %v6201_v38 = vld [vmem:[%s12149_s5 + $0x78] sm:$0xff] }
 0xcd7   : > { %4424 = vmatpush.msrb.mxu1 %v6182_v39  ;;  %v6202_v39 = vld [vmem:[%s12150_s6 + $0x2e0] sm:$0xff] }
 0xcd8   : > { %4444 = vmatpush.msra.mxu2 %v6183_v32  ;;  %v6203_v32 = vld [vmem:[%s12150_s6 + $0x260] sm:$0xff] }
 0xcd9   : > { %4425 = vmatpush.msrb.mxu1 %v6184_v40  ;;  %v6204_v40 = vld [vmem:[%s12149_s5 + $0x20] sm:$0xff] }
 0xcda   : > { %4445 = vmatpush.msra.mxu2 %v6185_v51  ;;  %v6205_v51 = vld [vmem:[%s12149_s5 + $0x28] sm:$0xff] }
 0xcdb   : > { %4426 = vmatpush.msrb.mxu1 %v6186_v41  ;;  %v6206_v41 = vld [vmem:[%s12149_s5 + $0x180] sm:$0xff] }
 0xcdc   : > { %4446 = vmatpush.msra.mxu2 %v6187_v55  ;;  %v6207_v55 = vld [vmem:[%s12149_s5 + $0x188] sm:$0xff] }
 0xd0f   : > { %v3999_v6 = vpop.f32.mrf.mxu1 }
 0xd12   : > { %v4059_v46 = vpop.f32.mrf.mxu0 }
 0xd16   : > { %v4019_v27 = vpop.f32.mrf.mxu2 }
 0xd17   : > { %v4020_v42 = vadd.f32 %v4019_v27, %v3999_v6  ;;  %v4039_v43 = vpop.f32.mrf.mxu3  ;;  %v4079_v63 = vpop.f32.mrf.mxu1  ;;  %v6208_v27 = vld [vmem:[%s12150_s6 + $0x2d8] sm:$0xff] }
 0xd18   : > { %v6209_v6 = vld [vmem:[%s12150_s6 + $0x258] sm:$0xff] }
 0xd19   : > { %v4040_v45 = vadd.f32 %v4039_v43, %v4020_v42  ;;  %v6210_v42 = vld [vmem:[%s12149_s5 + $0x130] sm:$0xff]  ;;  %v6211_v43 = vld [vmem:[%s12149_s5 + $0x138] sm:$0xff] }
 0xd1a   : > { %v4139_v13 = vpop.f32.mrf.mxu0 }
 0xd1b   : > { %v4060_v47 = vadd.f32 %v4059_v46, %v4040_v45  ;;  %v6212_v45 = vld [vmem:[%s12150_s6 + $0x2d0] sm:$0xff] }
 0xd1c   : > { %v6213_v46 = vld [vmem:[%s12150_s6 + $0x250] sm:$0xff] }
 0xd1d   : > { %v4080_v9 = vadd.f32 %v4079_v63, %v4060_v47  ;;  %v6214_v47 = vld [vmem:[%s12149_s5 + $0xe0] sm:$0xff]  ;;  %v6215_v63 = vld [vmem:[%s12149_s5 + $0xe8] sm:$0xff] }
 0xd1e   : > { %v4099_v57 = vpop.f32.mrf.mxu2 }
 0xd1f   : > { %v4100_v44 = vadd.f32 %v4099_v57, %v4080_v9  ;;  %v4119_v53 = vpop.f32.mrf.mxu3  ;;  %v6216_v9 = vld [vmem:[%s12150_s6 + $0x2c8] sm:$0xff] }
 0xd20   : > { %v6217_v57 = vld [vmem:[%s12150_s6 + $0x248] sm:$0xff] }
 0xd21   : > { %v4120_v4 = vadd.f32 %v4119_v53, %v4100_v44  ;;  %v6218_v44 = vld [vmem:[%s12149_s5 + $0x90] sm:$0xff]  ;;  %v6219_v53 = vld [vmem:[%s12149_s5 + $0x98] sm:$0xff] }
 0xd23   : > { %v4140_v16 = vadd.f32 %v4139_v13, %v4120_v4  ;;  %v6220_v4 = vld [vmem:[%s12150_s6 + $0x2c0] sm:$0xff] }
 0xd24   : > { %v6221_v13 = vld [vmem:[%s12150_s6 + $0x240] sm:$0xff] }
 0xd2f   : > { %v4159_v50 = vpop.f32.mrf.mxu1 }
 0xd30   : > { %v4160_v5 = vadd.f32 %v4159_v50, %v4140_v16  ;;  %v6222_v50 = vld [vmem:[%s12149_s5 + $0x40] sm:$0xff]  ;;  %v6223_v16 = vld [vmem:[%s12149_s5 + $0x48] sm:$0xff] }
 0xd36   : > { %v4179_v19 = vpop.f32.mrf.mxu2 }
 0xd37   : > { %v4180_v8 = vadd.f32 %v4179_v19, %v4160_v5  ;;  %v6224_v5 = vld [vmem:[%s12150_s6 + $0x1f8] sm:$0xff] }
 0xd38   : > { %v6225_v19 = vld [vmem:[%s12150_s6 + $0x178] sm:$0xff] }
 0xd39   : > { %v4182_v12 = vmax.f32 %v4180_v8, 1e-30  ;;  %v6226_v8 = vld [vmem:[%s12150_s6 + $0x2b8] sm:$0xff] }
 0xd3b   : > { %5087 = vrcp.f32 %v4182_v12  ;;  %v4194_v24 = vand.u32 2147483648, %v4182_v12  ;;  %v4192_v3 = vand.u32 2147483647, %v4182_v12  ;;  %vm4188_vm5 = vweird.f32 %v4182_v12 }
 0xd3d   : > { %v4195_v25 = vor.u32 1.1754944e-38, %v4194_v24  ;;  %vm4193_vm7 = vcmp.eq.f32.partialorder %v4192_v3, 8.507059e+37  ;;  %v6231_v24 = vld [vmem:[%s12150_s6 + $0x230] sm:$0xff]  ;;  %v6233_v3 = vld [vmem:[%s12150_s6 + $0x168] sm:$0xff] }
 0xd41   : > { %v5088_v21 = vpop.eup %5087 }
 0xd42   : > { %v4184_v22 = vmul.f32 %v5088_v21, %v4182_v12  ;;  %vm4189_vm4 = vweird.f32 %v5088_v21  ;;  %v6227_v12 = vld [vmem:[%s12150_s6 + $0x238] sm:$0xff] }
 0xd43   : > { %vm4190_vm6 = vmor %vm4188_vm5, %vm4189_vm4 }
 0xd44   : > { %v4185_v23 = vsub.f32 1.0, %v4184_v22  ;;  %v6229_v22 = vld [vmem:[%s12150_s6 + $0x170] sm:$0xff] }
 0xd46   : > { %v4186_v18 = vmul.f32 %v5088_v21, %v4185_v23  ;;  %v6230_v23 = vld [vmem:[%s12150_s6 + $0x2b0] sm:$0xff] }
 0xd48   : > { %v4187_v14 = vadd.f32 %v5088_v21, %v4186_v18  ;;  %v6232_v18 = vld [vmem:[%s12150_s6 + $0x1e8] sm:$0xff] }
 0xd4a   : > { %v4191_v26 = vsel %vm4190_vm6, %v5088_v21, %v4187_v14  ;;  %v6228_v21 = vld [vmem:[%s12150_s6 + $0x1f0] sm:$0xff]  ;;  %v6235_v14 = vld [vmem:[%s12150_s6 + $0x228] sm:$0xff] }
 0xd4b   : > { %v4196_v62 = vsel %vm4193_vm7, %v4195_v25, %v4191_v26  ;;  %v6236_v25 = vld [vmem:[%s12150_s6 + $0x1e0] sm:$0xff] }
 0xd4c   : > { %v11603_v34 = vmul.f32 %v4196_v62, %v3940_v33  ;;  %v6237_v26 = vld [vmem:[%s12150_s6 + $0x160] sm:$0xff] }
 0xd4d   : > { %v6238_v33 = vld [vmem:[%s12150_s6 + $0x2a0] sm:$0xff] }
 0xd4e   : > { %4910 = vmatmul.msk.f32.vlgmr.msra.gmra.mxu3 %vm1295_vm11, %v11603_v34  ;;  %4911 = vmatmul.msk.f32.vlgmr.msrb.gmra.mxu0 %vm1295_vm11, %v11603_v34  ;;  %v6239_v62 = vld [vmem:[%s12150_s6 + $0x220] sm:$0xff] }
 0xd4f   : > { %4916 = vmatmul.msk.f32.vlgmr.msra.gmra.mxu1 %vm1295_vm11, %v11603_v34  ;;  %4917 = vmatmul.msk.f32.vlgmr.msrb.gmra.mxu2 %vm1295_vm11, %v11603_v34 }
 0xd50   : > { %4292 = vmatpush.msra.mxu3 %v6188_v2  ;;  %4312 = vmatpush.msrb.mxu0 %v6189_v54  ;;  %v6241_v2 = vld [vmem:[%s12150_s6 + $0x158] sm:$0xff] }
 0xd51   : > { %4511 = vmatpush.msrb.mxu2 %v6190_v61  ;;  %4491 = vmatpush.msra.mxu1 %v6191_v31  ;;  %v6242_v54 = vld [vmem:[%s12150_s6 + $0x298] sm:$0xff]  ;;  %v6244_v31 = vld [vmem:[%s12150_s6 + $0x1d0] sm:$0xff] }
 0xd52   : > { %4293 = vmatpush.msra.mxu3 %v6192_v60  ;;  %4313 = vmatpush.msrb.mxu0 %v6193_v28  ;;  %v6243_v61 = vld [vmem:[%s12150_s6 + $0x218] sm:$0xff]  ;;  %v6245_v60 = vld [vmem:[%s12150_s6 + $0x150] sm:$0xff] }
 0xd53   : > { %4512 = vmatpush.msrb.mxu2 %v6194_v35  ;;  %4492 = vmatpush.msra.mxu1 %v6195_v10  ;;  %v6246_v28 = vld [vmem:[%s12150_s6 + $0x290] sm:$0xff]  ;;  %v6248_v10 = vld [vmem:[%s12150_s6 + $0x1c8] sm:$0xff] }
 0xd54   : > { %4294 = vmatpush.msra.mxu3 %v6196_v30  ;;  %4314 = vmatpush.msrb.mxu0 %v6197_v36  ;;  %v6247_v35 = vld [vmem:[%s12150_s6 + $0x210] sm:$0xff]  ;;  %v6249_v30 = vld [vmem:[%s12150_s6 + $0x148] sm:$0xff] }
 0xd55   : > { %4513 = vmatpush.msrb.mxu2 %v6198_v37  ;;  %4493 = vmatpush.msra.mxu1 %v6199_v1  ;;  %v6250_v36 = vld [vmem:[%s12150_s6 + $0x288] sm:$0xff]  ;;  %v6252_v1 = vld [vmem:[%s12150_s6 + $0x1c0] sm:$0xff] }
 0xd56   : > { %4912 = vmatmul.msk.f32.vlgmr.msrb.gmra.mxu3 %vm1295_vm11, %v11603_v34  ;;  %4913 = vmatmul.msk.f32.vlgmr.msra.gmra.mxu0 %vm1295_vm11, %v11603_v34  ;;  %v6251_v37 = vld [vmem:[%s12150_s6 + $0x208] sm:$0xff] }
 0xd57   : > { %4295 = vmatpush.msra.mxu3 %v6200_v29  ;;  %4315 = vmatpush.msrb.mxu0 %v6201_v38  ;;  %v6253_v29 = vld [vmem:[%s12150_s6 + $0x140] sm:$0xff] }
 0xd58   : > { %4514 = vmatpush.msrb.mxu2 %v6202_v39  ;;  %4494 = vmatpush.msra.mxu1 %v6203_v32  ;;  %v6254_v38 = vld [vmem:[%s12150_s6 + $0x280] sm:$0xff]  ;;  %v6256_v32 = vld [vmem:[%s12150_s6 + $0x1b8] sm:$0xff] }
 0xd59   : > { %4296 = vmatpush.msra.mxu3 %v6204_v40  ;;  %4316 = vmatpush.msrb.mxu0 %v6205_v51  ;;  %v6255_v39 = vld [vmem:[%s12150_s6 + $0x200] sm:$0xff]  ;;  %v6257_v40 = vld [vmem:[%s12150_s6 + $0x138] sm:$0xff]  ;;  %v6258_v51 = vld [vmem:[%s12150_s6 + $0x1b0] sm:$0xff] }
 0xd5a   : > { %4515 = vmatpush.msrb.mxu2 %v6208_v27  ;;  %4495 = vmatpush.msra.mxu1 %v6209_v6  ;;  %v6261_v27 = vld [vmem:[%s12150_s6 + $0x128] sm:$0xff]  ;;  %v6262_v6 = vld [vmem:[%s12150_s6 + $0x1a0] sm:$0xff] }
 0xd5b   : > { %4372 = vmatpush.msrb.mxu3 %v6206_v41  ;;  %4392 = vmatpush.msra.mxu0 %v6207_v55  ;;  %v6259_v41 = vld [vmem:[%s12150_s6 + $0x130] sm:$0xff]  ;;  %v6260_v55 = vld [vmem:[%s12150_s6 + $0x1a8] sm:$0xff] }
 0xd5c   : > { %4516 = vmatpush.msrb.mxu2 %v6212_v45  ;;  %4496 = vmatpush.msra.mxu1 %v6213_v46  ;;  %v6265_v45 = vld [vmem:[%s12150_s6 + $0x118] sm:$0xff]  ;;  %v6266_v46 = vld [vmem:[%s12150_s6 + $0x190] sm:$0xff] }
 0xd5d   : > { %4373 = vmatpush.msrb.mxu3 %v6210_v42  ;;  %4393 = vmatpush.msra.mxu0 %v6211_v43  ;;  %v6263_v42 = vld [vmem:[%s12150_s6 + $0x120] sm:$0xff]  ;;  %v6264_v43 = vld [vmem:[%s12150_s6 + $0x198] sm:$0xff] }
 0xd5e   : > { %4914 = vmatmul.msk.f32.vlgmr.msra.gmra.mxu3 %vm1295_vm11, %v11603_v34  ;;  %4915 = vmatmul.msk.f32.vlgmr.msrb.gmra.mxu0 %vm1295_vm11, %v11603_v34 }
 0xd5f   : > { %4374 = vmatpush.msrb.mxu3 %v6214_v47  ;;  %4394 = vmatpush.msra.mxu0 %v6215_v63  ;;  %v6267_v47 = vld [vmem:[%s12150_s6 + $0x110] sm:$0xff]  ;;  %v6268_v63 = vld [vmem:[%s12150_s6 + $0x188] sm:$0xff] }
 0xd60   : > { %4517 = vmatpush.msrb.mxu2 %v6216_v9  ;;  %4497 = vmatpush.msra.mxu1 %v6217_v57  ;;  %v6269_v9 = vld [vmem:[%s12150_s6 + $0x108] sm:$0xff]  ;;  %v6270_v57 = vld [vmem:[%s12150_s6 + $0x180] sm:$0xff] }
 0xd61   : > { %4375 = vmatpush.msrb.mxu3 %v6218_v44  ;;  %4395 = vmatpush.msra.mxu0 %v6219_v53  ;;  %v6271_v44 = vld [vmem:[%s12150_s6 + $0x100] sm:$0xff]  ;;  %v6272_v53 = vld [vmem:[%s12150_s6 + $0x3f8] sm:$0xff] }
 0xd62   : > { %4518 = vmatpush.msrb.mxu2 %v6220_v4  ;;  %4498 = vmatpush.msra.mxu1 %v6221_v13  ;;  %v6273_v4 = vld [vmem:[%s12150_s6 + $0x378] sm:$0xff]  ;;  %v6274_v13 = vld [vmem:[%s12150_s6 + $0x3f0] sm:$0xff] }
 0xd63   : > { %4376 = vmatpush.msrb.mxu3 %v6222_v50  ;;  %4396 = vmatpush.msra.mxu0 %v6223_v16  ;;  %v6275_v50 = vld [vmem:[%s12150_s6 + $0x370] sm:$0xff]  ;;  %v6276_v16 = vld [vmem:[%s12150_s6 + $0x3e8] sm:$0xff] }
 0xd64   : > { %4519 = vmatpush.msrb.mxu2 %v6226_v8  ;;  %4499 = vmatpush.msra.mxu1 %v6227_v12  ;;  %v6279_v8 = vld [vmem:[%s12150_s6 + $0x360] sm:$0xff]  ;;  %v6280_v12 = vld [vmem:[%s12150_s6 + $0x3d8] sm:$0xff] }
 0xd65   : > { %4471 = vmatpush.msrb.mxu0 %v6224_v5  ;;  %4451 = vmatpush.msra.mxu3 %v6225_v19  ;;  %v6277_v5 = vld [vmem:[%s12150_s6 + $0x368] sm:$0xff]  ;;  %v6278_v19 = vld [vmem:[%s12150_s6 + $0x3e0] sm:$0xff] }
 0xd66   : > { %4918 = vmatmul.msk.f32.vlgmr.msrb.gmra.mxu3 %vm1295_vm11, %v11603_v34  ;;  %4919 = vmatmul.msk.f32.vlgmr.msra.gmra.mxu0 %vm1295_vm11, %v11603_v34  ;;  %v6240_v34 = vld [vmem:[%s12150_s6 + $0x1d8] sm:$0xff] }
 0xd67   : > { %4472 = vmatpush.msrb.mxu0 %v6228_v21  ;;  %4452 = vmatpush.msra.mxu3 %v6229_v22  ;;  %v6281_v21 = vld [vmem:[%s12150_s6 + $0x358] sm:$0xff]  ;;  %v6282_v22 = vld [vmem:[%s12150_s6 + $0x3d0] sm:$0xff] }
 0xd68   : > { %4520 = vmatpush.msrb.mxu2 %v6230_v23  ;;  %4500 = vmatpush.msra.mxu1 %v6231_v24  ;;  %v6283_v23 = vld [vmem:[%s12150_s6 + $0x350] sm:$0xff]  ;;  %v6284_v24 = vld [vmem:[%s12150_s6 + $0x3c8] sm:$0xff] }
 0xd69   : > { %4473 = vmatpush.msrb.mxu0 %v6232_v18  ;;  %4453 = vmatpush.msra.mxu3 %v6233_v3  ;;  %v6285_v18 = vld [vmem:[%s12150_s6 + $0x348] sm:$0xff]  ;;  %v6286_v3 = vld [vmem:[%s12150_s6 + $0x3c0] sm:$0xff] }
 0xd6a   : > { %4521 = vmatpush.msrb.mxu2 %v6234_v20  ;;  %4501 = vmatpush.msra.mxu1 %v6235_v14  ;;  %v6287_v20 = vld [vmem:[%s12150_s6 + $0x340] sm:$0xff]  ;;  %v6288_v14 = vld [vmem:[%s12150_s6 + $0x3b8] sm:$0xff] }
 0xd6b   : > { %4474 = vmatpush.msrb.mxu0 %v6236_v25  ;;  %4454 = vmatpush.msra.mxu3 %v6237_v26  ;;  %v6289_v25 = vld [vmem:[%s12150_s6 + $0x338] sm:$0xff]  ;;  %v6290_v26 = vld [vmem:[%s12150_s6 + $0x3b0] sm:$0xff] }
 0xd6c   : > { %4522 = vmatpush.msrb.mxu2 %v6238_v33  ;;  %4502 = vmatpush.msra.mxu1 %v6239_v62  ;;  %v6291_v33 = vld [vmem:[%s12150_s6 + $0x330] sm:$0xff]  ;;  %v6292_v62 = vld [vmem:[%s12150_s6 + $0x3a8] sm:$0xff] }
 0xd6d   : > { %4475 = vmatpush.msrb.mxu0 %v6240_v34  ;;  %4455 = vmatpush.msra.mxu3 %v6241_v2  ;;  %v6293_v34 = vld [vmem:[%s12150_s6 + $0x328] sm:$0xff]  ;;  %v6294_v2 = vld [vmem:[%s12150_s6 + $0x3a0] sm:$0xff] }
 0xd6e   : > { %4523 = vmatpush.msrb.mxu2 %v6242_v54  ;;  %4503 = vmatpush.msra.mxu1 %v6243_v61  ;;  %v6295_v54 = vld [vmem:[%s12150_s6 + $0x320] sm:$0xff]  ;;  %v6296_v61 = vld [vmem:[%s12150_s6 + $0x398] sm:$0xff] }
 0xd6f   : > { %4476 = vmatpush.msrb.mxu0 %v6244_v31  ;;  %4456 = vmatpush.msra.mxu3 %v6245_v60  ;;  %v6297_v31 = vld [vmem:[%s12150_s6 + $0x318] sm:$0xff]  ;;  %v6298_v60 = vld [vmem:[%s12150_s6 + $0x390] sm:$0xff] }
 0xd70   : > { %4524 = vmatpush.msrb.mxu2 %v6246_v28  ;;  %4504 = vmatpush.msra.mxu1 %v6247_v35  ;;  %v6299_v28 = vld [vmem:[%s12150_s6 + $0x310] sm:$0xff]  ;;  %v6300_v35 = vld [vmem:[%s12150_s6 + $0x388] sm:$0xff] }
 0xd71   : > { %4477 = vmatpush.msrb.mxu0 %v6248_v10  ;;  %4457 = vmatpush.msra.mxu3 %v6249_v30  ;;  %v6301_v10 = vld [vmem:[%s12150_s6 + $0x308] sm:$0xff]  ;;  %v6302_v30 = vld [vmem:[%s12150_s6 + $0x380] sm:$0xff] }
 0xd72   : > { %4525 = vmatpush.msrb.mxu2 %v6250_v36  ;;  %4505 = vmatpush.msra.mxu1 %v6251_v37  ;;  %v6303_v36 = vld [vmem:[%s12150_s6 + $0x300] sm:$0xff] }
 0xd73   : > { %4478 = vmatpush.msrb.mxu0 %v6252_v1  ;;  %4458 = vmatpush.msra.mxu3 %v6253_v29  ;;  %v6304_v29 = vld [vmem:[%s12150_s6 + $0x4f8] sm:$0xff] }
 0xd74   : > { %4526 = vmatpush.msrb.mxu2 %v6254_v38  ;;  %4506 = vmatpush.msra.mxu1 %v6255_v39  ;;  %v6305_v38 = vld [vmem:[%s12150_s6 + $0x4f0] sm:$0xff] }
 0xd75   : > { %4479 = vmatpush.msrb.mxu0 %v6256_v32  ;;  %4459 = vmatpush.msra.mxu3 %v6257_v40  ;;  %v6306_v40 = vld [vmem:[%s12150_s6 + $0x4e8] sm:$0xff] }
 0xd77   : > { %4480 = vmatpush.msrb.mxu0 %v6258_v51  ;;  %4460 = vmatpush.msra.mxu3 %v6259_v41  ;;  %v6307_v41 = vld [vmem:[%s12150_s6 + $0x478] sm:$0xff] }
 0xd79   : > { %4481 = vmatpush.msrb.mxu0 %v6260_v55  ;;  %4461 = vmatpush.msra.mxu3 %v6261_v27  ;;  %v6308_v55 = vld [vmem:[%s12150_s6 + $0x4e0] sm:$0xff] }
 0xd7b   : > { %4482 = vmatpush.msrb.mxu0 %v6262_v6  ;;  %4462 = vmatpush.msra.mxu3 %v6263_v42  ;;  %v6311_v6 = vld [vmem:[%s12150_s6 + $0x468] sm:$0xff]  ;;  %v6312_v42 = vld [vmem:[%s12150_s6 + $0x4d0] sm:$0xff] }
 0xd7d   : > { %4483 = vmatpush.msrb.mxu0 %v6264_v43  ;;  %4463 = vmatpush.msra.mxu3 %v6265_v45 }
 0xd7f   : > { %4484 = vmatpush.msrb.mxu0 %v6266_v46  ;;  %4464 = vmatpush.msra.mxu3 %v6267_v47  ;;  %v6313_v46 = vld [vmem:[%s12150_s6 + $0x460] sm:$0xff]  ;;  %v6314_v47 = vld [vmem:[%s12150_s6 + $0x4c8] sm:$0xff] }
 0xd81   : > { %4485 = vmatpush.msrb.mxu0 %v6268_v63  ;;  %4465 = vmatpush.msra.mxu3 %v6269_v9 }
 0xd83   : > { %4486 = vmatpush.msrb.mxu0 %v6270_v57  ;;  %4466 = vmatpush.msra.mxu3 %v6271_v44  ;;  %v6316_v44 = vld [vmem:[%s12150_s6 + $0x4c0] sm:$0xff] }
 0xd85   : > { %4551 = vmatpush.msra.mxu0 %v6272_v53  ;;  %4531 = vmatpush.msrb.mxu3 %v6273_v4  ;;  %v6319_v4 = vld [vmem:[%s12150_s6 + $0x448] sm:$0xff] }
 0xd87   : > { %4552 = vmatpush.msra.mxu0 %v6274_v13  ;;  %4532 = vmatpush.msrb.mxu3 %v6275_v50  ;;  %v6320_v13 = vld [vmem:[%s12150_s6 + $0x4b0] sm:$0xff] }
 0xd89   : > { %4553 = vmatpush.msra.mxu0 %v6276_v16  ;;  %4533 = vmatpush.msrb.mxu3 %v6277_v5 }
 0xd8b   : > { %4554 = vmatpush.msra.mxu0 %v6278_v19  ;;  %4534 = vmatpush.msrb.mxu3 %v6279_v8  ;;  %v6321_v19 = vld [vmem:[%s12150_s6 + $0x440] sm:$0xff]  ;;  %v6322_v8 = vld [vmem:[%s12150_s6 + $0x4a8] sm:$0xff] }
 0xd8d   : > { %4555 = vmatpush.msra.mxu0 %v6280_v12  ;;  %4535 = vmatpush.msrb.mxu3 %v6281_v21  ;;  %v6323_v12 = vld [vmem:[%s12150_s6 + $0x438] sm:$0xff] }
 0xd8e   : > { %v6326_v21 = vld [vmem:[%s12150_s6 + $0x498] sm:$0xff] }
 0xd8f   : > { %4556 = vmatpush.msra.mxu0 %v6282_v22  ;;  %4536 = vmatpush.msrb.mxu3 %v6283_v23  ;;  %v6327_v23 = vld [vmem:[%s12150_s6 + $0x428] sm:$0xff] }
 0xd91   : > { %4557 = vmatpush.msra.mxu0 %v6284_v24  ;;  %4537 = vmatpush.msrb.mxu3 %v6285_v18  ;;  %v6328_v24 = vld [vmem:[%s12150_s6 + $0x490] sm:$0xff]  ;;  %v6329_v18 = vld [vmem:[%s12150_s6 + $0x420] sm:$0xff] }
 0xd93   : > { %4558 = vmatpush.msra.mxu0 %v6286_v3  ;;  %4538 = vmatpush.msrb.mxu3 %v6287_v20  ;;  %v6330_v3 = vld [vmem:[%s12150_s6 + $0x488] sm:$0xff] }
 0xd95   : > { %4559 = vmatpush.msra.mxu0 %v6288_v14  ;;  %4539 = vmatpush.msrb.mxu3 %v6289_v25  ;;  %v6331_v14 = vld [vmem:[%s12150_s6 + $0x418] sm:$0xff]  ;;  %v6332_v25 = vld [vmem:[%s12150_s6 + $0x480] sm:$0xff] }
 0xd97   : > { %4560 = vmatpush.msra.mxu0 %v6290_v26  ;;  %4540 = vmatpush.msrb.mxu3 %v6291_v33  ;;  %v6333_v33 = vld [vmem:[%s12150_s6 + $0x410] sm:$0xff] }
 0xd99   : > { %4561 = vmatpush.msra.mxu0 %v6292_v62  ;;  %4541 = vmatpush.msrb.mxu3 %v6293_v34  ;;  %v6335_v34 = vld [vmem:[%s12150_s6 + $0x400] sm:$0xff] }
 0xd9b   : > { %4562 = vmatpush.msra.mxu0 %v6294_v2  ;;  %4542 = vmatpush.msrb.mxu3 %v6295_v54  ;;  %v4897_v2 = vld [vmem:[%s6541_s10 + $0x158] sm:$0xff]  ;;  %s4931_s10 = sshll.u32 %s6501_s9, 5 }
 0xd9c   : > { %v3935_v54 = vadd.f32 %v4897_v2, %v11599_v59  ;;  %s4654_s29 = scalar_lea.hbm %s12151_s7, %s4931_s10  ;;  %s4671_s21 = scalar_lea.hbm %s12152_s8, %s4931_s10 }
 0xd9d   : > { %4563 = vmatpush.msra.mxu0 %v6296_v61  ;;  %4543 = vmatpush.msrb.mxu3 %v6297_v31  ;;  %s4657_s19 = sshll.u32 %s4654_s29, 4  ;;  %s4674_s22 = sshll.u32 %s4671_s21, 4  ;;  %s4658_s19 = int_to_ptr.hbm [resolvable:$true] %s4657_s19  ;;  %s12096_s22 = int_to_ptr.hbm [resolvable:$true] %s4674_s22 }
 0xd9e   : > { %v4920_v61 = vmul.f32 -1.442695, %v3935_v54  ;;  %s6350_s23 = sshra.s32 %s4658_s19, 4  ;;  %s6351_s23 = int_to_ptr.hbm [resolvable:$true] %s6350_s23 }
 0xd9f   : > { %4564 = vmatpush.msra.mxu0 %v6298_v60  ;;  %4544 = vmatpush.msrb.mxu3 %v6299_v28  ;;  %s6352_s25 = scalar_lea.hbm %s6351_s23, 32  ;;  %p6357_p1 = scmp.lt.s32.totalorder %s6351_s23, %s12151_s7 }
 0xda0   : > { %5089 = vpow2.f32 %v4920_v61  ;;  %p6353_p12 = scmp.ne.s32.totalorder %s6351_s23, %s6352_s25  ;;  %p6358_p2 = scmp.lt.s32.totalorder %s6356_s0, %s6352_s25 }
 0xda1   : > { %4565 = vmatpush.msra.mxu0 %v6300_v35  ;;  %4545 = vmatpush.msrb.mxu3 %v6301_v10 }
 0xda2   : > { %p6354_p13 = pnand %p6353_p12, %p6518_p5  ;;  %p6359_p3 = por %p6358_p2, %p6357_p1 }
 0xda3   : > { %4566 = vmatpush.msra.mxu0 %v6302_v30  ;;  %4546 = vmatpush.msrb.mxu3 %v6303_v36 }
 0xda4   : > { %p6355_p0 = pneg %p6354_p13 }
 0xda6   : > { %v5090_v31 = vpop.eup %5089  ;;  %p6360_p4 = pnand %p6359_p3, %p6355_p0 }
 0xda7   : > { %v4614_v60 = vadd.f32 1.0, %v5090_v31 }
 0xda9   : > { %5091 = vrcp.f32 %v4614_v60  ;;  %vm4620_vm8 = vweird.f32 %v4614_v60 }
 0xdaf   : > { %v5092_v30 = vpop.eup %5091 }
 0xdb0   : > { %vm4621_vm11 = vweird.f32 %v5092_v30 }
 0xdb1   : > { %vm4622_vm9 = vmor %vm4620_vm8, %vm4621_vm11 }
 0xdcb   : > { %v4238_v37 = vpop.f32.mrf.mxu0 }
 0xdcc   : > { %v4402_v1 = vmul.f32 %v11285_v58, %v4238_v37  ;;  %v4338_v53 = vpop.f32.mrf.mxu1 }
 0xdcd   : > { %v4407_v16 = vmul.f32 %v11336_v11, %v4338_v53  ;;  %v6325_v11 = vld [vmem:[%s12150_s6 + $0x430] sm:$0xff] }
 0xdce   : > { %4447 = vmatmul.f32.vlgmr.msra.gmra.mxu2 %v4402_v1 }
 0xdcf   : > { %4591 = vmatpush.msra.mxu2 %v6304_v29  ;;  %v4616_v29 = vmul.f32 %v5092_v30, %v4614_v60 }
 0xdd1   : > { %4592 = vmatpush.msra.mxu2 %v6305_v38  ;;  %v4218_v39 = vpop.f32.mrf.mxu3 }
 0xdd2   : > { %v4401_v32 = vmul.f32 %v11283_v0, %v4218_v39  ;;  %v6309_v0 = vld [vmem:[%s12150_s6 + $0x470] sm:$0xff]  ;;  %v4358_v27 = vpop.f32.mrf.mxu2 }
 0xdd3   : > { %4593 = vmatpush.msra.mxu2 %v6306_v40  ;;  %v4278_v58 = vpop.f32.mrf.mxu0  ;;  %v4408_v9 = vmul.f32 %v11342_v17, %v4358_v27  ;;  %v6317_v17 = vld [vmem:[%s12150_s6 + $0x450] sm:$0xff] }
 0xdd4   : > { %v4404_v51 = vmul.f32 %v11294_v49, %v4278_v58  ;;  %4427 = vmatmul.f32.vlgmr.msrb.gmra.mxu1 %v4401_v32  ;;  %v6310_v49 = vld [vmem:[%s12150_s6 + $0x4d8] sm:$0xff]  ;;  %v4617_v32 = vsub.f32 1.0, %v4616_v29 }
 0xdd5   : > { %4571 = vmatpush.msrb.mxu1 %v6307_v41  ;;  %4594 = vmatpush.msra.mxu2 %v6308_v55 }
 0xdd6   : > { %4487 = vmatmul.f32.vlgmr.msrb.gmra.mxu0 %v4404_v51  ;;  %v4618_v51 = vmul.f32 %v5092_v30, %v4617_v32 }
 0xdd7   : > { %4572 = vmatpush.msrb.mxu1 %v6309_v0  ;;  %4595 = vmatpush.msra.mxu2 %v6310_v49  ;;  %v4626_v49 = vand.u32 2147483648, %v4614_v60 }
 0xdd8   : > { %v4619_v55 = vadd.f32 %v5092_v30, %v4618_v51 }
 0xdd9   : > { %4573 = vmatpush.msrb.mxu1 %v6311_v6  ;;  %4596 = vmatpush.msra.mxu2 %v6312_v42  ;;  %v4258_v43 = vpop.f32.mrf.mxu3  ;;  %v4624_v6 = vand.u32 2147483647, %v4614_v60 }
 0xdda   : > { %v4403_v45 = vmul.f32 %v11288_v52, %v4258_v43  ;;  %v6315_v52 = vld [vmem:[%s12150_s6 + $0x458] sm:$0xff] }
 0xddb   : > { %4574 = vmatpush.msrb.mxu1 %v6313_v46  ;;  %4597 = vmatpush.msra.mxu2 %v6314_v47  ;;  %v4318_v63 = vpop.f32.mrf.mxu0  ;;  %v4627_v47 = vor.u32 1.1754944e-38, %v4626_v49  ;;  %vm4625_vm10 = vcmp.eq.f32.partialorder %v4624_v6, 8.507059e+37 }
 0xddc   : > { %v4406_v57 = vmul.f32 %v11330_v7, %v4318_v63  ;;  %4467 = vmatmul.f32.vlgmr.msra.gmra.mxu3 %v4403_v45  ;;  %v6318_v7 = vld [vmem:[%s12150_s6 + $0x4b8] sm:$0xff]  ;;  %v4623_v45 = vsel %vm4622_vm9, %v5092_v30, %v4619_v55 }
 0xddd   : > { %4575 = vmatpush.msrb.mxu1 %v6315_v52  ;;  %4598 = vmatpush.msra.mxu2 %v6316_v44 }
 0xdde   : > { %4527 = vmatmul.f32.vlgmr.msrb.gmra.mxu2 %v4406_v57  ;;  %4567 = vmatmul.f32.vlgmr.msra.gmra.mxu0 %v4408_v9  ;;  %v4628_v9 = vsel %vm4625_vm10, %v4627_v47, %v4623_v45 }
 0xddf   : > { %4576 = vmatpush.msrb.mxu1 %v6317_v17  ;;  %4599 = vmatpush.msra.mxu2 %v6318_v7 }
 0xde1   : > { %4577 = vmatpush.msrb.mxu1 %v6319_v4  ;;  %4600 = vmatpush.msra.mxu2 %v6320_v13  ;;  %v4298_v50 = vpop.f32.mrf.mxu3 }
 0xde2   : > { %v4405_v5 = vmul.f32 %v11322_v15, %v4298_v50  ;;  %v6324_v15 = vld [vmem:[%s12150_s6 + $0x4a0] sm:$0xff] }
 0xde3   : > { %4578 = vmatpush.msrb.mxu1 %v6321_v19  ;;  %4601 = vmatpush.msra.mxu2 %v6322_v8  ;;  %v4398_v22 = vpop.f32.mrf.mxu0 }
 0xde4   : > { %4507 = vmatmul.f32.vlgmr.msra.gmra.mxu1 %v4405_v5  ;;  %4547 = vmatmul.f32.vlgmr.msrb.gmra.mxu3 %v4407_v16  ;;  %v4410_v20 = vmul.f32 %v11466_v56, %v4398_v22  ;;  %v6334_v56 = vld [vmem:[%s12150_s6 + $0x408] sm:$0xff] }
 0xde5   : > { %4579 = vmatpush.msrb.mxu1 %v6323_v12  ;;  %4602 = vmatpush.msra.mxu2 %v6324_v15 }
 0xde7   : > { %4580 = vmatpush.msrb.mxu1 %v6325_v11  ;;  %4603 = vmatpush.msra.mxu2 %v6326_v21 }
 0xde9   : > { %4581 = vmatpush.msrb.mxu1 %v6327_v23  ;;  %4604 = vmatpush.msra.mxu2 %v6328_v24  ;;  %v4378_v26 = vpop.f32.mrf.mxu3 }
 0xdea   : > { %v4409_v62 = vmul.f32 %v11461_v48, %v4378_v26 }
 0xdeb   : > { %4582 = vmatpush.msrb.mxu1 %v6329_v18  ;;  %4605 = vmatpush.msra.mxu2 %v6330_v3 }
 0xded   : > { %4583 = vmatpush.msrb.mxu1 %v6331_v14  ;;  %4606 = vmatpush.msra.mxu2 %v6332_v25 }
 0xdee   : > { %4607 = vmatmul.f32.vlgmr.msra.gmra.mxu2 %v4410_v20 }
 0xdef   : > { %4584 = vmatpush.msrb.mxu1 %v6333_v33 }
 0xdf1   : > { %4585 = vmatpush.msrb.mxu1 %v6334_v56 }
 0xdf3   : > { %4586 = vmatpush.msrb.mxu1 %v6335_v34 }
 0xdf4   : > { %4587 = vmatmul.f32.vlgmr.msrb.gmra.mxu1 %v4409_v62 }
 0xe51   : > { %v4428_v28 = vpop.f32.mrf.mxu1  ;;  %v4448_v35 = vpop.f32.mrf.mxu2 }
 0xe52   : > { %v4449_v10 = vadd.f32 %v4448_v35, %v4428_v28 }
 0xe53   : > { %v4488_v37 = vpop.f32.mrf.mxu0 }
 0xe5b   : > { %v4568_v0 = vpop.f32.mrf.mxu0 }
 0xe5f   : > { %v4468_v48 = vpop.f32.mrf.mxu3 }
 0xe60   : > { %v4469_v36 = vadd.f32 %v4468_v48, %v4449_v10 }
 0xe61   : > { %v4508_v38 = vpop.f32.mrf.mxu1  ;;  %v4528_v40 = vpop.f32.mrf.mxu2 }
 0xe62   : > { %v4489_v1 = vadd.f32 %v4488_v37, %v4469_v36 }
 0xe64   : > { %v4509_v39 = vadd.f32 %v4508_v38, %v4489_v1 }
 0xe66   : > { %v4529_v59 = vadd.f32 %v4528_v40, %v4509_v39 }
 0xe67   : > { %v4548_v58 = vpop.f32.mrf.mxu3 }
 0xe68   : > { %v4549_v41 = vadd.f32 %v4548_v58, %v4529_v59 }
 0xe6a   : > { %v4569_v27 = vadd.f32 %v4568_v0, %v4549_v41 }
 0xe71   : > { %v4588_v42 = vpop.f32.mrf.mxu1  ;;  %v4608_v46 = vpop.f32.mrf.mxu2 }
 0xe72   : > { %v4589_v43 = vadd.f32 %v4588_v42, %v4569_v27 }
 0xe74   : > { %v4609_v63 = vadd.f32 %v4608_v46, %v4589_v43 }
 0xe76   : > { %v4630_v57 = vmul.f32 %v4628_v9, %v4609_v63 }
 0xe78   : > { %v4631_v52 = vsub.f32 %v4609_v63, %v4630_v57  ;;  %4921 = vst.msk [vmem:[%s6543_s12 + $0x18] sm:$0xff] %vm778_vm1, %v4630_v57 }
 0xe79   : > { %6363 = shalt.err (!%p6360_p4)
}
 0xe7a   : > { %s6433_s12 = smov 128   ;;  %s6434_s20 = smov 8   ;;  %4922 = vst.msk [vmem:[%s6545_s13 + $0x18] sm:$0xff] %vm778_vm1, %v4631_v52 }
 0xe7b   : > { %4934 = dma.vmem_to_hbm [thread:$0]  (%p6518_p5), %s12089_s18, 512, %s4658_s19, %s4638_s24, %s6433_s12, %s6433_s12, %s6434_s20   ;;  %4636 = vst.msk [vmem:[#allocation2] sm:$0xff] %vm778_vm1, %v4631_v52 }
 0xe7c   : > { %s4643_s21 = scalar_lea.sflag [#allocation6], %s6529_s17  ;;  %s6378_s23 = sshra.s32 %s12096_s22, 4  ;;  %s6379_s23 = int_to_ptr.hbm [resolvable:$true] %s6378_s23 }
 0xe7d   : > { %s6380_s25 = scalar_lea.hbm %s6379_s23, 32  ;;  %s6384_s0 = scalar_lea.hbm %s12152_s8, 64 }
 0xe7e   : > { %p6381_p7 = scmp.ne.s32.totalorder %s6379_s23, %s6380_s25  ;;  %p6385_p10 = scmp.lt.s32.totalorder %s6379_s23, %s12152_s8 }
 0xe7f   : > { %p6386_p11 = scmp.lt.s32.totalorder %s6384_s0, %s6380_s25 }
 0xe80   : > { %p6382_p8 = pnand %p6381_p7, %p6518_p5 }
 0xe81   : > { %p6387_p12 = por %p6386_p11, %p6385_p10 }
 0xe82   : > { %p6383_p9 = pneg %p6382_p8 }
 0xe84   : > { %p6388_p13 = pnand %p6387_p12, %p6383_p9 }
 0xe86   : > { %6391 = shalt.err (!%p6388_p13)
}
 0xe87   : > { %4935 = dma.vmem_to_hbm [thread:$0]  (%p6518_p5), %s12094_s14, 512, %s12096_s22, %s4643_s21, %s6433_s12, %s6433_s12, %s6434_s20  }
 0xe88 PF: > { %p4945_p0 = scmp.ge.s32.totalorder %s6430_s30, 2  ;;  %s4689_s17 = sand.u32 1, %s6418_s27  }
 0xe89   : > { %s4690_s13 = scalar_lea.sflag [#allocation4], %s4689_s17 }
 0xe8a   : > { %p4939_p1 = pnand %p4945_p0, %p6522_p6 }
 0xe8c   : > { %p4940_p2 = pneg %p4939_p1 }
 0xe8e   : > { %6409 = dma.done.wait (%p4940_p2), %s4690_s13, 512  }
 0xe8f   : > { %6411 = vsyncadd (%p4940_p2), %s4690_s13, 4294966784  ;;  %s4700_s18 = scalar_lea.sflag [#allocation6], %s4689_s17 }
 0xe90   : > { %6413 = dma.done.wait (%p4940_p2), %s4700_s18, 512  }
 0xe91   : > { %6415 = vsyncadd (%p4940_p2), %s4700_s18, 4294966784  ;;  %s12163_s15 = sld [smem:[#allocation9_spill]]  ;;  %p22_p5 = scmp.ge.s32.totalorder %s6505_s11, 4  }
 0xe92   : > { %s12164_s29 = sld [smem:[#allocation10_spill]]  ;;  %s12165_s27 = smov %s6422_s28 }
 0xe93   : > { %s12167_s30 = smov %s6505_s11  ;;  %24 = sbr.rel (!%p22_p5) target bundleno = 7 (0x7), region = 119 }
 0xe97   : > { %s12166_s28 = smov %s12163_s15 }
 0xe98   :  { %4706 = vsyncpa [#allocation4], 1 }
 0xe99   :  { %4708 = vsyncpa [#allocation4 + $0x1], 1 }
 0xe9a   :  { %4709 = vsyncpa [#allocation6], 1 }
 0xe9b   :  { %4711 = vsyncpa [#allocation6 + $0x1], 1 }

</bundles_post_ra>
